<compile_context>
chip_gen: v5e
topology: v5e:2x2
jax: 0.10.0
libtpu: 0.0.40
codegen_flags: <defaults>
</compile_context>

<pallas_src>
import functools
import math

import jax
import jax.numpy as jnp
from jax.experimental import pallas as pl
from jax.experimental.pallas import tpu as pltpu

# ---------------- model hyper-parameters (small synthetic config) -----------
D_ENC, D_DEC = 24, 16        # raw residue / atom feature dims
D_MODEL = 32                 # transformer width
NHEAD = 4
N_LAYERS = 2
D_FF = 64
N_RES, N_ATOM = 20, 12       # embedding vocab sizes
LN_EPS = 1e-5
NEG_INF = -1e30


# ------------------------------ megakernel ----------------------------------
def _megakernel(prot_ref, comp_ref, p_row_ref, c_row_ref, p_col_ref, c_col_ref,
                ptf_w_ref, ptf_b_ref, ctf_w_ref, ctf_b_ref,
                wqkv_ref, bqkv_ref, wo_ref, bo_ref,
                ff_w1_ref, ff_b1_ref, ff_w2_ref, ff_b2_ref,
                ln_g_ref, ln_b_ref, enc_g_ref, enc_b_ref,
                head_wp_ref, head_bp_ref, head_wc_ref, head_bc_ref,
                aff_wf_ref, aff_bf_ref,
                aff_out_ref, pw_out_ref, *, n_layers):
    f32 = jnp.float32
    D = D_MODEL
    dh = D // NHEAD
    sp = prot_ref.shape[0]
    sc = comp_ref.shape[0]

    def dot_t(x, w):
        # x: (N, Din), w: (Dout, Din) torch layout  ->  x @ w.T : (N, Dout)
        return jax.lax.dot_general(x, w, (((1,), (1,)), ((), ())),
                                   preferred_element_type=f32)

    def matmul(x, y):
        return jax.lax.dot_general(x, y, (((1,), (0,)), ((), ())),
                                   preferred_element_type=f32)

    def layer_norm(h, g, b):
        mu = jnp.mean(h, axis=-1, keepdims=True)
        var = jnp.mean((h - mu) ** 2, axis=-1, keepdims=True)
        return (h - mu) * jax.lax.rsqrt(var + LN_EPS) * g + b

    def add_ln(a, r, idx):
        return layer_norm(a + r, ln_g_ref[idx], ln_b_ref[idx])

    p_row = p_row_ref[...]     # (1, Sp)  1 = valid
    c_row = c_row_ref[...]     # (1, Sc)
    p_col = p_col_ref[...]     # (Sp, 1)
    c_col = c_col_ref[...]     # (Sc, 1)

    # --- hoisted head-packing constants (built once, reused in every layer) -
    lane = jax.lax.broadcasted_iota(jnp.int32, (1, D), 1)
    head_masks = [((lane >= h * dh) & (lane < (h + 1) * dh)).astype(f32)
                  for h in range(NHEAD)]

    def make_pack(sk, valid_row):
        # packmask: (NHEAD*Sk, D) head-column mask used to build K_heads/V_heads
        packmask = jnp.concatenate(
            [jnp.broadcast_to(hm, (sk, D)) for hm in head_masks], axis=0)
        glane = jax.lax.broadcasted_iota(jnp.int32, (1, NHEAD * sk), 1)
        gbool = [(glane >= h * sk) & (glane < (h + 1) * sk)
                 for h in range(NHEAD)]
        gfloat = [g.astype(f32) for g in gbool]
        # key-padding additive bias, tiled once per head group (hoisted)
        bias = jnp.tile((1.0 - valid_row) * NEG_INF, (1, NHEAD))   # (1, H*Sk)
        return packmask, gbool, gfloat, bias

    pack_p = make_pack(sp, p_row)   # protein keys
    pack_c = make_pack(sc, c_row)   # compound keys

    def mha(xq, xkv, pack, idx):
        packmask, gbool, gfloat, bias = pack
        W = wqkv_ref[idx]           # (3D, D); q-rows pre-scaled by 1/sqrt(dh)
        Bqkv = bqkv_ref[idx]        # (1, 3D)
        if xq is xkv:               # self-attention: single fused QKV matmul
            proj = dot_t(xq, W) + Bqkv                       # (S, 3D)
            q, k, v = proj[:, :D], proj[:, D:2 * D], proj[:, 2 * D:]
        else:                       # cross-attention: Q matmul + fused-KV matmul
            q = dot_t(xq, W[:D]) + Bqkv[:, :D]
            kv = dot_t(xkv, W[D:]) + Bqkv[:, D:]
            k, v = kv[:, :D], kv[:, D:]
        # lane-packed heads: one score matmul + one PV matmul for all heads
        k_heads = jnp.tile(k, (NHEAD, 1)) * packmask          # (H*Sk, D)
        v_heads = jnp.tile(v, (NHEAD, 1)) * packmask
        s = dot_t(q, k_heads) + bias                           # (Sq, H*Sk)
        # per-head (lane-group) masked softmax on the packed tile
        m_parts = [jnp.max(jnp.where(g, s, NEG_INF), axis=-1, keepdims=True)
                   for g in gbool]
        m_full = sum(m * g for m, g in zip(m_parts, gfloat))
        e = jnp.exp(s - m_full)
        inv_parts = [pl.reciprocal(jnp.sum(e * g, axis=-1, keepdims=True),
                                   approx=True)
                     for g in gfloat]
        inv_full = sum(r * g for r, g in zip(inv_parts, gfloat))
        o = matmul(e * inv_full, v_heads)                      # (Sq, D) concat-by-sum
        return dot_t(o, wo_ref[idx]) + bo_ref[idx]

    def ffn(x, idx):
        h = jnp.maximum(dot_t(x, ff_w1_ref[idx]) + ff_b1_ref[idx], 0.0)
        return dot_t(h, ff_w2_ref[idx]) + ff_b2_ref[idx]

    # LinearTransformLayer (embedding projection + ReLU); dropout = identity
    x = jnp.maximum(dot_t(prot_ref[...], ptf_w_ref[...]) + ptf_b_ref[...], 0.0)
    y = jnp.maximum(dot_t(comp_ref[...], ctf_w_ref[...]) + ctf_b_ref[...], 0.0)

    # ------------------- AttentionEncoderLayer stack ------------------------
    for l in range(n_layers):
        a0, n0 = 4 * l, 8 * l
        x = add_ln(x, mha(x, x, pack_p, a0 + 0), n0 + 0)       # prot self
        y = add_ln(y, mha(y, y, pack_c, a0 + 1), n0 + 1)       # comp self
        x = add_ln(x, ffn(x, a0 + 0), n0 + 2)                  # prot ff0
        y = add_ln(y, ffn(y, a0 + 1), n0 + 3)                  # comp ff0
        x1 = add_ln(x, mha(x, y, pack_c, a0 + 2), n0 + 4)      # prot cross
        y1 = add_ln(y, mha(y, x, pack_p, a0 + 3), n0 + 5)      # comp cross
        x1 = add_ln(x1, ffn(x1, a0 + 2), n0 + 6)               # prot ff1
        y1 = add_ln(y1, ffn(y1, a0 + 3), n0 + 7)               # comp ff1
        x, y = x1, y1

    # shared final encoder LayerNorm (AttentionPredictor.norm)
    x = layer_norm(x, enc_g_ref[...], enc_b_ref[...])
    y = layer_norm(y, enc_g_ref[...], enc_b_ref[...])

    # fused output-head projections: lanes [0:D) = affinity head,
    # lanes [D:2D) = pairwise head
    hp = jnp.maximum(dot_t(x, head_wp_ref[...]) + head_bp_ref[...], 0.0)  # (Sp, 2D)
    hc = jnp.maximum(dot_t(y, head_wc_ref[...]) + head_bc_ref[...], 0.0)  # (Sc, 2D)
    prot_f, prot_g = hp[:, :D], hp[:, D:]
    comp_f, comp_g = hc[:, :D], hc[:, D:]

    def mask_softmax_seq(a, mask):
        # exact torch reference semantics: max over ALL positions,
        # mask applied after exp, +1e-6 in the denominator (exact division).
        a_max = jnp.max(a, axis=0, keepdims=True)
        a_exp = jnp.exp(a - a_max) * mask
        return a_exp / (jnp.sum(a_exp, axis=0, keepdims=True) + 1e-6)

    p_w = mask_softmax_seq(
        jnp.sqrt(jnp.sum(prot_f * prot_f, axis=-1, keepdims=True)), p_col)
    c_w = mask_softmax_seq(
        jnp.sqrt(jnp.sum(comp_f * comp_f, axis=-1, keepdims=True)), c_col)
    prot_sum = jnp.sum(prot_f * p_w, axis=0, keepdims=True)    # (1, D)
    comp_sum = jnp.sum(comp_f * c_w, axis=0, keepdims=True)    # (1, D)

    # relu(outer(comp, prot)) . W  via exact sign decomposition:
    #   relu(c_i p_j) = relu(c)_i relu(p)_j + relu(-c)_i relu(-p)_j
    c_pos, c_neg = jnp.maximum(comp_sum, 0.0), jnp.maximum(-comp_sum, 0.0)
    p_pos, p_neg = jnp.maximum(prot_sum, 0.0), jnp.maximum(-prot_sum, 0.0)
    w_aff = aff_wf_ref[...]                    # (D, D): [i,j] = W[0, i*D+j]
    aff = (jnp.sum(c_pos * dot_t(p_pos, w_aff), axis=-1, keepdims=True)
           + jnp.sum(c_neg * dot_t(p_neg, w_aff), axis=-1, keepdims=True)
           + aff_bf_ref[...])
    aff_out_ref[...] = aff                     # (1, 1)

    # PairwiseOutputLayer: sigmoid(comp_g @ prot_g.T) * valid-mask outer
    pair = jax.nn.sigmoid(dot_t(comp_g, prot_g))               # (Sc, Sp)
    pw_out_ref[...] = pair * (c_col * p_row)


# ------------------------------ forward wrapper -----------------------------
def transformer_forward(params, src, tgt, src_kpm, tgt_kpm):
    b, sp = src.shape
    sc = tgt.shape[1]
    f32 = jnp.float32

    # nn.Embedding.from_pretrained lookups (XLA gather outside the kernel)
    prot_raw = params["init_residues"][src]                    # (B, Sp, D_ENC)
    comp_raw = params["init_atoms"][tgt]                       # (B, Sc, D_DEC)

    p_valid = (~src_kpm).astype(f32)                           # (B, Sp) 1=valid
    c_valid = (~tgt_kpm).astype(f32)
    p_row, c_row = p_valid[:, None, :], c_valid[:, None, :]    # (B, 1, S)
    p_col, c_col = p_valid[:, :, None], c_valid[:, :, None]    # (B, S, 1)

    weights = (
        params["prot_tf_w"], params["prot_tf_b"],
        params["comp_tf_w"], params["comp_tf_b"],
        params["attn_wqkv"], params["attn_bqkv"],
        params["attn_wo"], params["attn_bo"],
        params["ff_w1"], params["ff_b1"], params["ff_w2"], params["ff_b2"],
        params["ln_g"], params["ln_b"],
        params["enc_ln_g"], params["enc_ln_b"],
        params["head_wp"], params["head_bp"],
        params["head_wc"], params["head_bc"],
        params["aff_wf"], params["aff_bf"],
    )

    def per_batch(tail):
        n = len(tail)
        return pl.BlockSpec((None,) + tuple(tail),
                            lambda bb, _n=n: (bb,) + (0,) * _n)

    def resident(arr):       # full-array VMEM-resident block, fetched once
        zeros = (0,) * arr.ndim
        return pl.BlockSpec(arr.shape, lambda bb, _z=zeros: _z)

    in_specs = ([per_batch((sp, D_ENC)), per_batch((sc, D_DEC)),
                 per_batch((1, sp)), per_batch((1, sc)),
                 per_batch((sp, 1)), per_batch((sc, 1))]
                + [resident(w) for w in weights])
    out_specs = [pl.BlockSpec((None, 1, 1), lambda bb: (bb, 0, 0)),
                 pl.BlockSpec((None, sc, sp), lambda bb: (bb, 0, 0))]

    kern = functools.partial(_megakernel, n_layers=N_LAYERS)
    affinity, pairwise = pl.pallas_call(
        kern,
        out_shape=(jax.ShapeDtypeStruct((b, 1, 1), f32),
                   jax.ShapeDtypeStruct((b, sc, sp), f32)),
        grid_spec=pltpu.PrefetchScalarGridSpec(
            num_scalar_prefetch=0,
            grid=(b,),
            in_specs=in_specs,
            out_specs=out_specs),
        compiler_params=pltpu.CompilerParams(
            dimension_semantics=("parallel",)),
    )(prot_raw, comp_raw, p_row, c_row, p_col, c_col, *weights)
    return affinity.reshape(b, 1), pairwise


# ----------------------------- parameter init -------------------------------
def init_params(key):
    kit = iter(jax.random.split(key, 256))

    def xavier(shape):
        fan_out, fan_in = shape[-2], shape[-1]
        a = math.sqrt(6.0 / (fan_in + fan_out))
        return jax.random.uniform(next(kit), shape, jnp.float32, -a, a)

    def bias(shape, scale=0.05):
        return jax.random.uniform(next(kit), shape, jnp.float32, -scale, scale)

    la, lnrm = 4 * N_LAYERS, 8 * N_LAYERS
    scale = 1.0 / math.sqrt(D_MODEL // NHEAD)

    # per-MHA projection weights, torch (Dout, Din) layout; ordering per layer:
    # [prot_self, comp_self, prot_cross, comp_cross] / FF [p_ff0, c_ff0, p_ff1,
    # c_ff1]; LN base l*8 -> [p_n0, c_n0, p_n1, c_n1, p_n2, c_n2, p_n3, c_n3].
    wq, wk, wv = (xavier((la, D_MODEL, D_MODEL)) for _ in range(3))
    bq, bk, bv = (bias((la, 1, D_MODEL)) for _ in range(3))
    # fused QKV, with the 1/sqrt(dh) softmax scale folded into the q block
    attn_wqkv = jnp.concatenate([wq * scale, wk, wv], axis=1)   # (la, 3D, D)
    attn_bqkv = jnp.concatenate([bq * scale, bk, bv], axis=2)   # (la, 1, 3D)

    aff_wp, aff_wc = xavier((D_MODEL, D_MODEL)), xavier((D_MODEL, D_MODEL))
    aff_bp, aff_bc = bias((1, D_MODEL)), bias((1, D_MODEL))
    pw_wp, pw_wc = xavier((D_MODEL, D_MODEL)), xavier((D_MODEL, D_MODEL))
    pw_bp, pw_bc = bias((1, D_MODEL)), bias((1, D_MODEL))

    return dict(
        init_residues=jax.random.normal(next(kit), (N_RES, D_ENC), jnp.float32),
        init_atoms=jax.random.normal(next(kit), (N_ATOM, D_DEC), jnp.float32),
        prot_tf_w=xavier((D_MODEL, D_ENC)), prot_tf_b=bias((1, D_MODEL)),
        comp_tf_w=xavier((D_MODEL, D_DEC)), comp_tf_b=bias((1, D_MODEL)),
        attn_wqkv=attn_wqkv, attn_bqkv=attn_bqkv,
        attn_wo=xavier((la, D_MODEL, D_MODEL)), attn_bo=bias((la, 1, D_MODEL)),
        ff_w1=xavier((la, D_FF, D_MODEL)), ff_b1=bias((la, 1, D_FF)),
        ff_w2=xavier((la, D_MODEL, D_FF)), ff_b2=bias((la, 1, D_MODEL)),
        ln_g=jnp.ones((lnrm, 1, D_MODEL), jnp.float32),
        ln_b=jnp.zeros((lnrm, 1, D_MODEL), jnp.float32),
        enc_ln_g=jnp.ones((1, D_MODEL), jnp.float32),
        enc_ln_b=jnp.zeros((1, D_MODEL), jnp.float32),
        # fused per-stream output-head projections:
        #   rows [0:D) = AffinityOutputLayer linear, rows [D:2D) = PairwiseOutputLayer
        head_wp=jnp.concatenate([aff_wp, pw_wp], axis=0),
        head_bp=jnp.concatenate([aff_bp, pw_bp], axis=1),
        head_wc=jnp.concatenate([aff_wc, pw_wc], axis=0),
        head_bc=jnp.concatenate([aff_bc, pw_bc], axis=1),
        # final_layer weight (1, D*D) stored reshaped (D, D): row = comp idx,
        # col = prot idx (row-major flatten of comp (x) prot outer product).
        aff_wf=xavier((D_MODEL, D_MODEL)), aff_bf=bias((1, 1)),
    )


if __name__ == "__main__":
    key = jax.random.PRNGKey(0)
    kp, ks, kt = jax.random.split(key, 3)
    params = init_params(kp)

    # sequence lengths chosen 8-aligned for clean TPU sublane tiling
    B, SP, SC = 2, 16, 8
    src = jax.random.randint(ks, (B, SP), 0, N_RES, dtype=jnp.int32)
    tgt = jax.random.randint(kt, (B, SC), 0, N_ATOM, dtype=jnp.int32)
    # key-padding masks: True = padded (each sequence keeps >=1 valid token)
    src_kpm = jnp.zeros((B, SP), dtype=bool).at[1, SP - 3:].set(True)
    tgt_kpm = jnp.zeros((B, SC), dtype=bool).at[0, SC - 1:].set(True)

    fwd = jax.jit(transformer_forward)
    affinity, pairwise = fwd(params, src, tgt, src_kpm, tgt_kpm)
    jax.block_until_ready((affinity, pairwise))
    assert affinity.shape == (B, 1)
    assert pairwise.shape == (B, SC, SP)
    assert bool(jnp.all(jnp.isfinite(affinity)))
    assert bool(jnp.all(jnp.isfinite(pairwise)))
    print("KERNEL_OK")
</pallas_src>

<mosaic_0001>
module attributes {stable_mosaic.version = 11 : i64} {
  func.func @_megakernel(%arg0: i32, %arg1: memref<1x16x24xf32, #tpu.memory_space<vmem>>, %arg2: memref<1x8x16xf32, #tpu.memory_space<vmem>>, %arg3: memref<1x1x16xf32, #tpu.memory_space<vmem>>, %arg4: memref<1x1x8xf32, #tpu.memory_space<vmem>>, %arg5: memref<1x16x1xf32, #tpu.memory_space<vmem>>, %arg6: memref<1x8x1xf32, #tpu.memory_space<vmem>>, %arg7: memref<32x24xf32, #tpu.memory_space<vmem>>, %arg8: memref<1x32xf32, #tpu.memory_space<vmem>>, %arg9: memref<32x16xf32, #tpu.memory_space<vmem>>, %arg10: memref<1x32xf32, #tpu.memory_space<vmem>>, %arg11: memref<8x96x32xf32, #tpu.memory_space<vmem>>, %arg12: memref<8x1x96xf32, #tpu.memory_space<vmem>>, %arg13: memref<8x32x32xf32, #tpu.memory_space<vmem>>, %arg14: memref<8x1x32xf32, #tpu.memory_space<vmem>>, %arg15: memref<8x64x32xf32, #tpu.memory_space<vmem>>, %arg16: memref<8x1x64xf32, #tpu.memory_space<vmem>>, %arg17: memref<8x32x64xf32, #tpu.memory_space<vmem>>, %arg18: memref<8x1x32xf32, #tpu.memory_space<vmem>>, %arg19: memref<16x1x32xf32, #tpu.memory_space<vmem>>, %arg20: memref<16x1x32xf32, #tpu.memory_space<vmem>>, %arg21: memref<1x32xf32, #tpu.memory_space<vmem>>, %arg22: memref<1x32xf32, #tpu.memory_space<vmem>>, %arg23: memref<64x32xf32, #tpu.memory_space<vmem>>, %arg24: memref<1x64xf32, #tpu.memory_space<vmem>>, %arg25: memref<64x32xf32, #tpu.memory_space<vmem>>, %arg26: memref<1x64xf32, #tpu.memory_space<vmem>>, %arg27: memref<32x32xf32, #tpu.memory_space<vmem>>, %arg28: memref<1x1xf32, #tpu.memory_space<vmem>>, %arg29: memref<1x1x1xf32, #tpu.memory_space<vmem>>, %arg30: memref<1x8x16xf32, #tpu.memory_space<vmem>>) attributes {dimension_semantics = [#tpu.dimension_semantics<parallel>], iteration_bounds = array<i64: 2>, scalar_prefetch = 0 : i64, scratch_operands = 0 : i64, tpu.core_type = #tpu.core_type<tc>, window_params = [{transform_indices = @transform_0, window_bounds = array<i64: 1, 16, 24>}, {transform_indices = @transform_1, window_bounds = array<i64: 1, 8, 16>}, {transform_indices = @transform_2, window_bounds = array<i64: 1, 1, 16>}, {transform_indices = @transform_3, window_bounds = array<i64: 1, 1, 8>}, {transform_indices = @transform_4, window_bounds = array<i64: 1, 16, 1>}, {transform_indices = @transform_5, window_bounds = array<i64: 1, 8, 1>}, {pipeline_mode = #tpu.pipeline_mode<synchronous>, transform_indices = @transform_6, window_bounds = array<i64: 32, 24>}, {pipeline_mode = #tpu.pipeline_mode<synchronous>, transform_indices = @transform_7, window_bounds = array<i64: 1, 32>}, {pipeline_mode = #tpu.pipeline_mode<synchronous>, transform_indices = @transform_8, window_bounds = array<i64: 32, 16>}, {pipeline_mode = #tpu.pipeline_mode<synchronous>, transform_indices = @transform_9, window_bounds = array<i64: 1, 32>}, {pipeline_mode = #tpu.pipeline_mode<synchronous>, transform_indices = @transform_10, window_bounds = array<i64: 8, 96, 32>}, {pipeline_mode = #tpu.pipeline_mode<synchronous>, transform_indices = @transform_11, window_bounds = array<i64: 8, 1, 96>}, {pipeline_mode = #tpu.pipeline_mode<synchronous>, transform_indices = @transform_12, window_bounds = array<i64: 8, 32, 32>}, {pipeline_mode = #tpu.pipeline_mode<synchronous>, transform_indices = @transform_13, window_bounds = array<i64: 8, 1, 32>}, {pipeline_mode = #tpu.pipeline_mode<synchronous>, transform_indices = @transform_14, window_bounds = array<i64: 8, 64, 32>}, {pipeline_mode = #tpu.pipeline_mode<synchronous>, transform_indices = @transform_15, window_bounds = array<i64: 8, 1, 64>}, {pipeline_mode = #tpu.pipeline_mode<synchronous>, transform_indices = @transform_16, window_bounds = array<i64: 8, 32, 64>}, {pipeline_mode = #tpu.pipeline_mode<synchronous>, transform_indices = @transform_17, window_bounds = array<i64: 8, 1, 32>}, {pipeline_mode = #tpu.pipeline_mode<synchronous>, transform_indices = @transform_18, window_bounds = array<i64: 16, 1, 32>}, {pipeline_mode = #tpu.pipeline_mode<synchronous>, transform_indices = @transform_19, window_bounds = array<i64: 16, 1, 32>}, {pipeline_mode = #tpu.pipeline_mode<synchronous>, transform_indices = @transform_20, window_bounds = array<i64: 1, 32>}, {pipeline_mode = #tpu.pipeline_mode<synchronous>, transform_indices = @transform_21, window_bounds = array<i64: 1, 32>}, {pipeline_mode = #tpu.pipeline_mode<synchronous>, transform_indices = @transform_22, window_bounds = array<i64: 64, 32>}, {pipeline_mode = #tpu.pipeline_mode<synchronous>, transform_indices = @transform_23, window_bounds = array<i64: 1, 64>}, {pipeline_mode = #tpu.pipeline_mode<synchronous>, transform_indices = @transform_24, window_bounds = array<i64: 64, 32>}, {pipeline_mode = #tpu.pipeline_mode<synchronous>, transform_indices = @transform_25, window_bounds = array<i64: 1, 64>}, {pipeline_mode = #tpu.pipeline_mode<synchronous>, transform_indices = @transform_26, window_bounds = array<i64: 32, 32>}, {pipeline_mode = #tpu.pipeline_mode<synchronous>, transform_indices = @transform_27, window_bounds = array<i64: 1, 1>}, {transform_indices = @transform_28, window_bounds = array<i64: 1, 1, 1>}, {transform_indices = @transform_29, window_bounds = array<i64: 1, 8, 16>}]} {
    %c0 = arith.constant 0 : index
    %c0_0 = arith.constant 0 : index
    %c0_1 = arith.constant 0 : index
    %0 = vector.load %arg3[%c0, %c0_0, %c0_1] : memref<1x1x16xf32, #tpu.memory_space<vmem>>, vector<1x1x16xf32>
    %1 = vector.shape_cast %0 : vector<1x1x16xf32> to vector<1x16xf32>
    %c0_2 = arith.constant 0 : index
    %c0_3 = arith.constant 0 : index
    %c0_4 = arith.constant 0 : index
    %2 = vector.load %arg4[%c0_2, %c0_3, %c0_4] : memref<1x1x8xf32, #tpu.memory_space<vmem>>, vector<1x1x8xf32>
    %3 = vector.shape_cast %2 : vector<1x1x8xf32> to vector<1x8xf32>
    %c0_5 = arith.constant 0 : index
    %c0_6 = arith.constant 0 : index
    %c0_7 = arith.constant 0 : index
    %4 = vector.load %arg5[%c0_5, %c0_6, %c0_7] : memref<1x16x1xf32, #tpu.memory_space<vmem>>, vector<1x16x1xf32>
    %5 = vector.shape_cast %4 : vector<1x16x1xf32> to vector<16x1xf32>
    %c0_8 = arith.constant 0 : index
    %c0_9 = arith.constant 0 : index
    %c0_10 = arith.constant 0 : index
    %6 = vector.load %arg6[%c0_8, %c0_9, %c0_10] : memref<1x8x1xf32, #tpu.memory_space<vmem>>, vector<1x8x1xf32>
    %7 = vector.shape_cast %6 : vector<1x8x1xf32> to vector<8x1xf32>
    %8 = tpu.iota {dimensions = array<i32: 1>} : vector<1x32xi32>
    %c0_i32 = arith.constant 0 : i32
    %9 = vector.broadcast %c0_i32 : i32 to vector<1x32xi32>
    %10 = arith.cmpi sge, %8, %9 : vector<1x32xi32>
    %c8_i32 = arith.constant 8 : i32
    %11 = vector.broadcast %c8_i32 : i32 to vector<1x32xi32>
    %12 = arith.cmpi slt, %8, %11 : vector<1x32xi32>
    %13 = arith.andi %10, %12 : vector<1x32xi1>
    %14 = arith.extui %13 : vector<1x32xi1> to vector<1x32xi32>
    %15 = arith.sitofp %14 : vector<1x32xi32> to vector<1x32xf32>
    %c8_i32_11 = arith.constant 8 : i32
    %16 = vector.broadcast %c8_i32_11 : i32 to vector<1x32xi32>
    %17 = arith.cmpi sge, %8, %16 : vector<1x32xi32>
    %c16_i32 = arith.constant 16 : i32
    %18 = vector.broadcast %c16_i32 : i32 to vector<1x32xi32>
    %19 = arith.cmpi slt, %8, %18 : vector<1x32xi32>
    %20 = arith.andi %17, %19 : vector<1x32xi1>
    %21 = arith.extui %20 : vector<1x32xi1> to vector<1x32xi32>
    %22 = arith.sitofp %21 : vector<1x32xi32> to vector<1x32xf32>
    %c16_i32_12 = arith.constant 16 : i32
    %23 = vector.broadcast %c16_i32_12 : i32 to vector<1x32xi32>
    %24 = arith.cmpi sge, %8, %23 : vector<1x32xi32>
    %c24_i32 = arith.constant 24 : i32
    %25 = vector.broadcast %c24_i32 : i32 to vector<1x32xi32>
    %26 = arith.cmpi slt, %8, %25 : vector<1x32xi32>
    %27 = arith.andi %24, %26 : vector<1x32xi1>
    %28 = arith.extui %27 : vector<1x32xi1> to vector<1x32xi32>
    %29 = arith.sitofp %28 : vector<1x32xi32> to vector<1x32xf32>
    %c24_i32_13 = arith.constant 24 : i32
    %30 = vector.broadcast %c24_i32_13 : i32 to vector<1x32xi32>
    %31 = arith.cmpi sge, %8, %30 : vector<1x32xi32>
    %c32_i32 = arith.constant 32 : i32
    %32 = vector.broadcast %c32_i32 : i32 to vector<1x32xi32>
    %33 = arith.cmpi slt, %8, %32 : vector<1x32xi32>
    %34 = arith.andi %31, %33 : vector<1x32xi1>
    %35 = arith.extui %34 : vector<1x32xi1> to vector<1x32xi32>
    %36 = arith.sitofp %35 : vector<1x32xi32> to vector<1x32xf32>
    %37 = vector.shape_cast %15 : vector<1x32xf32> to vector<1x32xf32>
    %38 = vector.broadcast %37 : vector<1x32xf32> to vector<16x32xf32>
    %39 = vector.shape_cast %22 : vector<1x32xf32> to vector<1x32xf32>
    %40 = vector.broadcast %39 : vector<1x32xf32> to vector<16x32xf32>
    %41 = vector.shape_cast %29 : vector<1x32xf32> to vector<1x32xf32>
    %42 = vector.broadcast %41 : vector<1x32xf32> to vector<16x32xf32>
    %43 = vector.shape_cast %36 : vector<1x32xf32> to vector<1x32xf32>
    %44 = vector.broadcast %43 : vector<1x32xf32> to vector<16x32xf32>
    %45 = tpu.concatenate %38, %40, %42, %44 in 0 : vector<16x32xf32>, vector<16x32xf32>, vector<16x32xf32>, vector<16x32xf32> -> vector<64x32xf32>
    %46 = tpu.iota {dimensions = array<i32: 1>} : vector<1x64xi32>
    %c0_i32_14 = arith.constant 0 : i32
    %47 = vector.broadcast %c0_i32_14 : i32 to vector<1x64xi32>
    %48 = arith.cmpi sge, %46, %47 : vector<1x64xi32>
    %c16_i32_15 = arith.constant 16 : i32
    %49 = vector.broadcast %c16_i32_15 : i32 to vector<1x64xi32>
    %50 = arith.cmpi slt, %46, %49 : vector<1x64xi32>
    %51 = arith.andi %48, %50 : vector<1x64xi1>
    %c16_i32_16 = arith.constant 16 : i32
    %52 = vector.broadcast %c16_i32_16 : i32 to vector<1x64xi32>
    %53 = arith.cmpi sge, %46, %52 : vector<1x64xi32>
    %c32_i32_17 = arith.constant 32 : i32
    %54 = vector.broadcast %c32_i32_17 : i32 to vector<1x64xi32>
    %55 = arith.cmpi slt, %46, %54 : vector<1x64xi32>
    %56 = arith.andi %53, %55 : vector<1x64xi1>
    %c32_i32_18 = arith.constant 32 : i32
    %57 = vector.broadcast %c32_i32_18 : i32 to vector<1x64xi32>
    %58 = arith.cmpi sge, %46, %57 : vector<1x64xi32>
    %c48_i32 = arith.constant 48 : i32
    %59 = vector.broadcast %c48_i32 : i32 to vector<1x64xi32>
    %60 = arith.cmpi slt, %46, %59 : vector<1x64xi32>
    %61 = arith.andi %58, %60 : vector<1x64xi1>
    %c48_i32_19 = arith.constant 48 : i32
    %62 = vector.broadcast %c48_i32_19 : i32 to vector<1x64xi32>
    %63 = arith.cmpi sge, %46, %62 : vector<1x64xi32>
    %c64_i32 = arith.constant 64 : i32
    %64 = vector.broadcast %c64_i32 : i32 to vector<1x64xi32>
    %65 = arith.cmpi slt, %46, %64 : vector<1x64xi32>
    %66 = arith.andi %63, %65 : vector<1x64xi1>
    %67 = arith.extui %51 : vector<1x64xi1> to vector<1x64xi32>
    %68 = arith.sitofp %67 : vector<1x64xi32> to vector<1x64xf32>
    %69 = arith.extui %56 : vector<1x64xi1> to vector<1x64xi32>
    %70 = arith.sitofp %69 : vector<1x64xi32> to vector<1x64xf32>
    %71 = arith.extui %61 : vector<1x64xi1> to vector<1x64xi32>
    %72 = arith.sitofp %71 : vector<1x64xi32> to vector<1x64xf32>
    %73 = arith.extui %66 : vector<1x64xi1> to vector<1x64xi32>
    %74 = arith.sitofp %73 : vector<1x64xi32> to vector<1x64xf32>
    %cst = arith.constant 1.000000e+00 : f32
    %75 = vector.broadcast %cst : f32 to vector<1x16xf32>
    %76 = arith.subf %75, %1 : vector<1x16xf32>
    %cst_20 = arith.constant -1.000000e+30 : f32
    %77 = vector.broadcast %cst_20 : f32 to vector<1x16xf32>
    %78 = arith.mulf %76, %77 : vector<1x16xf32>
    %79 = tpu.concatenate %78, %78, %78, %78 in 1 : vector<1x16xf32>, vector<1x16xf32>, vector<1x16xf32>, vector<1x16xf32> -> vector<1x64xf32>
    %80 = vector.shape_cast %15 : vector<1x32xf32> to vector<1x32xf32>
    %81 = vector.broadcast %80 : vector<1x32xf32> to vector<8x32xf32>
    %82 = vector.shape_cast %22 : vector<1x32xf32> to vector<1x32xf32>
    %83 = vector.broadcast %82 : vector<1x32xf32> to vector<8x32xf32>
    %84 = vector.shape_cast %29 : vector<1x32xf32> to vector<1x32xf32>
    %85 = vector.broadcast %84 : vector<1x32xf32> to vector<8x32xf32>
    %86 = vector.shape_cast %36 : vector<1x32xf32> to vector<1x32xf32>
    %87 = vector.broadcast %86 : vector<1x32xf32> to vector<8x32xf32>
    %88 = tpu.concatenate %81, %83, %85, %87 in 0 : vector<8x32xf32>, vector<8x32xf32>, vector<8x32xf32>, vector<8x32xf32> -> vector<32x32xf32>
    %89 = tpu.iota {dimensions = array<i32: 1>} : vector<1x32xi32>
    %c0_i32_21 = arith.constant 0 : i32
    %90 = vector.broadcast %c0_i32_21 : i32 to vector<1x32xi32>
    %91 = arith.cmpi sge, %89, %90 : vector<1x32xi32>
    %c8_i32_22 = arith.constant 8 : i32
    %92 = vector.broadcast %c8_i32_22 : i32 to vector<1x32xi32>
    %93 = arith.cmpi slt, %89, %92 : vector<1x32xi32>
    %94 = arith.andi %91, %93 : vector<1x32xi1>
    %c8_i32_23 = arith.constant 8 : i32
    %95 = vector.broadcast %c8_i32_23 : i32 to vector<1x32xi32>
    %96 = arith.cmpi sge, %89, %95 : vector<1x32xi32>
    %c16_i32_24 = arith.constant 16 : i32
    %97 = vector.broadcast %c16_i32_24 : i32 to vector<1x32xi32>
    %98 = arith.cmpi slt, %89, %97 : vector<1x32xi32>
    %99 = arith.andi %96, %98 : vector<1x32xi1>
    %c16_i32_25 = arith.constant 16 : i32
    %100 = vector.broadcast %c16_i32_25 : i32 to vector<1x32xi32>
    %101 = arith.cmpi sge, %89, %100 : vector<1x32xi32>
    %c24_i32_26 = arith.constant 24 : i32
    %102 = vector.broadcast %c24_i32_26 : i32 to vector<1x32xi32>
    %103 = arith.cmpi slt, %89, %102 : vector<1x32xi32>
    %104 = arith.andi %101, %103 : vector<1x32xi1>
    %c24_i32_27 = arith.constant 24 : i32
    %105 = vector.broadcast %c24_i32_27 : i32 to vector<1x32xi32>
    %106 = arith.cmpi sge, %89, %105 : vector<1x32xi32>
    %c32_i32_28 = arith.constant 32 : i32
    %107 = vector.broadcast %c32_i32_28 : i32 to vector<1x32xi32>
    %108 = arith.cmpi slt, %89, %107 : vector<1x32xi32>
    %109 = arith.andi %106, %108 : vector<1x32xi1>
    %110 = arith.extui %94 : vector<1x32xi1> to vector<1x32xi32>
    %111 = arith.sitofp %110 : vector<1x32xi32> to vector<1x32xf32>
    %112 = arith.extui %99 : vector<1x32xi1> to vector<1x32xi32>
    %113 = arith.sitofp %112 : vector<1x32xi32> to vector<1x32xf32>
    %114 = arith.extui %104 : vector<1x32xi1> to vector<1x32xi32>
    %115 = arith.sitofp %114 : vector<1x32xi32> to vector<1x32xf32>
    %116 = arith.extui %109 : vector<1x32xi1> to vector<1x32xi32>
    %117 = arith.sitofp %116 : vector<1x32xi32> to vector<1x32xf32>
    %cst_29 = arith.constant 1.000000e+00 : f32
    %118 = vector.broadcast %cst_29 : f32 to vector<1x8xf32>
    %119 = arith.subf %118, %3 : vector<1x8xf32>
    %cst_30 = arith.constant -1.000000e+30 : f32
    %120 = vector.broadcast %cst_30 : f32 to vector<1x8xf32>
    %121 = arith.mulf %119, %120 : vector<1x8xf32>
    %122 = tpu.concatenate %121, %121, %121, %121 in 1 : vector<1x8xf32>, vector<1x8xf32>, vector<1x8xf32>, vector<1x8xf32> -> vector<1x32xf32>
    %c0_31 = arith.constant 0 : index
    %c0_32 = arith.constant 0 : index
    %c0_33 = arith.constant 0 : index
    %123 = vector.load %arg1[%c0_31, %c0_32, %c0_33] : memref<1x16x24xf32, #tpu.memory_space<vmem>>, vector<1x16x24xf32>
    %124 = vector.shape_cast %123 : vector<1x16x24xf32> to vector<16x24xf32>
    %c0_34 = arith.constant 0 : index
    %c0_35 = arith.constant 0 : index
    %125 = vector.load %arg7[%c0_34, %c0_35] : memref<32x24xf32, #tpu.memory_space<vmem>>, vector<32x24xf32>
    %cst_36 = arith.constant dense<0.000000e+00> : vector<16x32xf32>
    %126 = tpu.matmul %124, %125, %cst_36 {dimension_numbers = #tpu.dot_dimension_numbers<[1], [1], [0], [0], [0, 0, 1, 0], [], []>} : vector<16x24xf32>, vector<32x24xf32>, vector<16x32xf32> -> vector<16x32xf32>
    %c0_37 = arith.constant 0 : index
    %c0_38 = arith.constant 0 : index
    %127 = vector.load %arg8[%c0_37, %c0_38] : memref<1x32xf32, #tpu.memory_space<vmem>>, vector<1x32xf32>
    %128 = vector.broadcast %127 : vector<1x32xf32> to vector<16x32xf32>
    %129 = arith.addf %126, %128 : vector<16x32xf32>
    %cst_39 = arith.constant 0.000000e+00 : f32
    %130 = vector.broadcast %cst_39 : f32 to vector<16x32xf32>
    %131 = arith.maximumf %129, %130 : vector<16x32xf32>
    %c0_40 = arith.constant 0 : index
    %c0_41 = arith.constant 0 : index
    %c0_42 = arith.constant 0 : index
    %132 = vector.load %arg2[%c0_40, %c0_41, %c0_42] : memref<1x8x16xf32, #tpu.memory_space<vmem>>, vector<1x8x16xf32>
    %133 = vector.shape_cast %132 : vector<1x8x16xf32> to vector<8x16xf32>
    %c0_43 = arith.constant 0 : index
    %c0_44 = arith.constant 0 : index
    %134 = vector.load %arg9[%c0_43, %c0_44] : memref<32x16xf32, #tpu.memory_space<vmem>>, vector<32x16xf32>
    %cst_45 = arith.constant dense<0.000000e+00> : vector<8x32xf32>
    %135 = tpu.matmul %133, %134, %cst_45 {dimension_numbers = #tpu.dot_dimension_numbers<[1], [1], [0], [0], [0, 0, 1, 0], [], []>} : vector<8x16xf32>, vector<32x16xf32>, vector<8x32xf32> -> vector<8x32xf32>
    %c0_46 = arith.constant 0 : index
    %c0_47 = arith.constant 0 : index
    %136 = vector.load %arg10[%c0_46, %c0_47] : memref<1x32xf32, #tpu.memory_space<vmem>>, vector<1x32xf32>
    %137 = vector.broadcast %136 : vector<1x32xf32> to vector<8x32xf32>
    %138 = arith.addf %135, %137 : vector<8x32xf32>
    %cst_48 = arith.constant 0.000000e+00 : f32
    %139 = vector.broadcast %cst_48 : f32 to vector<8x32xf32>
    %140 = arith.maximumf %138, %139 : vector<8x32xf32>
    %c0_49 = arith.constant 0 : index
    %c0_50 = arith.constant 0 : index
    %c0_51 = arith.constant 0 : index
    %141 = vector.load %arg11[%c0_49, %c0_50, %c0_51] : memref<8x96x32xf32, #tpu.memory_space<vmem>>, vector<1x96x32xf32>
    %142 = vector.shape_cast %141 : vector<1x96x32xf32> to vector<96x32xf32>
    %c0_52 = arith.constant 0 : index
    %c0_53 = arith.constant 0 : index
    %c0_54 = arith.constant 0 : index
    %143 = vector.load %arg12[%c0_52, %c0_53, %c0_54] : memref<8x1x96xf32, #tpu.memory_space<vmem>>, vector<1x1x96xf32>
    %144 = vector.shape_cast %143 : vector<1x1x96xf32> to vector<1x96xf32>
    %cst_55 = arith.constant dense<0.000000e+00> : vector<16x96xf32>
    %145 = tpu.matmul %131, %142, %cst_55 {dimension_numbers = #tpu.dot_dimension_numbers<[1], [1], [0], [0], [0, 0, 1, 0], [], []>} : vector<16x32xf32>, vector<96x32xf32>, vector<16x96xf32> -> vector<16x96xf32>
    %146 = vector.broadcast %144 : vector<1x96xf32> to vector<16x96xf32>
    %147 = arith.addf %145, %146 : vector<16x96xf32>
    %148 = vector.extract_strided_slice %147 {offsets = [0, 0], sizes = [16, 32], strides = [1, 1]} : vector<16x96xf32> to vector<16x32xf32>
    %149 = vector.extract_strided_slice %147 {offsets = [0, 32], sizes = [16, 32], strides = [1, 1]} : vector<16x96xf32> to vector<16x32xf32>
    %150 = vector.extract_strided_slice %147 {offsets = [0, 64], sizes = [16, 32], strides = [1, 1]} : vector<16x96xf32> to vector<16x32xf32>
    %151 = tpu.concatenate %149, %149, %149, %149 in 0 : vector<16x32xf32>, vector<16x32xf32>, vector<16x32xf32>, vector<16x32xf32> -> vector<64x32xf32>
    %152 = arith.mulf %151, %45 : vector<64x32xf32>
    %153 = tpu.concatenate %150, %150, %150, %150 in 0 : vector<16x32xf32>, vector<16x32xf32>, vector<16x32xf32>, vector<16x32xf32> -> vector<64x32xf32>
    %154 = arith.mulf %153, %45 : vector<64x32xf32>
    %cst_56 = arith.constant dense<0.000000e+00> : vector<16x64xf32>
    %155 = tpu.matmul %148, %152, %cst_56 {dimension_numbers = #tpu.dot_dimension_numbers<[1], [1], [0], [0], [0, 0, 1, 0], [], []>} : vector<16x32xf32>, vector<64x32xf32>, vector<16x64xf32> -> vector<16x64xf32>
    %156 = vector.broadcast %79 : vector<1x64xf32> to vector<16x64xf32>
    %157 = arith.addf %155, %156 : vector<16x64xf32>
    %cst_57 = arith.constant -1.000000e+30 : f32
    %158 = vector.shape_cast %51 : vector<1x64xi1> to vector<1x64xi1>
    %159 = vector.broadcast %158 : vector<1x64xi1> to vector<16x64xi1>
    %160 = vector.broadcast %cst_57 : f32 to vector<16x64xf32>
    %161 = arith.select %159, %157, %160 : vector<16x64xi1>, vector<16x64xf32>
    %cst_58 = arith.constant dense<0xFF800000> : vector<16xf32>
    %162 = vector.multi_reduction <maximumf>, %161, %cst_58 [1] : vector<16x64xf32> to vector<16xf32>
    %163 = vector.shape_cast %162 : vector<16xf32> to vector<16x1xf32>
    %cst_59 = arith.constant -1.000000e+30 : f32
    %164 = vector.shape_cast %56 : vector<1x64xi1> to vector<1x64xi1>
    %165 = vector.broadcast %164 : vector<1x64xi1> to vector<16x64xi1>
    %166 = vector.broadcast %cst_59 : f32 to vector<16x64xf32>
    %167 = arith.select %165, %157, %166 : vector<16x64xi1>, vector<16x64xf32>
    %cst_60 = arith.constant dense<0xFF800000> : vector<16xf32>
    %168 = vector.multi_reduction <maximumf>, %167, %cst_60 [1] : vector<16x64xf32> to vector<16xf32>
    %169 = vector.shape_cast %168 : vector<16xf32> to vector<16x1xf32>
    %cst_61 = arith.constant -1.000000e+30 : f32
    %170 = vector.shape_cast %61 : vector<1x64xi1> to vector<1x64xi1>
    %171 = vector.broadcast %170 : vector<1x64xi1> to vector<16x64xi1>
    %172 = vector.broadcast %cst_61 : f32 to vector<16x64xf32>
    %173 = arith.select %171, %157, %172 : vector<16x64xi1>, vector<16x64xf32>
    %cst_62 = arith.constant dense<0xFF800000> : vector<16xf32>
    %174 = vector.multi_reduction <maximumf>, %173, %cst_62 [1] : vector<16x64xf32> to vector<16xf32>
    %175 = vector.shape_cast %174 : vector<16xf32> to vector<16x1xf32>
    %cst_63 = arith.constant -1.000000e+30 : f32
    %176 = vector.shape_cast %66 : vector<1x64xi1> to vector<1x64xi1>
    %177 = vector.broadcast %176 : vector<1x64xi1> to vector<16x64xi1>
    %178 = vector.broadcast %cst_63 : f32 to vector<16x64xf32>
    %179 = arith.select %177, %157, %178 : vector<16x64xi1>, vector<16x64xf32>
    %cst_64 = arith.constant dense<0xFF800000> : vector<16xf32>
    %180 = vector.multi_reduction <maximumf>, %179, %cst_64 [1] : vector<16x64xf32> to vector<16xf32>
    %181 = vector.shape_cast %180 : vector<16xf32> to vector<16x1xf32>
    %182 = vector.broadcast %163 : vector<16x1xf32> to vector<16x64xf32>
    %183 = vector.broadcast %68 : vector<1x64xf32> to vector<16x64xf32>
    %184 = arith.mulf %182, %183 : vector<16x64xf32>
    %cst_65 = arith.constant 0.000000e+00 : f32
    %185 = vector.broadcast %cst_65 : f32 to vector<16x64xf32>
    %186 = arith.addf %185, %184 : vector<16x64xf32>
    %187 = vector.broadcast %169 : vector<16x1xf32> to vector<16x64xf32>
    %188 = vector.broadcast %70 : vector<1x64xf32> to vector<16x64xf32>
    %189 = arith.mulf %187, %188 : vector<16x64xf32>
    %190 = arith.addf %186, %189 : vector<16x64xf32>
    %191 = vector.broadcast %175 : vector<16x1xf32> to vector<16x64xf32>
    %192 = vector.broadcast %72 : vector<1x64xf32> to vector<16x64xf32>
    %193 = arith.mulf %191, %192 : vector<16x64xf32>
    %194 = arith.addf %190, %193 : vector<16x64xf32>
    %195 = vector.broadcast %181 : vector<16x1xf32> to vector<16x64xf32>
    %196 = vector.broadcast %74 : vector<1x64xf32> to vector<16x64xf32>
    %197 = arith.mulf %195, %196 : vector<16x64xf32>
    %198 = arith.addf %194, %197 : vector<16x64xf32>
    %199 = arith.subf %157, %198 : vector<16x64xf32>
    %200 = math.exp %199 : vector<16x64xf32>
    %201 = vector.broadcast %68 : vector<1x64xf32> to vector<16x64xf32>
    %202 = arith.mulf %200, %201 : vector<16x64xf32>
    %cst_66 = arith.constant dense<0.000000e+00> : vector<16xf32>
    %203 = vector.multi_reduction <add>, %202, %cst_66 [1] : vector<16x64xf32> to vector<16xf32>
    %204 = vector.shape_cast %203 : vector<16xf32> to vector<16x1xf32>
    %205 = tpu.reciprocal %204 {approx = true} : vector<16x1xf32> -> vector<16x1xf32>
    %206 = vector.broadcast %70 : vector<1x64xf32> to vector<16x64xf32>
    %207 = arith.mulf %200, %206 : vector<16x64xf32>
    %cst_67 = arith.constant dense<0.000000e+00> : vector<16xf32>
    %208 = vector.multi_reduction <add>, %207, %cst_67 [1] : vector<16x64xf32> to vector<16xf32>
    %209 = vector.shape_cast %208 : vector<16xf32> to vector<16x1xf32>
    %210 = tpu.reciprocal %209 {approx = true} : vector<16x1xf32> -> vector<16x1xf32>
    %211 = vector.broadcast %72 : vector<1x64xf32> to vector<16x64xf32>
    %212 = arith.mulf %200, %211 : vector<16x64xf32>
    %cst_68 = arith.constant dense<0.000000e+00> : vector<16xf32>
    %213 = vector.multi_reduction <add>, %212, %cst_68 [1] : vector<16x64xf32> to vector<16xf32>
    %214 = vector.shape_cast %213 : vector<16xf32> to vector<16x1xf32>
    %215 = tpu.reciprocal %214 {approx = true} : vector<16x1xf32> -> vector<16x1xf32>
    %216 = vector.broadcast %74 : vector<1x64xf32> to vector<16x64xf32>
    %217 = arith.mulf %200, %216 : vector<16x64xf32>
    %cst_69 = arith.constant dense<0.000000e+00> : vector<16xf32>
    %218 = vector.multi_reduction <add>, %217, %cst_69 [1] : vector<16x64xf32> to vector<16xf32>
    %219 = vector.shape_cast %218 : vector<16xf32> to vector<16x1xf32>
    %220 = tpu.reciprocal %219 {approx = true} : vector<16x1xf32> -> vector<16x1xf32>
    %221 = vector.broadcast %205 : vector<16x1xf32> to vector<16x64xf32>
    %222 = vector.broadcast %68 : vector<1x64xf32> to vector<16x64xf32>
    %223 = arith.mulf %221, %222 : vector<16x64xf32>
    %cst_70 = arith.constant 0.000000e+00 : f32
    %224 = vector.broadcast %cst_70 : f32 to vector<16x64xf32>
    %225 = arith.addf %224, %223 : vector<16x64xf32>
    %226 = vector.broadcast %210 : vector<16x1xf32> to vector<16x64xf32>
    %227 = vector.broadcast %70 : vector<1x64xf32> to vector<16x64xf32>
    %228 = arith.mulf %226, %227 : vector<16x64xf32>
    %229 = arith.addf %225, %228 : vector<16x64xf32>
    %230 = vector.broadcast %215 : vector<16x1xf32> to vector<16x64xf32>
    %231 = vector.broadcast %72 : vector<1x64xf32> to vector<16x64xf32>
    %232 = arith.mulf %230, %231 : vector<16x64xf32>
    %233 = arith.addf %229, %232 : vector<16x64xf32>
    %234 = vector.broadcast %220 : vector<16x1xf32> to vector<16x64xf32>
    %235 = vector.broadcast %74 : vector<1x64xf32> to vector<16x64xf32>
    %236 = arith.mulf %234, %235 : vector<16x64xf32>
    %237 = arith.addf %233, %236 : vector<16x64xf32>
    %238 = arith.mulf %200, %237 : vector<16x64xf32>
    %cst_71 = arith.constant dense<0.000000e+00> : vector<16x32xf32>
    %239 = tpu.matmul %238, %154, %cst_71 {dimension_numbers = #tpu.dot_dimension_numbers<[1], [0], [0], [1], [0, 0, 1, 1], [], []>} : vector<16x64xf32>, vector<64x32xf32>, vector<16x32xf32> -> vector<16x32xf32>
    %c0_72 = arith.constant 0 : index
    %c0_73 = arith.constant 0 : index
    %c0_74 = arith.constant 0 : index
    %240 = vector.load %arg13[%c0_72, %c0_73, %c0_74] : memref<8x32x32xf32, #tpu.memory_space<vmem>>, vector<1x32x32xf32>
    %241 = vector.shape_cast %240 : vector<1x32x32xf32> to vector<32x32xf32>
    %cst_75 = arith.constant dense<0.000000e+00> : vector<16x32xf32>
    %242 = tpu.matmul %239, %241, %cst_75 {dimension_numbers = #tpu.dot_dimension_numbers<[1], [1], [0], [0], [0, 0, 1, 0], [], []>} : vector<16x32xf32>, vector<32x32xf32>, vector<16x32xf32> -> vector<16x32xf32>
    %c0_76 = arith.constant 0 : index
    %c0_77 = arith.constant 0 : index
    %c0_78 = arith.constant 0 : index
    %243 = vector.load %arg14[%c0_76, %c0_77, %c0_78] : memref<8x1x32xf32, #tpu.memory_space<vmem>>, vector<1x1x32xf32>
    %244 = vector.shape_cast %243 : vector<1x1x32xf32> to vector<1x32xf32>
    %245 = vector.broadcast %244 : vector<1x32xf32> to vector<16x32xf32>
    %246 = arith.addf %242, %245 : vector<16x32xf32>
    %247 = arith.addf %131, %246 : vector<16x32xf32>
    %c0_79 = arith.constant 0 : index
    %c0_80 = arith.constant 0 : index
    %c0_81 = arith.constant 0 : index
    %248 = vector.load %arg19[%c0_79, %c0_80, %c0_81] : memref<16x1x32xf32, #tpu.memory_space<vmem>>, vector<1x1x32xf32>
    %249 = vector.shape_cast %248 : vector<1x1x32xf32> to vector<1x32xf32>
    %c0_82 = arith.constant 0 : index
    %c0_83 = arith.constant 0 : index
    %c0_84 = arith.constant 0 : index
    %250 = vector.load %arg20[%c0_82, %c0_83, %c0_84] : memref<16x1x32xf32, #tpu.memory_space<vmem>>, vector<1x1x32xf32>
    %251 = vector.shape_cast %250 : vector<1x1x32xf32> to vector<1x32xf32>
    %cst_85 = arith.constant dense<0.000000e+00> : vector<16xf32>
    %252 = vector.multi_reduction <add>, %247, %cst_85 [1] : vector<16x32xf32> to vector<16xf32>
    %253 = vector.shape_cast %252 : vector<16xf32> to vector<16x1xf32>
    %cst_86 = arith.constant 3.200000e+01 : f32
    %254 = vector.broadcast %cst_86 : f32 to vector<16x1xf32>
    %255 = arith.divf %253, %254 : vector<16x1xf32>
    %256 = vector.broadcast %255 : vector<16x1xf32> to vector<16x32xf32>
    %257 = arith.subf %247, %256 : vector<16x32xf32>
    %258 = arith.mulf %257, %257 : vector<16x32xf32>
    %cst_87 = arith.constant dense<0.000000e+00> : vector<16xf32>
    %259 = vector.multi_reduction <add>, %258, %cst_87 [1] : vector<16x32xf32> to vector<16xf32>
    %260 = vector.shape_cast %259 : vector<16xf32> to vector<16x1xf32>
    %cst_88 = arith.constant 3.200000e+01 : f32
    %261 = vector.broadcast %cst_88 : f32 to vector<16x1xf32>
    %262 = arith.divf %260, %261 : vector<16x1xf32>
    %263 = vector.broadcast %255 : vector<16x1xf32> to vector<16x32xf32>
    %264 = arith.subf %247, %263 : vector<16x32xf32>
    %cst_89 = arith.constant 9.99999974E-6 : f32
    %265 = vector.broadcast %cst_89 : f32 to vector<16x1xf32>
    %266 = arith.addf %262, %265 : vector<16x1xf32>
    %267 = math.rsqrt %266 : vector<16x1xf32>
    %268 = vector.broadcast %267 : vector<16x1xf32> to vector<16x32xf32>
    %269 = arith.mulf %264, %268 : vector<16x32xf32>
    %270 = vector.broadcast %249 : vector<1x32xf32> to vector<16x32xf32>
    %271 = arith.mulf %269, %270 : vector<16x32xf32>
    %272 = vector.broadcast %251 : vector<1x32xf32> to vector<16x32xf32>
    %273 = arith.addf %271, %272 : vector<16x32xf32>
    %c1 = arith.constant 1 : index
    %c0_90 = arith.constant 0 : index
    %c0_91 = arith.constant 0 : index
    %274 = vector.load %arg11[%c1, %c0_90, %c0_91] : memref<8x96x32xf32, #tpu.memory_space<vmem>>, vector<1x96x32xf32>
    %275 = vector.shape_cast %274 : vector<1x96x32xf32> to vector<96x32xf32>
    %c1_92 = arith.constant 1 : index
    %c0_93 = arith.constant 0 : index
    %c0_94 = arith.constant 0 : index
    %276 = vector.load %arg12[%c1_92, %c0_93, %c0_94] : memref<8x1x96xf32, #tpu.memory_space<vmem>>, vector<1x1x96xf32>
    %277 = vector.shape_cast %276 : vector<1x1x96xf32> to vector<1x96xf32>
    %cst_95 = arith.constant dense<0.000000e+00> : vector<8x96xf32>
    %278 = tpu.matmul %140, %275, %cst_95 {dimension_numbers = #tpu.dot_dimension_numbers<[1], [1], [0], [0], [0, 0, 1, 0], [], []>} : vector<8x32xf32>, vector<96x32xf32>, vector<8x96xf32> -> vector<8x96xf32>
    %279 = vector.broadcast %277 : vector<1x96xf32> to vector<8x96xf32>
    %280 = arith.addf %278, %279 : vector<8x96xf32>
    %281 = vector.extract_strided_slice %280 {offsets = [0, 0], sizes = [8, 32], strides = [1, 1]} : vector<8x96xf32> to vector<8x32xf32>
    %282 = vector.extract_strided_slice %280 {offsets = [0, 32], sizes = [8, 32], strides = [1, 1]} : vector<8x96xf32> to vector<8x32xf32>
    %283 = vector.extract_strided_slice %280 {offsets = [0, 64], sizes = [8, 32], strides = [1, 1]} : vector<8x96xf32> to vector<8x32xf32>
    %284 = tpu.concatenate %282, %282, %282, %282 in 0 : vector<8x32xf32>, vector<8x32xf32>, vector<8x32xf32>, vector<8x32xf32> -> vector<32x32xf32>
    %285 = arith.mulf %284, %88 : vector<32x32xf32>
    %286 = tpu.concatenate %283, %283, %283, %283 in 0 : vector<8x32xf32>, vector<8x32xf32>, vector<8x32xf32>, vector<8x32xf32> -> vector<32x32xf32>
    %287 = arith.mulf %286, %88 : vector<32x32xf32>
    %cst_96 = arith.constant dense<0.000000e+00> : vector<8x32xf32>
    %288 = tpu.matmul %281, %285, %cst_96 {dimension_numbers = #tpu.dot_dimension_numbers<[1], [1], [0], [0], [0, 0, 1, 0], [], []>} : vector<8x32xf32>, vector<32x32xf32>, vector<8x32xf32> -> vector<8x32xf32>
    %289 = vector.broadcast %122 : vector<1x32xf32> to vector<8x32xf32>
    %290 = arith.addf %288, %289 : vector<8x32xf32>
    %cst_97 = arith.constant -1.000000e+30 : f32
    %291 = vector.shape_cast %94 : vector<1x32xi1> to vector<1x32xi1>
    %292 = vector.broadcast %291 : vector<1x32xi1> to vector<8x32xi1>
    %293 = vector.broadcast %cst_97 : f32 to vector<8x32xf32>
    %294 = arith.select %292, %290, %293 : vector<8x32xi1>, vector<8x32xf32>
    %cst_98 = arith.constant dense<0xFF800000> : vector<8xf32>
    %295 = vector.multi_reduction <maximumf>, %294, %cst_98 [1] : vector<8x32xf32> to vector<8xf32>
    %296 = vector.shape_cast %295 : vector<8xf32> to vector<8x1xf32>
    %cst_99 = arith.constant -1.000000e+30 : f32
    %297 = vector.shape_cast %99 : vector<1x32xi1> to vector<1x32xi1>
    %298 = vector.broadcast %297 : vector<1x32xi1> to vector<8x32xi1>
    %299 = vector.broadcast %cst_99 : f32 to vector<8x32xf32>
    %300 = arith.select %298, %290, %299 : vector<8x32xi1>, vector<8x32xf32>
    %cst_100 = arith.constant dense<0xFF800000> : vector<8xf32>
    %301 = vector.multi_reduction <maximumf>, %300, %cst_100 [1] : vector<8x32xf32> to vector<8xf32>
    %302 = vector.shape_cast %301 : vector<8xf32> to vector<8x1xf32>
    %cst_101 = arith.constant -1.000000e+30 : f32
    %303 = vector.shape_cast %104 : vector<1x32xi1> to vector<1x32xi1>
    %304 = vector.broadcast %303 : vector<1x32xi1> to vector<8x32xi1>
    %305 = vector.broadcast %cst_101 : f32 to vector<8x32xf32>
    %306 = arith.select %304, %290, %305 : vector<8x32xi1>, vector<8x32xf32>
    %cst_102 = arith.constant dense<0xFF800000> : vector<8xf32>
    %307 = vector.multi_reduction <maximumf>, %306, %cst_102 [1] : vector<8x32xf32> to vector<8xf32>
    %308 = vector.shape_cast %307 : vector<8xf32> to vector<8x1xf32>
    %cst_103 = arith.constant -1.000000e+30 : f32
    %309 = vector.shape_cast %109 : vector<1x32xi1> to vector<1x32xi1>
    %310 = vector.broadcast %309 : vector<1x32xi1> to vector<8x32xi1>
    %311 = vector.broadcast %cst_103 : f32 to vector<8x32xf32>
    %312 = arith.select %310, %290, %311 : vector<8x32xi1>, vector<8x32xf32>
    %cst_104 = arith.constant dense<0xFF800000> : vector<8xf32>
    %313 = vector.multi_reduction <maximumf>, %312, %cst_104 [1] : vector<8x32xf32> to vector<8xf32>
    %314 = vector.shape_cast %313 : vector<8xf32> to vector<8x1xf32>
    %315 = vector.broadcast %296 : vector<8x1xf32> to vector<8x32xf32>
    %316 = vector.broadcast %111 : vector<1x32xf32> to vector<8x32xf32>
    %317 = arith.mulf %315, %316 : vector<8x32xf32>
    %cst_105 = arith.constant 0.000000e+00 : f32
    %318 = vector.broadcast %cst_105 : f32 to vector<8x32xf32>
    %319 = arith.addf %318, %317 : vector<8x32xf32>
    %320 = vector.broadcast %302 : vector<8x1xf32> to vector<8x32xf32>
    %321 = vector.broadcast %113 : vector<1x32xf32> to vector<8x32xf32>
    %322 = arith.mulf %320, %321 : vector<8x32xf32>
    %323 = arith.addf %319, %322 : vector<8x32xf32>
    %324 = vector.broadcast %308 : vector<8x1xf32> to vector<8x32xf32>
    %325 = vector.broadcast %115 : vector<1x32xf32> to vector<8x32xf32>
    %326 = arith.mulf %324, %325 : vector<8x32xf32>
    %327 = arith.addf %323, %326 : vector<8x32xf32>
    %328 = vector.broadcast %314 : vector<8x1xf32> to vector<8x32xf32>
    %329 = vector.broadcast %117 : vector<1x32xf32> to vector<8x32xf32>
    %330 = arith.mulf %328, %329 : vector<8x32xf32>
    %331 = arith.addf %327, %330 : vector<8x32xf32>
    %332 = arith.subf %290, %331 : vector<8x32xf32>
    %333 = math.exp %332 : vector<8x32xf32>
    %334 = vector.broadcast %111 : vector<1x32xf32> to vector<8x32xf32>
    %335 = arith.mulf %333, %334 : vector<8x32xf32>
    %cst_106 = arith.constant dense<0.000000e+00> : vector<8xf32>
    %336 = vector.multi_reduction <add>, %335, %cst_106 [1] : vector<8x32xf32> to vector<8xf32>
    %337 = vector.shape_cast %336 : vector<8xf32> to vector<8x1xf32>
    %338 = tpu.reciprocal %337 {approx = true} : vector<8x1xf32> -> vector<8x1xf32>
    %339 = vector.broadcast %113 : vector<1x32xf32> to vector<8x32xf32>
    %340 = arith.mulf %333, %339 : vector<8x32xf32>
    %cst_107 = arith.constant dense<0.000000e+00> : vector<8xf32>
    %341 = vector.multi_reduction <add>, %340, %cst_107 [1] : vector<8x32xf32> to vector<8xf32>
    %342 = vector.shape_cast %341 : vector<8xf32> to vector<8x1xf32>
    %343 = tpu.reciprocal %342 {approx = true} : vector<8x1xf32> -> vector<8x1xf32>
    %344 = vector.broadcast %115 : vector<1x32xf32> to vector<8x32xf32>
    %345 = arith.mulf %333, %344 : vector<8x32xf32>
    %cst_108 = arith.constant dense<0.000000e+00> : vector<8xf32>
    %346 = vector.multi_reduction <add>, %345, %cst_108 [1] : vector<8x32xf32> to vector<8xf32>
    %347 = vector.shape_cast %346 : vector<8xf32> to vector<8x1xf32>
    %348 = tpu.reciprocal %347 {approx = true} : vector<8x1xf32> -> vector<8x1xf32>
    %349 = vector.broadcast %117 : vector<1x32xf32> to vector<8x32xf32>
    %350 = arith.mulf %333, %349 : vector<8x32xf32>
    %cst_109 = arith.constant dense<0.000000e+00> : vector<8xf32>
    %351 = vector.multi_reduction <add>, %350, %cst_109 [1] : vector<8x32xf32> to vector<8xf32>
    %352 = vector.shape_cast %351 : vector<8xf32> to vector<8x1xf32>
    %353 = tpu.reciprocal %352 {approx = true} : vector<8x1xf32> -> vector<8x1xf32>
    %354 = vector.broadcast %338 : vector<8x1xf32> to vector<8x32xf32>
    %355 = vector.broadcast %111 : vector<1x32xf32> to vector<8x32xf32>
    %356 = arith.mulf %354, %355 : vector<8x32xf32>
    %cst_110 = arith.constant 0.000000e+00 : f32
    %357 = vector.broadcast %cst_110 : f32 to vector<8x32xf32>
    %358 = arith.addf %357, %356 : vector<8x32xf32>
    %359 = vector.broadcast %343 : vector<8x1xf32> to vector<8x32xf32>
    %360 = vector.broadcast %113 : vector<1x32xf32> to vector<8x32xf32>
    %361 = arith.mulf %359, %360 : vector<8x32xf32>
    %362 = arith.addf %358, %361 : vector<8x32xf32>
    %363 = vector.broadcast %348 : vector<8x1xf32> to vector<8x32xf32>
    %364 = vector.broadcast %115 : vector<1x32xf32> to vector<8x32xf32>
    %365 = arith.mulf %363, %364 : vector<8x32xf32>
    %366 = arith.addf %362, %365 : vector<8x32xf32>
    %367 = vector.broadcast %353 : vector<8x1xf32> to vector<8x32xf32>
    %368 = vector.broadcast %117 : vector<1x32xf32> to vector<8x32xf32>
    %369 = arith.mulf %367, %368 : vector<8x32xf32>
    %370 = arith.addf %366, %369 : vector<8x32xf32>
    %371 = arith.mulf %333, %370 : vector<8x32xf32>
    %cst_111 = arith.constant dense<0.000000e+00> : vector<8x32xf32>
    %372 = tpu.matmul %371, %287, %cst_111 {dimension_numbers = #tpu.dot_dimension_numbers<[1], [0], [0], [1], [0, 0, 1, 1], [], []>} : vector<8x32xf32>, vector<32x32xf32>, vector<8x32xf32> -> vector<8x32xf32>
    %c1_112 = arith.constant 1 : index
    %c0_113 = arith.constant 0 : index
    %c0_114 = arith.constant 0 : index
    %373 = vector.load %arg13[%c1_112, %c0_113, %c0_114] : memref<8x32x32xf32, #tpu.memory_space<vmem>>, vector<1x32x32xf32>
    %374 = vector.shape_cast %373 : vector<1x32x32xf32> to vector<32x32xf32>
    %cst_115 = arith.constant dense<0.000000e+00> : vector<8x32xf32>
    %375 = tpu.matmul %372, %374, %cst_115 {dimension_numbers = #tpu.dot_dimension_numbers<[1], [1], [0], [0], [0, 0, 1, 0], [], []>} : vector<8x32xf32>, vector<32x32xf32>, vector<8x32xf32> -> vector<8x32xf32>
    %c1_116 = arith.constant 1 : index
    %c0_117 = arith.constant 0 : index
    %c0_118 = arith.constant 0 : index
    %376 = vector.load %arg14[%c1_116, %c0_117, %c0_118] : memref<8x1x32xf32, #tpu.memory_space<vmem>>, vector<1x1x32xf32>
    %377 = vector.shape_cast %376 : vector<1x1x32xf32> to vector<1x32xf32>
    %378 = vector.broadcast %377 : vector<1x32xf32> to vector<8x32xf32>
    %379 = arith.addf %375, %378 : vector<8x32xf32>
    %380 = arith.addf %140, %379 : vector<8x32xf32>
    %c1_119 = arith.constant 1 : index
    %c0_120 = arith.constant 0 : index
    %c0_121 = arith.constant 0 : index
    %381 = vector.load %arg19[%c1_119, %c0_120, %c0_121] : memref<16x1x32xf32, #tpu.memory_space<vmem>>, vector<1x1x32xf32>
    %382 = vector.shape_cast %381 : vector<1x1x32xf32> to vector<1x32xf32>
    %c1_122 = arith.constant 1 : index
    %c0_123 = arith.constant 0 : index
    %c0_124 = arith.constant 0 : index
    %383 = vector.load %arg20[%c1_122, %c0_123, %c0_124] : memref<16x1x32xf32, #tpu.memory_space<vmem>>, vector<1x1x32xf32>
    %384 = vector.shape_cast %383 : vector<1x1x32xf32> to vector<1x32xf32>
    %cst_125 = arith.constant dense<0.000000e+00> : vector<8xf32>
    %385 = vector.multi_reduction <add>, %380, %cst_125 [1] : vector<8x32xf32> to vector<8xf32>
    %386 = vector.shape_cast %385 : vector<8xf32> to vector<8x1xf32>
    %cst_126 = arith.constant 3.200000e+01 : f32
    %387 = vector.broadcast %cst_126 : f32 to vector<8x1xf32>
    %388 = arith.divf %386, %387 : vector<8x1xf32>
    %389 = vector.broadcast %388 : vector<8x1xf32> to vector<8x32xf32>
    %390 = arith.subf %380, %389 : vector<8x32xf32>
    %391 = arith.mulf %390, %390 : vector<8x32xf32>
    %cst_127 = arith.constant dense<0.000000e+00> : vector<8xf32>
    %392 = vector.multi_reduction <add>, %391, %cst_127 [1] : vector<8x32xf32> to vector<8xf32>
    %393 = vector.shape_cast %392 : vector<8xf32> to vector<8x1xf32>
    %cst_128 = arith.constant 3.200000e+01 : f32
    %394 = vector.broadcast %cst_128 : f32 to vector<8x1xf32>
    %395 = arith.divf %393, %394 : vector<8x1xf32>
    %396 = vector.broadcast %388 : vector<8x1xf32> to vector<8x32xf32>
    %397 = arith.subf %380, %396 : vector<8x32xf32>
    %cst_129 = arith.constant 9.99999974E-6 : f32
    %398 = vector.broadcast %cst_129 : f32 to vector<8x1xf32>
    %399 = arith.addf %395, %398 : vector<8x1xf32>
    %400 = math.rsqrt %399 : vector<8x1xf32>
    %401 = vector.broadcast %400 : vector<8x1xf32> to vector<8x32xf32>
    %402 = arith.mulf %397, %401 : vector<8x32xf32>
    %403 = vector.broadcast %382 : vector<1x32xf32> to vector<8x32xf32>
    %404 = arith.mulf %402, %403 : vector<8x32xf32>
    %405 = vector.broadcast %384 : vector<1x32xf32> to vector<8x32xf32>
    %406 = arith.addf %404, %405 : vector<8x32xf32>
    %c0_130 = arith.constant 0 : index
    %c0_131 = arith.constant 0 : index
    %c0_132 = arith.constant 0 : index
    %407 = vector.load %arg15[%c0_130, %c0_131, %c0_132] : memref<8x64x32xf32, #tpu.memory_space<vmem>>, vector<1x64x32xf32>
    %408 = vector.shape_cast %407 : vector<1x64x32xf32> to vector<64x32xf32>
    %cst_133 = arith.constant dense<0.000000e+00> : vector<16x64xf32>
    %409 = tpu.matmul %273, %408, %cst_133 {dimension_numbers = #tpu.dot_dimension_numbers<[1], [1], [0], [0], [0, 0, 1, 0], [], []>} : vector<16x32xf32>, vector<64x32xf32>, vector<16x64xf32> -> vector<16x64xf32>
    %c0_134 = arith.constant 0 : index
    %c0_135 = arith.constant 0 : index
    %c0_136 = arith.constant 0 : index
    %410 = vector.load %arg16[%c0_134, %c0_135, %c0_136] : memref<8x1x64xf32, #tpu.memory_space<vmem>>, vector<1x1x64xf32>
    %411 = vector.shape_cast %410 : vector<1x1x64xf32> to vector<1x64xf32>
    %412 = vector.broadcast %411 : vector<1x64xf32> to vector<16x64xf32>
    %413 = arith.addf %409, %412 : vector<16x64xf32>
    %cst_137 = arith.constant 0.000000e+00 : f32
    %414 = vector.broadcast %cst_137 : f32 to vector<16x64xf32>
    %415 = arith.maximumf %413, %414 : vector<16x64xf32>
    %c0_138 = arith.constant 0 : index
    %c0_139 = arith.constant 0 : index
    %c0_140 = arith.constant 0 : index
    %416 = vector.load %arg17[%c0_138, %c0_139, %c0_140] : memref<8x32x64xf32, #tpu.memory_space<vmem>>, vector<1x32x64xf32>
    %417 = vector.shape_cast %416 : vector<1x32x64xf32> to vector<32x64xf32>
    %cst_141 = arith.constant dense<0.000000e+00> : vector<16x32xf32>
    %418 = tpu.matmul %415, %417, %cst_141 {dimension_numbers = #tpu.dot_dimension_numbers<[1], [1], [0], [0], [0, 0, 1, 0], [], []>} : vector<16x64xf32>, vector<32x64xf32>, vector<16x32xf32> -> vector<16x32xf32>
    %c0_142 = arith.constant 0 : index
    %c0_143 = arith.constant 0 : index
    %c0_144 = arith.constant 0 : index
    %419 = vector.load %arg18[%c0_142, %c0_143, %c0_144] : memref<8x1x32xf32, #tpu.memory_space<vmem>>, vector<1x1x32xf32>
    %420 = vector.shape_cast %419 : vector<1x1x32xf32> to vector<1x32xf32>
    %421 = vector.broadcast %420 : vector<1x32xf32> to vector<16x32xf32>
    %422 = arith.addf %418, %421 : vector<16x32xf32>
    %423 = arith.addf %273, %422 : vector<16x32xf32>
    %c2 = arith.constant 2 : index
    %c0_145 = arith.constant 0 : index
    %c0_146 = arith.constant 0 : index
    %424 = vector.load %arg19[%c2, %c0_145, %c0_146] : memref<16x1x32xf32, #tpu.memory_space<vmem>>, vector<1x1x32xf32>
    %425 = vector.shape_cast %424 : vector<1x1x32xf32> to vector<1x32xf32>
    %c2_147 = arith.constant 2 : index
    %c0_148 = arith.constant 0 : index
    %c0_149 = arith.constant 0 : index
    %426 = vector.load %arg20[%c2_147, %c0_148, %c0_149] : memref<16x1x32xf32, #tpu.memory_space<vmem>>, vector<1x1x32xf32>
    %427 = vector.shape_cast %426 : vector<1x1x32xf32> to vector<1x32xf32>
    %cst_150 = arith.constant dense<0.000000e+00> : vector<16xf32>
    %428 = vector.multi_reduction <add>, %423, %cst_150 [1] : vector<16x32xf32> to vector<16xf32>
    %429 = vector.shape_cast %428 : vector<16xf32> to vector<16x1xf32>
    %cst_151 = arith.constant 3.200000e+01 : f32
    %430 = vector.broadcast %cst_151 : f32 to vector<16x1xf32>
    %431 = arith.divf %429, %430 : vector<16x1xf32>
    %432 = vector.broadcast %431 : vector<16x1xf32> to vector<16x32xf32>
    %433 = arith.subf %423, %432 : vector<16x32xf32>
    %434 = arith.mulf %433, %433 : vector<16x32xf32>
    %cst_152 = arith.constant dense<0.000000e+00> : vector<16xf32>
    %435 = vector.multi_reduction <add>, %434, %cst_152 [1] : vector<16x32xf32> to vector<16xf32>
    %436 = vector.shape_cast %435 : vector<16xf32> to vector<16x1xf32>
    %cst_153 = arith.constant 3.200000e+01 : f32
    %437 = vector.broadcast %cst_153 : f32 to vector<16x1xf32>
    %438 = arith.divf %436, %437 : vector<16x1xf32>
    %439 = vector.broadcast %431 : vector<16x1xf32> to vector<16x32xf32>
    %440 = arith.subf %423, %439 : vector<16x32xf32>
    %cst_154 = arith.constant 9.99999974E-6 : f32
    %441 = vector.broadcast %cst_154 : f32 to vector<16x1xf32>
    %442 = arith.addf %438, %441 : vector<16x1xf32>
    %443 = math.rsqrt %442 : vector<16x1xf32>
    %444 = vector.broadcast %443 : vector<16x1xf32> to vector<16x32xf32>
    %445 = arith.mulf %440, %444 : vector<16x32xf32>
    %446 = vector.broadcast %425 : vector<1x32xf32> to vector<16x32xf32>
    %447 = arith.mulf %445, %446 : vector<16x32xf32>
    %448 = vector.broadcast %427 : vector<1x32xf32> to vector<16x32xf32>
    %449 = arith.addf %447, %448 : vector<16x32xf32>
    %c1_155 = arith.constant 1 : index
    %c0_156 = arith.constant 0 : index
    %c0_157 = arith.constant 0 : index
    %450 = vector.load %arg15[%c1_155, %c0_156, %c0_157] : memref<8x64x32xf32, #tpu.memory_space<vmem>>, vector<1x64x32xf32>
    %451 = vector.shape_cast %450 : vector<1x64x32xf32> to vector<64x32xf32>
    %cst_158 = arith.constant dense<0.000000e+00> : vector<8x64xf32>
    %452 = tpu.matmul %406, %451, %cst_158 {dimension_numbers = #tpu.dot_dimension_numbers<[1], [1], [0], [0], [0, 0, 1, 0], [], []>} : vector<8x32xf32>, vector<64x32xf32>, vector<8x64xf32> -> vector<8x64xf32>
    %c1_159 = arith.constant 1 : index
    %c0_160 = arith.constant 0 : index
    %c0_161 = arith.constant 0 : index
    %453 = vector.load %arg16[%c1_159, %c0_160, %c0_161] : memref<8x1x64xf32, #tpu.memory_space<vmem>>, vector<1x1x64xf32>
    %454 = vector.shape_cast %453 : vector<1x1x64xf32> to vector<1x64xf32>
    %455 = vector.broadcast %454 : vector<1x64xf32> to vector<8x64xf32>
    %456 = arith.addf %452, %455 : vector<8x64xf32>
    %cst_162 = arith.constant 0.000000e+00 : f32
    %457 = vector.broadcast %cst_162 : f32 to vector<8x64xf32>
    %458 = arith.maximumf %456, %457 : vector<8x64xf32>
    %c1_163 = arith.constant 1 : index
    %c0_164 = arith.constant 0 : index
    %c0_165 = arith.constant 0 : index
    %459 = vector.load %arg17[%c1_163, %c0_164, %c0_165] : memref<8x32x64xf32, #tpu.memory_space<vmem>>, vector<1x32x64xf32>
    %460 = vector.shape_cast %459 : vector<1x32x64xf32> to vector<32x64xf32>
    %cst_166 = arith.constant dense<0.000000e+00> : vector<8x32xf32>
    %461 = tpu.matmul %458, %460, %cst_166 {dimension_numbers = #tpu.dot_dimension_numbers<[1], [1], [0], [0], [0, 0, 1, 0], [], []>} : vector<8x64xf32>, vector<32x64xf32>, vector<8x32xf32> -> vector<8x32xf32>
    %c1_167 = arith.constant 1 : index
    %c0_168 = arith.constant 0 : index
    %c0_169 = arith.constant 0 : index
    %462 = vector.load %arg18[%c1_167, %c0_168, %c0_169] : memref<8x1x32xf32, #tpu.memory_space<vmem>>, vector<1x1x32xf32>
    %463 = vector.shape_cast %462 : vector<1x1x32xf32> to vector<1x32xf32>
    %464 = vector.broadcast %463 : vector<1x32xf32> to vector<8x32xf32>
    %465 = arith.addf %461, %464 : vector<8x32xf32>
    %466 = arith.addf %406, %465 : vector<8x32xf32>
    %c3 = arith.constant 3 : index
    %c0_170 = arith.constant 0 : index
    %c0_171 = arith.constant 0 : index
    %467 = vector.load %arg19[%c3, %c0_170, %c0_171] : memref<16x1x32xf32, #tpu.memory_space<vmem>>, vector<1x1x32xf32>
    %468 = vector.shape_cast %467 : vector<1x1x32xf32> to vector<1x32xf32>
    %c3_172 = arith.constant 3 : index
    %c0_173 = arith.constant 0 : index
    %c0_174 = arith.constant 0 : index
    %469 = vector.load %arg20[%c3_172, %c0_173, %c0_174] : memref<16x1x32xf32, #tpu.memory_space<vmem>>, vector<1x1x32xf32>
    %470 = vector.shape_cast %469 : vector<1x1x32xf32> to vector<1x32xf32>
    %cst_175 = arith.constant dense<0.000000e+00> : vector<8xf32>
    %471 = vector.multi_reduction <add>, %466, %cst_175 [1] : vector<8x32xf32> to vector<8xf32>
    %472 = vector.shape_cast %471 : vector<8xf32> to vector<8x1xf32>
    %cst_176 = arith.constant 3.200000e+01 : f32
    %473 = vector.broadcast %cst_176 : f32 to vector<8x1xf32>
    %474 = arith.divf %472, %473 : vector<8x1xf32>
    %475 = vector.broadcast %474 : vector<8x1xf32> to vector<8x32xf32>
    %476 = arith.subf %466, %475 : vector<8x32xf32>
    %477 = arith.mulf %476, %476 : vector<8x32xf32>
    %cst_177 = arith.constant dense<0.000000e+00> : vector<8xf32>
    %478 = vector.multi_reduction <add>, %477, %cst_177 [1] : vector<8x32xf32> to vector<8xf32>
    %479 = vector.shape_cast %478 : vector<8xf32> to vector<8x1xf32>
    %cst_178 = arith.constant 3.200000e+01 : f32
    %480 = vector.broadcast %cst_178 : f32 to vector<8x1xf32>
    %481 = arith.divf %479, %480 : vector<8x1xf32>
    %482 = vector.broadcast %474 : vector<8x1xf32> to vector<8x32xf32>
    %483 = arith.subf %466, %482 : vector<8x32xf32>
    %cst_179 = arith.constant 9.99999974E-6 : f32
    %484 = vector.broadcast %cst_179 : f32 to vector<8x1xf32>
    %485 = arith.addf %481, %484 : vector<8x1xf32>
    %486 = math.rsqrt %485 : vector<8x1xf32>
    %487 = vector.broadcast %486 : vector<8x1xf32> to vector<8x32xf32>
    %488 = arith.mulf %483, %487 : vector<8x32xf32>
    %489 = vector.broadcast %468 : vector<1x32xf32> to vector<8x32xf32>
    %490 = arith.mulf %488, %489 : vector<8x32xf32>
    %491 = vector.broadcast %470 : vector<1x32xf32> to vector<8x32xf32>
    %492 = arith.addf %490, %491 : vector<8x32xf32>
    %c2_180 = arith.constant 2 : index
    %c0_181 = arith.constant 0 : index
    %c0_182 = arith.constant 0 : index
    %493 = vector.load %arg11[%c2_180, %c0_181, %c0_182] : memref<8x96x32xf32, #tpu.memory_space<vmem>>, vector<1x96x32xf32>
    %494 = vector.shape_cast %493 : vector<1x96x32xf32> to vector<96x32xf32>
    %c2_183 = arith.constant 2 : index
    %c0_184 = arith.constant 0 : index
    %c0_185 = arith.constant 0 : index
    %495 = vector.load %arg12[%c2_183, %c0_184, %c0_185] : memref<8x1x96xf32, #tpu.memory_space<vmem>>, vector<1x1x96xf32>
    %496 = vector.shape_cast %495 : vector<1x1x96xf32> to vector<1x96xf32>
    %497 = vector.extract_strided_slice %494 {offsets = [0, 0], sizes = [32, 32], strides = [1, 1]} : vector<96x32xf32> to vector<32x32xf32>
    %cst_186 = arith.constant dense<0.000000e+00> : vector<16x32xf32>
    %498 = tpu.matmul %449, %497, %cst_186 {dimension_numbers = #tpu.dot_dimension_numbers<[1], [1], [0], [0], [0, 0, 1, 0], [], []>} : vector<16x32xf32>, vector<32x32xf32>, vector<16x32xf32> -> vector<16x32xf32>
    %499 = vector.extract_strided_slice %496 {offsets = [0, 0], sizes = [1, 32], strides = [1, 1]} : vector<1x96xf32> to vector<1x32xf32>
    %500 = vector.broadcast %499 : vector<1x32xf32> to vector<16x32xf32>
    %501 = arith.addf %498, %500 : vector<16x32xf32>
    %502 = vector.extract_strided_slice %494 {offsets = [32, 0], sizes = [64, 32], strides = [1, 1]} : vector<96x32xf32> to vector<64x32xf32>
    %cst_187 = arith.constant dense<0.000000e+00> : vector<8x64xf32>
    %503 = tpu.matmul %492, %502, %cst_187 {dimension_numbers = #tpu.dot_dimension_numbers<[1], [1], [0], [0], [0, 0, 1, 0], [], []>} : vector<8x32xf32>, vector<64x32xf32>, vector<8x64xf32> -> vector<8x64xf32>
    %504 = vector.extract_strided_slice %496 {offsets = [0, 32], sizes = [1, 64], strides = [1, 1]} : vector<1x96xf32> to vector<1x64xf32>
    %505 = vector.broadcast %504 : vector<1x64xf32> to vector<8x64xf32>
    %506 = arith.addf %503, %505 : vector<8x64xf32>
    %507 = vector.extract_strided_slice %506 {offsets = [0, 0], sizes = [8, 32], strides = [1, 1]} : vector<8x64xf32> to vector<8x32xf32>
    %508 = vector.extract_strided_slice %506 {offsets = [0, 32], sizes = [8, 32], strides = [1, 1]} : vector<8x64xf32> to vector<8x32xf32>
    %509 = tpu.concatenate %507, %507, %507, %507 in 0 : vector<8x32xf32>, vector<8x32xf32>, vector<8x32xf32>, vector<8x32xf32> -> vector<32x32xf32>
    %510 = arith.mulf %509, %88 : vector<32x32xf32>
    %511 = tpu.concatenate %508, %508, %508, %508 in 0 : vector<8x32xf32>, vector<8x32xf32>, vector<8x32xf32>, vector<8x32xf32> -> vector<32x32xf32>
    %512 = arith.mulf %511, %88 : vector<32x32xf32>
    %cst_188 = arith.constant dense<0.000000e+00> : vector<16x32xf32>
    %513 = tpu.matmul %501, %510, %cst_188 {dimension_numbers = #tpu.dot_dimension_numbers<[1], [1], [0], [0], [0, 0, 1, 0], [], []>} : vector<16x32xf32>, vector<32x32xf32>, vector<16x32xf32> -> vector<16x32xf32>
    %514 = vector.broadcast %122 : vector<1x32xf32> to vector<16x32xf32>
    %515 = arith.addf %513, %514 : vector<16x32xf32>
    %cst_189 = arith.constant -1.000000e+30 : f32
    %516 = vector.shape_cast %94 : vector<1x32xi1> to vector<1x32xi1>
    %517 = vector.broadcast %516 : vector<1x32xi1> to vector<16x32xi1>
    %518 = vector.broadcast %cst_189 : f32 to vector<16x32xf32>
    %519 = arith.select %517, %515, %518 : vector<16x32xi1>, vector<16x32xf32>
    %cst_190 = arith.constant dense<0xFF800000> : vector<16xf32>
    %520 = vector.multi_reduction <maximumf>, %519, %cst_190 [1] : vector<16x32xf32> to vector<16xf32>
    %521 = vector.shape_cast %520 : vector<16xf32> to vector<16x1xf32>
    %cst_191 = arith.constant -1.000000e+30 : f32
    %522 = vector.shape_cast %99 : vector<1x32xi1> to vector<1x32xi1>
    %523 = vector.broadcast %522 : vector<1x32xi1> to vector<16x32xi1>
    %524 = vector.broadcast %cst_191 : f32 to vector<16x32xf32>
    %525 = arith.select %523, %515, %524 : vector<16x32xi1>, vector<16x32xf32>
    %cst_192 = arith.constant dense<0xFF800000> : vector<16xf32>
    %526 = vector.multi_reduction <maximumf>, %525, %cst_192 [1] : vector<16x32xf32> to vector<16xf32>
    %527 = vector.shape_cast %526 : vector<16xf32> to vector<16x1xf32>
    %cst_193 = arith.constant -1.000000e+30 : f32
    %528 = vector.shape_cast %104 : vector<1x32xi1> to vector<1x32xi1>
    %529 = vector.broadcast %528 : vector<1x32xi1> to vector<16x32xi1>
    %530 = vector.broadcast %cst_193 : f32 to vector<16x32xf32>
    %531 = arith.select %529, %515, %530 : vector<16x32xi1>, vector<16x32xf32>
    %cst_194 = arith.constant dense<0xFF800000> : vector<16xf32>
    %532 = vector.multi_reduction <maximumf>, %531, %cst_194 [1] : vector<16x32xf32> to vector<16xf32>
    %533 = vector.shape_cast %532 : vector<16xf32> to vector<16x1xf32>
    %cst_195 = arith.constant -1.000000e+30 : f32
    %534 = vector.shape_cast %109 : vector<1x32xi1> to vector<1x32xi1>
    %535 = vector.broadcast %534 : vector<1x32xi1> to vector<16x32xi1>
    %536 = vector.broadcast %cst_195 : f32 to vector<16x32xf32>
    %537 = arith.select %535, %515, %536 : vector<16x32xi1>, vector<16x32xf32>
    %cst_196 = arith.constant dense<0xFF800000> : vector<16xf32>
    %538 = vector.multi_reduction <maximumf>, %537, %cst_196 [1] : vector<16x32xf32> to vector<16xf32>
    %539 = vector.shape_cast %538 : vector<16xf32> to vector<16x1xf32>
    %540 = vector.broadcast %521 : vector<16x1xf32> to vector<16x32xf32>
    %541 = vector.broadcast %111 : vector<1x32xf32> to vector<16x32xf32>
    %542 = arith.mulf %540, %541 : vector<16x32xf32>
    %cst_197 = arith.constant 0.000000e+00 : f32
    %543 = vector.broadcast %cst_197 : f32 to vector<16x32xf32>
    %544 = arith.addf %543, %542 : vector<16x32xf32>
    %545 = vector.broadcast %527 : vector<16x1xf32> to vector<16x32xf32>
    %546 = vector.broadcast %113 : vector<1x32xf32> to vector<16x32xf32>
    %547 = arith.mulf %545, %546 : vector<16x32xf32>
    %548 = arith.addf %544, %547 : vector<16x32xf32>
    %549 = vector.broadcast %533 : vector<16x1xf32> to vector<16x32xf32>
    %550 = vector.broadcast %115 : vector<1x32xf32> to vector<16x32xf32>
    %551 = arith.mulf %549, %550 : vector<16x32xf32>
    %552 = arith.addf %548, %551 : vector<16x32xf32>
    %553 = vector.broadcast %539 : vector<16x1xf32> to vector<16x32xf32>
    %554 = vector.broadcast %117 : vector<1x32xf32> to vector<16x32xf32>
    %555 = arith.mulf %553, %554 : vector<16x32xf32>
    %556 = arith.addf %552, %555 : vector<16x32xf32>
    %557 = arith.subf %515, %556 : vector<16x32xf32>
    %558 = math.exp %557 : vector<16x32xf32>
    %559 = vector.broadcast %111 : vector<1x32xf32> to vector<16x32xf32>
    %560 = arith.mulf %558, %559 : vector<16x32xf32>
    %cst_198 = arith.constant dense<0.000000e+00> : vector<16xf32>
    %561 = vector.multi_reduction <add>, %560, %cst_198 [1] : vector<16x32xf32> to vector<16xf32>
    %562 = vector.shape_cast %561 : vector<16xf32> to vector<16x1xf32>
    %563 = tpu.reciprocal %562 {approx = true} : vector<16x1xf32> -> vector<16x1xf32>
    %564 = vector.broadcast %113 : vector<1x32xf32> to vector<16x32xf32>
    %565 = arith.mulf %558, %564 : vector<16x32xf32>
    %cst_199 = arith.constant dense<0.000000e+00> : vector<16xf32>
    %566 = vector.multi_reduction <add>, %565, %cst_199 [1] : vector<16x32xf32> to vector<16xf32>
    %567 = vector.shape_cast %566 : vector<16xf32> to vector<16x1xf32>
    %568 = tpu.reciprocal %567 {approx = true} : vector<16x1xf32> -> vector<16x1xf32>
    %569 = vector.broadcast %115 : vector<1x32xf32> to vector<16x32xf32>
    %570 = arith.mulf %558, %569 : vector<16x32xf32>
    %cst_200 = arith.constant dense<0.000000e+00> : vector<16xf32>
    %571 = vector.multi_reduction <add>, %570, %cst_200 [1] : vector<16x32xf32> to vector<16xf32>
    %572 = vector.shape_cast %571 : vector<16xf32> to vector<16x1xf32>
    %573 = tpu.reciprocal %572 {approx = true} : vector<16x1xf32> -> vector<16x1xf32>
    %574 = vector.broadcast %117 : vector<1x32xf32> to vector<16x32xf32>
    %575 = arith.mulf %558, %574 : vector<16x32xf32>
    %cst_201 = arith.constant dense<0.000000e+00> : vector<16xf32>
    %576 = vector.multi_reduction <add>, %575, %cst_201 [1] : vector<16x32xf32> to vector<16xf32>
    %577 = vector.shape_cast %576 : vector<16xf32> to vector<16x1xf32>
    %578 = tpu.reciprocal %577 {approx = true} : vector<16x1xf32> -> vector<16x1xf32>
    %579 = vector.broadcast %563 : vector<16x1xf32> to vector<16x32xf32>
    %580 = vector.broadcast %111 : vector<1x32xf32> to vector<16x32xf32>
    %581 = arith.mulf %579, %580 : vector<16x32xf32>
    %cst_202 = arith.constant 0.000000e+00 : f32
    %582 = vector.broadcast %cst_202 : f32 to vector<16x32xf32>
    %583 = arith.addf %582, %581 : vector<16x32xf32>
    %584 = vector.broadcast %568 : vector<16x1xf32> to vector<16x32xf32>
    %585 = vector.broadcast %113 : vector<1x32xf32> to vector<16x32xf32>
    %586 = arith.mulf %584, %585 : vector<16x32xf32>
    %587 = arith.addf %583, %586 : vector<16x32xf32>
    %588 = vector.broadcast %573 : vector<16x1xf32> to vector<16x32xf32>
    %589 = vector.broadcast %115 : vector<1x32xf32> to vector<16x32xf32>
    %590 = arith.mulf %588, %589 : vector<16x32xf32>
    %591 = arith.addf %587, %590 : vector<16x32xf32>
    %592 = vector.broadcast %578 : vector<16x1xf32> to vector<16x32xf32>
    %593 = vector.broadcast %117 : vector<1x32xf32> to vector<16x32xf32>
    %594 = arith.mulf %592, %593 : vector<16x32xf32>
    %595 = arith.addf %591, %594 : vector<16x32xf32>
    %596 = arith.mulf %558, %595 : vector<16x32xf32>
    %cst_203 = arith.constant dense<0.000000e+00> : vector<16x32xf32>
    %597 = tpu.matmul %596, %512, %cst_203 {dimension_numbers = #tpu.dot_dimension_numbers<[1], [0], [0], [1], [0, 0, 1, 1], [], []>} : vector<16x32xf32>, vector<32x32xf32>, vector<16x32xf32> -> vector<16x32xf32>
    %c2_204 = arith.constant 2 : index
    %c0_205 = arith.constant 0 : index
    %c0_206 = arith.constant 0 : index
    %598 = vector.load %arg13[%c2_204, %c0_205, %c0_206] : memref<8x32x32xf32, #tpu.memory_space<vmem>>, vector<1x32x32xf32>
    %599 = vector.shape_cast %598 : vector<1x32x32xf32> to vector<32x32xf32>
    %cst_207 = arith.constant dense<0.000000e+00> : vector<16x32xf32>
    %600 = tpu.matmul %597, %599, %cst_207 {dimension_numbers = #tpu.dot_dimension_numbers<[1], [1], [0], [0], [0, 0, 1, 0], [], []>} : vector<16x32xf32>, vector<32x32xf32>, vector<16x32xf32> -> vector<16x32xf32>
    %c2_208 = arith.constant 2 : index
    %c0_209 = arith.constant 0 : index
    %c0_210 = arith.constant 0 : index
    %601 = vector.load %arg14[%c2_208, %c0_209, %c0_210] : memref<8x1x32xf32, #tpu.memory_space<vmem>>, vector<1x1x32xf32>
    %602 = vector.shape_cast %601 : vector<1x1x32xf32> to vector<1x32xf32>
    %603 = vector.broadcast %602 : vector<1x32xf32> to vector<16x32xf32>
    %604 = arith.addf %600, %603 : vector<16x32xf32>
    %605 = arith.addf %449, %604 : vector<16x32xf32>
    %c4 = arith.constant 4 : index
    %c0_211 = arith.constant 0 : index
    %c0_212 = arith.constant 0 : index
    %606 = vector.load %arg19[%c4, %c0_211, %c0_212] : memref<16x1x32xf32, #tpu.memory_space<vmem>>, vector<1x1x32xf32>
    %607 = vector.shape_cast %606 : vector<1x1x32xf32> to vector<1x32xf32>
    %c4_213 = arith.constant 4 : index
    %c0_214 = arith.constant 0 : index
    %c0_215 = arith.constant 0 : index
    %608 = vector.load %arg20[%c4_213, %c0_214, %c0_215] : memref<16x1x32xf32, #tpu.memory_space<vmem>>, vector<1x1x32xf32>
    %609 = vector.shape_cast %608 : vector<1x1x32xf32> to vector<1x32xf32>
    %cst_216 = arith.constant dense<0.000000e+00> : vector<16xf32>
    %610 = vector.multi_reduction <add>, %605, %cst_216 [1] : vector<16x32xf32> to vector<16xf32>
    %611 = vector.shape_cast %610 : vector<16xf32> to vector<16x1xf32>
    %cst_217 = arith.constant 3.200000e+01 : f32
    %612 = vector.broadcast %cst_217 : f32 to vector<16x1xf32>
    %613 = arith.divf %611, %612 : vector<16x1xf32>
    %614 = vector.broadcast %613 : vector<16x1xf32> to vector<16x32xf32>
    %615 = arith.subf %605, %614 : vector<16x32xf32>
    %616 = arith.mulf %615, %615 : vector<16x32xf32>
    %cst_218 = arith.constant dense<0.000000e+00> : vector<16xf32>
    %617 = vector.multi_reduction <add>, %616, %cst_218 [1] : vector<16x32xf32> to vector<16xf32>
    %618 = vector.shape_cast %617 : vector<16xf32> to vector<16x1xf32>
    %cst_219 = arith.constant 3.200000e+01 : f32
    %619 = vector.broadcast %cst_219 : f32 to vector<16x1xf32>
    %620 = arith.divf %618, %619 : vector<16x1xf32>
    %621 = vector.broadcast %613 : vector<16x1xf32> to vector<16x32xf32>
    %622 = arith.subf %605, %621 : vector<16x32xf32>
    %cst_220 = arith.constant 9.99999974E-6 : f32
    %623 = vector.broadcast %cst_220 : f32 to vector<16x1xf32>
    %624 = arith.addf %620, %623 : vector<16x1xf32>
    %625 = math.rsqrt %624 : vector<16x1xf32>
    %626 = vector.broadcast %625 : vector<16x1xf32> to vector<16x32xf32>
    %627 = arith.mulf %622, %626 : vector<16x32xf32>
    %628 = vector.broadcast %607 : vector<1x32xf32> to vector<16x32xf32>
    %629 = arith.mulf %627, %628 : vector<16x32xf32>
    %630 = vector.broadcast %609 : vector<1x32xf32> to vector<16x32xf32>
    %631 = arith.addf %629, %630 : vector<16x32xf32>
    %c3_221 = arith.constant 3 : index
    %c0_222 = arith.constant 0 : index
    %c0_223 = arith.constant 0 : index
    %632 = vector.load %arg11[%c3_221, %c0_222, %c0_223] : memref<8x96x32xf32, #tpu.memory_space<vmem>>, vector<1x96x32xf32>
    %633 = vector.shape_cast %632 : vector<1x96x32xf32> to vector<96x32xf32>
    %c3_224 = arith.constant 3 : index
    %c0_225 = arith.constant 0 : index
    %c0_226 = arith.constant 0 : index
    %634 = vector.load %arg12[%c3_224, %c0_225, %c0_226] : memref<8x1x96xf32, #tpu.memory_space<vmem>>, vector<1x1x96xf32>
    %635 = vector.shape_cast %634 : vector<1x1x96xf32> to vector<1x96xf32>
    %636 = vector.extract_strided_slice %633 {offsets = [0, 0], sizes = [32, 32], strides = [1, 1]} : vector<96x32xf32> to vector<32x32xf32>
    %cst_227 = arith.constant dense<0.000000e+00> : vector<8x32xf32>
    %637 = tpu.matmul %492, %636, %cst_227 {dimension_numbers = #tpu.dot_dimension_numbers<[1], [1], [0], [0], [0, 0, 1, 0], [], []>} : vector<8x32xf32>, vector<32x32xf32>, vector<8x32xf32> -> vector<8x32xf32>
    %638 = vector.extract_strided_slice %635 {offsets = [0, 0], sizes = [1, 32], strides = [1, 1]} : vector<1x96xf32> to vector<1x32xf32>
    %639 = vector.broadcast %638 : vector<1x32xf32> to vector<8x32xf32>
    %640 = arith.addf %637, %639 : vector<8x32xf32>
    %641 = vector.extract_strided_slice %633 {offsets = [32, 0], sizes = [64, 32], strides = [1, 1]} : vector<96x32xf32> to vector<64x32xf32>
    %cst_228 = arith.constant dense<0.000000e+00> : vector<16x64xf32>
    %642 = tpu.matmul %449, %641, %cst_228 {dimension_numbers = #tpu.dot_dimension_numbers<[1], [1], [0], [0], [0, 0, 1, 0], [], []>} : vector<16x32xf32>, vector<64x32xf32>, vector<16x64xf32> -> vector<16x64xf32>
    %643 = vector.extract_strided_slice %635 {offsets = [0, 32], sizes = [1, 64], strides = [1, 1]} : vector<1x96xf32> to vector<1x64xf32>
    %644 = vector.broadcast %643 : vector<1x64xf32> to vector<16x64xf32>
    %645 = arith.addf %642, %644 : vector<16x64xf32>
    %646 = vector.extract_strided_slice %645 {offsets = [0, 0], sizes = [16, 32], strides = [1, 1]} : vector<16x64xf32> to vector<16x32xf32>
    %647 = vector.extract_strided_slice %645 {offsets = [0, 32], sizes = [16, 32], strides = [1, 1]} : vector<16x64xf32> to vector<16x32xf32>
    %648 = tpu.concatenate %646, %646, %646, %646 in 0 : vector<16x32xf32>, vector<16x32xf32>, vector<16x32xf32>, vector<16x32xf32> -> vector<64x32xf32>
    %649 = arith.mulf %648, %45 : vector<64x32xf32>
    %650 = tpu.concatenate %647, %647, %647, %647 in 0 : vector<16x32xf32>, vector<16x32xf32>, vector<16x32xf32>, vector<16x32xf32> -> vector<64x32xf32>
    %651 = arith.mulf %650, %45 : vector<64x32xf32>
    %cst_229 = arith.constant dense<0.000000e+00> : vector<8x64xf32>
    %652 = tpu.matmul %640, %649, %cst_229 {dimension_numbers = #tpu.dot_dimension_numbers<[1], [1], [0], [0], [0, 0, 1, 0], [], []>} : vector<8x32xf32>, vector<64x32xf32>, vector<8x64xf32> -> vector<8x64xf32>
    %653 = vector.broadcast %79 : vector<1x64xf32> to vector<8x64xf32>
    %654 = arith.addf %652, %653 : vector<8x64xf32>
    %cst_230 = arith.constant -1.000000e+30 : f32
    %655 = vector.shape_cast %51 : vector<1x64xi1> to vector<1x64xi1>
    %656 = vector.broadcast %655 : vector<1x64xi1> to vector<8x64xi1>
    %657 = vector.broadcast %cst_230 : f32 to vector<8x64xf32>
    %658 = arith.select %656, %654, %657 : vector<8x64xi1>, vector<8x64xf32>
    %cst_231 = arith.constant dense<0xFF800000> : vector<8xf32>
    %659 = vector.multi_reduction <maximumf>, %658, %cst_231 [1] : vector<8x64xf32> to vector<8xf32>
    %660 = vector.shape_cast %659 : vector<8xf32> to vector<8x1xf32>
    %cst_232 = arith.constant -1.000000e+30 : f32
    %661 = vector.shape_cast %56 : vector<1x64xi1> to vector<1x64xi1>
    %662 = vector.broadcast %661 : vector<1x64xi1> to vector<8x64xi1>
    %663 = vector.broadcast %cst_232 : f32 to vector<8x64xf32>
    %664 = arith.select %662, %654, %663 : vector<8x64xi1>, vector<8x64xf32>
    %cst_233 = arith.constant dense<0xFF800000> : vector<8xf32>
    %665 = vector.multi_reduction <maximumf>, %664, %cst_233 [1] : vector<8x64xf32> to vector<8xf32>
    %666 = vector.shape_cast %665 : vector<8xf32> to vector<8x1xf32>
    %cst_234 = arith.constant -1.000000e+30 : f32
    %667 = vector.shape_cast %61 : vector<1x64xi1> to vector<1x64xi1>
    %668 = vector.broadcast %667 : vector<1x64xi1> to vector<8x64xi1>
    %669 = vector.broadcast %cst_234 : f32 to vector<8x64xf32>
    %670 = arith.select %668, %654, %669 : vector<8x64xi1>, vector<8x64xf32>
    %cst_235 = arith.constant dense<0xFF800000> : vector<8xf32>
    %671 = vector.multi_reduction <maximumf>, %670, %cst_235 [1] : vector<8x64xf32> to vector<8xf32>
    %672 = vector.shape_cast %671 : vector<8xf32> to vector<8x1xf32>
    %cst_236 = arith.constant -1.000000e+30 : f32
    %673 = vector.shape_cast %66 : vector<1x64xi1> to vector<1x64xi1>
    %674 = vector.broadcast %673 : vector<1x64xi1> to vector<8x64xi1>
    %675 = vector.broadcast %cst_236 : f32 to vector<8x64xf32>
    %676 = arith.select %674, %654, %675 : vector<8x64xi1>, vector<8x64xf32>
    %cst_237 = arith.constant dense<0xFF800000> : vector<8xf32>
    %677 = vector.multi_reduction <maximumf>, %676, %cst_237 [1] : vector<8x64xf32> to vector<8xf32>
    %678 = vector.shape_cast %677 : vector<8xf32> to vector<8x1xf32>
    %679 = vector.broadcast %660 : vector<8x1xf32> to vector<8x64xf32>
    %680 = vector.broadcast %68 : vector<1x64xf32> to vector<8x64xf32>
    %681 = arith.mulf %679, %680 : vector<8x64xf32>
    %cst_238 = arith.constant 0.000000e+00 : f32
    %682 = vector.broadcast %cst_238 : f32 to vector<8x64xf32>
    %683 = arith.addf %682, %681 : vector<8x64xf32>
    %684 = vector.broadcast %666 : vector<8x1xf32> to vector<8x64xf32>
    %685 = vector.broadcast %70 : vector<1x64xf32> to vector<8x64xf32>
    %686 = arith.mulf %684, %685 : vector<8x64xf32>
    %687 = arith.addf %683, %686 : vector<8x64xf32>
    %688 = vector.broadcast %672 : vector<8x1xf32> to vector<8x64xf32>
    %689 = vector.broadcast %72 : vector<1x64xf32> to vector<8x64xf32>
    %690 = arith.mulf %688, %689 : vector<8x64xf32>
    %691 = arith.addf %687, %690 : vector<8x64xf32>
    %692 = vector.broadcast %678 : vector<8x1xf32> to vector<8x64xf32>
    %693 = vector.broadcast %74 : vector<1x64xf32> to vector<8x64xf32>
    %694 = arith.mulf %692, %693 : vector<8x64xf32>
    %695 = arith.addf %691, %694 : vector<8x64xf32>
    %696 = arith.subf %654, %695 : vector<8x64xf32>
    %697 = math.exp %696 : vector<8x64xf32>
    %698 = vector.broadcast %68 : vector<1x64xf32> to vector<8x64xf32>
    %699 = arith.mulf %697, %698 : vector<8x64xf32>
    %cst_239 = arith.constant dense<0.000000e+00> : vector<8xf32>
    %700 = vector.multi_reduction <add>, %699, %cst_239 [1] : vector<8x64xf32> to vector<8xf32>
    %701 = vector.shape_cast %700 : vector<8xf32> to vector<8x1xf32>
    %702 = tpu.reciprocal %701 {approx = true} : vector<8x1xf32> -> vector<8x1xf32>
    %703 = vector.broadcast %70 : vector<1x64xf32> to vector<8x64xf32>
    %704 = arith.mulf %697, %703 : vector<8x64xf32>
    %cst_240 = arith.constant dense<0.000000e+00> : vector<8xf32>
    %705 = vector.multi_reduction <add>, %704, %cst_240 [1] : vector<8x64xf32> to vector<8xf32>
    %706 = vector.shape_cast %705 : vector<8xf32> to vector<8x1xf32>
    %707 = tpu.reciprocal %706 {approx = true} : vector<8x1xf32> -> vector<8x1xf32>
    %708 = vector.broadcast %72 : vector<1x64xf32> to vector<8x64xf32>
    %709 = arith.mulf %697, %708 : vector<8x64xf32>
    %cst_241 = arith.constant dense<0.000000e+00> : vector<8xf32>
    %710 = vector.multi_reduction <add>, %709, %cst_241 [1] : vector<8x64xf32> to vector<8xf32>
    %711 = vector.shape_cast %710 : vector<8xf32> to vector<8x1xf32>
    %712 = tpu.reciprocal %711 {approx = true} : vector<8x1xf32> -> vector<8x1xf32>
    %713 = vector.broadcast %74 : vector<1x64xf32> to vector<8x64xf32>
    %714 = arith.mulf %697, %713 : vector<8x64xf32>
    %cst_242 = arith.constant dense<0.000000e+00> : vector<8xf32>
    %715 = vector.multi_reduction <add>, %714, %cst_242 [1] : vector<8x64xf32> to vector<8xf32>
    %716 = vector.shape_cast %715 : vector<8xf32> to vector<8x1xf32>
    %717 = tpu.reciprocal %716 {approx = true} : vector<8x1xf32> -> vector<8x1xf32>
    %718 = vector.broadcast %702 : vector<8x1xf32> to vector<8x64xf32>
    %719 = vector.broadcast %68 : vector<1x64xf32> to vector<8x64xf32>
    %720 = arith.mulf %718, %719 : vector<8x64xf32>
    %cst_243 = arith.constant 0.000000e+00 : f32
    %721 = vector.broadcast %cst_243 : f32 to vector<8x64xf32>
    %722 = arith.addf %721, %720 : vector<8x64xf32>
    %723 = vector.broadcast %707 : vector<8x1xf32> to vector<8x64xf32>
    %724 = vector.broadcast %70 : vector<1x64xf32> to vector<8x64xf32>
    %725 = arith.mulf %723, %724 : vector<8x64xf32>
    %726 = arith.addf %722, %725 : vector<8x64xf32>
    %727 = vector.broadcast %712 : vector<8x1xf32> to vector<8x64xf32>
    %728 = vector.broadcast %72 : vector<1x64xf32> to vector<8x64xf32>
    %729 = arith.mulf %727, %728 : vector<8x64xf32>
    %730 = arith.addf %726, %729 : vector<8x64xf32>
    %731 = vector.broadcast %717 : vector<8x1xf32> to vector<8x64xf32>
    %732 = vector.broadcast %74 : vector<1x64xf32> to vector<8x64xf32>
    %733 = arith.mulf %731, %732 : vector<8x64xf32>
    %734 = arith.addf %730, %733 : vector<8x64xf32>
    %735 = arith.mulf %697, %734 : vector<8x64xf32>
    %cst_244 = arith.constant dense<0.000000e+00> : vector<8x32xf32>
    %736 = tpu.matmul %735, %651, %cst_244 {dimension_numbers = #tpu.dot_dimension_numbers<[1], [0], [0], [1], [0, 0, 1, 1], [], []>} : vector<8x64xf32>, vector<64x32xf32>, vector<8x32xf32> -> vector<8x32xf32>
    %c3_245 = arith.constant 3 : index
    %c0_246 = arith.constant 0 : index
    %c0_247 = arith.constant 0 : index
    %737 = vector.load %arg13[%c3_245, %c0_246, %c0_247] : memref<8x32x32xf32, #tpu.memory_space<vmem>>, vector<1x32x32xf32>
    %738 = vector.shape_cast %737 : vector<1x32x32xf32> to vector<32x32xf32>
    %cst_248 = arith.constant dense<0.000000e+00> : vector<8x32xf32>
    %739 = tpu.matmul %736, %738, %cst_248 {dimension_numbers = #tpu.dot_dimension_numbers<[1], [1], [0], [0], [0, 0, 1, 0], [], []>} : vector<8x32xf32>, vector<32x32xf32>, vector<8x32xf32> -> vector<8x32xf32>
    %c3_249 = arith.constant 3 : index
    %c0_250 = arith.constant 0 : index
    %c0_251 = arith.constant 0 : index
    %740 = vector.load %arg14[%c3_249, %c0_250, %c0_251] : memref<8x1x32xf32, #tpu.memory_space<vmem>>, vector<1x1x32xf32>
    %741 = vector.shape_cast %740 : vector<1x1x32xf32> to vector<1x32xf32>
    %742 = vector.broadcast %741 : vector<1x32xf32> to vector<8x32xf32>
    %743 = arith.addf %739, %742 : vector<8x32xf32>
    %744 = arith.addf %492, %743 : vector<8x32xf32>
    %c5 = arith.constant 5 : index
    %c0_252 = arith.constant 0 : index
    %c0_253 = arith.constant 0 : index
    %745 = vector.load %arg19[%c5, %c0_252, %c0_253] : memref<16x1x32xf32, #tpu.memory_space<vmem>>, vector<1x1x32xf32>
    %746 = vector.shape_cast %745 : vector<1x1x32xf32> to vector<1x32xf32>
    %c5_254 = arith.constant 5 : index
    %c0_255 = arith.constant 0 : index
    %c0_256 = arith.constant 0 : index
    %747 = vector.load %arg20[%c5_254, %c0_255, %c0_256] : memref<16x1x32xf32, #tpu.memory_space<vmem>>, vector<1x1x32xf32>
    %748 = vector.shape_cast %747 : vector<1x1x32xf32> to vector<1x32xf32>
    %cst_257 = arith.constant dense<0.000000e+00> : vector<8xf32>
    %749 = vector.multi_reduction <add>, %744, %cst_257 [1] : vector<8x32xf32> to vector<8xf32>
    %750 = vector.shape_cast %749 : vector<8xf32> to vector<8x1xf32>
    %cst_258 = arith.constant 3.200000e+01 : f32
    %751 = vector.broadcast %cst_258 : f32 to vector<8x1xf32>
    %752 = arith.divf %750, %751 : vector<8x1xf32>
    %753 = vector.broadcast %752 : vector<8x1xf32> to vector<8x32xf32>
    %754 = arith.subf %744, %753 : vector<8x32xf32>
    %755 = arith.mulf %754, %754 : vector<8x32xf32>
    %cst_259 = arith.constant dense<0.000000e+00> : vector<8xf32>
    %756 = vector.multi_reduction <add>, %755, %cst_259 [1] : vector<8x32xf32> to vector<8xf32>
    %757 = vector.shape_cast %756 : vector<8xf32> to vector<8x1xf32>
    %cst_260 = arith.constant 3.200000e+01 : f32
    %758 = vector.broadcast %cst_260 : f32 to vector<8x1xf32>
    %759 = arith.divf %757, %758 : vector<8x1xf32>
    %760 = vector.broadcast %752 : vector<8x1xf32> to vector<8x32xf32>
    %761 = arith.subf %744, %760 : vector<8x32xf32>
    %cst_261 = arith.constant 9.99999974E-6 : f32
    %762 = vector.broadcast %cst_261 : f32 to vector<8x1xf32>
    %763 = arith.addf %759, %762 : vector<8x1xf32>
    %764 = math.rsqrt %763 : vector<8x1xf32>
    %765 = vector.broadcast %764 : vector<8x1xf32> to vector<8x32xf32>
    %766 = arith.mulf %761, %765 : vector<8x32xf32>
    %767 = vector.broadcast %746 : vector<1x32xf32> to vector<8x32xf32>
    %768 = arith.mulf %766, %767 : vector<8x32xf32>
    %769 = vector.broadcast %748 : vector<1x32xf32> to vector<8x32xf32>
    %770 = arith.addf %768, %769 : vector<8x32xf32>
    %c2_262 = arith.constant 2 : index
    %c0_263 = arith.constant 0 : index
    %c0_264 = arith.constant 0 : index
    %771 = vector.load %arg15[%c2_262, %c0_263, %c0_264] : memref<8x64x32xf32, #tpu.memory_space<vmem>>, vector<1x64x32xf32>
    %772 = vector.shape_cast %771 : vector<1x64x32xf32> to vector<64x32xf32>
    %cst_265 = arith.constant dense<0.000000e+00> : vector<16x64xf32>
    %773 = tpu.matmul %631, %772, %cst_265 {dimension_numbers = #tpu.dot_dimension_numbers<[1], [1], [0], [0], [0, 0, 1, 0], [], []>} : vector<16x32xf32>, vector<64x32xf32>, vector<16x64xf32> -> vector<16x64xf32>
    %c2_266 = arith.constant 2 : index
    %c0_267 = arith.constant 0 : index
    %c0_268 = arith.constant 0 : index
    %774 = vector.load %arg16[%c2_266, %c0_267, %c0_268] : memref<8x1x64xf32, #tpu.memory_space<vmem>>, vector<1x1x64xf32>
    %775 = vector.shape_cast %774 : vector<1x1x64xf32> to vector<1x64xf32>
    %776 = vector.broadcast %775 : vector<1x64xf32> to vector<16x64xf32>
    %777 = arith.addf %773, %776 : vector<16x64xf32>
    %cst_269 = arith.constant 0.000000e+00 : f32
    %778 = vector.broadcast %cst_269 : f32 to vector<16x64xf32>
    %779 = arith.maximumf %777, %778 : vector<16x64xf32>
    %c2_270 = arith.constant 2 : index
    %c0_271 = arith.constant 0 : index
    %c0_272 = arith.constant 0 : index
    %780 = vector.load %arg17[%c2_270, %c0_271, %c0_272] : memref<8x32x64xf32, #tpu.memory_space<vmem>>, vector<1x32x64xf32>
    %781 = vector.shape_cast %780 : vector<1x32x64xf32> to vector<32x64xf32>
    %cst_273 = arith.constant dense<0.000000e+00> : vector<16x32xf32>
    %782 = tpu.matmul %779, %781, %cst_273 {dimension_numbers = #tpu.dot_dimension_numbers<[1], [1], [0], [0], [0, 0, 1, 0], [], []>} : vector<16x64xf32>, vector<32x64xf32>, vector<16x32xf32> -> vector<16x32xf32>
    %c2_274 = arith.constant 2 : index
    %c0_275 = arith.constant 0 : index
    %c0_276 = arith.constant 0 : index
    %783 = vector.load %arg18[%c2_274, %c0_275, %c0_276] : memref<8x1x32xf32, #tpu.memory_space<vmem>>, vector<1x1x32xf32>
    %784 = vector.shape_cast %783 : vector<1x1x32xf32> to vector<1x32xf32>
    %785 = vector.broadcast %784 : vector<1x32xf32> to vector<16x32xf32>
    %786 = arith.addf %782, %785 : vector<16x32xf32>
    %787 = arith.addf %631, %786 : vector<16x32xf32>
    %c6 = arith.constant 6 : index
    %c0_277 = arith.constant 0 : index
    %c0_278 = arith.constant 0 : index
    %788 = vector.load %arg19[%c6, %c0_277, %c0_278] : memref<16x1x32xf32, #tpu.memory_space<vmem>>, vector<1x1x32xf32>
    %789 = vector.shape_cast %788 : vector<1x1x32xf32> to vector<1x32xf32>
    %c6_279 = arith.constant 6 : index
    %c0_280 = arith.constant 0 : index
    %c0_281 = arith.constant 0 : index
    %790 = vector.load %arg20[%c6_279, %c0_280, %c0_281] : memref<16x1x32xf32, #tpu.memory_space<vmem>>, vector<1x1x32xf32>
    %791 = vector.shape_cast %790 : vector<1x1x32xf32> to vector<1x32xf32>
    %cst_282 = arith.constant dense<0.000000e+00> : vector<16xf32>
    %792 = vector.multi_reduction <add>, %787, %cst_282 [1] : vector<16x32xf32> to vector<16xf32>
    %793 = vector.shape_cast %792 : vector<16xf32> to vector<16x1xf32>
    %cst_283 = arith.constant 3.200000e+01 : f32
    %794 = vector.broadcast %cst_283 : f32 to vector<16x1xf32>
    %795 = arith.divf %793, %794 : vector<16x1xf32>
    %796 = vector.broadcast %795 : vector<16x1xf32> to vector<16x32xf32>
    %797 = arith.subf %787, %796 : vector<16x32xf32>
    %798 = arith.mulf %797, %797 : vector<16x32xf32>
    %cst_284 = arith.constant dense<0.000000e+00> : vector<16xf32>
    %799 = vector.multi_reduction <add>, %798, %cst_284 [1] : vector<16x32xf32> to vector<16xf32>
    %800 = vector.shape_cast %799 : vector<16xf32> to vector<16x1xf32>
    %cst_285 = arith.constant 3.200000e+01 : f32
    %801 = vector.broadcast %cst_285 : f32 to vector<16x1xf32>
    %802 = arith.divf %800, %801 : vector<16x1xf32>
    %803 = vector.broadcast %795 : vector<16x1xf32> to vector<16x32xf32>
    %804 = arith.subf %787, %803 : vector<16x32xf32>
    %cst_286 = arith.constant 9.99999974E-6 : f32
    %805 = vector.broadcast %cst_286 : f32 to vector<16x1xf32>
    %806 = arith.addf %802, %805 : vector<16x1xf32>
    %807 = math.rsqrt %806 : vector<16x1xf32>
    %808 = vector.broadcast %807 : vector<16x1xf32> to vector<16x32xf32>
    %809 = arith.mulf %804, %808 : vector<16x32xf32>
    %810 = vector.broadcast %789 : vector<1x32xf32> to vector<16x32xf32>
    %811 = arith.mulf %809, %810 : vector<16x32xf32>
    %812 = vector.broadcast %791 : vector<1x32xf32> to vector<16x32xf32>
    %813 = arith.addf %811, %812 : vector<16x32xf32>
    %c3_287 = arith.constant 3 : index
    %c0_288 = arith.constant 0 : index
    %c0_289 = arith.constant 0 : index
    %814 = vector.load %arg15[%c3_287, %c0_288, %c0_289] : memref<8x64x32xf32, #tpu.memory_space<vmem>>, vector<1x64x32xf32>
    %815 = vector.shape_cast %814 : vector<1x64x32xf32> to vector<64x32xf32>
    %cst_290 = arith.constant dense<0.000000e+00> : vector<8x64xf32>
    %816 = tpu.matmul %770, %815, %cst_290 {dimension_numbers = #tpu.dot_dimension_numbers<[1], [1], [0], [0], [0, 0, 1, 0], [], []>} : vector<8x32xf32>, vector<64x32xf32>, vector<8x64xf32> -> vector<8x64xf32>
    %c3_291 = arith.constant 3 : index
    %c0_292 = arith.constant 0 : index
    %c0_293 = arith.constant 0 : index
    %817 = vector.load %arg16[%c3_291, %c0_292, %c0_293] : memref<8x1x64xf32, #tpu.memory_space<vmem>>, vector<1x1x64xf32>
    %818 = vector.shape_cast %817 : vector<1x1x64xf32> to vector<1x64xf32>
    %819 = vector.broadcast %818 : vector<1x64xf32> to vector<8x64xf32>
    %820 = arith.addf %816, %819 : vector<8x64xf32>
    %cst_294 = arith.constant 0.000000e+00 : f32
    %821 = vector.broadcast %cst_294 : f32 to vector<8x64xf32>
    %822 = arith.maximumf %820, %821 : vector<8x64xf32>
    %c3_295 = arith.constant 3 : index
    %c0_296 = arith.constant 0 : index
    %c0_297 = arith.constant 0 : index
    %823 = vector.load %arg17[%c3_295, %c0_296, %c0_297] : memref<8x32x64xf32, #tpu.memory_space<vmem>>, vector<1x32x64xf32>
    %824 = vector.shape_cast %823 : vector<1x32x64xf32> to vector<32x64xf32>
    %cst_298 = arith.constant dense<0.000000e+00> : vector<8x32xf32>
    %825 = tpu.matmul %822, %824, %cst_298 {dimension_numbers = #tpu.dot_dimension_numbers<[1], [1], [0], [0], [0, 0, 1, 0], [], []>} : vector<8x64xf32>, vector<32x64xf32>, vector<8x32xf32> -> vector<8x32xf32>
    %c3_299 = arith.constant 3 : index
    %c0_300 = arith.constant 0 : index
    %c0_301 = arith.constant 0 : index
    %826 = vector.load %arg18[%c3_299, %c0_300, %c0_301] : memref<8x1x32xf32, #tpu.memory_space<vmem>>, vector<1x1x32xf32>
    %827 = vector.shape_cast %826 : vector<1x1x32xf32> to vector<1x32xf32>
    %828 = vector.broadcast %827 : vector<1x32xf32> to vector<8x32xf32>
    %829 = arith.addf %825, %828 : vector<8x32xf32>
    %830 = arith.addf %770, %829 : vector<8x32xf32>
    %c7 = arith.constant 7 : index
    %c0_302 = arith.constant 0 : index
    %c0_303 = arith.constant 0 : index
    %831 = vector.load %arg19[%c7, %c0_302, %c0_303] : memref<16x1x32xf32, #tpu.memory_space<vmem>>, vector<1x1x32xf32>
    %832 = vector.shape_cast %831 : vector<1x1x32xf32> to vector<1x32xf32>
    %c7_304 = arith.constant 7 : index
    %c0_305 = arith.constant 0 : index
    %c0_306 = arith.constant 0 : index
    %833 = vector.load %arg20[%c7_304, %c0_305, %c0_306] : memref<16x1x32xf32, #tpu.memory_space<vmem>>, vector<1x1x32xf32>
    %834 = vector.shape_cast %833 : vector<1x1x32xf32> to vector<1x32xf32>
    %cst_307 = arith.constant dense<0.000000e+00> : vector<8xf32>
    %835 = vector.multi_reduction <add>, %830, %cst_307 [1] : vector<8x32xf32> to vector<8xf32>
    %836 = vector.shape_cast %835 : vector<8xf32> to vector<8x1xf32>
    %cst_308 = arith.constant 3.200000e+01 : f32
    %837 = vector.broadcast %cst_308 : f32 to vector<8x1xf32>
    %838 = arith.divf %836, %837 : vector<8x1xf32>
    %839 = vector.broadcast %838 : vector<8x1xf32> to vector<8x32xf32>
    %840 = arith.subf %830, %839 : vector<8x32xf32>
    %841 = arith.mulf %840, %840 : vector<8x32xf32>
    %cst_309 = arith.constant dense<0.000000e+00> : vector<8xf32>
    %842 = vector.multi_reduction <add>, %841, %cst_309 [1] : vector<8x32xf32> to vector<8xf32>
    %843 = vector.shape_cast %842 : vector<8xf32> to vector<8x1xf32>
    %cst_310 = arith.constant 3.200000e+01 : f32
    %844 = vector.broadcast %cst_310 : f32 to vector<8x1xf32>
    %845 = arith.divf %843, %844 : vector<8x1xf32>
    %846 = vector.broadcast %838 : vector<8x1xf32> to vector<8x32xf32>
    %847 = arith.subf %830, %846 : vector<8x32xf32>
    %cst_311 = arith.constant 9.99999974E-6 : f32
    %848 = vector.broadcast %cst_311 : f32 to vector<8x1xf32>
    %849 = arith.addf %845, %848 : vector<8x1xf32>
    %850 = math.rsqrt %849 : vector<8x1xf32>
    %851 = vector.broadcast %850 : vector<8x1xf32> to vector<8x32xf32>
    %852 = arith.mulf %847, %851 : vector<8x32xf32>
    %853 = vector.broadcast %832 : vector<1x32xf32> to vector<8x32xf32>
    %854 = arith.mulf %852, %853 : vector<8x32xf32>
    %855 = vector.broadcast %834 : vector<1x32xf32> to vector<8x32xf32>
    %856 = arith.addf %854, %855 : vector<8x32xf32>
    %c4_312 = arith.constant 4 : index
    %c0_313 = arith.constant 0 : index
    %c0_314 = arith.constant 0 : index
    %857 = vector.load %arg11[%c4_312, %c0_313, %c0_314] : memref<8x96x32xf32, #tpu.memory_space<vmem>>, vector<1x96x32xf32>
    %858 = vector.shape_cast %857 : vector<1x96x32xf32> to vector<96x32xf32>
    %c4_315 = arith.constant 4 : index
    %c0_316 = arith.constant 0 : index
    %c0_317 = arith.constant 0 : index
    %859 = vector.load %arg12[%c4_315, %c0_316, %c0_317] : memref<8x1x96xf32, #tpu.memory_space<vmem>>, vector<1x1x96xf32>
    %860 = vector.shape_cast %859 : vector<1x1x96xf32> to vector<1x96xf32>
    %cst_318 = arith.constant dense<0.000000e+00> : vector<16x96xf32>
    %861 = tpu.matmul %813, %858, %cst_318 {dimension_numbers = #tpu.dot_dimension_numbers<[1], [1], [0], [0], [0, 0, 1, 0], [], []>} : vector<16x32xf32>, vector<96x32xf32>, vector<16x96xf32> -> vector<16x96xf32>
    %862 = vector.broadcast %860 : vector<1x96xf32> to vector<16x96xf32>
    %863 = arith.addf %861, %862 : vector<16x96xf32>
    %864 = vector.extract_strided_slice %863 {offsets = [0, 0], sizes = [16, 32], strides = [1, 1]} : vector<16x96xf32> to vector<16x32xf32>
    %865 = vector.extract_strided_slice %863 {offsets = [0, 32], sizes = [16, 32], strides = [1, 1]} : vector<16x96xf32> to vector<16x32xf32>
    %866 = vector.extract_strided_slice %863 {offsets = [0, 64], sizes = [16, 32], strides = [1, 1]} : vector<16x96xf32> to vector<16x32xf32>
    %867 = tpu.concatenate %865, %865, %865, %865 in 0 : vector<16x32xf32>, vector<16x32xf32>, vector<16x32xf32>, vector<16x32xf32> -> vector<64x32xf32>
    %868 = arith.mulf %867, %45 : vector<64x32xf32>
    %869 = tpu.concatenate %866, %866, %866, %866 in 0 : vector<16x32xf32>, vector<16x32xf32>, vector<16x32xf32>, vector<16x32xf32> -> vector<64x32xf32>
    %870 = arith.mulf %869, %45 : vector<64x32xf32>
    %cst_319 = arith.constant dense<0.000000e+00> : vector<16x64xf32>
    %871 = tpu.matmul %864, %868, %cst_319 {dimension_numbers = #tpu.dot_dimension_numbers<[1], [1], [0], [0], [0, 0, 1, 0], [], []>} : vector<16x32xf32>, vector<64x32xf32>, vector<16x64xf32> -> vector<16x64xf32>
    %872 = vector.broadcast %79 : vector<1x64xf32> to vector<16x64xf32>
    %873 = arith.addf %871, %872 : vector<16x64xf32>
    %cst_320 = arith.constant -1.000000e+30 : f32
    %874 = vector.shape_cast %51 : vector<1x64xi1> to vector<1x64xi1>
    %875 = vector.broadcast %874 : vector<1x64xi1> to vector<16x64xi1>
    %876 = vector.broadcast %cst_320 : f32 to vector<16x64xf32>
    %877 = arith.select %875, %873, %876 : vector<16x64xi1>, vector<16x64xf32>
    %cst_321 = arith.constant dense<0xFF800000> : vector<16xf32>
    %878 = vector.multi_reduction <maximumf>, %877, %cst_321 [1] : vector<16x64xf32> to vector<16xf32>
    %879 = vector.shape_cast %878 : vector<16xf32> to vector<16x1xf32>
    %cst_322 = arith.constant -1.000000e+30 : f32
    %880 = vector.shape_cast %56 : vector<1x64xi1> to vector<1x64xi1>
    %881 = vector.broadcast %880 : vector<1x64xi1> to vector<16x64xi1>
    %882 = vector.broadcast %cst_322 : f32 to vector<16x64xf32>
    %883 = arith.select %881, %873, %882 : vector<16x64xi1>, vector<16x64xf32>
    %cst_323 = arith.constant dense<0xFF800000> : vector<16xf32>
    %884 = vector.multi_reduction <maximumf>, %883, %cst_323 [1] : vector<16x64xf32> to vector<16xf32>
    %885 = vector.shape_cast %884 : vector<16xf32> to vector<16x1xf32>
    %cst_324 = arith.constant -1.000000e+30 : f32
    %886 = vector.shape_cast %61 : vector<1x64xi1> to vector<1x64xi1>
    %887 = vector.broadcast %886 : vector<1x64xi1> to vector<16x64xi1>
    %888 = vector.broadcast %cst_324 : f32 to vector<16x64xf32>
    %889 = arith.select %887, %873, %888 : vector<16x64xi1>, vector<16x64xf32>
    %cst_325 = arith.constant dense<0xFF800000> : vector<16xf32>
    %890 = vector.multi_reduction <maximumf>, %889, %cst_325 [1] : vector<16x64xf32> to vector<16xf32>
    %891 = vector.shape_cast %890 : vector<16xf32> to vector<16x1xf32>
    %cst_326 = arith.constant -1.000000e+30 : f32
    %892 = vector.shape_cast %66 : vector<1x64xi1> to vector<1x64xi1>
    %893 = vector.broadcast %892 : vector<1x64xi1> to vector<16x64xi1>
    %894 = vector.broadcast %cst_326 : f32 to vector<16x64xf32>
    %895 = arith.select %893, %873, %894 : vector<16x64xi1>, vector<16x64xf32>
    %cst_327 = arith.constant dense<0xFF800000> : vector<16xf32>
    %896 = vector.multi_reduction <maximumf>, %895, %cst_327 [1] : vector<16x64xf32> to vector<16xf32>
    %897 = vector.shape_cast %896 : vector<16xf32> to vector<16x1xf32>
    %898 = vector.broadcast %879 : vector<16x1xf32> to vector<16x64xf32>
    %899 = vector.broadcast %68 : vector<1x64xf32> to vector<16x64xf32>
    %900 = arith.mulf %898, %899 : vector<16x64xf32>
    %cst_328 = arith.constant 0.000000e+00 : f32
    %901 = vector.broadcast %cst_328 : f32 to vector<16x64xf32>
    %902 = arith.addf %901, %900 : vector<16x64xf32>
    %903 = vector.broadcast %885 : vector<16x1xf32> to vector<16x64xf32>
    %904 = vector.broadcast %70 : vector<1x64xf32> to vector<16x64xf32>
    %905 = arith.mulf %903, %904 : vector<16x64xf32>
    %906 = arith.addf %902, %905 : vector<16x64xf32>
    %907 = vector.broadcast %891 : vector<16x1xf32> to vector<16x64xf32>
    %908 = vector.broadcast %72 : vector<1x64xf32> to vector<16x64xf32>
    %909 = arith.mulf %907, %908 : vector<16x64xf32>
    %910 = arith.addf %906, %909 : vector<16x64xf32>
    %911 = vector.broadcast %897 : vector<16x1xf32> to vector<16x64xf32>
    %912 = vector.broadcast %74 : vector<1x64xf32> to vector<16x64xf32>
    %913 = arith.mulf %911, %912 : vector<16x64xf32>
    %914 = arith.addf %910, %913 : vector<16x64xf32>
    %915 = arith.subf %873, %914 : vector<16x64xf32>
    %916 = math.exp %915 : vector<16x64xf32>
    %917 = vector.broadcast %68 : vector<1x64xf32> to vector<16x64xf32>
    %918 = arith.mulf %916, %917 : vector<16x64xf32>
    %cst_329 = arith.constant dense<0.000000e+00> : vector<16xf32>
    %919 = vector.multi_reduction <add>, %918, %cst_329 [1] : vector<16x64xf32> to vector<16xf32>
    %920 = vector.shape_cast %919 : vector<16xf32> to vector<16x1xf32>
    %921 = tpu.reciprocal %920 {approx = true} : vector<16x1xf32> -> vector<16x1xf32>
    %922 = vector.broadcast %70 : vector<1x64xf32> to vector<16x64xf32>
    %923 = arith.mulf %916, %922 : vector<16x64xf32>
    %cst_330 = arith.constant dense<0.000000e+00> : vector<16xf32>
    %924 = vector.multi_reduction <add>, %923, %cst_330 [1] : vector<16x64xf32> to vector<16xf32>
    %925 = vector.shape_cast %924 : vector<16xf32> to vector<16x1xf32>
    %926 = tpu.reciprocal %925 {approx = true} : vector<16x1xf32> -> vector<16x1xf32>
    %927 = vector.broadcast %72 : vector<1x64xf32> to vector<16x64xf32>
    %928 = arith.mulf %916, %927 : vector<16x64xf32>
    %cst_331 = arith.constant dense<0.000000e+00> : vector<16xf32>
    %929 = vector.multi_reduction <add>, %928, %cst_331 [1] : vector<16x64xf32> to vector<16xf32>
    %930 = vector.shape_cast %929 : vector<16xf32> to vector<16x1xf32>
    %931 = tpu.reciprocal %930 {approx = true} : vector<16x1xf32> -> vector<16x1xf32>
    %932 = vector.broadcast %74 : vector<1x64xf32> to vector<16x64xf32>
    %933 = arith.mulf %916, %932 : vector<16x64xf32>
    %cst_332 = arith.constant dense<0.000000e+00> : vector<16xf32>
    %934 = vector.multi_reduction <add>, %933, %cst_332 [1] : vector<16x64xf32> to vector<16xf32>
    %935 = vector.shape_cast %934 : vector<16xf32> to vector<16x1xf32>
    %936 = tpu.reciprocal %935 {approx = true} : vector<16x1xf32> -> vector<16x1xf32>
    %937 = vector.broadcast %921 : vector<16x1xf32> to vector<16x64xf32>
    %938 = vector.broadcast %68 : vector<1x64xf32> to vector<16x64xf32>
    %939 = arith.mulf %937, %938 : vector<16x64xf32>
    %cst_333 = arith.constant 0.000000e+00 : f32
    %940 = vector.broadcast %cst_333 : f32 to vector<16x64xf32>
    %941 = arith.addf %940, %939 : vector<16x64xf32>
    %942 = vector.broadcast %926 : vector<16x1xf32> to vector<16x64xf32>
    %943 = vector.broadcast %70 : vector<1x64xf32> to vector<16x64xf32>
    %944 = arith.mulf %942, %943 : vector<16x64xf32>
    %945 = arith.addf %941, %944 : vector<16x64xf32>
    %946 = vector.broadcast %931 : vector<16x1xf32> to vector<16x64xf32>
    %947 = vector.broadcast %72 : vector<1x64xf32> to vector<16x64xf32>
    %948 = arith.mulf %946, %947 : vector<16x64xf32>
    %949 = arith.addf %945, %948 : vector<16x64xf32>
    %950 = vector.broadcast %936 : vector<16x1xf32> to vector<16x64xf32>
    %951 = vector.broadcast %74 : vector<1x64xf32> to vector<16x64xf32>
    %952 = arith.mulf %950, %951 : vector<16x64xf32>
    %953 = arith.addf %949, %952 : vector<16x64xf32>
    %954 = arith.mulf %916, %953 : vector<16x64xf32>
    %cst_334 = arith.constant dense<0.000000e+00> : vector<16x32xf32>
    %955 = tpu.matmul %954, %870, %cst_334 {dimension_numbers = #tpu.dot_dimension_numbers<[1], [0], [0], [1], [0, 0, 1, 1], [], []>} : vector<16x64xf32>, vector<64x32xf32>, vector<16x32xf32> -> vector<16x32xf32>
    %c4_335 = arith.constant 4 : index
    %c0_336 = arith.constant 0 : index
    %c0_337 = arith.constant 0 : index
    %956 = vector.load %arg13[%c4_335, %c0_336, %c0_337] : memref<8x32x32xf32, #tpu.memory_space<vmem>>, vector<1x32x32xf32>
    %957 = vector.shape_cast %956 : vector<1x32x32xf32> to vector<32x32xf32>
    %cst_338 = arith.constant dense<0.000000e+00> : vector<16x32xf32>
    %958 = tpu.matmul %955, %957, %cst_338 {dimension_numbers = #tpu.dot_dimension_numbers<[1], [1], [0], [0], [0, 0, 1, 0], [], []>} : vector<16x32xf32>, vector<32x32xf32>, vector<16x32xf32> -> vector<16x32xf32>
    %c4_339 = arith.constant 4 : index
    %c0_340 = arith.constant 0 : index
    %c0_341 = arith.constant 0 : index
    %959 = vector.load %arg14[%c4_339, %c0_340, %c0_341] : memref<8x1x32xf32, #tpu.memory_space<vmem>>, vector<1x1x32xf32>
    %960 = vector.shape_cast %959 : vector<1x1x32xf32> to vector<1x32xf32>
    %961 = vector.broadcast %960 : vector<1x32xf32> to vector<16x32xf32>
    %962 = arith.addf %958, %961 : vector<16x32xf32>
    %963 = arith.addf %813, %962 : vector<16x32xf32>
    %c8 = arith.constant 8 : index
    %c0_342 = arith.constant 0 : index
    %c0_343 = arith.constant 0 : index
    %964 = vector.load %arg19[%c8, %c0_342, %c0_343] : memref<16x1x32xf32, #tpu.memory_space<vmem>>, vector<1x1x32xf32>
    %965 = vector.shape_cast %964 : vector<1x1x32xf32> to vector<1x32xf32>
    %c8_344 = arith.constant 8 : index
    %c0_345 = arith.constant 0 : index
    %c0_346 = arith.constant 0 : index
    %966 = vector.load %arg20[%c8_344, %c0_345, %c0_346] : memref<16x1x32xf32, #tpu.memory_space<vmem>>, vector<1x1x32xf32>
    %967 = vector.shape_cast %966 : vector<1x1x32xf32> to vector<1x32xf32>
    %cst_347 = arith.constant dense<0.000000e+00> : vector<16xf32>
    %968 = vector.multi_reduction <add>, %963, %cst_347 [1] : vector<16x32xf32> to vector<16xf32>
    %969 = vector.shape_cast %968 : vector<16xf32> to vector<16x1xf32>
    %cst_348 = arith.constant 3.200000e+01 : f32
    %970 = vector.broadcast %cst_348 : f32 to vector<16x1xf32>
    %971 = arith.divf %969, %970 : vector<16x1xf32>
    %972 = vector.broadcast %971 : vector<16x1xf32> to vector<16x32xf32>
    %973 = arith.subf %963, %972 : vector<16x32xf32>
    %974 = arith.mulf %973, %973 : vector<16x32xf32>
    %cst_349 = arith.constant dense<0.000000e+00> : vector<16xf32>
    %975 = vector.multi_reduction <add>, %974, %cst_349 [1] : vector<16x32xf32> to vector<16xf32>
    %976 = vector.shape_cast %975 : vector<16xf32> to vector<16x1xf32>
    %cst_350 = arith.constant 3.200000e+01 : f32
    %977 = vector.broadcast %cst_350 : f32 to vector<16x1xf32>
    %978 = arith.divf %976, %977 : vector<16x1xf32>
    %979 = vector.broadcast %971 : vector<16x1xf32> to vector<16x32xf32>
    %980 = arith.subf %963, %979 : vector<16x32xf32>
    %cst_351 = arith.constant 9.99999974E-6 : f32
    %981 = vector.broadcast %cst_351 : f32 to vector<16x1xf32>
    %982 = arith.addf %978, %981 : vector<16x1xf32>
    %983 = math.rsqrt %982 : vector<16x1xf32>
    %984 = vector.broadcast %983 : vector<16x1xf32> to vector<16x32xf32>
    %985 = arith.mulf %980, %984 : vector<16x32xf32>
    %986 = vector.broadcast %965 : vector<1x32xf32> to vector<16x32xf32>
    %987 = arith.mulf %985, %986 : vector<16x32xf32>
    %988 = vector.broadcast %967 : vector<1x32xf32> to vector<16x32xf32>
    %989 = arith.addf %987, %988 : vector<16x32xf32>
    %c5_352 = arith.constant 5 : index
    %c0_353 = arith.constant 0 : index
    %c0_354 = arith.constant 0 : index
    %990 = vector.load %arg11[%c5_352, %c0_353, %c0_354] : memref<8x96x32xf32, #tpu.memory_space<vmem>>, vector<1x96x32xf32>
    %991 = vector.shape_cast %990 : vector<1x96x32xf32> to vector<96x32xf32>
    %c5_355 = arith.constant 5 : index
    %c0_356 = arith.constant 0 : index
    %c0_357 = arith.constant 0 : index
    %992 = vector.load %arg12[%c5_355, %c0_356, %c0_357] : memref<8x1x96xf32, #tpu.memory_space<vmem>>, vector<1x1x96xf32>
    %993 = vector.shape_cast %992 : vector<1x1x96xf32> to vector<1x96xf32>
    %cst_358 = arith.constant dense<0.000000e+00> : vector<8x96xf32>
    %994 = tpu.matmul %856, %991, %cst_358 {dimension_numbers = #tpu.dot_dimension_numbers<[1], [1], [0], [0], [0, 0, 1, 0], [], []>} : vector<8x32xf32>, vector<96x32xf32>, vector<8x96xf32> -> vector<8x96xf32>
    %995 = vector.broadcast %993 : vector<1x96xf32> to vector<8x96xf32>
    %996 = arith.addf %994, %995 : vector<8x96xf32>
    %997 = vector.extract_strided_slice %996 {offsets = [0, 0], sizes = [8, 32], strides = [1, 1]} : vector<8x96xf32> to vector<8x32xf32>
    %998 = vector.extract_strided_slice %996 {offsets = [0, 32], sizes = [8, 32], strides = [1, 1]} : vector<8x96xf32> to vector<8x32xf32>
    %999 = vector.extract_strided_slice %996 {offsets = [0, 64], sizes = [8, 32], strides = [1, 1]} : vector<8x96xf32> to vector<8x32xf32>
    %1000 = tpu.concatenate %998, %998, %998, %998 in 0 : vector<8x32xf32>, vector<8x32xf32>, vector<8x32xf32>, vector<8x32xf32> -> vector<32x32xf32>
    %1001 = arith.mulf %1000, %88 : vector<32x32xf32>
    %1002 = tpu.concatenate %999, %999, %999, %999 in 0 : vector<8x32xf32>, vector<8x32xf32>, vector<8x32xf32>, vector<8x32xf32> -> vector<32x32xf32>
    %1003 = arith.mulf %1002, %88 : vector<32x32xf32>
    %cst_359 = arith.constant dense<0.000000e+00> : vector<8x32xf32>
    %1004 = tpu.matmul %997, %1001, %cst_359 {dimension_numbers = #tpu.dot_dimension_numbers<[1], [1], [0], [0], [0, 0, 1, 0], [], []>} : vector<8x32xf32>, vector<32x32xf32>, vector<8x32xf32> -> vector<8x32xf32>
    %1005 = vector.broadcast %122 : vector<1x32xf32> to vector<8x32xf32>
    %1006 = arith.addf %1004, %1005 : vector<8x32xf32>
    %cst_360 = arith.constant -1.000000e+30 : f32
    %1007 = vector.shape_cast %94 : vector<1x32xi1> to vector<1x32xi1>
    %1008 = vector.broadcast %1007 : vector<1x32xi1> to vector<8x32xi1>
    %1009 = vector.broadcast %cst_360 : f32 to vector<8x32xf32>
    %1010 = arith.select %1008, %1006, %1009 : vector<8x32xi1>, vector<8x32xf32>
    %cst_361 = arith.constant dense<0xFF800000> : vector<8xf32>
    %1011 = vector.multi_reduction <maximumf>, %1010, %cst_361 [1] : vector<8x32xf32> to vector<8xf32>
    %1012 = vector.shape_cast %1011 : vector<8xf32> to vector<8x1xf32>
    %cst_362 = arith.constant -1.000000e+30 : f32
    %1013 = vector.shape_cast %99 : vector<1x32xi1> to vector<1x32xi1>
    %1014 = vector.broadcast %1013 : vector<1x32xi1> to vector<8x32xi1>
    %1015 = vector.broadcast %cst_362 : f32 to vector<8x32xf32>
    %1016 = arith.select %1014, %1006, %1015 : vector<8x32xi1>, vector<8x32xf32>
    %cst_363 = arith.constant dense<0xFF800000> : vector<8xf32>
    %1017 = vector.multi_reduction <maximumf>, %1016, %cst_363 [1] : vector<8x32xf32> to vector<8xf32>
    %1018 = vector.shape_cast %1017 : vector<8xf32> to vector<8x1xf32>
    %cst_364 = arith.constant -1.000000e+30 : f32
    %1019 = vector.shape_cast %104 : vector<1x32xi1> to vector<1x32xi1>
    %1020 = vector.broadcast %1019 : vector<1x32xi1> to vector<8x32xi1>
    %1021 = vector.broadcast %cst_364 : f32 to vector<8x32xf32>
    %1022 = arith.select %1020, %1006, %1021 : vector<8x32xi1>, vector<8x32xf32>
    %cst_365 = arith.constant dense<0xFF800000> : vector<8xf32>
    %1023 = vector.multi_reduction <maximumf>, %1022, %cst_365 [1] : vector<8x32xf32> to vector<8xf32>
    %1024 = vector.shape_cast %1023 : vector<8xf32> to vector<8x1xf32>
    %cst_366 = arith.constant -1.000000e+30 : f32
    %1025 = vector.shape_cast %109 : vector<1x32xi1> to vector<1x32xi1>
    %1026 = vector.broadcast %1025 : vector<1x32xi1> to vector<8x32xi1>
    %1027 = vector.broadcast %cst_366 : f32 to vector<8x32xf32>
    %1028 = arith.select %1026, %1006, %1027 : vector<8x32xi1>, vector<8x32xf32>
    %cst_367 = arith.constant dense<0xFF800000> : vector<8xf32>
    %1029 = vector.multi_reduction <maximumf>, %1028, %cst_367 [1] : vector<8x32xf32> to vector<8xf32>
    %1030 = vector.shape_cast %1029 : vector<8xf32> to vector<8x1xf32>
    %1031 = vector.broadcast %1012 : vector<8x1xf32> to vector<8x32xf32>
    %1032 = vector.broadcast %111 : vector<1x32xf32> to vector<8x32xf32>
    %1033 = arith.mulf %1031, %1032 : vector<8x32xf32>
    %cst_368 = arith.constant 0.000000e+00 : f32
    %1034 = vector.broadcast %cst_368 : f32 to vector<8x32xf32>
    %1035 = arith.addf %1034, %1033 : vector<8x32xf32>
    %1036 = vector.broadcast %1018 : vector<8x1xf32> to vector<8x32xf32>
    %1037 = vector.broadcast %113 : vector<1x32xf32> to vector<8x32xf32>
    %1038 = arith.mulf %1036, %1037 : vector<8x32xf32>
    %1039 = arith.addf %1035, %1038 : vector<8x32xf32>
    %1040 = vector.broadcast %1024 : vector<8x1xf32> to vector<8x32xf32>
    %1041 = vector.broadcast %115 : vector<1x32xf32> to vector<8x32xf32>
    %1042 = arith.mulf %1040, %1041 : vector<8x32xf32>
    %1043 = arith.addf %1039, %1042 : vector<8x32xf32>
    %1044 = vector.broadcast %1030 : vector<8x1xf32> to vector<8x32xf32>
    %1045 = vector.broadcast %117 : vector<1x32xf32> to vector<8x32xf32>
    %1046 = arith.mulf %1044, %1045 : vector<8x32xf32>
    %1047 = arith.addf %1043, %1046 : vector<8x32xf32>
    %1048 = arith.subf %1006, %1047 : vector<8x32xf32>
    %1049 = math.exp %1048 : vector<8x32xf32>
    %1050 = vector.broadcast %111 : vector<1x32xf32> to vector<8x32xf32>
    %1051 = arith.mulf %1049, %1050 : vector<8x32xf32>
    %cst_369 = arith.constant dense<0.000000e+00> : vector<8xf32>
    %1052 = vector.multi_reduction <add>, %1051, %cst_369 [1] : vector<8x32xf32> to vector<8xf32>
    %1053 = vector.shape_cast %1052 : vector<8xf32> to vector<8x1xf32>
    %1054 = tpu.reciprocal %1053 {approx = true} : vector<8x1xf32> -> vector<8x1xf32>
    %1055 = vector.broadcast %113 : vector<1x32xf32> to vector<8x32xf32>
    %1056 = arith.mulf %1049, %1055 : vector<8x32xf32>
    %cst_370 = arith.constant dense<0.000000e+00> : vector<8xf32>
    %1057 = vector.multi_reduction <add>, %1056, %cst_370 [1] : vector<8x32xf32> to vector<8xf32>
    %1058 = vector.shape_cast %1057 : vector<8xf32> to vector<8x1xf32>
    %1059 = tpu.reciprocal %1058 {approx = true} : vector<8x1xf32> -> vector<8x1xf32>
    %1060 = vector.broadcast %115 : vector<1x32xf32> to vector<8x32xf32>
    %1061 = arith.mulf %1049, %1060 : vector<8x32xf32>
    %cst_371 = arith.constant dense<0.000000e+00> : vector<8xf32>
    %1062 = vector.multi_reduction <add>, %1061, %cst_371 [1] : vector<8x32xf32> to vector<8xf32>
    %1063 = vector.shape_cast %1062 : vector<8xf32> to vector<8x1xf32>
    %1064 = tpu.reciprocal %1063 {approx = true} : vector<8x1xf32> -> vector<8x1xf32>
    %1065 = vector.broadcast %117 : vector<1x32xf32> to vector<8x32xf32>
    %1066 = arith.mulf %1049, %1065 : vector<8x32xf32>
    %cst_372 = arith.constant dense<0.000000e+00> : vector<8xf32>
    %1067 = vector.multi_reduction <add>, %1066, %cst_372 [1] : vector<8x32xf32> to vector<8xf32>
    %1068 = vector.shape_cast %1067 : vector<8xf32> to vector<8x1xf32>
    %1069 = tpu.reciprocal %1068 {approx = true} : vector<8x1xf32> -> vector<8x1xf32>
    %1070 = vector.broadcast %1054 : vector<8x1xf32> to vector<8x32xf32>
    %1071 = vector.broadcast %111 : vector<1x32xf32> to vector<8x32xf32>
    %1072 = arith.mulf %1070, %1071 : vector<8x32xf32>
    %cst_373 = arith.constant 0.000000e+00 : f32
    %1073 = vector.broadcast %cst_373 : f32 to vector<8x32xf32>
    %1074 = arith.addf %1073, %1072 : vector<8x32xf32>
    %1075 = vector.broadcast %1059 : vector<8x1xf32> to vector<8x32xf32>
    %1076 = vector.broadcast %113 : vector<1x32xf32> to vector<8x32xf32>
    %1077 = arith.mulf %1075, %1076 : vector<8x32xf32>
    %1078 = arith.addf %1074, %1077 : vector<8x32xf32>
    %1079 = vector.broadcast %1064 : vector<8x1xf32> to vector<8x32xf32>
    %1080 = vector.broadcast %115 : vector<1x32xf32> to vector<8x32xf32>
    %1081 = arith.mulf %1079, %1080 : vector<8x32xf32>
    %1082 = arith.addf %1078, %1081 : vector<8x32xf32>
    %1083 = vector.broadcast %1069 : vector<8x1xf32> to vector<8x32xf32>
    %1084 = vector.broadcast %117 : vector<1x32xf32> to vector<8x32xf32>
    %1085 = arith.mulf %1083, %1084 : vector<8x32xf32>
    %1086 = arith.addf %1082, %1085 : vector<8x32xf32>
    %1087 = arith.mulf %1049, %1086 : vector<8x32xf32>
    %cst_374 = arith.constant dense<0.000000e+00> : vector<8x32xf32>
    %1088 = tpu.matmul %1087, %1003, %cst_374 {dimension_numbers = #tpu.dot_dimension_numbers<[1], [0], [0], [1], [0, 0, 1, 1], [], []>} : vector<8x32xf32>, vector<32x32xf32>, vector<8x32xf32> -> vector<8x32xf32>
    %c5_375 = arith.constant 5 : index
    %c0_376 = arith.constant 0 : index
    %c0_377 = arith.constant 0 : index
    %1089 = vector.load %arg13[%c5_375, %c0_376, %c0_377] : memref<8x32x32xf32, #tpu.memory_space<vmem>>, vector<1x32x32xf32>
    %1090 = vector.shape_cast %1089 : vector<1x32x32xf32> to vector<32x32xf32>
    %cst_378 = arith.constant dense<0.000000e+00> : vector<8x32xf32>
    %1091 = tpu.matmul %1088, %1090, %cst_378 {dimension_numbers = #tpu.dot_dimension_numbers<[1], [1], [0], [0], [0, 0, 1, 0], [], []>} : vector<8x32xf32>, vector<32x32xf32>, vector<8x32xf32> -> vector<8x32xf32>
    %c5_379 = arith.constant 5 : index
    %c0_380 = arith.constant 0 : index
    %c0_381 = arith.constant 0 : index
    %1092 = vector.load %arg14[%c5_379, %c0_380, %c0_381] : memref<8x1x32xf32, #tpu.memory_space<vmem>>, vector<1x1x32xf32>
    %1093 = vector.shape_cast %1092 : vector<1x1x32xf32> to vector<1x32xf32>
    %1094 = vector.broadcast %1093 : vector<1x32xf32> to vector<8x32xf32>
    %1095 = arith.addf %1091, %1094 : vector<8x32xf32>
    %1096 = arith.addf %856, %1095 : vector<8x32xf32>
    %c9 = arith.constant 9 : index
    %c0_382 = arith.constant 0 : index
    %c0_383 = arith.constant 0 : index
    %1097 = vector.load %arg19[%c9, %c0_382, %c0_383] : memref<16x1x32xf32, #tpu.memory_space<vmem>>, vector<1x1x32xf32>
    %1098 = vector.shape_cast %1097 : vector<1x1x32xf32> to vector<1x32xf32>
    %c9_384 = arith.constant 9 : index
    %c0_385 = arith.constant 0 : index
    %c0_386 = arith.constant 0 : index
    %1099 = vector.load %arg20[%c9_384, %c0_385, %c0_386] : memref<16x1x32xf32, #tpu.memory_space<vmem>>, vector<1x1x32xf32>
    %1100 = vector.shape_cast %1099 : vector<1x1x32xf32> to vector<1x32xf32>
    %cst_387 = arith.constant dense<0.000000e+00> : vector<8xf32>
    %1101 = vector.multi_reduction <add>, %1096, %cst_387 [1] : vector<8x32xf32> to vector<8xf32>
    %1102 = vector.shape_cast %1101 : vector<8xf32> to vector<8x1xf32>
    %cst_388 = arith.constant 3.200000e+01 : f32
    %1103 = vector.broadcast %cst_388 : f32 to vector<8x1xf32>
    %1104 = arith.divf %1102, %1103 : vector<8x1xf32>
    %1105 = vector.broadcast %1104 : vector<8x1xf32> to vector<8x32xf32>
    %1106 = arith.subf %1096, %1105 : vector<8x32xf32>
    %1107 = arith.mulf %1106, %1106 : vector<8x32xf32>
    %cst_389 = arith.constant dense<0.000000e+00> : vector<8xf32>
    %1108 = vector.multi_reduction <add>, %1107, %cst_389 [1] : vector<8x32xf32> to vector<8xf32>
    %1109 = vector.shape_cast %1108 : vector<8xf32> to vector<8x1xf32>
    %cst_390 = arith.constant 3.200000e+01 : f32
    %1110 = vector.broadcast %cst_390 : f32 to vector<8x1xf32>
    %1111 = arith.divf %1109, %1110 : vector<8x1xf32>
    %1112 = vector.broadcast %1104 : vector<8x1xf32> to vector<8x32xf32>
    %1113 = arith.subf %1096, %1112 : vector<8x32xf32>
    %cst_391 = arith.constant 9.99999974E-6 : f32
    %1114 = vector.broadcast %cst_391 : f32 to vector<8x1xf32>
    %1115 = arith.addf %1111, %1114 : vector<8x1xf32>
    %1116 = math.rsqrt %1115 : vector<8x1xf32>
    %1117 = vector.broadcast %1116 : vector<8x1xf32> to vector<8x32xf32>
    %1118 = arith.mulf %1113, %1117 : vector<8x32xf32>
    %1119 = vector.broadcast %1098 : vector<1x32xf32> to vector<8x32xf32>
    %1120 = arith.mulf %1118, %1119 : vector<8x32xf32>
    %1121 = vector.broadcast %1100 : vector<1x32xf32> to vector<8x32xf32>
    %1122 = arith.addf %1120, %1121 : vector<8x32xf32>
    %c4_392 = arith.constant 4 : index
    %c0_393 = arith.constant 0 : index
    %c0_394 = arith.constant 0 : index
    %1123 = vector.load %arg15[%c4_392, %c0_393, %c0_394] : memref<8x64x32xf32, #tpu.memory_space<vmem>>, vector<1x64x32xf32>
    %1124 = vector.shape_cast %1123 : vector<1x64x32xf32> to vector<64x32xf32>
    %cst_395 = arith.constant dense<0.000000e+00> : vector<16x64xf32>
    %1125 = tpu.matmul %989, %1124, %cst_395 {dimension_numbers = #tpu.dot_dimension_numbers<[1], [1], [0], [0], [0, 0, 1, 0], [], []>} : vector<16x32xf32>, vector<64x32xf32>, vector<16x64xf32> -> vector<16x64xf32>
    %c4_396 = arith.constant 4 : index
    %c0_397 = arith.constant 0 : index
    %c0_398 = arith.constant 0 : index
    %1126 = vector.load %arg16[%c4_396, %c0_397, %c0_398] : memref<8x1x64xf32, #tpu.memory_space<vmem>>, vector<1x1x64xf32>
    %1127 = vector.shape_cast %1126 : vector<1x1x64xf32> to vector<1x64xf32>
    %1128 = vector.broadcast %1127 : vector<1x64xf32> to vector<16x64xf32>
    %1129 = arith.addf %1125, %1128 : vector<16x64xf32>
    %cst_399 = arith.constant 0.000000e+00 : f32
    %1130 = vector.broadcast %cst_399 : f32 to vector<16x64xf32>
    %1131 = arith.maximumf %1129, %1130 : vector<16x64xf32>
    %c4_400 = arith.constant 4 : index
    %c0_401 = arith.constant 0 : index
    %c0_402 = arith.constant 0 : index
    %1132 = vector.load %arg17[%c4_400, %c0_401, %c0_402] : memref<8x32x64xf32, #tpu.memory_space<vmem>>, vector<1x32x64xf32>
    %1133 = vector.shape_cast %1132 : vector<1x32x64xf32> to vector<32x64xf32>
    %cst_403 = arith.constant dense<0.000000e+00> : vector<16x32xf32>
    %1134 = tpu.matmul %1131, %1133, %cst_403 {dimension_numbers = #tpu.dot_dimension_numbers<[1], [1], [0], [0], [0, 0, 1, 0], [], []>} : vector<16x64xf32>, vector<32x64xf32>, vector<16x32xf32> -> vector<16x32xf32>
    %c4_404 = arith.constant 4 : index
    %c0_405 = arith.constant 0 : index
    %c0_406 = arith.constant 0 : index
    %1135 = vector.load %arg18[%c4_404, %c0_405, %c0_406] : memref<8x1x32xf32, #tpu.memory_space<vmem>>, vector<1x1x32xf32>
    %1136 = vector.shape_cast %1135 : vector<1x1x32xf32> to vector<1x32xf32>
    %1137 = vector.broadcast %1136 : vector<1x32xf32> to vector<16x32xf32>
    %1138 = arith.addf %1134, %1137 : vector<16x32xf32>
    %1139 = arith.addf %989, %1138 : vector<16x32xf32>
    %c10 = arith.constant 10 : index
    %c0_407 = arith.constant 0 : index
    %c0_408 = arith.constant 0 : index
    %1140 = vector.load %arg19[%c10, %c0_407, %c0_408] : memref<16x1x32xf32, #tpu.memory_space<vmem>>, vector<1x1x32xf32>
    %1141 = vector.shape_cast %1140 : vector<1x1x32xf32> to vector<1x32xf32>
    %c10_409 = arith.constant 10 : index
    %c0_410 = arith.constant 0 : index
    %c0_411 = arith.constant 0 : index
    %1142 = vector.load %arg20[%c10_409, %c0_410, %c0_411] : memref<16x1x32xf32, #tpu.memory_space<vmem>>, vector<1x1x32xf32>
    %1143 = vector.shape_cast %1142 : vector<1x1x32xf32> to vector<1x32xf32>
    %cst_412 = arith.constant dense<0.000000e+00> : vector<16xf32>
    %1144 = vector.multi_reduction <add>, %1139, %cst_412 [1] : vector<16x32xf32> to vector<16xf32>
    %1145 = vector.shape_cast %1144 : vector<16xf32> to vector<16x1xf32>
    %cst_413 = arith.constant 3.200000e+01 : f32
    %1146 = vector.broadcast %cst_413 : f32 to vector<16x1xf32>
    %1147 = arith.divf %1145, %1146 : vector<16x1xf32>
    %1148 = vector.broadcast %1147 : vector<16x1xf32> to vector<16x32xf32>
    %1149 = arith.subf %1139, %1148 : vector<16x32xf32>
    %1150 = arith.mulf %1149, %1149 : vector<16x32xf32>
    %cst_414 = arith.constant dense<0.000000e+00> : vector<16xf32>
    %1151 = vector.multi_reduction <add>, %1150, %cst_414 [1] : vector<16x32xf32> to vector<16xf32>
    %1152 = vector.shape_cast %1151 : vector<16xf32> to vector<16x1xf32>
    %cst_415 = arith.constant 3.200000e+01 : f32
    %1153 = vector.broadcast %cst_415 : f32 to vector<16x1xf32>
    %1154 = arith.divf %1152, %1153 : vector<16x1xf32>
    %1155 = vector.broadcast %1147 : vector<16x1xf32> to vector<16x32xf32>
    %1156 = arith.subf %1139, %1155 : vector<16x32xf32>
    %cst_416 = arith.constant 9.99999974E-6 : f32
    %1157 = vector.broadcast %cst_416 : f32 to vector<16x1xf32>
    %1158 = arith.addf %1154, %1157 : vector<16x1xf32>
    %1159 = math.rsqrt %1158 : vector<16x1xf32>
    %1160 = vector.broadcast %1159 : vector<16x1xf32> to vector<16x32xf32>
    %1161 = arith.mulf %1156, %1160 : vector<16x32xf32>
    %1162 = vector.broadcast %1141 : vector<1x32xf32> to vector<16x32xf32>
    %1163 = arith.mulf %1161, %1162 : vector<16x32xf32>
    %1164 = vector.broadcast %1143 : vector<1x32xf32> to vector<16x32xf32>
    %1165 = arith.addf %1163, %1164 : vector<16x32xf32>
    %c5_417 = arith.constant 5 : index
    %c0_418 = arith.constant 0 : index
    %c0_419 = arith.constant 0 : index
    %1166 = vector.load %arg15[%c5_417, %c0_418, %c0_419] : memref<8x64x32xf32, #tpu.memory_space<vmem>>, vector<1x64x32xf32>
    %1167 = vector.shape_cast %1166 : vector<1x64x32xf32> to vector<64x32xf32>
    %cst_420 = arith.constant dense<0.000000e+00> : vector<8x64xf32>
    %1168 = tpu.matmul %1122, %1167, %cst_420 {dimension_numbers = #tpu.dot_dimension_numbers<[1], [1], [0], [0], [0, 0, 1, 0], [], []>} : vector<8x32xf32>, vector<64x32xf32>, vector<8x64xf32> -> vector<8x64xf32>
    %c5_421 = arith.constant 5 : index
    %c0_422 = arith.constant 0 : index
    %c0_423 = arith.constant 0 : index
    %1169 = vector.load %arg16[%c5_421, %c0_422, %c0_423] : memref<8x1x64xf32, #tpu.memory_space<vmem>>, vector<1x1x64xf32>
    %1170 = vector.shape_cast %1169 : vector<1x1x64xf32> to vector<1x64xf32>
    %1171 = vector.broadcast %1170 : vector<1x64xf32> to vector<8x64xf32>
    %1172 = arith.addf %1168, %1171 : vector<8x64xf32>
    %cst_424 = arith.constant 0.000000e+00 : f32
    %1173 = vector.broadcast %cst_424 : f32 to vector<8x64xf32>
    %1174 = arith.maximumf %1172, %1173 : vector<8x64xf32>
    %c5_425 = arith.constant 5 : index
    %c0_426 = arith.constant 0 : index
    %c0_427 = arith.constant 0 : index
    %1175 = vector.load %arg17[%c5_425, %c0_426, %c0_427] : memref<8x32x64xf32, #tpu.memory_space<vmem>>, vector<1x32x64xf32>
    %1176 = vector.shape_cast %1175 : vector<1x32x64xf32> to vector<32x64xf32>
    %cst_428 = arith.constant dense<0.000000e+00> : vector<8x32xf32>
    %1177 = tpu.matmul %1174, %1176, %cst_428 {dimension_numbers = #tpu.dot_dimension_numbers<[1], [1], [0], [0], [0, 0, 1, 0], [], []>} : vector<8x64xf32>, vector<32x64xf32>, vector<8x32xf32> -> vector<8x32xf32>
    %c5_429 = arith.constant 5 : index
    %c0_430 = arith.constant 0 : index
    %c0_431 = arith.constant 0 : index
    %1178 = vector.load %arg18[%c5_429, %c0_430, %c0_431] : memref<8x1x32xf32, #tpu.memory_space<vmem>>, vector<1x1x32xf32>
    %1179 = vector.shape_cast %1178 : vector<1x1x32xf32> to vector<1x32xf32>
    %1180 = vector.broadcast %1179 : vector<1x32xf32> to vector<8x32xf32>
    %1181 = arith.addf %1177, %1180 : vector<8x32xf32>
    %1182 = arith.addf %1122, %1181 : vector<8x32xf32>
    %c11 = arith.constant 11 : index
    %c0_432 = arith.constant 0 : index
    %c0_433 = arith.constant 0 : index
    %1183 = vector.load %arg19[%c11, %c0_432, %c0_433] : memref<16x1x32xf32, #tpu.memory_space<vmem>>, vector<1x1x32xf32>
    %1184 = vector.shape_cast %1183 : vector<1x1x32xf32> to vector<1x32xf32>
    %c11_434 = arith.constant 11 : index
    %c0_435 = arith.constant 0 : index
    %c0_436 = arith.constant 0 : index
    %1185 = vector.load %arg20[%c11_434, %c0_435, %c0_436] : memref<16x1x32xf32, #tpu.memory_space<vmem>>, vector<1x1x32xf32>
    %1186 = vector.shape_cast %1185 : vector<1x1x32xf32> to vector<1x32xf32>
    %cst_437 = arith.constant dense<0.000000e+00> : vector<8xf32>
    %1187 = vector.multi_reduction <add>, %1182, %cst_437 [1] : vector<8x32xf32> to vector<8xf32>
    %1188 = vector.shape_cast %1187 : vector<8xf32> to vector<8x1xf32>
    %cst_438 = arith.constant 3.200000e+01 : f32
    %1189 = vector.broadcast %cst_438 : f32 to vector<8x1xf32>
    %1190 = arith.divf %1188, %1189 : vector<8x1xf32>
    %1191 = vector.broadcast %1190 : vector<8x1xf32> to vector<8x32xf32>
    %1192 = arith.subf %1182, %1191 : vector<8x32xf32>
    %1193 = arith.mulf %1192, %1192 : vector<8x32xf32>
    %cst_439 = arith.constant dense<0.000000e+00> : vector<8xf32>
    %1194 = vector.multi_reduction <add>, %1193, %cst_439 [1] : vector<8x32xf32> to vector<8xf32>
    %1195 = vector.shape_cast %1194 : vector<8xf32> to vector<8x1xf32>
    %cst_440 = arith.constant 3.200000e+01 : f32
    %1196 = vector.broadcast %cst_440 : f32 to vector<8x1xf32>
    %1197 = arith.divf %1195, %1196 : vector<8x1xf32>
    %1198 = vector.broadcast %1190 : vector<8x1xf32> to vector<8x32xf32>
    %1199 = arith.subf %1182, %1198 : vector<8x32xf32>
    %cst_441 = arith.constant 9.99999974E-6 : f32
    %1200 = vector.broadcast %cst_441 : f32 to vector<8x1xf32>
    %1201 = arith.addf %1197, %1200 : vector<8x1xf32>
    %1202 = math.rsqrt %1201 : vector<8x1xf32>
    %1203 = vector.broadcast %1202 : vector<8x1xf32> to vector<8x32xf32>
    %1204 = arith.mulf %1199, %1203 : vector<8x32xf32>
    %1205 = vector.broadcast %1184 : vector<1x32xf32> to vector<8x32xf32>
    %1206 = arith.mulf %1204, %1205 : vector<8x32xf32>
    %1207 = vector.broadcast %1186 : vector<1x32xf32> to vector<8x32xf32>
    %1208 = arith.addf %1206, %1207 : vector<8x32xf32>
    %c6_442 = arith.constant 6 : index
    %c0_443 = arith.constant 0 : index
    %c0_444 = arith.constant 0 : index
    %1209 = vector.load %arg11[%c6_442, %c0_443, %c0_444] : memref<8x96x32xf32, #tpu.memory_space<vmem>>, vector<1x96x32xf32>
    %1210 = vector.shape_cast %1209 : vector<1x96x32xf32> to vector<96x32xf32>
    %c6_445 = arith.constant 6 : index
    %c0_446 = arith.constant 0 : index
    %c0_447 = arith.constant 0 : index
    %1211 = vector.load %arg12[%c6_445, %c0_446, %c0_447] : memref<8x1x96xf32, #tpu.memory_space<vmem>>, vector<1x1x96xf32>
    %1212 = vector.shape_cast %1211 : vector<1x1x96xf32> to vector<1x96xf32>
    %1213 = vector.extract_strided_slice %1210 {offsets = [0, 0], sizes = [32, 32], strides = [1, 1]} : vector<96x32xf32> to vector<32x32xf32>
    %cst_448 = arith.constant dense<0.000000e+00> : vector<16x32xf32>
    %1214 = tpu.matmul %1165, %1213, %cst_448 {dimension_numbers = #tpu.dot_dimension_numbers<[1], [1], [0], [0], [0, 0, 1, 0], [], []>} : vector<16x32xf32>, vector<32x32xf32>, vector<16x32xf32> -> vector<16x32xf32>
    %1215 = vector.extract_strided_slice %1212 {offsets = [0, 0], sizes = [1, 32], strides = [1, 1]} : vector<1x96xf32> to vector<1x32xf32>
    %1216 = vector.broadcast %1215 : vector<1x32xf32> to vector<16x32xf32>
    %1217 = arith.addf %1214, %1216 : vector<16x32xf32>
    %1218 = vector.extract_strided_slice %1210 {offsets = [32, 0], sizes = [64, 32], strides = [1, 1]} : vector<96x32xf32> to vector<64x32xf32>
    %cst_449 = arith.constant dense<0.000000e+00> : vector<8x64xf32>
    %1219 = tpu.matmul %1208, %1218, %cst_449 {dimension_numbers = #tpu.dot_dimension_numbers<[1], [1], [0], [0], [0, 0, 1, 0], [], []>} : vector<8x32xf32>, vector<64x32xf32>, vector<8x64xf32> -> vector<8x64xf32>
    %1220 = vector.extract_strided_slice %1212 {offsets = [0, 32], sizes = [1, 64], strides = [1, 1]} : vector<1x96xf32> to vector<1x64xf32>
    %1221 = vector.broadcast %1220 : vector<1x64xf32> to vector<8x64xf32>
    %1222 = arith.addf %1219, %1221 : vector<8x64xf32>
    %1223 = vector.extract_strided_slice %1222 {offsets = [0, 0], sizes = [8, 32], strides = [1, 1]} : vector<8x64xf32> to vector<8x32xf32>
    %1224 = vector.extract_strided_slice %1222 {offsets = [0, 32], sizes = [8, 32], strides = [1, 1]} : vector<8x64xf32> to vector<8x32xf32>
    %1225 = tpu.concatenate %1223, %1223, %1223, %1223 in 0 : vector<8x32xf32>, vector<8x32xf32>, vector<8x32xf32>, vector<8x32xf32> -> vector<32x32xf32>
    %1226 = arith.mulf %1225, %88 : vector<32x32xf32>
    %1227 = tpu.concatenate %1224, %1224, %1224, %1224 in 0 : vector<8x32xf32>, vector<8x32xf32>, vector<8x32xf32>, vector<8x32xf32> -> vector<32x32xf32>
    %1228 = arith.mulf %1227, %88 : vector<32x32xf32>
    %cst_450 = arith.constant dense<0.000000e+00> : vector<16x32xf32>
    %1229 = tpu.matmul %1217, %1226, %cst_450 {dimension_numbers = #tpu.dot_dimension_numbers<[1], [1], [0], [0], [0, 0, 1, 0], [], []>} : vector<16x32xf32>, vector<32x32xf32>, vector<16x32xf32> -> vector<16x32xf32>
    %1230 = vector.broadcast %122 : vector<1x32xf32> to vector<16x32xf32>
    %1231 = arith.addf %1229, %1230 : vector<16x32xf32>
    %cst_451 = arith.constant -1.000000e+30 : f32
    %1232 = vector.shape_cast %94 : vector<1x32xi1> to vector<1x32xi1>
    %1233 = vector.broadcast %1232 : vector<1x32xi1> to vector<16x32xi1>
    %1234 = vector.broadcast %cst_451 : f32 to vector<16x32xf32>
    %1235 = arith.select %1233, %1231, %1234 : vector<16x32xi1>, vector<16x32xf32>
    %cst_452 = arith.constant dense<0xFF800000> : vector<16xf32>
    %1236 = vector.multi_reduction <maximumf>, %1235, %cst_452 [1] : vector<16x32xf32> to vector<16xf32>
    %1237 = vector.shape_cast %1236 : vector<16xf32> to vector<16x1xf32>
    %cst_453 = arith.constant -1.000000e+30 : f32
    %1238 = vector.shape_cast %99 : vector<1x32xi1> to vector<1x32xi1>
    %1239 = vector.broadcast %1238 : vector<1x32xi1> to vector<16x32xi1>
    %1240 = vector.broadcast %cst_453 : f32 to vector<16x32xf32>
    %1241 = arith.select %1239, %1231, %1240 : vector<16x32xi1>, vector<16x32xf32>
    %cst_454 = arith.constant dense<0xFF800000> : vector<16xf32>
    %1242 = vector.multi_reduction <maximumf>, %1241, %cst_454 [1] : vector<16x32xf32> to vector<16xf32>
    %1243 = vector.shape_cast %1242 : vector<16xf32> to vector<16x1xf32>
    %cst_455 = arith.constant -1.000000e+30 : f32
    %1244 = vector.shape_cast %104 : vector<1x32xi1> to vector<1x32xi1>
    %1245 = vector.broadcast %1244 : vector<1x32xi1> to vector<16x32xi1>
    %1246 = vector.broadcast %cst_455 : f32 to vector<16x32xf32>
    %1247 = arith.select %1245, %1231, %1246 : vector<16x32xi1>, vector<16x32xf32>
    %cst_456 = arith.constant dense<0xFF800000> : vector<16xf32>
    %1248 = vector.multi_reduction <maximumf>, %1247, %cst_456 [1] : vector<16x32xf32> to vector<16xf32>
    %1249 = vector.shape_cast %1248 : vector<16xf32> to vector<16x1xf32>
    %cst_457 = arith.constant -1.000000e+30 : f32
    %1250 = vector.shape_cast %109 : vector<1x32xi1> to vector<1x32xi1>
    %1251 = vector.broadcast %1250 : vector<1x32xi1> to vector<16x32xi1>
    %1252 = vector.broadcast %cst_457 : f32 to vector<16x32xf32>
    %1253 = arith.select %1251, %1231, %1252 : vector<16x32xi1>, vector<16x32xf32>
    %cst_458 = arith.constant dense<0xFF800000> : vector<16xf32>
    %1254 = vector.multi_reduction <maximumf>, %1253, %cst_458 [1] : vector<16x32xf32> to vector<16xf32>
    %1255 = vector.shape_cast %1254 : vector<16xf32> to vector<16x1xf32>
    %1256 = vector.broadcast %1237 : vector<16x1xf32> to vector<16x32xf32>
    %1257 = vector.broadcast %111 : vector<1x32xf32> to vector<16x32xf32>
    %1258 = arith.mulf %1256, %1257 : vector<16x32xf32>
    %cst_459 = arith.constant 0.000000e+00 : f32
    %1259 = vector.broadcast %cst_459 : f32 to vector<16x32xf32>
    %1260 = arith.addf %1259, %1258 : vector<16x32xf32>
    %1261 = vector.broadcast %1243 : vector<16x1xf32> to vector<16x32xf32>
    %1262 = vector.broadcast %113 : vector<1x32xf32> to vector<16x32xf32>
    %1263 = arith.mulf %1261, %1262 : vector<16x32xf32>
    %1264 = arith.addf %1260, %1263 : vector<16x32xf32>
    %1265 = vector.broadcast %1249 : vector<16x1xf32> to vector<16x32xf32>
    %1266 = vector.broadcast %115 : vector<1x32xf32> to vector<16x32xf32>
    %1267 = arith.mulf %1265, %1266 : vector<16x32xf32>
    %1268 = arith.addf %1264, %1267 : vector<16x32xf32>
    %1269 = vector.broadcast %1255 : vector<16x1xf32> to vector<16x32xf32>
    %1270 = vector.broadcast %117 : vector<1x32xf32> to vector<16x32xf32>
    %1271 = arith.mulf %1269, %1270 : vector<16x32xf32>
    %1272 = arith.addf %1268, %1271 : vector<16x32xf32>
    %1273 = arith.subf %1231, %1272 : vector<16x32xf32>
    %1274 = math.exp %1273 : vector<16x32xf32>
    %1275 = vector.broadcast %111 : vector<1x32xf32> to vector<16x32xf32>
    %1276 = arith.mulf %1274, %1275 : vector<16x32xf32>
    %cst_460 = arith.constant dense<0.000000e+00> : vector<16xf32>
    %1277 = vector.multi_reduction <add>, %1276, %cst_460 [1] : vector<16x32xf32> to vector<16xf32>
    %1278 = vector.shape_cast %1277 : vector<16xf32> to vector<16x1xf32>
    %1279 = tpu.reciprocal %1278 {approx = true} : vector<16x1xf32> -> vector<16x1xf32>
    %1280 = vector.broadcast %113 : vector<1x32xf32> to vector<16x32xf32>
    %1281 = arith.mulf %1274, %1280 : vector<16x32xf32>
    %cst_461 = arith.constant dense<0.000000e+00> : vector<16xf32>
    %1282 = vector.multi_reduction <add>, %1281, %cst_461 [1] : vector<16x32xf32> to vector<16xf32>
    %1283 = vector.shape_cast %1282 : vector<16xf32> to vector<16x1xf32>
    %1284 = tpu.reciprocal %1283 {approx = true} : vector<16x1xf32> -> vector<16x1xf32>
    %1285 = vector.broadcast %115 : vector<1x32xf32> to vector<16x32xf32>
    %1286 = arith.mulf %1274, %1285 : vector<16x32xf32>
    %cst_462 = arith.constant dense<0.000000e+00> : vector<16xf32>
    %1287 = vector.multi_reduction <add>, %1286, %cst_462 [1] : vector<16x32xf32> to vector<16xf32>
    %1288 = vector.shape_cast %1287 : vector<16xf32> to vector<16x1xf32>
    %1289 = tpu.reciprocal %1288 {approx = true} : vector<16x1xf32> -> vector<16x1xf32>
    %1290 = vector.broadcast %117 : vector<1x32xf32> to vector<16x32xf32>
    %1291 = arith.mulf %1274, %1290 : vector<16x32xf32>
    %cst_463 = arith.constant dense<0.000000e+00> : vector<16xf32>
    %1292 = vector.multi_reduction <add>, %1291, %cst_463 [1] : vector<16x32xf32> to vector<16xf32>
    %1293 = vector.shape_cast %1292 : vector<16xf32> to vector<16x1xf32>
    %1294 = tpu.reciprocal %1293 {approx = true} : vector<16x1xf32> -> vector<16x1xf32>
    %1295 = vector.broadcast %1279 : vector<16x1xf32> to vector<16x32xf32>
    %1296 = vector.broadcast %111 : vector<1x32xf32> to vector<16x32xf32>
    %1297 = arith.mulf %1295, %1296 : vector<16x32xf32>
    %cst_464 = arith.constant 0.000000e+00 : f32
    %1298 = vector.broadcast %cst_464 : f32 to vector<16x32xf32>
    %1299 = arith.addf %1298, %1297 : vector<16x32xf32>
    %1300 = vector.broadcast %1284 : vector<16x1xf32> to vector<16x32xf32>
    %1301 = vector.broadcast %113 : vector<1x32xf32> to vector<16x32xf32>
    %1302 = arith.mulf %1300, %1301 : vector<16x32xf32>
    %1303 = arith.addf %1299, %1302 : vector<16x32xf32>
    %1304 = vector.broadcast %1289 : vector<16x1xf32> to vector<16x32xf32>
    %1305 = vector.broadcast %115 : vector<1x32xf32> to vector<16x32xf32>
    %1306 = arith.mulf %1304, %1305 : vector<16x32xf32>
    %1307 = arith.addf %1303, %1306 : vector<16x32xf32>
    %1308 = vector.broadcast %1294 : vector<16x1xf32> to vector<16x32xf32>
    %1309 = vector.broadcast %117 : vector<1x32xf32> to vector<16x32xf32>
    %1310 = arith.mulf %1308, %1309 : vector<16x32xf32>
    %1311 = arith.addf %1307, %1310 : vector<16x32xf32>
    %1312 = arith.mulf %1274, %1311 : vector<16x32xf32>
    %cst_465 = arith.constant dense<0.000000e+00> : vector<16x32xf32>
    %1313 = tpu.matmul %1312, %1228, %cst_465 {dimension_numbers = #tpu.dot_dimension_numbers<[1], [0], [0], [1], [0, 0, 1, 1], [], []>} : vector<16x32xf32>, vector<32x32xf32>, vector<16x32xf32> -> vector<16x32xf32>
    %c6_466 = arith.constant 6 : index
    %c0_467 = arith.constant 0 : index
    %c0_468 = arith.constant 0 : index
    %1314 = vector.load %arg13[%c6_466, %c0_467, %c0_468] : memref<8x32x32xf32, #tpu.memory_space<vmem>>, vector<1x32x32xf32>
    %1315 = vector.shape_cast %1314 : vector<1x32x32xf32> to vector<32x32xf32>
    %cst_469 = arith.constant dense<0.000000e+00> : vector<16x32xf32>
    %1316 = tpu.matmul %1313, %1315, %cst_469 {dimension_numbers = #tpu.dot_dimension_numbers<[1], [1], [0], [0], [0, 0, 1, 0], [], []>} : vector<16x32xf32>, vector<32x32xf32>, vector<16x32xf32> -> vector<16x32xf32>
    %c6_470 = arith.constant 6 : index
    %c0_471 = arith.constant 0 : index
    %c0_472 = arith.constant 0 : index
    %1317 = vector.load %arg14[%c6_470, %c0_471, %c0_472] : memref<8x1x32xf32, #tpu.memory_space<vmem>>, vector<1x1x32xf32>
    %1318 = vector.shape_cast %1317 : vector<1x1x32xf32> to vector<1x32xf32>
    %1319 = vector.broadcast %1318 : vector<1x32xf32> to vector<16x32xf32>
    %1320 = arith.addf %1316, %1319 : vector<16x32xf32>
    %1321 = arith.addf %1165, %1320 : vector<16x32xf32>
    %c12 = arith.constant 12 : index
    %c0_473 = arith.constant 0 : index
    %c0_474 = arith.constant 0 : index
    %1322 = vector.load %arg19[%c12, %c0_473, %c0_474] : memref<16x1x32xf32, #tpu.memory_space<vmem>>, vector<1x1x32xf32>
    %1323 = vector.shape_cast %1322 : vector<1x1x32xf32> to vector<1x32xf32>
    %c12_475 = arith.constant 12 : index
    %c0_476 = arith.constant 0 : index
    %c0_477 = arith.constant 0 : index
    %1324 = vector.load %arg20[%c12_475, %c0_476, %c0_477] : memref<16x1x32xf32, #tpu.memory_space<vmem>>, vector<1x1x32xf32>
    %1325 = vector.shape_cast %1324 : vector<1x1x32xf32> to vector<1x32xf32>
    %cst_478 = arith.constant dense<0.000000e+00> : vector<16xf32>
    %1326 = vector.multi_reduction <add>, %1321, %cst_478 [1] : vector<16x32xf32> to vector<16xf32>
    %1327 = vector.shape_cast %1326 : vector<16xf32> to vector<16x1xf32>
    %cst_479 = arith.constant 3.200000e+01 : f32
    %1328 = vector.broadcast %cst_479 : f32 to vector<16x1xf32>
    %1329 = arith.divf %1327, %1328 : vector<16x1xf32>
    %1330 = vector.broadcast %1329 : vector<16x1xf32> to vector<16x32xf32>
    %1331 = arith.subf %1321, %1330 : vector<16x32xf32>
    %1332 = arith.mulf %1331, %1331 : vector<16x32xf32>
    %cst_480 = arith.constant dense<0.000000e+00> : vector<16xf32>
    %1333 = vector.multi_reduction <add>, %1332, %cst_480 [1] : vector<16x32xf32> to vector<16xf32>
    %1334 = vector.shape_cast %1333 : vector<16xf32> to vector<16x1xf32>
    %cst_481 = arith.constant 3.200000e+01 : f32
    %1335 = vector.broadcast %cst_481 : f32 to vector<16x1xf32>
    %1336 = arith.divf %1334, %1335 : vector<16x1xf32>
    %1337 = vector.broadcast %1329 : vector<16x1xf32> to vector<16x32xf32>
    %1338 = arith.subf %1321, %1337 : vector<16x32xf32>
    %cst_482 = arith.constant 9.99999974E-6 : f32
    %1339 = vector.broadcast %cst_482 : f32 to vector<16x1xf32>
    %1340 = arith.addf %1336, %1339 : vector<16x1xf32>
    %1341 = math.rsqrt %1340 : vector<16x1xf32>
    %1342 = vector.broadcast %1341 : vector<16x1xf32> to vector<16x32xf32>
    %1343 = arith.mulf %1338, %1342 : vector<16x32xf32>
    %1344 = vector.broadcast %1323 : vector<1x32xf32> to vector<16x32xf32>
    %1345 = arith.mulf %1343, %1344 : vector<16x32xf32>
    %1346 = vector.broadcast %1325 : vector<1x32xf32> to vector<16x32xf32>
    %1347 = arith.addf %1345, %1346 : vector<16x32xf32>
    %c7_483 = arith.constant 7 : index
    %c0_484 = arith.constant 0 : index
    %c0_485 = arith.constant 0 : index
    %1348 = vector.load %arg11[%c7_483, %c0_484, %c0_485] : memref<8x96x32xf32, #tpu.memory_space<vmem>>, vector<1x96x32xf32>
    %1349 = vector.shape_cast %1348 : vector<1x96x32xf32> to vector<96x32xf32>
    %c7_486 = arith.constant 7 : index
    %c0_487 = arith.constant 0 : index
    %c0_488 = arith.constant 0 : index
    %1350 = vector.load %arg12[%c7_486, %c0_487, %c0_488] : memref<8x1x96xf32, #tpu.memory_space<vmem>>, vector<1x1x96xf32>
    %1351 = vector.shape_cast %1350 : vector<1x1x96xf32> to vector<1x96xf32>
    %1352 = vector.extract_strided_slice %1349 {offsets = [0, 0], sizes = [32, 32], strides = [1, 1]} : vector<96x32xf32> to vector<32x32xf32>
    %cst_489 = arith.constant dense<0.000000e+00> : vector<8x32xf32>
    %1353 = tpu.matmul %1208, %1352, %cst_489 {dimension_numbers = #tpu.dot_dimension_numbers<[1], [1], [0], [0], [0, 0, 1, 0], [], []>} : vector<8x32xf32>, vector<32x32xf32>, vector<8x32xf32> -> vector<8x32xf32>
    %1354 = vector.extract_strided_slice %1351 {offsets = [0, 0], sizes = [1, 32], strides = [1, 1]} : vector<1x96xf32> to vector<1x32xf32>
    %1355 = vector.broadcast %1354 : vector<1x32xf32> to vector<8x32xf32>
    %1356 = arith.addf %1353, %1355 : vector<8x32xf32>
    %1357 = vector.extract_strided_slice %1349 {offsets = [32, 0], sizes = [64, 32], strides = [1, 1]} : vector<96x32xf32> to vector<64x32xf32>
    %cst_490 = arith.constant dense<0.000000e+00> : vector<16x64xf32>
    %1358 = tpu.matmul %1165, %1357, %cst_490 {dimension_numbers = #tpu.dot_dimension_numbers<[1], [1], [0], [0], [0, 0, 1, 0], [], []>} : vector<16x32xf32>, vector<64x32xf32>, vector<16x64xf32> -> vector<16x64xf32>
    %1359 = vector.extract_strided_slice %1351 {offsets = [0, 32], sizes = [1, 64], strides = [1, 1]} : vector<1x96xf32> to vector<1x64xf32>
    %1360 = vector.broadcast %1359 : vector<1x64xf32> to vector<16x64xf32>
    %1361 = arith.addf %1358, %1360 : vector<16x64xf32>
    %1362 = vector.extract_strided_slice %1361 {offsets = [0, 0], sizes = [16, 32], strides = [1, 1]} : vector<16x64xf32> to vector<16x32xf32>
    %1363 = vector.extract_strided_slice %1361 {offsets = [0, 32], sizes = [16, 32], strides = [1, 1]} : vector<16x64xf32> to vector<16x32xf32>
    %1364 = tpu.concatenate %1362, %1362, %1362, %1362 in 0 : vector<16x32xf32>, vector<16x32xf32>, vector<16x32xf32>, vector<16x32xf32> -> vector<64x32xf32>
    %1365 = arith.mulf %1364, %45 : vector<64x32xf32>
    %1366 = tpu.concatenate %1363, %1363, %1363, %1363 in 0 : vector<16x32xf32>, vector<16x32xf32>, vector<16x32xf32>, vector<16x32xf32> -> vector<64x32xf32>
    %1367 = arith.mulf %1366, %45 : vector<64x32xf32>
    %cst_491 = arith.constant dense<0.000000e+00> : vector<8x64xf32>
    %1368 = tpu.matmul %1356, %1365, %cst_491 {dimension_numbers = #tpu.dot_dimension_numbers<[1], [1], [0], [0], [0, 0, 1, 0], [], []>} : vector<8x32xf32>, vector<64x32xf32>, vector<8x64xf32> -> vector<8x64xf32>
    %1369 = vector.broadcast %79 : vector<1x64xf32> to vector<8x64xf32>
    %1370 = arith.addf %1368, %1369 : vector<8x64xf32>
    %cst_492 = arith.constant -1.000000e+30 : f32
    %1371 = vector.shape_cast %51 : vector<1x64xi1> to vector<1x64xi1>
    %1372 = vector.broadcast %1371 : vector<1x64xi1> to vector<8x64xi1>
    %1373 = vector.broadcast %cst_492 : f32 to vector<8x64xf32>
    %1374 = arith.select %1372, %1370, %1373 : vector<8x64xi1>, vector<8x64xf32>
    %cst_493 = arith.constant dense<0xFF800000> : vector<8xf32>
    %1375 = vector.multi_reduction <maximumf>, %1374, %cst_493 [1] : vector<8x64xf32> to vector<8xf32>
    %1376 = vector.shape_cast %1375 : vector<8xf32> to vector<8x1xf32>
    %cst_494 = arith.constant -1.000000e+30 : f32
    %1377 = vector.shape_cast %56 : vector<1x64xi1> to vector<1x64xi1>
    %1378 = vector.broadcast %1377 : vector<1x64xi1> to vector<8x64xi1>
    %1379 = vector.broadcast %cst_494 : f32 to vector<8x64xf32>
    %1380 = arith.select %1378, %1370, %1379 : vector<8x64xi1>, vector<8x64xf32>
    %cst_495 = arith.constant dense<0xFF800000> : vector<8xf32>
    %1381 = vector.multi_reduction <maximumf>, %1380, %cst_495 [1] : vector<8x64xf32> to vector<8xf32>
    %1382 = vector.shape_cast %1381 : vector<8xf32> to vector<8x1xf32>
    %cst_496 = arith.constant -1.000000e+30 : f32
    %1383 = vector.shape_cast %61 : vector<1x64xi1> to vector<1x64xi1>
    %1384 = vector.broadcast %1383 : vector<1x64xi1> to vector<8x64xi1>
    %1385 = vector.broadcast %cst_496 : f32 to vector<8x64xf32>
    %1386 = arith.select %1384, %1370, %1385 : vector<8x64xi1>, vector<8x64xf32>
    %cst_497 = arith.constant dense<0xFF800000> : vector<8xf32>
    %1387 = vector.multi_reduction <maximumf>, %1386, %cst_497 [1] : vector<8x64xf32> to vector<8xf32>
    %1388 = vector.shape_cast %1387 : vector<8xf32> to vector<8x1xf32>
    %cst_498 = arith.constant -1.000000e+30 : f32
    %1389 = vector.shape_cast %66 : vector<1x64xi1> to vector<1x64xi1>
    %1390 = vector.broadcast %1389 : vector<1x64xi1> to vector<8x64xi1>
    %1391 = vector.broadcast %cst_498 : f32 to vector<8x64xf32>
    %1392 = arith.select %1390, %1370, %1391 : vector<8x64xi1>, vector<8x64xf32>
    %cst_499 = arith.constant dense<0xFF800000> : vector<8xf32>
    %1393 = vector.multi_reduction <maximumf>, %1392, %cst_499 [1] : vector<8x64xf32> to vector<8xf32>
    %1394 = vector.shape_cast %1393 : vector<8xf32> to vector<8x1xf32>
    %1395 = vector.broadcast %1376 : vector<8x1xf32> to vector<8x64xf32>
    %1396 = vector.broadcast %68 : vector<1x64xf32> to vector<8x64xf32>
    %1397 = arith.mulf %1395, %1396 : vector<8x64xf32>
    %cst_500 = arith.constant 0.000000e+00 : f32
    %1398 = vector.broadcast %cst_500 : f32 to vector<8x64xf32>
    %1399 = arith.addf %1398, %1397 : vector<8x64xf32>
    %1400 = vector.broadcast %1382 : vector<8x1xf32> to vector<8x64xf32>
    %1401 = vector.broadcast %70 : vector<1x64xf32> to vector<8x64xf32>
    %1402 = arith.mulf %1400, %1401 : vector<8x64xf32>
    %1403 = arith.addf %1399, %1402 : vector<8x64xf32>
    %1404 = vector.broadcast %1388 : vector<8x1xf32> to vector<8x64xf32>
    %1405 = vector.broadcast %72 : vector<1x64xf32> to vector<8x64xf32>
    %1406 = arith.mulf %1404, %1405 : vector<8x64xf32>
    %1407 = arith.addf %1403, %1406 : vector<8x64xf32>
    %1408 = vector.broadcast %1394 : vector<8x1xf32> to vector<8x64xf32>
    %1409 = vector.broadcast %74 : vector<1x64xf32> to vector<8x64xf32>
    %1410 = arith.mulf %1408, %1409 : vector<8x64xf32>
    %1411 = arith.addf %1407, %1410 : vector<8x64xf32>
    %1412 = arith.subf %1370, %1411 : vector<8x64xf32>
    %1413 = math.exp %1412 : vector<8x64xf32>
    %1414 = vector.broadcast %68 : vector<1x64xf32> to vector<8x64xf32>
    %1415 = arith.mulf %1413, %1414 : vector<8x64xf32>
    %cst_501 = arith.constant dense<0.000000e+00> : vector<8xf32>
    %1416 = vector.multi_reduction <add>, %1415, %cst_501 [1] : vector<8x64xf32> to vector<8xf32>
    %1417 = vector.shape_cast %1416 : vector<8xf32> to vector<8x1xf32>
    %1418 = tpu.reciprocal %1417 {approx = true} : vector<8x1xf32> -> vector<8x1xf32>
    %1419 = vector.broadcast %70 : vector<1x64xf32> to vector<8x64xf32>
    %1420 = arith.mulf %1413, %1419 : vector<8x64xf32>
    %cst_502 = arith.constant dense<0.000000e+00> : vector<8xf32>
    %1421 = vector.multi_reduction <add>, %1420, %cst_502 [1] : vector<8x64xf32> to vector<8xf32>
    %1422 = vector.shape_cast %1421 : vector<8xf32> to vector<8x1xf32>
    %1423 = tpu.reciprocal %1422 {approx = true} : vector<8x1xf32> -> vector<8x1xf32>
    %1424 = vector.broadcast %72 : vector<1x64xf32> to vector<8x64xf32>
    %1425 = arith.mulf %1413, %1424 : vector<8x64xf32>
    %cst_503 = arith.constant dense<0.000000e+00> : vector<8xf32>
    %1426 = vector.multi_reduction <add>, %1425, %cst_503 [1] : vector<8x64xf32> to vector<8xf32>
    %1427 = vector.shape_cast %1426 : vector<8xf32> to vector<8x1xf32>
    %1428 = tpu.reciprocal %1427 {approx = true} : vector<8x1xf32> -> vector<8x1xf32>
    %1429 = vector.broadcast %74 : vector<1x64xf32> to vector<8x64xf32>
    %1430 = arith.mulf %1413, %1429 : vector<8x64xf32>
    %cst_504 = arith.constant dense<0.000000e+00> : vector<8xf32>
    %1431 = vector.multi_reduction <add>, %1430, %cst_504 [1] : vector<8x64xf32> to vector<8xf32>
    %1432 = vector.shape_cast %1431 : vector<8xf32> to vector<8x1xf32>
    %1433 = tpu.reciprocal %1432 {approx = true} : vector<8x1xf32> -> vector<8x1xf32>
    %1434 = vector.broadcast %1418 : vector<8x1xf32> to vector<8x64xf32>
    %1435 = vector.broadcast %68 : vector<1x64xf32> to vector<8x64xf32>
    %1436 = arith.mulf %1434, %1435 : vector<8x64xf32>
    %cst_505 = arith.constant 0.000000e+00 : f32
    %1437 = vector.broadcast %cst_505 : f32 to vector<8x64xf32>
    %1438 = arith.addf %1437, %1436 : vector<8x64xf32>
    %1439 = vector.broadcast %1423 : vector<8x1xf32> to vector<8x64xf32>
    %1440 = vector.broadcast %70 : vector<1x64xf32> to vector<8x64xf32>
    %1441 = arith.mulf %1439, %1440 : vector<8x64xf32>
    %1442 = arith.addf %1438, %1441 : vector<8x64xf32>
    %1443 = vector.broadcast %1428 : vector<8x1xf32> to vector<8x64xf32>
    %1444 = vector.broadcast %72 : vector<1x64xf32> to vector<8x64xf32>
    %1445 = arith.mulf %1443, %1444 : vector<8x64xf32>
    %1446 = arith.addf %1442, %1445 : vector<8x64xf32>
    %1447 = vector.broadcast %1433 : vector<8x1xf32> to vector<8x64xf32>
    %1448 = vector.broadcast %74 : vector<1x64xf32> to vector<8x64xf32>
    %1449 = arith.mulf %1447, %1448 : vector<8x64xf32>
    %1450 = arith.addf %1446, %1449 : vector<8x64xf32>
    %1451 = arith.mulf %1413, %1450 : vector<8x64xf32>
    %cst_506 = arith.constant dense<0.000000e+00> : vector<8x32xf32>
    %1452 = tpu.matmul %1451, %1367, %cst_506 {dimension_numbers = #tpu.dot_dimension_numbers<[1], [0], [0], [1], [0, 0, 1, 1], [], []>} : vector<8x64xf32>, vector<64x32xf32>, vector<8x32xf32> -> vector<8x32xf32>
    %c7_507 = arith.constant 7 : index
    %c0_508 = arith.constant 0 : index
    %c0_509 = arith.constant 0 : index
    %1453 = vector.load %arg13[%c7_507, %c0_508, %c0_509] : memref<8x32x32xf32, #tpu.memory_space<vmem>>, vector<1x32x32xf32>
    %1454 = vector.shape_cast %1453 : vector<1x32x32xf32> to vector<32x32xf32>
    %cst_510 = arith.constant dense<0.000000e+00> : vector<8x32xf32>
    %1455 = tpu.matmul %1452, %1454, %cst_510 {dimension_numbers = #tpu.dot_dimension_numbers<[1], [1], [0], [0], [0, 0, 1, 0], [], []>} : vector<8x32xf32>, vector<32x32xf32>, vector<8x32xf32> -> vector<8x32xf32>
    %c7_511 = arith.constant 7 : index
    %c0_512 = arith.constant 0 : index
    %c0_513 = arith.constant 0 : index
    %1456 = vector.load %arg14[%c7_511, %c0_512, %c0_513] : memref<8x1x32xf32, #tpu.memory_space<vmem>>, vector<1x1x32xf32>
    %1457 = vector.shape_cast %1456 : vector<1x1x32xf32> to vector<1x32xf32>
    %1458 = vector.broadcast %1457 : vector<1x32xf32> to vector<8x32xf32>
    %1459 = arith.addf %1455, %1458 : vector<8x32xf32>
    %1460 = arith.addf %1208, %1459 : vector<8x32xf32>
    %c13 = arith.constant 13 : index
    %c0_514 = arith.constant 0 : index
    %c0_515 = arith.constant 0 : index
    %1461 = vector.load %arg19[%c13, %c0_514, %c0_515] : memref<16x1x32xf32, #tpu.memory_space<vmem>>, vector<1x1x32xf32>
    %1462 = vector.shape_cast %1461 : vector<1x1x32xf32> to vector<1x32xf32>
    %c13_516 = arith.constant 13 : index
    %c0_517 = arith.constant 0 : index
    %c0_518 = arith.constant 0 : index
    %1463 = vector.load %arg20[%c13_516, %c0_517, %c0_518] : memref<16x1x32xf32, #tpu.memory_space<vmem>>, vector<1x1x32xf32>
    %1464 = vector.shape_cast %1463 : vector<1x1x32xf32> to vector<1x32xf32>
    %cst_519 = arith.constant dense<0.000000e+00> : vector<8xf32>
    %1465 = vector.multi_reduction <add>, %1460, %cst_519 [1] : vector<8x32xf32> to vector<8xf32>
    %1466 = vector.shape_cast %1465 : vector<8xf32> to vector<8x1xf32>
    %cst_520 = arith.constant 3.200000e+01 : f32
    %1467 = vector.broadcast %cst_520 : f32 to vector<8x1xf32>
    %1468 = arith.divf %1466, %1467 : vector<8x1xf32>
    %1469 = vector.broadcast %1468 : vector<8x1xf32> to vector<8x32xf32>
    %1470 = arith.subf %1460, %1469 : vector<8x32xf32>
    %1471 = arith.mulf %1470, %1470 : vector<8x32xf32>
    %cst_521 = arith.constant dense<0.000000e+00> : vector<8xf32>
    %1472 = vector.multi_reduction <add>, %1471, %cst_521 [1] : vector<8x32xf32> to vector<8xf32>
    %1473 = vector.shape_cast %1472 : vector<8xf32> to vector<8x1xf32>
    %cst_522 = arith.constant 3.200000e+01 : f32
    %1474 = vector.broadcast %cst_522 : f32 to vector<8x1xf32>
    %1475 = arith.divf %1473, %1474 : vector<8x1xf32>
    %1476 = vector.broadcast %1468 : vector<8x1xf32> to vector<8x32xf32>
    %1477 = arith.subf %1460, %1476 : vector<8x32xf32>
    %cst_523 = arith.constant 9.99999974E-6 : f32
    %1478 = vector.broadcast %cst_523 : f32 to vector<8x1xf32>
    %1479 = arith.addf %1475, %1478 : vector<8x1xf32>
    %1480 = math.rsqrt %1479 : vector<8x1xf32>
    %1481 = vector.broadcast %1480 : vector<8x1xf32> to vector<8x32xf32>
    %1482 = arith.mulf %1477, %1481 : vector<8x32xf32>
    %1483 = vector.broadcast %1462 : vector<1x32xf32> to vector<8x32xf32>
    %1484 = arith.mulf %1482, %1483 : vector<8x32xf32>
    %1485 = vector.broadcast %1464 : vector<1x32xf32> to vector<8x32xf32>
    %1486 = arith.addf %1484, %1485 : vector<8x32xf32>
    %c6_524 = arith.constant 6 : index
    %c0_525 = arith.constant 0 : index
    %c0_526 = arith.constant 0 : index
    %1487 = vector.load %arg15[%c6_524, %c0_525, %c0_526] : memref<8x64x32xf32, #tpu.memory_space<vmem>>, vector<1x64x32xf32>
    %1488 = vector.shape_cast %1487 : vector<1x64x32xf32> to vector<64x32xf32>
    %cst_527 = arith.constant dense<0.000000e+00> : vector<16x64xf32>
    %1489 = tpu.matmul %1347, %1488, %cst_527 {dimension_numbers = #tpu.dot_dimension_numbers<[1], [1], [0], [0], [0, 0, 1, 0], [], []>} : vector<16x32xf32>, vector<64x32xf32>, vector<16x64xf32> -> vector<16x64xf32>
    %c6_528 = arith.constant 6 : index
    %c0_529 = arith.constant 0 : index
    %c0_530 = arith.constant 0 : index
    %1490 = vector.load %arg16[%c6_528, %c0_529, %c0_530] : memref<8x1x64xf32, #tpu.memory_space<vmem>>, vector<1x1x64xf32>
    %1491 = vector.shape_cast %1490 : vector<1x1x64xf32> to vector<1x64xf32>
    %1492 = vector.broadcast %1491 : vector<1x64xf32> to vector<16x64xf32>
    %1493 = arith.addf %1489, %1492 : vector<16x64xf32>
    %cst_531 = arith.constant 0.000000e+00 : f32
    %1494 = vector.broadcast %cst_531 : f32 to vector<16x64xf32>
    %1495 = arith.maximumf %1493, %1494 : vector<16x64xf32>
    %c6_532 = arith.constant 6 : index
    %c0_533 = arith.constant 0 : index
    %c0_534 = arith.constant 0 : index
    %1496 = vector.load %arg17[%c6_532, %c0_533, %c0_534] : memref<8x32x64xf32, #tpu.memory_space<vmem>>, vector<1x32x64xf32>
    %1497 = vector.shape_cast %1496 : vector<1x32x64xf32> to vector<32x64xf32>
    %cst_535 = arith.constant dense<0.000000e+00> : vector<16x32xf32>
    %1498 = tpu.matmul %1495, %1497, %cst_535 {dimension_numbers = #tpu.dot_dimension_numbers<[1], [1], [0], [0], [0, 0, 1, 0], [], []>} : vector<16x64xf32>, vector<32x64xf32>, vector<16x32xf32> -> vector<16x32xf32>
    %c6_536 = arith.constant 6 : index
    %c0_537 = arith.constant 0 : index
    %c0_538 = arith.constant 0 : index
    %1499 = vector.load %arg18[%c6_536, %c0_537, %c0_538] : memref<8x1x32xf32, #tpu.memory_space<vmem>>, vector<1x1x32xf32>
    %1500 = vector.shape_cast %1499 : vector<1x1x32xf32> to vector<1x32xf32>
    %1501 = vector.broadcast %1500 : vector<1x32xf32> to vector<16x32xf32>
    %1502 = arith.addf %1498, %1501 : vector<16x32xf32>
    %1503 = arith.addf %1347, %1502 : vector<16x32xf32>
    %c14 = arith.constant 14 : index
    %c0_539 = arith.constant 0 : index
    %c0_540 = arith.constant 0 : index
    %1504 = vector.load %arg19[%c14, %c0_539, %c0_540] : memref<16x1x32xf32, #tpu.memory_space<vmem>>, vector<1x1x32xf32>
    %1505 = vector.shape_cast %1504 : vector<1x1x32xf32> to vector<1x32xf32>
    %c14_541 = arith.constant 14 : index
    %c0_542 = arith.constant 0 : index
    %c0_543 = arith.constant 0 : index
    %1506 = vector.load %arg20[%c14_541, %c0_542, %c0_543] : memref<16x1x32xf32, #tpu.memory_space<vmem>>, vector<1x1x32xf32>
    %1507 = vector.shape_cast %1506 : vector<1x1x32xf32> to vector<1x32xf32>
    %cst_544 = arith.constant dense<0.000000e+00> : vector<16xf32>
    %1508 = vector.multi_reduction <add>, %1503, %cst_544 [1] : vector<16x32xf32> to vector<16xf32>
    %1509 = vector.shape_cast %1508 : vector<16xf32> to vector<16x1xf32>
    %cst_545 = arith.constant 3.200000e+01 : f32
    %1510 = vector.broadcast %cst_545 : f32 to vector<16x1xf32>
    %1511 = arith.divf %1509, %1510 : vector<16x1xf32>
    %1512 = vector.broadcast %1511 : vector<16x1xf32> to vector<16x32xf32>
    %1513 = arith.subf %1503, %1512 : vector<16x32xf32>
    %1514 = arith.mulf %1513, %1513 : vector<16x32xf32>
    %cst_546 = arith.constant dense<0.000000e+00> : vector<16xf32>
    %1515 = vector.multi_reduction <add>, %1514, %cst_546 [1] : vector<16x32xf32> to vector<16xf32>
    %1516 = vector.shape_cast %1515 : vector<16xf32> to vector<16x1xf32>
    %cst_547 = arith.constant 3.200000e+01 : f32
    %1517 = vector.broadcast %cst_547 : f32 to vector<16x1xf32>
    %1518 = arith.divf %1516, %1517 : vector<16x1xf32>
    %1519 = vector.broadcast %1511 : vector<16x1xf32> to vector<16x32xf32>
    %1520 = arith.subf %1503, %1519 : vector<16x32xf32>
    %cst_548 = arith.constant 9.99999974E-6 : f32
    %1521 = vector.broadcast %cst_548 : f32 to vector<16x1xf32>
    %1522 = arith.addf %1518, %1521 : vector<16x1xf32>
    %1523 = math.rsqrt %1522 : vector<16x1xf32>
    %1524 = vector.broadcast %1523 : vector<16x1xf32> to vector<16x32xf32>
    %1525 = arith.mulf %1520, %1524 : vector<16x32xf32>
    %1526 = vector.broadcast %1505 : vector<1x32xf32> to vector<16x32xf32>
    %1527 = arith.mulf %1525, %1526 : vector<16x32xf32>
    %1528 = vector.broadcast %1507 : vector<1x32xf32> to vector<16x32xf32>
    %1529 = arith.addf %1527, %1528 : vector<16x32xf32>
    %c7_549 = arith.constant 7 : index
    %c0_550 = arith.constant 0 : index
    %c0_551 = arith.constant 0 : index
    %1530 = vector.load %arg15[%c7_549, %c0_550, %c0_551] : memref<8x64x32xf32, #tpu.memory_space<vmem>>, vector<1x64x32xf32>
    %1531 = vector.shape_cast %1530 : vector<1x64x32xf32> to vector<64x32xf32>
    %cst_552 = arith.constant dense<0.000000e+00> : vector<8x64xf32>
    %1532 = tpu.matmul %1486, %1531, %cst_552 {dimension_numbers = #tpu.dot_dimension_numbers<[1], [1], [0], [0], [0, 0, 1, 0], [], []>} : vector<8x32xf32>, vector<64x32xf32>, vector<8x64xf32> -> vector<8x64xf32>
    %c7_553 = arith.constant 7 : index
    %c0_554 = arith.constant 0 : index
    %c0_555 = arith.constant 0 : index
    %1533 = vector.load %arg16[%c7_553, %c0_554, %c0_555] : memref<8x1x64xf32, #tpu.memory_space<vmem>>, vector<1x1x64xf32>
    %1534 = vector.shape_cast %1533 : vector<1x1x64xf32> to vector<1x64xf32>
    %1535 = vector.broadcast %1534 : vector<1x64xf32> to vector<8x64xf32>
    %1536 = arith.addf %1532, %1535 : vector<8x64xf32>
    %cst_556 = arith.constant 0.000000e+00 : f32
    %1537 = vector.broadcast %cst_556 : f32 to vector<8x64xf32>
    %1538 = arith.maximumf %1536, %1537 : vector<8x64xf32>
    %c7_557 = arith.constant 7 : index
    %c0_558 = arith.constant 0 : index
    %c0_559 = arith.constant 0 : index
    %1539 = vector.load %arg17[%c7_557, %c0_558, %c0_559] : memref<8x32x64xf32, #tpu.memory_space<vmem>>, vector<1x32x64xf32>
    %1540 = vector.shape_cast %1539 : vector<1x32x64xf32> to vector<32x64xf32>
    %cst_560 = arith.constant dense<0.000000e+00> : vector<8x32xf32>
    %1541 = tpu.matmul %1538, %1540, %cst_560 {dimension_numbers = #tpu.dot_dimension_numbers<[1], [1], [0], [0], [0, 0, 1, 0], [], []>} : vector<8x64xf32>, vector<32x64xf32>, vector<8x32xf32> -> vector<8x32xf32>
    %c7_561 = arith.constant 7 : index
    %c0_562 = arith.constant 0 : index
    %c0_563 = arith.constant 0 : index
    %1542 = vector.load %arg18[%c7_561, %c0_562, %c0_563] : memref<8x1x32xf32, #tpu.memory_space<vmem>>, vector<1x1x32xf32>
    %1543 = vector.shape_cast %1542 : vector<1x1x32xf32> to vector<1x32xf32>
    %1544 = vector.broadcast %1543 : vector<1x32xf32> to vector<8x32xf32>
    %1545 = arith.addf %1541, %1544 : vector<8x32xf32>
    %1546 = arith.addf %1486, %1545 : vector<8x32xf32>
    %c15 = arith.constant 15 : index
    %c0_564 = arith.constant 0 : index
    %c0_565 = arith.constant 0 : index
    %1547 = vector.load %arg19[%c15, %c0_564, %c0_565] : memref<16x1x32xf32, #tpu.memory_space<vmem>>, vector<1x1x32xf32>
    %1548 = vector.shape_cast %1547 : vector<1x1x32xf32> to vector<1x32xf32>
    %c15_566 = arith.constant 15 : index
    %c0_567 = arith.constant 0 : index
    %c0_568 = arith.constant 0 : index
    %1549 = vector.load %arg20[%c15_566, %c0_567, %c0_568] : memref<16x1x32xf32, #tpu.memory_space<vmem>>, vector<1x1x32xf32>
    %1550 = vector.shape_cast %1549 : vector<1x1x32xf32> to vector<1x32xf32>
    %cst_569 = arith.constant dense<0.000000e+00> : vector<8xf32>
    %1551 = vector.multi_reduction <add>, %1546, %cst_569 [1] : vector<8x32xf32> to vector<8xf32>
    %1552 = vector.shape_cast %1551 : vector<8xf32> to vector<8x1xf32>
    %cst_570 = arith.constant 3.200000e+01 : f32
    %1553 = vector.broadcast %cst_570 : f32 to vector<8x1xf32>
    %1554 = arith.divf %1552, %1553 : vector<8x1xf32>
    %1555 = vector.broadcast %1554 : vector<8x1xf32> to vector<8x32xf32>
    %1556 = arith.subf %1546, %1555 : vector<8x32xf32>
    %1557 = arith.mulf %1556, %1556 : vector<8x32xf32>
    %cst_571 = arith.constant dense<0.000000e+00> : vector<8xf32>
    %1558 = vector.multi_reduction <add>, %1557, %cst_571 [1] : vector<8x32xf32> to vector<8xf32>
    %1559 = vector.shape_cast %1558 : vector<8xf32> to vector<8x1xf32>
    %cst_572 = arith.constant 3.200000e+01 : f32
    %1560 = vector.broadcast %cst_572 : f32 to vector<8x1xf32>
    %1561 = arith.divf %1559, %1560 : vector<8x1xf32>
    %1562 = vector.broadcast %1554 : vector<8x1xf32> to vector<8x32xf32>
    %1563 = arith.subf %1546, %1562 : vector<8x32xf32>
    %cst_573 = arith.constant 9.99999974E-6 : f32
    %1564 = vector.broadcast %cst_573 : f32 to vector<8x1xf32>
    %1565 = arith.addf %1561, %1564 : vector<8x1xf32>
    %1566 = math.rsqrt %1565 : vector<8x1xf32>
    %1567 = vector.broadcast %1566 : vector<8x1xf32> to vector<8x32xf32>
    %1568 = arith.mulf %1563, %1567 : vector<8x32xf32>
    %1569 = vector.broadcast %1548 : vector<1x32xf32> to vector<8x32xf32>
    %1570 = arith.mulf %1568, %1569 : vector<8x32xf32>
    %1571 = vector.broadcast %1550 : vector<1x32xf32> to vector<8x32xf32>
    %1572 = arith.addf %1570, %1571 : vector<8x32xf32>
    %c0_574 = arith.constant 0 : index
    %c0_575 = arith.constant 0 : index
    %1573 = vector.load %arg21[%c0_574, %c0_575] : memref<1x32xf32, #tpu.memory_space<vmem>>, vector<1x32xf32>
    %c0_576 = arith.constant 0 : index
    %c0_577 = arith.constant 0 : index
    %1574 = vector.load %arg22[%c0_576, %c0_577] : memref<1x32xf32, #tpu.memory_space<vmem>>, vector<1x32xf32>
    %cst_578 = arith.constant dense<0.000000e+00> : vector<16xf32>
    %1575 = vector.multi_reduction <add>, %1529, %cst_578 [1] : vector<16x32xf32> to vector<16xf32>
    %1576 = vector.shape_cast %1575 : vector<16xf32> to vector<16x1xf32>
    %cst_579 = arith.constant 3.200000e+01 : f32
    %1577 = vector.broadcast %cst_579 : f32 to vector<16x1xf32>
    %1578 = arith.divf %1576, %1577 : vector<16x1xf32>
    %1579 = vector.broadcast %1578 : vector<16x1xf32> to vector<16x32xf32>
    %1580 = arith.subf %1529, %1579 : vector<16x32xf32>
    %1581 = arith.mulf %1580, %1580 : vector<16x32xf32>
    %cst_580 = arith.constant dense<0.000000e+00> : vector<16xf32>
    %1582 = vector.multi_reduction <add>, %1581, %cst_580 [1] : vector<16x32xf32> to vector<16xf32>
    %1583 = vector.shape_cast %1582 : vector<16xf32> to vector<16x1xf32>
    %cst_581 = arith.constant 3.200000e+01 : f32
    %1584 = vector.broadcast %cst_581 : f32 to vector<16x1xf32>
    %1585 = arith.divf %1583, %1584 : vector<16x1xf32>
    %1586 = vector.broadcast %1578 : vector<16x1xf32> to vector<16x32xf32>
    %1587 = arith.subf %1529, %1586 : vector<16x32xf32>
    %cst_582 = arith.constant 9.99999974E-6 : f32
    %1588 = vector.broadcast %cst_582 : f32 to vector<16x1xf32>
    %1589 = arith.addf %1585, %1588 : vector<16x1xf32>
    %1590 = math.rsqrt %1589 : vector<16x1xf32>
    %1591 = vector.broadcast %1590 : vector<16x1xf32> to vector<16x32xf32>
    %1592 = arith.mulf %1587, %1591 : vector<16x32xf32>
    %1593 = vector.broadcast %1573 : vector<1x32xf32> to vector<16x32xf32>
    %1594 = arith.mulf %1592, %1593 : vector<16x32xf32>
    %1595 = vector.broadcast %1574 : vector<1x32xf32> to vector<16x32xf32>
    %1596 = arith.addf %1594, %1595 : vector<16x32xf32>
    %c0_583 = arith.constant 0 : index
    %c0_584 = arith.constant 0 : index
    %1597 = vector.load %arg21[%c0_583, %c0_584] : memref<1x32xf32, #tpu.memory_space<vmem>>, vector<1x32xf32>
    %c0_585 = arith.constant 0 : index
    %c0_586 = arith.constant 0 : index
    %1598 = vector.load %arg22[%c0_585, %c0_586] : memref<1x32xf32, #tpu.memory_space<vmem>>, vector<1x32xf32>
    %cst_587 = arith.constant dense<0.000000e+00> : vector<8xf32>
    %1599 = vector.multi_reduction <add>, %1572, %cst_587 [1] : vector<8x32xf32> to vector<8xf32>
    %1600 = vector.shape_cast %1599 : vector<8xf32> to vector<8x1xf32>
    %cst_588 = arith.constant 3.200000e+01 : f32
    %1601 = vector.broadcast %cst_588 : f32 to vector<8x1xf32>
    %1602 = arith.divf %1600, %1601 : vector<8x1xf32>
    %1603 = vector.broadcast %1602 : vector<8x1xf32> to vector<8x32xf32>
    %1604 = arith.subf %1572, %1603 : vector<8x32xf32>
    %1605 = arith.mulf %1604, %1604 : vector<8x32xf32>
    %cst_589 = arith.constant dense<0.000000e+00> : vector<8xf32>
    %1606 = vector.multi_reduction <add>, %1605, %cst_589 [1] : vector<8x32xf32> to vector<8xf32>
    %1607 = vector.shape_cast %1606 : vector<8xf32> to vector<8x1xf32>
    %cst_590 = arith.constant 3.200000e+01 : f32
    %1608 = vector.broadcast %cst_590 : f32 to vector<8x1xf32>
    %1609 = arith.divf %1607, %1608 : vector<8x1xf32>
    %1610 = vector.broadcast %1602 : vector<8x1xf32> to vector<8x32xf32>
    %1611 = arith.subf %1572, %1610 : vector<8x32xf32>
    %cst_591 = arith.constant 9.99999974E-6 : f32
    %1612 = vector.broadcast %cst_591 : f32 to vector<8x1xf32>
    %1613 = arith.addf %1609, %1612 : vector<8x1xf32>
    %1614 = math.rsqrt %1613 : vector<8x1xf32>
    %1615 = vector.broadcast %1614 : vector<8x1xf32> to vector<8x32xf32>
    %1616 = arith.mulf %1611, %1615 : vector<8x32xf32>
    %1617 = vector.broadcast %1597 : vector<1x32xf32> to vector<8x32xf32>
    %1618 = arith.mulf %1616, %1617 : vector<8x32xf32>
    %1619 = vector.broadcast %1598 : vector<1x32xf32> to vector<8x32xf32>
    %1620 = arith.addf %1618, %1619 : vector<8x32xf32>
    %c0_592 = arith.constant 0 : index
    %c0_593 = arith.constant 0 : index
    %1621 = vector.load %arg23[%c0_592, %c0_593] : memref<64x32xf32, #tpu.memory_space<vmem>>, vector<64x32xf32>
    %cst_594 = arith.constant dense<0.000000e+00> : vector<16x64xf32>
    %1622 = tpu.matmul %1596, %1621, %cst_594 {dimension_numbers = #tpu.dot_dimension_numbers<[1], [1], [0], [0], [0, 0, 1, 0], [], []>} : vector<16x32xf32>, vector<64x32xf32>, vector<16x64xf32> -> vector<16x64xf32>
    %c0_595 = arith.constant 0 : index
    %c0_596 = arith.constant 0 : index
    %1623 = vector.load %arg24[%c0_595, %c0_596] : memref<1x64xf32, #tpu.memory_space<vmem>>, vector<1x64xf32>
    %1624 = vector.broadcast %1623 : vector<1x64xf32> to vector<16x64xf32>
    %1625 = arith.addf %1622, %1624 : vector<16x64xf32>
    %cst_597 = arith.constant 0.000000e+00 : f32
    %1626 = vector.broadcast %cst_597 : f32 to vector<16x64xf32>
    %1627 = arith.maximumf %1625, %1626 : vector<16x64xf32>
    %c0_598 = arith.constant 0 : index
    %c0_599 = arith.constant 0 : index
    %1628 = vector.load %arg25[%c0_598, %c0_599] : memref<64x32xf32, #tpu.memory_space<vmem>>, vector<64x32xf32>
    %cst_600 = arith.constant dense<0.000000e+00> : vector<8x64xf32>
    %1629 = tpu.matmul %1620, %1628, %cst_600 {dimension_numbers = #tpu.dot_dimension_numbers<[1], [1], [0], [0], [0, 0, 1, 0], [], []>} : vector<8x32xf32>, vector<64x32xf32>, vector<8x64xf32> -> vector<8x64xf32>
    %c0_601 = arith.constant 0 : index
    %c0_602 = arith.constant 0 : index
    %1630 = vector.load %arg26[%c0_601, %c0_602] : memref<1x64xf32, #tpu.memory_space<vmem>>, vector<1x64xf32>
    %1631 = vector.broadcast %1630 : vector<1x64xf32> to vector<8x64xf32>
    %1632 = arith.addf %1629, %1631 : vector<8x64xf32>
    %cst_603 = arith.constant 0.000000e+00 : f32
    %1633 = vector.broadcast %cst_603 : f32 to vector<8x64xf32>
    %1634 = arith.maximumf %1632, %1633 : vector<8x64xf32>
    %1635 = vector.extract_strided_slice %1627 {offsets = [0, 0], sizes = [16, 32], strides = [1, 1]} : vector<16x64xf32> to vector<16x32xf32>
    %1636 = vector.extract_strided_slice %1627 {offsets = [0, 32], sizes = [16, 32], strides = [1, 1]} : vector<16x64xf32> to vector<16x32xf32>
    %1637 = vector.extract_strided_slice %1634 {offsets = [0, 0], sizes = [8, 32], strides = [1, 1]} : vector<8x64xf32> to vector<8x32xf32>
    %1638 = vector.extract_strided_slice %1634 {offsets = [0, 32], sizes = [8, 32], strides = [1, 1]} : vector<8x64xf32> to vector<8x32xf32>
    %1639 = arith.mulf %1635, %1635 : vector<16x32xf32>
    %cst_604 = arith.constant dense<0.000000e+00> : vector<16xf32>
    %1640 = vector.multi_reduction <add>, %1639, %cst_604 [1] : vector<16x32xf32> to vector<16xf32>
    %1641 = vector.shape_cast %1640 : vector<16xf32> to vector<16x1xf32>
    %1642 = math.sqrt %1641 : vector<16x1xf32>
    %cst_605 = arith.constant dense<0xFF800000> : vector<1xf32>
    %1643 = vector.multi_reduction <maximumf>, %1642, %cst_605 [0] : vector<16x1xf32> to vector<1xf32>
    %1644 = vector.shape_cast %1643 : vector<1xf32> to vector<1x1xf32>
    %1645 = vector.broadcast %1644 : vector<1x1xf32> to vector<16x1xf32>
    %1646 = arith.subf %1642, %1645 : vector<16x1xf32>
    %1647 = math.exp %1646 : vector<16x1xf32>
    %1648 = arith.mulf %1647, %5 : vector<16x1xf32>
    %cst_606 = arith.constant dense<0.000000e+00> : vector<1xf32>
    %1649 = vector.multi_reduction <add>, %1648, %cst_606 [0] : vector<16x1xf32> to vector<1xf32>
    %1650 = vector.shape_cast %1649 : vector<1xf32> to vector<1x1xf32>
    %cst_607 = arith.constant 9.99999997E-7 : f32
    %1651 = vector.broadcast %cst_607 : f32 to vector<1x1xf32>
    %1652 = arith.addf %1650, %1651 : vector<1x1xf32>
    %1653 = vector.broadcast %1652 : vector<1x1xf32> to vector<16x1xf32>
    %1654 = arith.divf %1648, %1653 : vector<16x1xf32>
    %1655 = arith.mulf %1637, %1637 : vector<8x32xf32>
    %cst_608 = arith.constant dense<0.000000e+00> : vector<8xf32>
    %1656 = vector.multi_reduction <add>, %1655, %cst_608 [1] : vector<8x32xf32> to vector<8xf32>
    %1657 = vector.shape_cast %1656 : vector<8xf32> to vector<8x1xf32>
    %1658 = math.sqrt %1657 : vector<8x1xf32>
    %cst_609 = arith.constant dense<0xFF800000> : vector<1xf32>
    %1659 = vector.multi_reduction <maximumf>, %1658, %cst_609 [0] : vector<8x1xf32> to vector<1xf32>
    %1660 = vector.shape_cast %1659 : vector<1xf32> to vector<1x1xf32>
    %1661 = vector.broadcast %1660 : vector<1x1xf32> to vector<8x1xf32>
    %1662 = arith.subf %1658, %1661 : vector<8x1xf32>
    %1663 = math.exp %1662 : vector<8x1xf32>
    %1664 = arith.mulf %1663, %7 : vector<8x1xf32>
    %cst_610 = arith.constant dense<0.000000e+00> : vector<1xf32>
    %1665 = vector.multi_reduction <add>, %1664, %cst_610 [0] : vector<8x1xf32> to vector<1xf32>
    %1666 = vector.shape_cast %1665 : vector<1xf32> to vector<1x1xf32>
    %cst_611 = arith.constant 9.99999997E-7 : f32
    %1667 = vector.broadcast %cst_611 : f32 to vector<1x1xf32>
    %1668 = arith.addf %1666, %1667 : vector<1x1xf32>
    %1669 = vector.broadcast %1668 : vector<1x1xf32> to vector<8x1xf32>
    %1670 = arith.divf %1664, %1669 : vector<8x1xf32>
    %1671 = vector.broadcast %1654 : vector<16x1xf32> to vector<16x32xf32>
    %1672 = arith.mulf %1635, %1671 : vector<16x32xf32>
    %cst_612 = arith.constant dense<0.000000e+00> : vector<32xf32>
    %1673 = vector.multi_reduction <add>, %1672, %cst_612 [0] : vector<16x32xf32> to vector<32xf32>
    %1674 = vector.shape_cast %1673 : vector<32xf32> to vector<1x32xf32>
    %1675 = vector.broadcast %1670 : vector<8x1xf32> to vector<8x32xf32>
    %1676 = arith.mulf %1637, %1675 : vector<8x32xf32>
    %cst_613 = arith.constant dense<0.000000e+00> : vector<32xf32>
    %1677 = vector.multi_reduction <add>, %1676, %cst_613 [0] : vector<8x32xf32> to vector<32xf32>
    %1678 = vector.shape_cast %1677 : vector<32xf32> to vector<1x32xf32>
    %cst_614 = arith.constant 0.000000e+00 : f32
    %1679 = vector.broadcast %cst_614 : f32 to vector<1x32xf32>
    %1680 = arith.maximumf %1678, %1679 : vector<1x32xf32>
    %cst_615 = arith.constant 0.000000e+00 : f32
    %1681 = vector.broadcast %cst_615 : f32 to vector<1x32xf32>
    %1682 = arith.subf %1681, %1678 : vector<1x32xf32>
    %cst_616 = arith.constant 0.000000e+00 : f32
    %1683 = vector.broadcast %cst_616 : f32 to vector<1x32xf32>
    %1684 = arith.maximumf %1682, %1683 : vector<1x32xf32>
    %cst_617 = arith.constant 0.000000e+00 : f32
    %1685 = vector.broadcast %cst_617 : f32 to vector<1x32xf32>
    %1686 = arith.maximumf %1674, %1685 : vector<1x32xf32>
    %cst_618 = arith.constant 0.000000e+00 : f32
    %1687 = vector.broadcast %cst_618 : f32 to vector<1x32xf32>
    %1688 = arith.subf %1687, %1674 : vector<1x32xf32>
    %cst_619 = arith.constant 0.000000e+00 : f32
    %1689 = vector.broadcast %cst_619 : f32 to vector<1x32xf32>
    %1690 = arith.maximumf %1688, %1689 : vector<1x32xf32>
    %c0_620 = arith.constant 0 : index
    %c0_621 = arith.constant 0 : index
    %1691 = vector.load %arg27[%c0_620, %c0_621] : memref<32x32xf32, #tpu.memory_space<vmem>>, vector<32x32xf32>
    %cst_622 = arith.constant dense<0.000000e+00> : vector<1x32xf32>
    %1692 = tpu.matmul %1686, %1691, %cst_622 {dimension_numbers = #tpu.dot_dimension_numbers<[1], [1], [0], [0], [0, 0, 1, 0], [], []>} : vector<1x32xf32>, vector<32x32xf32>, vector<1x32xf32> -> vector<1x32xf32>
    %1693 = arith.mulf %1680, %1692 : vector<1x32xf32>
    %cst_623 = arith.constant dense<0.000000e+00> : vector<1xf32>
    %1694 = vector.multi_reduction <add>, %1693, %cst_623 [1] : vector<1x32xf32> to vector<1xf32>
    %1695 = vector.shape_cast %1694 : vector<1xf32> to vector<1x1xf32>
    %cst_624 = arith.constant dense<0.000000e+00> : vector<1x32xf32>
    %1696 = tpu.matmul %1690, %1691, %cst_624 {dimension_numbers = #tpu.dot_dimension_numbers<[1], [1], [0], [0], [0, 0, 1, 0], [], []>} : vector<1x32xf32>, vector<32x32xf32>, vector<1x32xf32> -> vector<1x32xf32>
    %1697 = arith.mulf %1684, %1696 : vector<1x32xf32>
    %cst_625 = arith.constant dense<0.000000e+00> : vector<1xf32>
    %1698 = vector.multi_reduction <add>, %1697, %cst_625 [1] : vector<1x32xf32> to vector<1xf32>
    %1699 = vector.shape_cast %1698 : vector<1xf32> to vector<1x1xf32>
    %1700 = arith.addf %1695, %1699 : vector<1x1xf32>
    %c0_626 = arith.constant 0 : index
    %c0_627 = arith.constant 0 : index
    %1701 = vector.load %arg28[%c0_626, %c0_627] : memref<1x1xf32, #tpu.memory_space<vmem>>, vector<1x1xf32>
    %1702 = arith.addf %1700, %1701 : vector<1x1xf32>
    %c0_628 = arith.constant 0 : index
    %c0_629 = arith.constant 0 : index
    %c0_630 = arith.constant 0 : index
    %1703 = vector.load %arg29[%c0_628, %c0_629, %c0_630] : memref<1x1x1xf32, #tpu.memory_space<vmem>>, vector<1x1x1xf32>
    %1704 = vector.shape_cast %1703 : vector<1x1x1xf32> to vector<1x1xf32>
    %1705 = vector.shape_cast %1702 : vector<1x1xf32> to vector<1x1x1xf32>
    tpu.vector_store %arg29[%c0_628, %c0_629, %c0_630], %1705 {strides = array<i32>} : memref<1x1x1xf32, #tpu.memory_space<vmem>>, vector<1x1x1xf32>,
    %cst_631 = arith.constant dense<0.000000e+00> : vector<8x16xf32>
    %1706 = tpu.matmul %1638, %1636, %cst_631 {dimension_numbers = #tpu.dot_dimension_numbers<[1], [1], [0], [0], [0, 0, 1, 0], [], []>} : vector<8x32xf32>, vector<16x32xf32>, vector<8x16xf32> -> vector<8x16xf32>
    %1707 = arith.negf %1706 : vector<8x16xf32>
    %1708 = math.exp %1707 : vector<8x16xf32>
    %cst_632 = arith.constant 1.000000e+00 : f32
    %1709 = vector.broadcast %cst_632 : f32 to vector<8x16xf32>
    %1710 = arith.addf %1709, %1708 : vector<8x16xf32>
    %1711 = arith.divf %1709, %1710 : vector<8x16xf32>
    %1712 = vector.broadcast %7 : vector<8x1xf32> to vector<8x16xf32>
    %1713 = vector.broadcast %1 : vector<1x16xf32> to vector<8x16xf32>
    %1714 = arith.mulf %1712, %1713 : vector<8x16xf32>
    %1715 = arith.mulf %1711, %1714 : vector<8x16xf32>
    %c0_633 = arith.constant 0 : index
    %c0_634 = arith.constant 0 : index
    %c0_635 = arith.constant 0 : index
    %1716 = vector.load %arg30[%c0_633, %c0_634, %c0_635] : memref<1x8x16xf32, #tpu.memory_space<vmem>>, vector<1x8x16xf32>
    %1717 = vector.shape_cast %1716 : vector<1x8x16xf32> to vector<8x16xf32>
    %1718 = vector.shape_cast %1715 : vector<8x16xf32> to vector<1x8x16xf32>
    tpu.vector_store %arg30[%c0_633, %c0_634, %c0_635], %1718 {strides = array<i32>} : memref<1x8x16xf32, #tpu.memory_space<vmem>>, vector<1x8x16xf32>,
    return
  }
  func.func @transform_0(%arg0: i32) -> (i32, i32, i32) {
    %c0_i32 = arith.constant 0 : i32
    %c0_i32_0 = arith.constant 0 : i32
    %c0_i32_1 = arith.constant 0 : i32
    return %arg0, %c0_i32, %c0_i32_0 : i32, i32, i32
  }
  func.func @transform_1(%arg0: i32) -> (i32, i32, i32) {
    %c0_i32 = arith.constant 0 : i32
    %c0_i32_0 = arith.constant 0 : i32
    %c0_i32_1 = arith.constant 0 : i32
    return %arg0, %c0_i32, %c0_i32_0 : i32, i32, i32
  }
  func.func @transform_2(%arg0: i32) -> (i32, i32, i32) {
    %c0_i32 = arith.constant 0 : i32
    %c0_i32_0 = arith.constant 0 : i32
    %c0_i32_1 = arith.constant 0 : i32
    return %arg0, %c0_i32, %c0_i32_0 : i32, i32, i32
  }
  func.func @transform_3(%arg0: i32) -> (i32, i32, i32) {
    %c0_i32 = arith.constant 0 : i32
    %c0_i32_0 = arith.constant 0 : i32
    %c0_i32_1 = arith.constant 0 : i32
    return %arg0, %c0_i32, %c0_i32_0 : i32, i32, i32
  }
  func.func @transform_4(%arg0: i32) -> (i32, i32, i32) {
    %c0_i32 = arith.constant 0 : i32
    %c0_i32_0 = arith.constant 0 : i32
    %c0_i32_1 = arith.constant 0 : i32
    return %arg0, %c0_i32, %c0_i32_0 : i32, i32, i32
  }
  func.func @transform_5(%arg0: i32) -> (i32, i32, i32) {
    %c0_i32 = arith.constant 0 : i32
    %c0_i32_0 = arith.constant 0 : i32
    %c0_i32_1 = arith.constant 0 : i32
    return %arg0, %c0_i32, %c0_i32_0 : i32, i32, i32
  }
  func.func @transform_6(%arg0: i32) -> (i32, i32) {
    %c0_i32 = arith.constant 0 : i32
    %c0_i32_0 = arith.constant 0 : i32
    %c0_i32_1 = arith.constant 0 : i32
    return %c0_i32, %c0_i32_0 : i32, i32
  }
  func.func @transform_7(%arg0: i32) -> (i32, i32) {
    %c0_i32 = arith.constant 0 : i32
    %c0_i32_0 = arith.constant 0 : i32
    %c0_i32_1 = arith.constant 0 : i32
    return %c0_i32, %c0_i32_0 : i32, i32
  }
  func.func @transform_8(%arg0: i32) -> (i32, i32) {
    %c0_i32 = arith.constant 0 : i32
    %c0_i32_0 = arith.constant 0 : i32
    %c0_i32_1 = arith.constant 0 : i32
    return %c0_i32, %c0_i32_0 : i32, i32
  }
  func.func @transform_9(%arg0: i32) -> (i32, i32) {
    %c0_i32 = arith.constant 0 : i32
    %c0_i32_0 = arith.constant 0 : i32
    %c0_i32_1 = arith.constant 0 : i32
    return %c0_i32, %c0_i32_0 : i32, i32
  }
  func.func @transform_10(%arg0: i32) -> (i32, i32, i32) {
    %c0_i32 = arith.constant 0 : i32
    %c0_i32_0 = arith.constant 0 : i32
    %c0_i32_1 = arith.constant 0 : i32
    %c0_i32_2 = arith.constant 0 : i32
    return %c0_i32, %c0_i32_0, %c0_i32_1 : i32, i32, i32
  }
  func.func @transform_11(%arg0: i32) -> (i32, i32, i32) {
    %c0_i32 = arith.constant 0 : i32
    %c0_i32_0 = arith.constant 0 : i32
    %c0_i32_1 = arith.constant 0 : i32
    %c0_i32_2 = arith.constant 0 : i32
    return %c0_i32, %c0_i32_0, %c0_i32_1 : i32, i32, i32
  }
  func.func @transform_12(%arg0: i32) -> (i32, i32, i32) {
    %c0_i32 = arith.constant 0 : i32
    %c0_i32_0 = arith.constant 0 : i32
    %c0_i32_1 = arith.constant 0 : i32
    %c0_i32_2 = arith.constant 0 : i32
    return %c0_i32, %c0_i32_0, %c0_i32_1 : i32, i32, i32
  }
  func.func @transform_13(%arg0: i32) -> (i32, i32, i32) {
    %c0_i32 = arith.constant 0 : i32
    %c0_i32_0 = arith.constant 0 : i32
    %c0_i32_1 = arith.constant 0 : i32
    %c0_i32_2 = arith.constant 0 : i32
    return %c0_i32, %c0_i32_0, %c0_i32_1 : i32, i32, i32
  }
  func.func @transform_14(%arg0: i32) -> (i32, i32, i32) {
    %c0_i32 = arith.constant 0 : i32
    %c0_i32_0 = arith.constant 0 : i32
    %c0_i32_1 = arith.constant 0 : i32
    %c0_i32_2 = arith.constant 0 : i32
    return %c0_i32, %c0_i32_0, %c0_i32_1 : i32, i32, i32
  }
  func.func @transform_15(%arg0: i32) -> (i32, i32, i32) {
    %c0_i32 = arith.constant 0 : i32
    %c0_i32_0 = arith.constant 0 : i32
    %c0_i32_1 = arith.constant 0 : i32
    %c0_i32_2 = arith.constant 0 : i32
    return %c0_i32, %c0_i32_0, %c0_i32_1 : i32, i32, i32
  }
  func.func @transform_16(%arg0: i32) -> (i32, i32, i32) {
    %c0_i32 = arith.constant 0 : i32
    %c0_i32_0 = arith.constant 0 : i32
    %c0_i32_1 = arith.constant 0 : i32
    %c0_i32_2 = arith.constant 0 : i32
    return %c0_i32, %c0_i32_0, %c0_i32_1 : i32, i32, i32
  }
  func.func @transform_17(%arg0: i32) -> (i32, i32, i32) {
    %c0_i32 = arith.constant 0 : i32
    %c0_i32_0 = arith.constant 0 : i32
    %c0_i32_1 = arith.constant 0 : i32
    %c0_i32_2 = arith.constant 0 : i32
    return %c0_i32, %c0_i32_0, %c0_i32_1 : i32, i32, i32
  }
  func.func @transform_18(%arg0: i32) -> (i32, i32, i32) {
    %c0_i32 = arith.constant 0 : i32
    %c0_i32_0 = arith.constant 0 : i32
    %c0_i32_1 = arith.constant 0 : i32
    %c0_i32_2 = arith.constant 0 : i32
    return %c0_i32, %c0_i32_0, %c0_i32_1 : i32, i32, i32
  }
  func.func @transform_19(%arg0: i32) -> (i32, i32, i32) {
    %c0_i32 = arith.constant 0 : i32
    %c0_i32_0 = arith.constant 0 : i32
    %c0_i32_1 = arith.constant 0 : i32
    %c0_i32_2 = arith.constant 0 : i32
    return %c0_i32, %c0_i32_0, %c0_i32_1 : i32, i32, i32
  }
  func.func @transform_20(%arg0: i32) -> (i32, i32) {
    %c0_i32 = arith.constant 0 : i32
    %c0_i32_0 = arith.constant 0 : i32
    %c0_i32_1 = arith.constant 0 : i32
    return %c0_i32, %c0_i32_0 : i32, i32
  }
  func.func @transform_21(%arg0: i32) -> (i32, i32) {
    %c0_i32 = arith.constant 0 : i32
    %c0_i32_0 = arith.constant 0 : i32
    %c0_i32_1 = arith.constant 0 : i32
    return %c0_i32, %c0_i32_0 : i32, i32
  }
  func.func @transform_22(%arg0: i32) -> (i32, i32) {
    %c0_i32 = arith.constant 0 : i32
    %c0_i32_0 = arith.constant 0 : i32
    %c0_i32_1 = arith.constant 0 : i32
    return %c0_i32, %c0_i32_0 : i32, i32
  }
  func.func @transform_23(%arg0: i32) -> (i32, i32) {
    %c0_i32 = arith.constant 0 : i32
    %c0_i32_0 = arith.constant 0 : i32
    %c0_i32_1 = arith.constant 0 : i32
    return %c0_i32, %c0_i32_0 : i32, i32
  }
  func.func @transform_24(%arg0: i32) -> (i32, i32) {
    %c0_i32 = arith.constant 0 : i32
    %c0_i32_0 = arith.constant 0 : i32
    %c0_i32_1 = arith.constant 0 : i32
    return %c0_i32, %c0_i32_0 : i32, i32
  }
  func.func @transform_25(%arg0: i32) -> (i32, i32) {
    %c0_i32 = arith.constant 0 : i32
    %c0_i32_0 = arith.constant 0 : i32
    %c0_i32_1 = arith.constant 0 : i32
    return %c0_i32, %c0_i32_0 : i32, i32
  }
  func.func @transform_26(%arg0: i32) -> (i32, i32) {
    %c0_i32 = arith.constant 0 : i32
    %c0_i32_0 = arith.constant 0 : i32
    %c0_i32_1 = arith.constant 0 : i32
    return %c0_i32, %c0_i32_0 : i32, i32
  }
  func.func @transform_27(%arg0: i32) -> (i32, i32) {
    %c0_i32 = arith.constant 0 : i32
    %c0_i32_0 = arith.constant 0 : i32
    %c0_i32_1 = arith.constant 0 : i32
    return %c0_i32, %c0_i32_0 : i32, i32
  }
  func.func @transform_28(%arg0: i32) -> (i32, i32, i32) {
    %c0_i32 = arith.constant 0 : i32
    %c0_i32_0 = arith.constant 0 : i32
    %c0_i32_1 = arith.constant 0 : i32
    return %arg0, %c0_i32, %c0_i32_0 : i32, i32, i32
  }
  func.func @transform_29(%arg0: i32) -> (i32, i32, i32) {
    %c0_i32 = arith.constant 0 : i32
    %c0_i32_0 = arith.constant 0 : i32
    %c0_i32_1 = arith.constant 0 : i32
    return %arg0, %c0_i32, %c0_i32_0 : i32, i32, i32
  }
}

</mosaic_0001>

<bundles_post_ra>
// kernel: transformer_forward.1
= control target key start
LH: loop header
LB: loop body
LE: loop exit
PB: predicated region body
PF: predicated region fallthrough
CT: control target
= control target key end

     0   :  { %s7475_s6 = smov 1   ;;  %s7476_s10 = smov 2   ;;  %s9711_s0 = inlined_call_operand.smem [shape: u32[30], index: -1, kind: input, shape index: {}] }
   0x1   :  { %s7522_s5 = sld [smem:[%s9711_s0]]   ;;  %s7477_s14 = smov 3  }
   0x2   :  { %s7527_s9 = sld [smem:[%s9711_s0 + %s7475_s6]]   ;;  %s7478_s18 = smov 4  }
   0x3   :  { %s7532_s13 = sld [smem:[%s9711_s0 + %s7476_s10]]   ;;  %s7479_s22 = smov 5  }
   0x4   :  { %s7537_s17 = sld [smem:[%s9711_s0 + %s7477_s14]]   ;;  %s7480_s26 = smov 6  }
   0x5   :  { %s7542_s21 = sld [smem:[%s9711_s0 + %s7478_s18]]   ;;  %s7481_s30 = smov 7  }
   0x6   :  { %s7547_s25 = sld [smem:[%s9711_s0 + %s7479_s22]]   ;;  %s7482_s4 = smov 8  }
   0x7   :  { %9734 = sst [smem:[#allocation6_spill]] %s7522_s5  ;;  %s7483_s10 = smov 9  }
   0x8   :  { %9735 = sst [smem:[#allocation7_spill]] %s7527_s9  ;;  %s7484_s15 = smov 10  }
   0x9   :  { %9736 = sst [smem:[#allocation8_spill]] %s7532_s13  ;;  %s7485_s20 = smov 11  }
   0xa   :  { %s7552_s29 = sld [smem:[%s9711_s0 + %s7480_s26]]   ;;  %s7486_s26 = smov 12  }
   0xb   :  { %9737 = sst [smem:[#allocation9_spill]] %s7542_s21  ;;  %s7487_s1 = smov 13  }
   0xc   :  { %9738 = sst [smem:[#allocation10_spill]] %s7547_s25  ;;  %s7488_s7 = smov 14  }
   0xd   :  { %s7557_s3 = sld [smem:[%s9711_s0 + %s7481_s30]]   ;;  %s7490_s22 = smov 16  }
   0xe   :  { %s7562_s8 = sld [smem:[%s9711_s0 + %s7482_s4]]   ;;  %s7491_s28 = smov 17  }
   0xf   :  { %s7567_s14 = sld [smem:[%s9711_s0 + %s7483_s10]]   ;;  %s7502_s23 = smov 28  }
  0x10   :  { %s7572_s19 = sld [smem:[%s9711_s0 + %s7484_s15]]   ;;  %s7489_s15 = smov 15  }
  0x11   :  { %s7577_s24 = sld [smem:[%s9711_s0 + %s7485_s20]]  }
  0x12   :  { %s7582_s30 = sld [smem:[%s9711_s0 + %s7486_s26]]  }
  0x13   :  { %9739 = sst [smem:[#allocation11_spill]] %s7557_s3 }
  0x14   :  { %9740 = sst [smem:[#allocation12_spill]] %s7562_s8 }
  0x15   :  { %s7587_s6 = sld [smem:[%s9711_s0 + %s7487_s1]]   ;;  %s7503_s1 = smov 29  }
  0x16   :  { %s7592_s12 = sld [smem:[%s9711_s0 + %s7488_s7]]   ;;  %s7492_s7 = smov 18  }
  0x17   :  { %s7597_s20 = sld [smem:[%s9711_s0 + %s7489_s15]]   ;;  %s7493_s15 = smov 19  }
  0x18   :  { %s7602_s27 = sld [smem:[%s9711_s0 + %s7490_s22]]   ;;  %s7494_s22 = smov 20  }
  0x19   :  { %s7607_s4 = sld [smem:[%s9711_s0 + %s7491_s28]]   ;;  %s7495_s28 = smov 21  }
  0x1a   :  { %s7612_s25 = sld [smem:[%s9711_s0 + %s7492_s7]]   ;;  %s7496_s7 = smov 22  }
  0x1b   :  { %9741 = sst [smem:[#allocation13_spill]] %s7587_s6 }
  0x1c   :  { %9742 = sst [smem:[#allocation14_spill]] %s7592_s12 }
  0x1d   :  { %9743 = sst [smem:[#allocation15_spill]] %s7597_s20 }
  0x1e   :  { %9744 = sst [smem:[#allocation16_spill]] %s7602_s27 }
  0x1f   :  { %9745 = sst [smem:[#allocation17_spill]] %s7607_s4 }
  0x20   :  { %s7617_s21 = sld [smem:[%s9711_s0 + %s7493_s15]]   ;;  %s7497_s15 = smov 23  }
  0x21   :  { %s7622_s20 = sld [smem:[%s9711_s0 + %s7494_s22]]   ;;  %s7498_s22 = smov 24  }
  0x22   :  { %s7627_s4 = sld [smem:[%s9711_s0 + %s7495_s28]]   ;;  %s7499_s28 = smov 25  }
  0x23   :  { %s7632_s27 = sld [smem:[%s9711_s0 + %s7496_s7]]   ;;  %s7500_s7 = smov 26  }
  0x26   :  { %9746 = sst [smem:[#allocation18_spill]] %s7617_s21 }
  0x27   :  { %9747 = sst [smem:[#allocation19_spill]] %s7622_s20 }
  0x28   :  { %9748 = sst [smem:[#allocation20_spill]] %s7627_s4 }
  0x29   :  { %9749 = sst [smem:[#allocation21_spill]] %s7632_s27 }
  0x2a   :  { %s7637_s21 = sld [smem:[%s9711_s0 + %s7497_s15]]   ;;  %s7501_s15 = smov 27  }
  0x2b   :  { %s7642_s20 = sld [smem:[%s9711_s0 + %s7498_s22]]  }
  0x2c   :  { %s7647_s4 = sld [smem:[%s9711_s0 + %s7499_s28]]  }
  0x2d   :  { %s7652_s27 = sld [smem:[%s9711_s0 + %s7500_s7]]  }
  0x30   :  { %9750 = sst [smem:[#allocation22_spill]] %s7637_s21 }
  0x31   :  { %9751 = sst [smem:[#allocation23_spill]] %s7642_s20 }
  0x32   :  { %9752 = sst [smem:[#allocation24_spill]] %s7647_s4 }
  0x33   :  { %s6256_s21 = sld [smem:[%s9711_s0 + %s7501_s15]]  }
  0x34   :  { %s7660_s20 = sld [smem:[%s9711_s0 + %s7502_s23]]  }
  0x35   :  { %s7665_s4 = sld [smem:[%s9711_s0 + %s7503_s1]]  }
  0x39   :  { %v65_v0 = vstv %s6256_s21 }
  0x3a   :  { %66 = vst [vmem:[#allocation2] sm:$0x1] %v65_v0 }
  0x3b   :  { %67 = vsyncpa [#allocation4], 0 }
  0x3c   :  { %69 = vsyncpa [#allocation4 + $0x1], 0  ;;  %s7667_s7 = smov 0   ;;  %s7669_s10 = smov 0  }
  0x3d   :  { %s7671_s11 = smov 0   ;;  %s7673_s15 = smov 0  }
  0x3e LB: > { %s9753_s12 = sld [smem:[#allocation14_spill]]  ;;  %s7688_s0 = sadd.s32 4294967295, %s7473_s15   ;;  %s7469_s11 = sphi %s7671_s11, %s9795_s11   ;;  %s7465_s10 = sphi %s7669_s10, %s9794_s10   ;;  %s7461_s7 = sphi %s7667_s7, %s9793_s7   ;;  %s7473_s15 = sphi %s7673_s15, %s9796_s15  }
  0x3f   : > { %s9754_s6 = sld [smem:[#allocation13_spill]]  ;;  %s6260_s21 = sadd.s32 4294967294, %s7473_s15  }
  0x40   : > { %s9755_s8 = sld [smem:[#allocation12_spill]]  ;;  %s7692_s16 = sadd.s32 1, %s7473_s15  }
  0x41   : > { %s726_s18 = sadd.s32 1, %s7469_s11  ;;  %s723_s23 = ssub.s32 %s7473_s15, %s7692_s16 }
  0x42   : > { %p736_p0 = scmp.ne.s32.totalorder %s7469_s11, %s7465_s10  ;;  %p724_p1 = scmp.eq.s32.totalorder %s723_s23, 0 }
  0x43   : > { %p737_p2 = scmp.eq.s32.totalorder %s7688_s0, 1  ;;  %p742_p3 = scmp.ne.s32.totalorder %s7465_s10, %s7461_s7 }
  0x44   : > { %p743_p4 = scmp.eq.s32.totalorder %s6260_s21, 1  ;;  %p6263_p7 = scmp.ge.s32.totalorder %s7473_s15, 1 }
  0x45   : > { %s7703_s22 = scalar_select %p724_p1, %s7469_s11, %s726_s18  }
  0x46   : > { %p7705_p5 = por %p737_p2, %p736_p0  ;;  %p7709_p6 = por %p743_p4, %p742_p3 }
  0x47   : > { %p869_p8 = scmp.lt.s32.totalorder %s7473_s15, 3 }
  0x49   : > { %p870_p9 = pnand %p6263_p7, %p869_p8 }
  0x4a   : > { %s9758_s5 = sld [smem:[#allocation6_spill]] (!%p870_p9)  ;;  %p967_p10 = scmp.lt.s32.totalorder (!%p870_p9), %s7688_s0, 1 }
  0x4b   : > { %873 = sbr.rel (%p870_p9) target bundleno = 10154 (0x27aa), region = 132  ;;  %s9761_s3 = sld [smem:[#allocation11_spill]] (!%p870_p9) }
  0x4c   : > { %s7505_s18 = smov (!%p870_p9), 32   ;;  %s9766_s13 = sld [smem:[#allocation8_spill]] (!%p870_p9) }
  0x4d   : > { %s9773_s9 = sld [smem:[#allocation7_spill]] (!%p870_p9) }
  0x50   : > { %vm1076_vm0 = vcmask 195584   ;;  %v1083_v1 = vld [vmem:[%s7552_s29 + $0x18] sm:$0xff]  ;;  %vm1056_vm1 = vcmask 261120   ;;  %v1082_v3 = vld [vmem:[%s7552_s29 + $0x10] sm:$0xff]  ;;  %s7721_s28 = scalar_select %p967_p10, %s7688_s0, 1  ;;  %v1081_v5 = vld [vmem:[%s7552_s29 + $0x8] sm:$0xff]  ;;  %v999_v19 = vlaneseq }
  0x51   : > { %6279 = vmatpush.xpose.msk.msra.mxu0 %vm1076_vm0, %v1083_v1  ;;  %v1187_v2 = vld [vmem:[%s7572_s19 + $0x58] sm:$0xff]  ;;  %v1186_v4 = vld [vmem:[%s7572_s19 + $0x50] sm:$0xff]  ;;  %v1185_v6 = vld [vmem:[%s7572_s19 + $0x48] sm:$0xff]  ;;  %v7504_v22 = vmov 0.0   ;;  %vm9723_vm12 = vcmask 130048   ;;  %vm1058_vm13 = vcmask 392192  }
  0x52   : > { %6290 = vmatpush.xpose.msk.msra.mxu2 %vm1056_vm1, %v1187_v2  ;;  %s9718_s2 = sshll.u32 %s7721_s28, 4  ;;  %v1080_v7 = vld [vmem:[%s7552_s29] sm:$0xff]  ;;  %v1183_v10 = vld [vmem:[%s7572_s19 + $0x38] sm:$0xff]  ;;  %v1182_v11 = vld [vmem:[%s7572_s19 + $0x30] sm:$0xff]  ;;  %v7757_v20 = vand.u32 127, %v999_v19  ;;  %s7838_s23 = scalar_lea.vmem %s9766_s13, %s7721_s28 }
  0x53   : > { %s971_s21 = scalar_lea.vmem %s9758_s5, %s9718_s2  ;;  %v1184_v8 = vld [vmem:[%s7572_s19 + $0x40] sm:$0xff]  ;;  %v1181_v13 = vld [vmem:[%s7572_s19 + $0x28] sm:$0xff]  ;;  %v1179_v15 = vld [vmem:[%s7572_s19 + $0x18] sm:$0xff]  ;;  %s9721_s2 = smov 64  }
  0x54   : > { %v1078_v9 = vld [vmem:[%s971_s21] sm:$0xff]  ;;  %v1079_v12 = vld [vmem:[%s971_s21 + $0x8] sm:$0xff]  ;;  %v1178_v16 = vld [vmem:[%s7572_s19 + $0x10] sm:$0xff]  ;;  %vm1016_vm2 = vcmp.ge.s32.totalorder %v7757_v20, 24  ;;  %vm1017_vm3 = vcmp.lt.s32.totalorder %v7757_v20, 32  ;;  %vm1006_vm4 = vcmp.ge.s32.totalorder %v7757_v20, 8 }
  0x55   : > { %6280 = vmatpush.xpose.msk.msra.mxu0 %vm1076_vm0, %v1082_v3  ;;  %v1180_v14 = vld [vmem:[%s7572_s19 + $0x20] sm:$0xff]  ;;  %v1177_v17 = vld [vmem:[%s7572_s19 + $0x8] sm:$0xff]  ;;  %vm7764_vm5 = vmand %vm1016_vm2, %vm1017_vm3  ;;  %vm1007_vm6 = vcmp.lt.s32.totalorder %v7757_v20, 16  ;;  %vm1011_vm8 = vcmp.ge.s32.totalorder %v7757_v20, 16  ;;  %vm1012_vm9 = vcmp.lt.s32.totalorder %v7757_v20, 24  ;;  %vm1002_vm11 = vcmp.lt.s32.totalorder %v7757_v20, 8 }
  0x56   : > { %6291 = vmatpush.xpose.msk.msra.mxu2 %vm1056_vm1, %v1186_v4  ;;  %v1176_v18 = vld [vmem:[%s7572_s19] sm:$0xff]  ;;  %v7772_v23 = vsel %vm7764_vm5, 1.0, %v7504_v22  ;;  %vm7776_vm7 = vmand %vm1006_vm4, %vm1007_vm6  ;;  %v7806_v28 = vsel %vm1002_vm11, 1.0, %v7504_v22  ;;  %s9724_s21 = smov 96   ;;  %vm1027_vm14 = vcmp.ge.s32.totalorder %v7757_v20, 32  ;;  %vm1028_vm15 = vcmp.lt.s32.totalorder %v7757_v20, 48 }
  0x57   : > { %1263 = vrot.lane.b32.xlu0 %v7772_v23, %s7505_s18  ;;  %v7787_v25 = vsel %vm7776_vm7, 1.0, %v7504_v22  ;;  %vm7793_vm10 = vmand %vm1011_vm8, %vm1012_vm9  ;;  %v7144_v29 = vld [vmem:[%s9761_s3] ss:$0 sm:$0xff]  ;;  %s9719_s3 = smov 16   ;;  %vm1370_vm9 = vcmask 523264   ;;  %s7511_s5 = smov 24  }
  0x58   : > { %1259 = vrot.lane.b32.xlu1 %v7787_v25, %s7505_s18  ;;  %v7801_v27 = vsel %vm7793_vm10, 1.0, %v7504_v22  ;;  %v7145_v37 = vld [vmem:[%s7577_s24] ss:$0 sm:$0xff]  ;;  %vm7890_vm2 = vmand %vm1027_vm14, %vm1028_vm15  ;;  %vm1031_vm14 = vcmp.lt.s32.totalorder %v7757_v20, 64 }
  0x59   : > { %6281 = vmatpush.xpose.msk.msra.mxu0 %vm1076_vm0, %v1081_v5  ;;  %v994_v43 = vld [vmem:[%s7838_s23] sm:$0x1]  ;;  %v7011_v55 = vpack.i.bf16 %v7801_v27, %v7772_v23  ;;  %vm7898_vm4 = vmand %vm1011_vm8, %vm1017_vm3  ;;  %vm1073_vm8 = vcmask 64512  }
  0x5a   : > { %6292 = vmatpush.xpose.msk.msra.mxu2 %vm1056_vm1, %v1185_v6  ;;  %v1041_v47 = vsub.f32 1.0, %v994_v43 }
  0x5c   : > { %v1042_v51 = vmul.f32 -1e+30, %v1041_v47 }
  0x5d   : > { %6282 = vmatpush.xpose.msk.msra.mxu0 %vm1076_vm0, %v1080_v7 }
  0x5e   : > { %6293 = vmatpush.xpose.msk.msra.mxu2 %vm1056_vm1, %v1184_v8  ;;  %v1044_v52 = vperm.slane %v1042_v51, 0 }
  0x5f   : > { %1261 = vrot.lane.b32.xlu0 %v7801_v27, %s7505_s18 }
  0x60   : > { %6283 = vmatmul.msk.f32.vlgmr.msra.gmra.mxu0 %vm1076_vm0, %v1078_v9  ;;  %1257 = vrot.lane.b32.xlu1 %v7806_v28, %s7505_s18 }
  0x62   : > { %6294 = vmatpush.xpose.msk.msra.mxu2 %vm1056_vm1, %v1183_v10 }
  0x66   : > { %6295 = vmatpush.xpose.msk.msra.mxu2 %vm1056_vm1, %v1182_v11 }
  0x68   : > { %6284 = vmatmul.msk.f32.gmra.mxu0 %vm1076_vm0, %v1079_v12 }
  0x6a   : > { %6296 = vmatpush.xpose.msk.msra.mxu2 %vm1056_vm1, %v1181_v13 }
  0x6e   : > { %6297 = vmatpush.xpose.msk.msra.mxu2 %vm1056_vm1, %v1180_v14 }
  0x72   : > { %6298 = vmatpush.xpose.msk.msra.mxu2 %vm1056_vm1, %v1179_v15 }
  0x76   : > { %6299 = vmatpush.xpose.msk.msra.mxu2 %vm1056_vm1, %v1178_v16 }
  0x7a   : > { %6300 = vmatpush.xpose.msk.msra.mxu2 %vm1056_vm1, %v1177_v17 }
  0x7e   : > { %6301 = vmatpush.xpose.msk.msra.mxu2 %vm1056_vm1, %v1176_v18 }
  0xc9   : > { %v7825_v36 = vpop.permute.xlu0 %1263 }
  0xca   : > { %v7828_v38 = vpop.permute.xlu1 %1259 }
  0xd1   : > { %v7830_v40 = vpop.permute.xlu0 %1261 }
  0xd2   : > { %v7844_v46 = vpop.permute.xlu1 %1257 }
  0xdd   : > { %v1123_v30 = vpop.f32.mrf.mxu0 }
  0xde   : > { %v7813_v31 = vadd.f32 %v7144_v29, %v1123_v30 }
  0xe0   : > { %v1129_v32 = vmax.f32 %v7813_v31, 0.0 }
  0xe2   : > { %6302 = vmatmul.msk.f32.vlgmr.msra.gmra.mxu2 %vm1056_vm1, %v1129_v32 }
  0xe5   : > { %v1126_v33 = vpop.f32.mrf.mxu0 }
  0xe6   : > { %v7819_v34 = vadd.f32 %v7144_v29, %v1126_v33 }
  0xe8   : > { %v1130_v35 = vmax.f32 %v7819_v34, 0.0 }
  0xea   : > { %6303 = vmatmul.msk.f32.gmra.mxu2 %vm1056_vm1, %v1130_v35 }
 0x165   : > { %v1251_v39 = vpop.f32.mrf.mxu2 }
 0x166   : > { %v7832_v41 = vadd.f32 %v7145_v37, %v1251_v39 }
 0x168   : > { %v1273_v42 = vmul.f32 %v7830_v40, %v7832_v41  ;;  %v1275_v53 = vmul.f32 %v7825_v36, %v7832_v41  ;;  %v1271_v54 = vmul.f32 %v7828_v38, %v7832_v41  ;;  %v1269_v57 = vmul.f32 %v7844_v46, %v7832_v41 }
 0x16a   : > { %1314 = vrot.lane.b32.xlu1 %v1273_v42, %s9724_s21 }
 0x16d   : > { %v1254_v44 = vpop.f32.mrf.mxu2 }
 0x16e   : > { %v7842_v45 = vadd.f32 %v7145_v37, %v1254_v44 }
 0x170   : > { %v1276_v48 = vmul.f32 %v7825_v36, %v7842_v45  ;;  %v1274_v49 = vmul.f32 %v7830_v40, %v7842_v45  ;;  %v1270_v50 = vmul.f32 %v7844_v46, %v7842_v45  ;;  %v1272_v56 = vmul.f32 %v7828_v38, %v7842_v45 }
 0x172   : > { %1320 = vrot.lane.b32.xlu2 %v1276_v48, %s9724_s21  ;;  %1316 = vrot.lane.b32.xlu0 %v1274_v49, %s9724_s21 }
 0x173   : > { %1308 = vrot.lane.b32.xlu1 %v1270_v50, %s9724_s21 }
 0x17a   : > { %1318 = vrot.lane.b32.xlu2 %v1275_v53, %s9724_s21  ;;  %1310 = vrot.lane.b32.xlu0 %v1271_v54, %s9724_s21 }
 0x17b   : > { %1048 = vrot.lane.b32.xlu1 %v1044_v52, %s7505_s18  ;;  %s7509_s18 = smov 48  }
 0x182   : > { %1312 = vrot.lane.b32.xlu2 %v1272_v56, %s9724_s21  ;;  %1045 = vrot.lane.b32.xlu0 %v1044_v52, %s9719_s3 }
 0x183   : > { %7012 = vrot.lane.b32.xlu1 %v7011_v55, %s9721_s2 }
 0x18a   : > { %1306 = vrot.lane.b32.xlu2 %v1269_v57, %s9724_s21 }
 0x192   : > { %1051 = vrot.lane.b32.xlu2 %v1044_v52, %s7509_s18  ;;  %s9720_s18 = sshll.u32 %s7721_s28, 3 }
 0x193   : > { %s975_s3 = scalar_lea.vmem %s9773_s9, %s9720_s18  ;;  %s7510_s18 = smov 8  }
 0x194   : > { %s9792_s9 = sand.u32 1, %s7465_s10  }
 0x1cc   : > { %v1321_v58 = vpop.permute.xlu2 %1320 }
 0x1cd   : > { %6304 = vmatpush.xpose.msk.msra.mxu3 %vm1056_vm1, %v1321_v58 }
 0x1d4   : > { %v1319_v59 = vpop.permute.xlu2 %1318 }
 0x1d5   : > { %6305 = vmatpush.xpose.msk.msra.mxu3 %vm1056_vm1, %v1319_v59 }
 0x1dc   : > { %v1315_v61 = vpop.permute.xlu1 %1314  ;;  %v1313_v62 = vpop.permute.xlu2 %1312 }
 0x1e4   : > { %v1317_v60 = vpop.permute.xlu0 %1316  ;;  %v1307_v1 = vpop.permute.xlu2 %1306 }
 0x1e5   : > { %6306 = vmatpush.xpose.msk.msra.mxu3 %vm1056_vm1, %v1317_v60  ;;  %v1309_v0 = vpop.permute.xlu1 %1308  ;;  %v7016_v60 = vpack.i.bf16 %v7806_v28, %v7787_v25 }
 0x1e9   : > { %6307 = vmatpush.xpose.msk.msra.mxu3 %vm1056_vm1, %v1315_v61  ;;  %v7960_v61 = vsel %vm7898_vm4, 1.0, %v7504_v22 }
 0x1ec   : > { %v1311_v63 = vpop.permute.xlu0 %1310  ;;  %v1052_v6 = vpop.permute.xlu2 %1051 }
 0x1ed   : > { %6308 = vmatpush.xpose.msk.msra.mxu3 %vm1056_vm1, %v1313_v62  ;;  %v1049_v4 = vpop.permute.xlu1 %1048  ;;  %v7965_v62 = vsel %vm1007_vm6, 1.0, %v7504_v22 }
 0x1f1   : > { %6309 = vmatpush.xpose.msk.msra.mxu3 %vm1056_vm1, %v1311_v63 }
 0x1f4   : > { %v1046_v2 = vpop.permute.xlu0 %1045 }
 0x1f5   : > { %6310 = vmatpush.xpose.msk.msra.mxu3 %vm1056_vm1, %v1309_v0  ;;  %v1055_v3 = vsel %vm9723_vm12, %v1042_v51, %v1046_v2  ;;  %v7013_v51 = vpop.permute.xlu1 %7012 }
 0x1f6   : > { %v1057_v5 = vsel %vm1056_vm1, %v1055_v3, %v1049_v4  ;;  %v7940_v52 = vunpack.i.l.bf16 %v7013_v51  ;;  %v7942_v53 = vunpack.i.h.bf16 %v7013_v51  ;;  %v7972_v4 = vsel %vm7890_vm2, 1.0, %v7504_v22 }
 0x1f7   : > { %v1059_v7 = vsel %vm1058_vm13, %v1057_v5, %v1052_v6  ;;  %vm1030_vm13 = vcmp.ge.s32.totalorder %v7757_v20, 48 }
 0x1f8   : > { %v7888_v8 = vperm.slane %v1059_v7, 0  ;;  %vm7919_vm3 = vmand %vm1030_vm13, %vm1031_vm14  ;;  %v1295_v54 = vmul.f32 %v7940_v52, %v7832_v41  ;;  %v1296_v55 = vmul.f32 %v7940_v52, %v7842_v45  ;;  %v1293_v57 = vmul.f32 %v7942_v53, %v7832_v41 }
 0x1f9   : > { %6311 = vmatpush.xpose.msk.msra.mxu3 %vm1056_vm1, %v1307_v1  ;;  %v1294_v58 = vmul.f32 %v7942_v53, %v7842_v45  ;;  %v7977_v6 = vsel %vm7919_vm3, 1.0, %v7504_v22 }
 0x1fa   : > { %v7021_v56 = vpack.i.bf16 %v1295_v54, %v1296_v55 }
 0x1fb   : > { %v7026_v59 = vpack.i.bf16 %v1293_v57, %v1294_v58 }
 0x1fc   : > { %6312 = vmatmul.msk.f32.vlgmr.msra.gmra.mxu3 %vm1056_vm1, %v7832_v41 }
 0x204   : > { %6313 = vmatmul.msk.f32.gmra.mxu3 %vm1056_vm1, %v7842_v45 }
 0x27f   : > { %v1361_v10 = vpop.f32.mrf.mxu3 }
 0x280   : > { %v7903_v12 = vadd.f32 %v1361_v10, %v7888_v8 }
 0x282   : > { %v1387_v13 = vsel %vm7890_vm2, %v7903_v12, -1e+30  ;;  %v1378_v14 = vsel %vm7898_vm4, %v7903_v12, -1e+30  ;;  %v1368_v15 = vsel %vm1007_vm6, %v7903_v12, -1e+30 }
 0x283   : > { %v1389_v16 = vsel %vm1370_vm9, %v1387_v13, -inf  ;;  %v1380_v17 = vsel %vm1370_vm9, %v1378_v14, -inf  ;;  %v1371_v18 = vsel %vm1370_vm9, %v1368_v15, -inf  ;;  %v1396_v33 = vsel %vm7919_vm3, %v7903_v12, -1e+30 }
 0x284   : > { %1390 = vmax.xlane.f32.xlu2 %v1389_v16  ;;  %1381 = vmax.xlane.f32.xlu1 %v1380_v17  ;;  %v1398_v42 = vsel %vm1370_vm9, %v1396_v33, -inf }
 0x285   : > { %1372 = vmax.xlane.f32.xlu0 %v1371_v18 }
 0x287   : > { %v1364_v29 = vpop.f32.mrf.mxu3 }
 0x288   : > { %v1365_v30 = vadd.f32 %v1364_v29, %v7888_v8 }
 0x28a   : > { %v1379_v37 = vsel %vm7898_vm4, %v1365_v30, -1e+30  ;;  %v1369_v39 = vsel %vm1007_vm6, %v1365_v30, -1e+30  ;;  %v1388_v47 = vsel %vm7890_vm2, %v1365_v30, -1e+30 }
 0x28b   : > { %v1383_v43 = vsel %vm1370_vm9, %v1379_v37, -inf  ;;  %v1374_v44 = vsel %vm1370_vm9, %v1369_v39, -inf  ;;  %v1397_v48 = vsel %vm7919_vm3, %v1365_v30, -1e+30  ;;  %v1392_v49 = vsel %vm1370_vm9, %v1388_v47, -inf }
 0x28c   : > { %1399 = vmax.xlane.f32.xlu2 %v1398_v42  ;;  %1384 = vmax.xlane.f32.xlu1 %v1383_v43  ;;  %v1401_v50 = vsel %vm1370_vm9, %v1397_v48, -inf }
 0x28d   : > { %1375 = vmax.xlane.f32.xlu0 %v1374_v44 }
 0x294   : > { %1393 = vmax.xlane.f32.xlu2 %v1392_v49 }
 0x295   : > { %1402 = vmax.xlane.f32.xlu0 %v1401_v50 }
 0x2a5   : > { %7022 = vrot.lane.b32.xlu1 %v7021_v56, %s9721_s2 }
 0x2a9   : > { %7027 = vrot.lane.b32.xlu0 %v7026_v59, %s9721_s2 }
 0x2ac   : > { %7017 = vrot.lane.b32.xlu2 %v7016_v60, %s9721_s2 }
 0x2f7   : > { %v1391_v63 = vpop.xlane.xlu2 %1390  ;;  %v1382_v0 = vpop.xlane.xlu1 %1381 }
 0x2f8   : > { %v1408_v1 = vmul.f32 %v7960_v61, %v1382_v0  ;;  %v1373_v2 = vpop.xlane.xlu0 %1372  ;;  %v1412_v7 = vmul.f32 %v7972_v4, %v1391_v63 }
 0x2f9   : > { %v1404_v3 = vmul.f32 %v7965_v62, %v1373_v2 }
 0x2fb   : > { %v1410_v5 = vadd.f32 %v1408_v1, %v1404_v3 }
 0x2fd   : > { %v1414_v13 = vadd.f32 %v1412_v7, %v1410_v5 }
 0x2ff   : > { %v1400_v10 = vpop.xlane.xlu2 %1399  ;;  %v1385_v16 = vpop.xlane.xlu1 %1384 }
 0x300   : > { %v1416_v14 = vmul.f32 %v7977_v6, %v1400_v10  ;;  %v1376_v15 = vpop.xlane.xlu0 %1375  ;;  %v1409_v29 = vmul.f32 %v7960_v61, %v1385_v16  ;;  %v1135_v10 = vld [vmem:[%s9755_s8 + $0x18] sm:$0xff] }
 0x301   : > { %v1405_v33 = vmul.f32 %v7965_v62, %v1376_v15  ;;  %6285 = vmatpush.xpose.msk.msra.mxu1 %vm9723_vm12, %v1135_v10  ;;  %v1134_v15 = vld [vmem:[%s9755_s8 + $0x10] sm:$0xff] }
 0x302   : > { %v1418_v17 = vadd.f32 %v1416_v14, %v1414_v13 }
 0x303   : > { %v1411_v22 = vadd.f32 %v1409_v29, %v1405_v33 }
 0x304   : > { %v1420_v18 = vsub.f32 %v7903_v12, %v1418_v17 }
 0x305   : > { %6286 = vmatpush.xpose.msk.msra.mxu1 %vm9723_vm12, %v1134_v15 }
 0x306   : > { %v1422_v37 = vmul.f32 1.442695, %v1420_v18  ;;  %v1133_v18 = vld [vmem:[%s9755_s8 + $0x8] sm:$0xff] }
 0x307   : > { %v1394_v39 = vpop.xlane.xlu2 %1393 }
 0x308   : > { %7215 = vpow2.f32 %v1422_v37  ;;  %v1413_v42 = vmul.f32 %v7972_v4, %v1394_v39  ;;  %v1403_v43 = vpop.xlane.xlu0 %1402  ;;  %v1132_v37 = vld [vmem:[%s9755_s8] sm:$0xff]  ;;  %s9780_s8 = smov 96  }
 0x309   : > { %v1417_v47 = vmul.f32 %v7977_v6, %v1403_v43  ;;  %6287 = vmatpush.xpose.msk.msra.mxu1 %vm9723_vm12, %v1133_v18 }
 0x30a   : > { %v1415_v44 = vadd.f32 %v1413_v42, %v1411_v22  ;;  %v1131_v42 = vld [vmem:[%s975_s3] sm:$0xff]  ;;  %s981_s3 = scalar_lea.vmem %s7537_s17, %s7721_s28 }
 0x30c   : > { %v1419_v48 = vadd.f32 %v1417_v47, %v1415_v44 }
 0x30d   : > { %6288 = vmatpush.xpose.msk.msra.mxu1 %vm9723_vm12, %v1132_v37 }
 0x30e   : > { %v7986_v49 = vpop.eup %7215  ;;  %v1421_v50 = vsub.f32 %v1365_v30, %v1419_v48 }
 0x30f   : > { %v1456_v12 = vmul.f32 %v7986_v49, %v7977_v6  ;;  %v1426_v51 = vmul.f32 %v7986_v49, %v7965_v62  ;;  %v1436_v57 = vmul.f32 %v7986_v49, %v7960_v61  ;;  %v1446_v13 = vmul.f32 %v7986_v49, %v7972_v4  ;;  %v7018_v39 = vpop.permute.xlu2 %7017 }
 0x310   : > { %v1424_v54 = vmul.f32 1.442695, %v1421_v50  ;;  %v8026_v43 = vunpack.i.l.bf16 %v7018_v39  ;;  %6289 = vmatmul.msk.f32.vlgmr.msra.gmra.mxu1 %vm9723_vm12, %v1131_v42  ;;  %v8033_v48 = vunpack.i.h.bf16 %v7018_v39 }
 0x311   : > { %v1458_v55 = vsel %vm1370_vm9, %v1456_v12, 0.0  ;;  %v1428_v56 = vsel %vm1370_vm9, %v1426_v51, 0.0  ;;  %v1438_v60 = vsel %vm1370_vm9, %v1436_v57, 0.0  ;;  %v1448_v17 = vsel %vm1370_vm9, %v1446_v13, 0.0 }
 0x312   : > { %7217 = vpow2.f32 %v1424_v54  ;;  %1459 = vadd.xlane.f32.xlu2 %v1458_v55  ;;  %1429 = vadd.xlane.f32.xlu0 %v1428_v56  ;;  %v1291_v44 = vmul.f32 %v8026_v43, %v7832_v41  ;;  %v1292_v47 = vmul.f32 %v8026_v43, %v7842_v45  ;;  %v1289_v12 = vmul.f32 %v8033_v48, %v7832_v41 }
 0x313   : > { %v1290_v51 = vmul.f32 %v8033_v48, %v7842_v45 }
 0x314   : > { %v7031_v50 = vpack.i.bf16 %v1291_v44, %v1292_v47 }
 0x315   : > { %v7036_v54 = vpack.i.bf16 %v1289_v12, %v1290_v51 }
 0x317   : > { %v7023_v58 = vpop.permute.xlu1 %7022 }
 0x318   : > { %v7996_v30 = vpop.eup %7217  ;;  %v7024_v59 = vunpack.i.l.bf16 %v7023_v58  ;;  %v7025_v1 = vunpack.i.h.bf16 %v7023_v58 }
 0x319   : > { %v1447_v63 = vmul.f32 %v7996_v30, %v7972_v4  ;;  %v1427_v0 = vmul.f32 %v7996_v30, %v7965_v62  ;;  %v1457_v16 = vmul.f32 %v7996_v30, %v7977_v6  ;;  %v1437_v33 = vmul.f32 %v7996_v30, %v7960_v61 }
 0x31a   : > { %1530 = vmatpush.msrb.mxu0 %v7024_v59  ;;  %1439 = vadd.xlane.f32.xlu0 %v1438_v60 }
 0x31b   : > { %v7028_v2 = vpop.permute.xlu0 %7027  ;;  %v1451_v3 = vsel %vm1370_vm9, %v1447_v63, 0.0  ;;  %v1431_v5 = vsel %vm1370_vm9, %v1427_v0, 0.0  ;;  %v1461_v29 = vsel %vm1370_vm9, %v1457_v16, 0.0  ;;  %v1441_v22 = vsel %vm1370_vm9, %v1437_v33, 0.0 }
 0x31c   : > { %1531 = vmatpush.msrb.mxu0 %v7025_v1  ;;  %1452 = vadd.xlane.f32.xlu2 %v1451_v3  ;;  %v7029_v7 = vunpack.i.l.bf16 %v7028_v2  ;;  %v7030_v14 = vunpack.i.h.bf16 %v7028_v2 }
 0x31d   : > { %1432 = vadd.xlane.f32.xlu1 %v1431_v5 }
 0x31e   : > { %1532 = vmatpush.msrb.mxu0 %v7029_v7 }
 0x320   : > { %1533 = vmatpush.msrb.mxu0 %v7030_v14 }
 0x322   : > { %1449 = vadd.xlane.f32.xlu0 %v1448_v17 }
 0x324   : > { %1462 = vadd.xlane.f32.xlu2 %v1461_v29 }
 0x32a   : > { %1442 = vadd.xlane.f32.xlu0 %v1441_v22 }
 0x336   : > { %7032 = vrot.lane.b32.xlu1 %v7031_v50, %s9721_s2 }
 0x33c   : > { %7037 = vrot.lane.b32.xlu2 %v7036_v54, %s9721_s2  ;;  %s9774_s2 = smov 16  }
 0x385   : > { %v1430_v55 = vpop.xlane.xlu0 %1429  ;;  %v1460_v57 = vpop.xlane.xlu2 %1459 }
 0x38d   : > { %v1440_v56 = vpop.xlane.xlu0 %1439 }
 0x38e   : > { %7219 = vrcp.f32 %v1440_v56 }
 0x38f   : > { %v1453_v59 = vpop.xlane.xlu2 %1452  ;;  %7221 = vrcp.f32 %v1430_v55  ;;  %v6333_v55 = vld [vmem:[%s7572_s19 + $0xb8] sm:$0xff] }
 0x390   : > { %v1433_v63 = vpop.xlane.xlu1 %1432 }
 0x394   : > { %v7220_v0 = vpop.eup %7219 }
 0x395   : > { %v1450_v58 = vpop.xlane.xlu0 %1449  ;;  %v7222_v1 = vpop.eup %7221  ;;  %v1470_v45 = vmul.f32 %v7220_v0, %v7960_v61  ;;  %v6329_v0 = vld [vmem:[%s7572_s19 + $0x98] sm:$0xff] }
 0x396   : > { %7223 = vrcp.f32 %v1450_v58  ;;  %v1466_v3 = vmul.f32 %v7222_v1, %v7965_v62  ;;  %v6332_v58 = vld [vmem:[%s7572_s19 + $0xb0] sm:$0xff]  ;;  %v1548_v1 = vld [vmem:[%s7582_s30 + $0x18] sm:$0xff] }
 0x397   : > { %v1463_v41 = vpop.xlane.xlu2 %1462  ;;  %6316 = vmatpush.xpose.msk.msrb.mxu1 %vm1056_vm1, %v1548_v1 }
 0x398   : > { %v1472_v13 = vadd.f32 %v1470_v45, %v1466_v3  ;;  %v1546_v45 = vld [vmem:[%s7582_s30 + $0x8] sm:$0xff]  ;;  %v6326_v3 = vld [vmem:[%s7572_s19 + $0x80] sm:$0xff] }
 0x39c   : > { %v7224_v2 = vpop.eup %7223 }
 0x39d   : > { %v1443_v60 = vpop.xlane.xlu0 %1442  ;;  %v1474_v5 = vmul.f32 %v7224_v2, %v7972_v4  ;;  %v6327_v2 = vld [vmem:[%s7572_s19 + $0x88] sm:$0xff] }
 0x39e   : > { %7225 = vrcp.f32 %v1443_v60  ;;  %v6331_v60 = vld [vmem:[%s7572_s19 + $0xa8] sm:$0xff] }
 0x39f   : > { %7227 = vrcp.f32 %v1460_v57  ;;  %v1476_v15 = vadd.f32 %v1474_v5, %v1472_v13  ;;  %v7038_v37 = vpop.permute.xlu2 %7037  ;;  %v1545_v5 = vld [vmem:[%s7582_s30] sm:$0xff] }
 0x3a0   : > { %7229 = vrcp.f32 %v1433_v63  ;;  %v7039_v47 = vunpack.i.l.bf16 %v7038_v37  ;;  %v7040_v51 = vunpack.i.h.bf16 %v7038_v37  ;;  %v6330_v63 = vld [vmem:[%s7572_s19 + $0xa0] sm:$0xff] }
 0x3a1   : > { %7231 = vrcp.f32 %v1453_v59  ;;  %v7146_v13 = vld [vmem:[%s7567_s14] ss:$0 sm:$0xff]  ;;  %v7147_v37 = vld [vmem:[%s7577_s24 + $0x1] ss:$0 sm:$0xff] }
 0x3a2   : > { %7233 = vrcp.f32 %v1463_v41  ;;  %v1547_v41 = vld [vmem:[%s7582_s30 + $0x10] sm:$0xff] }
 0x3a3   : > { %6317 = vmatpush.xpose.msk.msrb.mxu1 %vm1056_vm1, %v1547_v41 }
 0x3a4   : > { %v7226_v7 = vpop.eup %7225 }
 0x3a5   : > { %v7228_v10 = vpop.eup %7227  ;;  %v1471_v16 = vmul.f32 %v7226_v7, %v7960_v61  ;;  %v6325_v7 = vld [vmem:[%s7572_s19 + $0x78] sm:$0xff] }
 0x3a6   : > { %v7230_v14 = vpop.eup %7229  ;;  %v1478_v29 = vmul.f32 %v7228_v10, %v7977_v6  ;;  %v6324_v10 = vld [vmem:[%s7572_s19 + $0x70] sm:$0xff] }
 0x3a7   : > { %v1467_v33 = vmul.f32 %v7230_v14, %v7965_v62  ;;  %v7232_v39 = vpop.eup %7231  ;;  %6318 = vmatpush.xpose.msk.msrb.mxu1 %vm1056_vm1, %v1546_v45  ;;  %v1172_v14 = vpop.f32.mrf.mxu1 }
 0x3a8   : > { %v7033_v17 = vpop.permute.xlu1 %7032  ;;  %v1480_v42 = vadd.f32 %v1478_v29, %v1476_v15  ;;  %v1475_v50 = vmul.f32 %v7232_v39, %v7972_v4  ;;  %v7234_v12 = vpop.eup %7233  ;;  %v6323_v15 = vld [vmem:[%s7572_s19 + $0x68] sm:$0xff] }
 0x3a9   : > { %v7034_v18 = vunpack.i.l.bf16 %v7033_v17  ;;  %v7035_v22 = vunpack.i.h.bf16 %v7033_v17  ;;  %v1473_v44 = vadd.f32 %v1471_v16, %v1467_v33  ;;  %v1479_v57 = vmul.f32 %v7234_v12, %v7977_v6  ;;  %v6322_v17 = vld [vmem:[%s7572_s19 + $0x60] sm:$0xff] }
 0x3aa   : > { %v1482_v54 = vmul.f32 %v7986_v49, %v1480_v42  ;;  %v8083_v16 = vadd.f32 %v7146_v13, %v1172_v14  ;;  %v995_v12 = vld [vmem:[%s981_s3] sm:$0x1]  ;;  %s9778_s3 = sld [smem:[#allocation15_spill]] }
 0x3ab   : > { %1534 = vmatpush.msrb.mxu0 %v7034_v18  ;;  %v1477_v56 = vadd.f32 %v1475_v50, %v1473_v44  ;;  %6319 = vmatpush.xpose.msk.msrb.mxu1 %vm1056_vm1, %v1545_v5 }
 0x3ac   : > { %v1175_v18 = vmax.f32 %v8083_v16, 0.0 }
 0x3ad   : > { %1535 = vmatpush.msrb.mxu0 %v7035_v22  ;;  %v1481_v59 = vadd.f32 %v1479_v57, %v1477_v56 }
 0x3af   : > { %1536 = vmatpush.msrb.mxu0 %v7039_v47  ;;  %v1483_v49 = vmul.f32 %v7996_v30, %v1481_v59  ;;  %v6328_v30 = vld [vmem:[%s7572_s19 + $0x90] sm:$0xff] }
 0x3b1   : > { %1537 = vmatpush.msrb.mxu0 %v7040_v51  ;;  %v1060_v51 = vsub.f32 1.0, %v995_v12 }
 0x3b2   : > { %6314 = vmatmul.msk.f32.vlgmr.msrb.gmra.mxu0 %vm1370_vm9, %v1482_v54 }
 0x3b3   : > { %6335 = vmatpush.xpose.msk.msra.mxu0 %vm1056_vm1, %v6333_v55  ;;  %v1061_v54 = vmul.f32 -1e+30, %v1060_v51 }
 0x3b5   : > { %v1063_v55 = vperm.slane %v1061_v54, 0 }
 0x3b7   : > { %6336 = vmatpush.xpose.msk.msra.mxu0 %vm1056_vm1, %v6332_v58 }
 0x3ba   : > { %6315 = vmatmul.msk.f32.gmra.mxu0 %vm1370_vm9, %v1483_v49 }
 0x3bb   : > { %6337 = vmatpush.xpose.msk.msra.mxu0 %vm1056_vm1, %v6331_v60 }
 0x3bf   : > { %6338 = vmatpush.xpose.msk.msra.mxu0 %vm1056_vm1, %v6330_v63 }
 0x3c3   : > { %6339 = vmatpush.xpose.msk.msra.mxu0 %vm1056_vm1, %v6329_v0 }
 0x3c7   : > { %6340 = vmatpush.xpose.msk.msra.mxu0 %vm1056_vm1, %v6328_v30 }
 0x3cb   : > { %6341 = vmatpush.xpose.msk.msra.mxu0 %vm1056_vm1, %v6327_v2 }
 0x3cf   : > { %6342 = vmatpush.xpose.msk.msra.mxu0 %vm1056_vm1, %v6326_v3 }
 0x3d3   : > { %6343 = vmatpush.xpose.msk.msra.mxu0 %vm1056_vm1, %v6325_v7 }
 0x3d7   : > { %6344 = vmatpush.xpose.msk.msra.mxu0 %vm1056_vm1, %v6324_v10 }
 0x3db   : > { %6345 = vmatpush.xpose.msk.msra.mxu0 %vm1056_vm1, %v6323_v15 }
 0x3df   : > { %6346 = vmatpush.xpose.msk.msra.mxu0 %vm1056_vm1, %v6322_v17 }
 0x3e2   : > { %6347 = vmatmul.msk.f32.vlgmr.msra.gmra.mxu0 %vm1056_vm1, %v1175_v18 }
 0x42f   : > { %v1539_v29 = vpop.f32.mrf.mxu0 }
 0x430   : > { %6320 = vmatmul.msk.f32.vlgmr.msrb.gmra.mxu1 %vm1056_vm1, %v1539_v29 }
 0x437   : > { %v1542_v33 = vpop.f32.mrf.mxu0 }
 0x438   : > { %6321 = vmatmul.msk.f32.gmra.mxu1 %vm1056_vm1, %v1542_v33 }
 0x45f   : > { %v1733_v39 = vpop.f32.mrf.mxu0 }
 0x460   : > { %v8095_v22 = vadd.f32 %v7147_v37, %v1733_v39 }
 0x462   : > { %v1739_v42 = vmul.f32 %v8095_v22, %v7825_v36  ;;  %v1738_v44 = vmul.f32 %v8095_v22, %v7830_v40  ;;  %v1736_v47 = vmul.f32 %v8095_v22, %v7844_v46  ;;  %v1737_v50 = vmul.f32 %v8095_v22, %v7828_v38 }
 0x464   : > { %1755 = vrot.lane.b32.xlu0 %v1739_v42, %s9724_s21  ;;  %1753 = vrot.lane.b32.xlu1 %v1738_v44, %s9724_s21 }
 0x465   : > { %1749 = vrot.lane.b32.xlu2 %v1736_v47, %s9724_s21 }
 0x46c   : > { %1751 = vrot.lane.b32.xlu1 %v1737_v50, %s9724_s21  ;;  %1064 = vrot.lane.b32.xlu0 %v1063_v55, %s7510_s18  ;;  %s9777_s18 = sld [smem:[#allocation16_spill]] }
 0x46d   : > { %1070 = vrot.lane.b32.xlu2 %v1063_v55, %s7511_s5  ;;  %s9775_s5 = smov 64   ;;  %s9779_s21 = sld [smem:[#allocation17_spill]] }
 0x474   : > { %1067 = vrot.lane.b32.xlu1 %v1063_v55, %s9774_s2  ;;  %s9776_s2 = sld [smem:[#allocation18_spill]] }
 0x4ad   : > { %v1588_v49 = vpop.f32.mrf.mxu1 }
 0x4b5   : > { %v1591_v41 = vpop.f32.mrf.mxu1 }
 0x4bf   : > { %v1750_v59 = vpop.permute.xlu2 %1749 }
 0x4c7   : > { %v1071_v30 = vpop.permute.xlu2 %1070 }
 0x4d6   : > { %v1756_v56 = vpop.permute.xlu0 %1755  ;;  %v1754_v57 = vpop.permute.xlu1 %1753 }
 0x4d7   : > { %6348 = vmatpush.xpose.msk.msra.mxu1 %vm1056_vm1, %v1756_v56 }
 0x4db   : > { %6349 = vmatpush.xpose.msk.msra.mxu1 %vm1056_vm1, %v1754_v57 }
 0x4de   : > { %v1752_v58 = vpop.permute.xlu1 %1751  ;;  %v1065_v60 = vpop.permute.xlu0 %1064 }
 0x4df   : > { %6350 = vmatpush.xpose.msk.msra.mxu1 %vm1056_vm1, %v1752_v58  ;;  %v1074_v63 = vsel %vm1073_vm8, %v1061_v54, %v1065_v60 }
 0x4e3   : > { %6351 = vmatpush.xpose.msk.msra.mxu1 %vm1056_vm1, %v1750_v59 }
 0x4e6   : > { %6352 = vmatmul.msk.f32.vlgmr.msra.gmra.mxu1 %vm1056_vm1, %v8095_v22  ;;  %v1068_v0 = vpop.permute.xlu1 %1067 }
 0x4e7   : > { %v1075_v1 = vsel %vm9723_vm12, %v1074_v63, %v1068_v0 }
 0x4e8   : > { %v1077_v2 = vsel %vm1076_vm0, %v1075_v1, %v1071_v30 }
 0x4e9   : > { %v8120_v45 = vperm.slane %v1077_v2, 0 }
 0x563   : > { %v1785_v3 = vpop.f32.mrf.mxu1 }
 0x564   : > { %v1786_v5 = vadd.f32 %v1785_v3, %v8120_v45  ;;  %v7148_v3 = vld [vmem:[%s9754_s6] ss:$0 sm:$0xff] }
 0x566   : > { %v1799_v7 = vsel %vm7793_vm10, %v1786_v5, -1e+30  ;;  %v1794_v10 = vsel %vm7776_vm7, %v1786_v5, -1e+30  ;;  %v1789_v13 = vsel %vm1002_vm11, %v1786_v5, -1e+30 }
 0x567   : > { %v1800_v14 = vsel %vm1056_vm1, %v1799_v7, -inf  ;;  %v1795_v15 = vsel %vm1056_vm1, %v1794_v10, -inf  ;;  %v1790_v17 = vsel %vm1056_vm1, %v1789_v13, -inf  ;;  %v1804_v29 = vsel %vm7764_vm5, %v1786_v5, -1e+30 }
 0x568   : > { %1801 = vmax.xlane.f32.xlu2 %v1800_v14  ;;  %1796 = vmax.xlane.f32.xlu1 %v1795_v15  ;;  %v1805_v33 = vsel %vm1056_vm1, %v1804_v29, -inf  ;;  %v1589_v7 = vadd.f32 %v7148_v3, %v1588_v49  ;;  %v1740_v14 = vmul.f32 %v8033_v48, %v8095_v22  ;;  %v1741_v15 = vmul.f32 %v8026_v43, %v8095_v22 }
 0x569   : > { %1791 = vmax.xlane.f32.xlu0 %v1790_v17  ;;  %v1592_v17 = vadd.f32 %v7148_v3, %v1591_v41  ;;  %v1742_v49 = vmul.f32 %v7942_v53, %v8095_v22 }
 0x56a   : > { %v1594_v13 = vadd.f32 %v1589_v7, %v1129_v32 }
 0x56b   : > { %v1595_v31 = vadd.f32 %v1592_v17, %v1130_v35 }
 0x56c   : > { %v1598_v29 = vsel %vm1056_vm1, %v1594_v13, 0.0 }
 0x56d   : > { %v1601_v41 = vsel %vm1056_vm1, %v1595_v31, 0.0 }
 0x571   : > { %1806 = vmax.xlane.f32.xlu0 %v1805_v33  ;;  %v7046_v33 = vpack.i.bf16 %v1740_v14, %v1741_v15 }
 0x5db   : > { %v1797_v37 = vpop.xlane.xlu1 %1796  ;;  %v1802_v47 = vpop.xlane.xlu2 %1801 }
 0x5dc   : > { %v1792_v39 = vpop.xlane.xlu0 %1791  ;;  %v1810_v42 = vmul.f32 %v7787_v25, %v1797_v37  ;;  %v1812_v12 = vmul.f32 %v7801_v27, %v1802_v47  ;;  %v1743_v37 = vmul.f32 %v7940_v52, %v8095_v22 }
 0x5dd   : > { %v1808_v44 = vmul.f32 %v7806_v28, %v1792_v39  ;;  %v7512_v39 = vmov 32.0  }
 0x5de   : > { %v7041_v32 = vpack.i.bf16 %v1742_v49, %v1743_v37 }
 0x5df   : > { %v1811_v50 = vadd.f32 %v1810_v42, %v1808_v44 }
 0x5e1   : > { %v1813_v54 = vadd.f32 %v1812_v12, %v1811_v50  ;;  %v1974_v12 = vld [vmem:[%s9753_s12 + $0x38] sm:$0xff] }
 0x5e2   : > { %6366 = vmatpush.xpose.msk.msrb.mxu2 %vm1056_vm1, %v1974_v12  ;;  %v6357_v12 = vld [vmem:[%s7582_s30 + $0x38] sm:$0xff] }
 0x5e3   : > { %6359 = vmatpush.xpose.msk.msrb.mxu1 %vm1056_vm1, %v6357_v12 }
 0x5e4   : > { %v1807_v51 = vpop.xlane.xlu0 %1806 }
 0x5e5   : > { %v1814_v55 = vmul.f32 %v7772_v23, %v1807_v51 }
 0x5e7   : > { %v1815_v56 = vadd.f32 %v1814_v55, %v1813_v54 }
 0x5e9   : > { %v1816_v57 = vsub.f32 %v1786_v5, %v1815_v56 }
 0x5eb   : > { %v1817_v58 = vmul.f32 1.442695, %v1816_v57 }
 0x5ed   : > { %7235 = vpow2.f32 %v1817_v58 }
 0x5ee   : > { %7237 = vrcp.f32 %v7512_v39 }
 0x5f3   : > { %v8139_v59 = vpop.eup %7235 }
 0x5f4   : > { %v1829_v60 = vmul.f32 %v8139_v59, %v7801_v27  ;;  %v1824_v63 = vmul.f32 %v8139_v59, %v7787_v25  ;;  %v1819_v0 = vmul.f32 %v8139_v59, %v7806_v28  ;;  %v1834_v5 = vmul.f32 %v8139_v59, %v7772_v23  ;;  %v7238_v42 = vpop.eup %7237 }
 0x5f5   : > { %v1605_v44 = vmul.f32 32.0, %v7238_v42  ;;  %vm1609_vm0 = vweird.f32 %v7238_v42 }
 0x5f6   : > { %v1830_v1 = vsel %vm1056_vm1, %v1829_v60, 0.0  ;;  %v1825_v30 = vsel %vm1056_vm1, %v1824_v63, 0.0  ;;  %v1820_v2 = vsel %vm1056_vm1, %v1819_v0, 0.0  ;;  %v1835_v10 = vsel %vm1056_vm1, %v1834_v5, 0.0 }
 0x5f7   : > { %1831 = vadd.xlane.f32.xlu0 %v1830_v1  ;;  %1826 = vadd.xlane.f32.xlu2 %v1825_v30  ;;  %v1606_v34 = vsub.f32 1.0, %v1605_v44 }
 0x5f8   : > { %1821 = vadd.xlane.f32.xlu1 %v1820_v2 }
 0x5f9   : > { %v1607_v35 = vmul.f32 %v7238_v42, %v1606_v34  ;;  %v1971_v34 = vld [vmem:[%s9753_s12 + $0x20] sm:$0xff] }
 0x5fb   : > { %v1608_v0 = vadd.f32 %v7238_v42, %v1607_v35  ;;  %v6355_v35 = vld [vmem:[%s7582_s30 + $0x28] sm:$0xff] }
 0x5fd   : > { %v8175_v3 = vsel %vm1609_vm0, %v7238_v42, %v1608_v0 }
 0x600   : > { %1836 = vadd.xlane.f32.xlu1 %v1835_v10 }
 0x608   : > { %1599 = vadd.xlane.f32.xlu1 %v1598_v29 }
 0x60b   : > { %7047 = vrot.lane.b32.xlu0 %v7046_v33, %s9775_s5 }
 0x60f   : > { %7042 = vrot.lane.b32.xlu2 %v7041_v32, %s9775_s5 }
 0x610   : > { %1602 = vadd.xlane.f32.xlu1 %v1601_v41 }
 0x66a   : > { %v1827_v47 = vpop.xlane.xlu2 %1826  ;;  %v1832_v22 = vpop.xlane.xlu0 %1831 }
 0x66b   : > { %v1822_v50 = vpop.xlane.xlu1 %1821  ;;  %7239 = vrcp.f32 %v1827_v47 }
 0x66c   : > { %7241 = vrcp.f32 %v1822_v50  ;;  %v1973_v50 = vld [vmem:[%s9753_s12 + $0x30] sm:$0xff] }
 0x66d   : > { %7243 = vrcp.f32 %v1832_v22  ;;  %6367 = vmatpush.xpose.msk.msrb.mxu2 %vm1056_vm1, %v1973_v50  ;;  %v1972_v22 = vld [vmem:[%s9753_s12 + $0x28] sm:$0xff] }
 0x671   : > { %v7240_v51 = vpop.eup %7239  ;;  %6368 = vmatpush.xpose.msk.msrb.mxu2 %vm1056_vm1, %v1972_v22 }
 0x672   : > { %v7043_v54 = vpop.permute.xlu2 %7042  ;;  %v7242_v55 = vpop.eup %7241  ;;  %v1841_v56 = vmul.f32 %v7240_v51, %v7787_v25  ;;  %v1970_v51 = vld [vmem:[%s9753_s12 + $0x18] sm:$0xff] }
 0x673   : > { %v1837_v57 = vpop.xlane.xlu1 %1836  ;;  %v7044_v58 = vunpack.i.l.bf16 %v7043_v54  ;;  %v1839_v60 = vmul.f32 %v7242_v55, %v7806_v28  ;;  %v7045_v63 = vunpack.i.h.bf16 %v7043_v54  ;;  %v7244_v1 = vpop.eup %7243  ;;  %v6354_v54 = vld [vmem:[%s7582_s30 + $0x20] sm:$0xff]  ;;  %v1969_v55 = vld [vmem:[%s9753_s12 + $0x10] sm:$0xff] }
 0x674   : > { %7245 = vrcp.f32 %v1837_v57  ;;  %v1843_v2 = vmul.f32 %v7244_v1, %v7801_v27  ;;  %v1967_v57 = vld [vmem:[%s9753_s12] sm:$0xff] }
 0x675   : > { %1879 = vmatpush.msrb.mxu3 %v7044_v58  ;;  %v1842_v30 = vadd.f32 %v1841_v56, %v1839_v60  ;;  %6369 = vmatpush.xpose.msk.msrb.mxu2 %vm1056_vm1, %v1971_v34  ;;  %v1968_v56 = vld [vmem:[%s9753_s12 + $0x8] sm:$0xff] }
 0x677   : > { %1880 = vmatpush.msrb.mxu3 %v7045_v63  ;;  %v1844_v14 = vadd.f32 %v1843_v2, %v1842_v30 }
 0x679   : > { %6370 = vmatpush.xpose.msk.msrb.mxu2 %vm1056_vm1, %v1970_v51  ;;  %v2036_v51 = vld [vmem:[%s9777_s18 + $0x10] sm:$0xff] }
 0x67a   : > { %v7246_v5 = vpop.eup %7245 }
 0x67b   : > { %v1845_v7 = vmul.f32 %v7246_v5, %v7772_v23  ;;  %v1600_v10 = vpop.xlane.xlu1 %1599 }
 0x67c   : > { %v1611_v15 = vmul.f32 %v8175_v3, %v1600_v10 }
 0x67d   : > { %v7048_v17 = vpop.permute.xlu0 %7047  ;;  %v1846_v29 = vadd.f32 %v1845_v7, %v1844_v14  ;;  %6371 = vmatpush.xpose.msk.msrb.mxu2 %vm1056_vm1, %v1969_v55  ;;  %v2034_v55 = vld [vmem:[%s9777_s18] sm:$0xff] }
 0x67e   : > { %v1613_v33 = vsub.f32 %v1594_v13, %v1611_v15  ;;  %v7049_v49 = vunpack.i.l.bf16 %v7048_v17  ;;  %v7050_v37 = vunpack.i.h.bf16 %v7048_v17 }
 0x67f   : > { %v1847_v41 = vmul.f32 %v8139_v59, %v1846_v29 }
 0x680   : > { %1881 = vmatpush.msrb.mxu3 %v7049_v49  ;;  %v1615_v32 = vmul.f32 %v1613_v33, %v1613_v33 }
 0x681   : > { %6372 = vmatpush.xpose.msk.msrb.mxu2 %vm1056_vm1, %v1968_v56 }
 0x682   : > { %1882 = vmatpush.msrb.mxu3 %v7050_v37  ;;  %v1617_v39 = vsel %vm1056_vm1, %v1615_v32, 0.0  ;;  %v7149_v37 = vld [vmem:[%s7612_s25] ss:$0 sm:$0xff] }
 0x683   : > { %1618 = vadd.xlane.f32.xlu0 %v1617_v39  ;;  %v1603_v42 = vpop.xlane.xlu1 %1602  ;;  %6353 = vmatmul.msk.f32.vlgmr.msrb.gmra.mxu3 %vm1056_vm1, %v1847_v41 }
 0x684   : > { %v1612_v13 = vmul.f32 %v8175_v3, %v1603_v42  ;;  %v7150_v42 = vld [vmem:[%s9776_s2] ss:$0 sm:$0xff] }
 0x685   : > { %6373 = vmatpush.xpose.msk.msrb.mxu2 %vm1056_vm1, %v1967_v57 }
 0x686   : > { %v8183_v44 = vsub.f32 %v1595_v31, %v1612_v13  ;;  %v6356_v31 = vld [vmem:[%s7582_s30 + $0x30] sm:$0xff] }
 0x687   : > { %6360 = vmatpush.xpose.msk.msrb.mxu1 %vm1056_vm1, %v6356_v31 }
 0x688   : > { %v1616_v47 = vmul.f32 %v8183_v44, %v8183_v44 }
 0x68a   : > { %v1620_v59 = vsel %vm1056_vm1, %v1616_v47, 0.0 }
 0x68b   : > { %1621 = vadd.xlane.f32.xlu2 %v1620_v59  ;;  %6361 = vmatpush.xpose.msk.msrb.mxu1 %vm1056_vm1, %v6355_v35  ;;  %v2037_v35 = vld [vmem:[%s9777_s18 + $0x18] sm:$0xff] }
 0x68c   : > { %6376 = vmatpush.xpose.msk.msra.mxu3 %vm1370_vm9, %v2037_v35 }
 0x68f   : > { %6362 = vmatpush.xpose.msk.msrb.mxu1 %vm1056_vm1, %v6354_v54  ;;  %v2035_v54 = vld [vmem:[%s9777_s18 + $0x8] sm:$0xff] }
 0x690   : > { %6377 = vmatpush.xpose.msk.msra.mxu3 %vm1370_vm9, %v2036_v51 }
 0x694   : > { %6378 = vmatpush.xpose.msk.msra.mxu3 %vm1370_vm9, %v2035_v54 }
 0x698   : > { %6379 = vmatpush.xpose.msk.msra.mxu3 %vm1370_vm9, %v2034_v55 }
 0x6f6   : > { %v1619_v58 = vpop.xlane.xlu0 %1618 }
 0x6f7   : > { %v1623_v60 = vmul.f32 %v1619_v58, %v8175_v3 }
 0x6f9   : > { %v1625_v63 = vadd.f32 1e-05, %v1623_v60 }
 0x6fb   : > { %7247 = vrsqrt.f32 %v1625_v63  ;;  %vm1633_vm13 = vweird.f32 %v1625_v63 }
 0x6fe   : > { %v1622_v0 = vpop.xlane.xlu2 %1621 }
 0x6ff   : > { %v1624_v1 = vmul.f32 %v1622_v0, %v8175_v3 }
 0x701   : > { %v7248_v30 = vpop.eup %7247  ;;  %v1626_v2 = vadd.f32 1e-05, %v1624_v1 }
 0x702   : > { %v1628_v5 = vmul.f32 %v7248_v30, %v1625_v63  ;;  %vm1634_vm15 = vweird.f32 %v7248_v30  ;;  %v7152_v63 = vld [vmem:[%s9778_s3] ss:$0 sm:$0xff] }
 0x703   : > { %7249 = vrsqrt.f32 %v1626_v2  ;;  %vm1635_vm14 = vmor %vm1633_vm13, %vm1634_vm15  ;;  %vm1643_vm0 = vweird.f32 %v1626_v2 }
 0x704   : > { %v1629_v7 = vmul.f32 %v7248_v30, %v1628_v5 }
 0x706   : > { %v1630_v10 = vmul.f32 0.5, %v1629_v7  ;;  %v1884_v14 = vpop.f32.mrf.mxu3 }
 0x707   : > { %6363 = vmatmul.msk.f32.vlgmr.msrb.gmra.mxu1 %vm1056_vm1, %v1884_v14 }
 0x708   : > { %v1631_v15 = vsub.f32 1.5, %v1630_v10 }
 0x709   : > { %v7250_v17 = vpop.eup %7249 }
 0x70a   : > { %v1632_v29 = vmul.f32 %v7248_v30, %v1631_v15  ;;  %v1638_v49 = vmul.f32 %v7250_v17, %v1626_v2  ;;  %vm1644_vm8 = vweird.f32 %v7250_v17 }
 0x70b   : > { %vm1645_vm12 = vmor %vm1643_vm0, %vm1644_vm8 }
 0x70c   : > { %v1636_v32 = vsel %vm1635_vm14, %v7248_v30, %v1632_v29  ;;  %v1639_v41 = vmul.f32 %v7250_v17, %v1638_v49  ;;  %v6390_v29 = vld [vmem:[%s9753_s12 + $0x70] sm:$0xff]  ;;  %v6389_v49 = vld [vmem:[%s9753_s12 + $0x68] sm:$0xff] }
 0x70d   : > { %v1647_v39 = vmul.f32 %v1636_v32, %v1613_v33  ;;  %v6387_v32 = vld [vmem:[%s9753_s12 + $0x58] sm:$0xff] }
 0x70e   : > { %v1640_v13 = vmul.f32 0.5, %v1639_v41  ;;  %v6386_v41 = vld [vmem:[%s9753_s12 + $0x50] sm:$0xff] }
 0x70f   : > { %v1652_v47 = vmul.f32 %v7149_v37, %v1647_v39  ;;  %v6385_v39 = vld [vmem:[%s9753_s12 + $0x48] sm:$0xff] }
 0x710   : > { %v1641_v59 = vsub.f32 1.5, %v1640_v13  ;;  %v6405_v13 = vld [vmem:[%s9777_s18 + $0x38] sm:$0xff] }
 0x711   : > { %v8215_v50 = vadd.f32 %v7150_v42, %v1652_v47  ;;  %6407 = vmatpush.xpose.msk.msrb.mxu3 %vm1370_vm9, %v6405_v13  ;;  %v6404_v47 = vld [vmem:[%s9777_s18 + $0x30] sm:$0xff] }
 0x712   : > { %v1642_v12 = vmul.f32 %v7250_v17, %v1641_v59 }
 0x713   : > { %6374 = vmatmul.msk.f32.vlgmr.msrb.gmra.mxu2 %vm1056_vm1, %v8215_v50 }
 0x714   : > { %v1646_v22 = vsel %vm1645_vm12, %v7250_v17, %v1642_v12  ;;  %v6391_v17 = vld [vmem:[%s9753_s12 + $0x78] sm:$0xff] }
 0x715   : > { %v1648_v33 = vmul.f32 %v1646_v22, %v8183_v44  ;;  %v7151_v44 = vld [vmem:[%s9754_s6 + $0x1] ss:$0 sm:$0xff]  ;;  %6393 = vmatpush.xpose.msk.msra.mxu1 %vm1056_vm1, %v6391_v17  ;;  %6408 = vmatpush.xpose.msk.msrb.mxu3 %vm1370_vm9, %v6404_v47  ;;  %v6425_v47 = vld [vmem:[%s7572_s19 + $0x118] sm:$0xff] }
 0x716   : > { %6433 = vmatpush.xpose.msk.msra.mxu2 %vm1056_vm1, %v6425_v47 }
 0x717   : > { %v1653_v31 = vmul.f32 %v7149_v37, %v1648_v33  ;;  %v6388_v37 = vld [vmem:[%s9753_s12 + $0x60] sm:$0xff]  ;;  %v6403_v33 = vld [vmem:[%s9777_s18 + $0x28] sm:$0xff] }
 0x719   : > { %v8220_v34 = vadd.f32 %v7150_v42, %v1653_v31  ;;  %6394 = vmatpush.xpose.msk.msra.mxu1 %vm1056_vm1, %v6390_v29  ;;  %v6384_v42 = vld [vmem:[%s9753_s12 + $0x40] sm:$0xff]  ;;  %6409 = vmatpush.xpose.msk.msrb.mxu3 %vm1370_vm9, %v6403_v33 }
 0x71b   : > { %6375 = vmatmul.msk.f32.gmra.mxu2 %vm1056_vm1, %v8220_v34 }
 0x71d   : > { %6395 = vmatpush.xpose.msk.msra.mxu1 %vm1056_vm1, %v6389_v49 }
 0x721   : > { %6396 = vmatpush.xpose.msk.msra.mxu1 %vm1056_vm1, %v6388_v37 }
 0x725   : > { %6397 = vmatpush.xpose.msk.msra.mxu1 %vm1056_vm1, %v6387_v32 }
 0x729   : > { %6398 = vmatpush.xpose.msk.msra.mxu1 %vm1056_vm1, %v6386_v41 }
 0x72d   : > { %6399 = vmatpush.xpose.msk.msra.mxu1 %vm1056_vm1, %v6385_v39 }
 0x731   : > { %6400 = vmatpush.xpose.msk.msra.mxu1 %vm1056_vm1, %v6384_v42 }
 0x784   : > { %v1929_v56 = vpop.f32.mrf.mxu1 }
 0x785   : > { %v1930_v57 = vadd.f32 %v7151_v44, %v1929_v56  ;;  %v7154_v56 = vld [vmem:[%s7612_s25 + $0x1] ss:$0 sm:$0xff] }
 0x787   : > { %v1932_v58 = vadd.f32 %v1930_v57, %v1175_v18 }
 0x789   : > { %v1937_v60 = vsel %vm1056_vm1, %v1932_v58, 0.0 }
 0x78a   : > { %1938 = vadd.xlane.f32.xlu1 %v1937_v60  ;;  %v7155_v60 = vld [vmem:[%s9776_s2 + $0x1] ss:$0 sm:$0xff] }
 0x796   : > { %v2026_v0 = vpop.f32.mrf.mxu2 }
 0x797   : > { %v2027_v1 = vadd.f32 %v7152_v63, %v2026_v0 }
 0x799   : > { %v2032_v30 = vmax.f32 %v2027_v1, 0.0  ;;  %v6402_v1 = vld [vmem:[%s9777_s18 + $0x20] sm:$0xff] }
 0x79a   : > { %6410 = vmatpush.xpose.msk.msrb.mxu3 %vm1370_vm9, %v6402_v1  ;;  %v6421_v1 = vld [vmem:[%s7572_s19 + $0xf8] sm:$0xff] }
 0x79b   : > { %6380 = vmatmul.msk.f32.vlgmr.msra.gmra.mxu3 %vm1370_vm9, %v2032_v30  ;;  %v7156_v30 = vld [vmem:[%s9778_s3 + $0x1] ss:$0 sm:$0xff] }
 0x79e   : > { %v2029_v2 = vpop.f32.mrf.mxu2 }
 0x79f   : > { %v2030_v5 = vadd.f32 %v7152_v63, %v2029_v2 }
 0x7a1   : > { %v2033_v7 = vmax.f32 %v2030_v5, 0.0 }
 0x7a3   : > { %6381 = vmatmul.msk.f32.gmra.mxu3 %vm1370_vm9, %v2033_v7 }
 0x7fd   : > { %v1939_v16 = vpop.xlane.xlu1 %1938 }
 0x7fe   : > { %v1940_v18 = vmul.f32 %v1939_v16, %v8175_v3 }
 0x800   : > { %v1941_v10 = vsub.f32 %v1932_v58, %v1940_v18 }
 0x802   : > { %v1942_v14 = vmul.f32 %v1941_v10, %v1941_v10 }
 0x804   : > { %v1943_v15 = vsel %vm1056_vm1, %v1942_v14, 0.0  ;;  %v7157_v14 = vld [vmem:[%s9779_s21 + $0x1] ss:$0 sm:$0xff] }
 0x805   : > { %1944 = vadd.xlane.f32.xlu1 %v1943_v15  ;;  %v7153_v15 = vld [vmem:[%s9779_s21] ss:$0 sm:$0xff] }
 0x81e   : > { %v2077_v16 = vpop.f32.mrf.mxu3 }
 0x81f   : > { %v2078_v49 = vadd.f32 %v7153_v15, %v2077_v16  ;;  %v6418_v16 = vld [vmem:[%s7572_s19 + $0xe0] sm:$0xff] }
 0x821   : > { %v2083_v32 = vadd.f32 %v2078_v49, %v8215_v50 }
 0x823   : > { %v2089_v39 = vsel %vm1056_vm1, %v2083_v32, 0.0 }
 0x826   : > { %v2080_v18 = vpop.f32.mrf.mxu3 }
 0x827   : > { %v2081_v41 = vadd.f32 %v7153_v15, %v2080_v18  ;;  %v6415_v18 = vld [vmem:[%s7572_s19 + $0xc8] sm:$0xff] }
 0x829   : > { %v2084_v42 = vadd.f32 %v2081_v41, %v8220_v34 }
 0x82b   : > { %v2092_v13 = vsel %vm1056_vm1, %v2084_v42, 0.0 }
 0x878   : > { %v1945_v59 = vpop.xlane.xlu1 %1944 }
 0x879   : > { %v1946_v12 = vmul.f32 %v1945_v59, %v8175_v3 }
 0x87b   : > { %v1947_v22 = vadd.f32 1e-05, %v1946_v12 }
 0x87d   : > { %7251 = vrsqrt.f32 %v1947_v22  ;;  %vm1954_vm15 = vweird.f32 %v1947_v22 }
 0x883   : > { %v7252_v31 = vpop.eup %7251 }
 0x884   : > { %v1949_v35 = vmul.f32 %v7252_v31, %v1947_v22  ;;  %vm1955_vm12 = vweird.f32 %v7252_v31 }
 0x885   : > { %vm1956_vm13 = vmor %vm1954_vm15, %vm1955_vm12 }
 0x886   : > { %v1950_v51 = vmul.f32 %v7252_v31, %v1949_v35 }
 0x888   : > { %v1951_v54 = vmul.f32 0.5, %v1950_v51 }
 0x88a   : > { %v1952_v55 = vsub.f32 1.5, %v1951_v54 }
 0x88c   : > { %v1953_v44 = vmul.f32 %v7252_v31, %v1952_v55 }
 0x88e   : > { %v1957_v57 = vsel %vm1956_vm13, %v7252_v31, %v1953_v44 }
 0x88f   : > { %v1958_v58 = vmul.f32 %v1957_v57, %v1941_v10 }
 0x891   : > { %v1962_v63 = vmul.f32 %v7154_v56, %v1958_v58 }
 0x893   : > { %v1966_v0 = vadd.f32 %v7155_v60, %v1962_v63  ;;  %v6424_v60 = vld [vmem:[%s7572_s19 + $0x110] sm:$0xff]  ;;  %v6423_v63 = vld [vmem:[%s7572_s19 + $0x108] sm:$0xff] }
 0x894   : > { %6434 = vmatpush.xpose.msk.msra.mxu2 %vm1056_vm1, %v6424_v60 }
 0x895   : > { %6401 = vmatmul.msk.f32.vlgmr.msra.gmra.mxu1 %vm1056_vm1, %v1966_v0 }
 0x898   : > { %6435 = vmatpush.xpose.msk.msra.mxu2 %vm1056_vm1, %v6423_v63 }
 0x912   : > { %v2201_v2 = vpop.f32.mrf.mxu1 }
 0x913   : > { %v2202_v5 = vadd.f32 %v7156_v30, %v2201_v2  ;;  %v6420_v30 = vld [vmem:[%s7572_s19 + $0xf0] sm:$0xff]  ;;  %v6417_v2 = vld [vmem:[%s7572_s19 + $0xd8] sm:$0xff] }
 0x914   : > { %6427 = vmatpush.xpose.msk.msrb.mxu0 %vm1056_vm1, %v6417_v2 }
 0x915   : > { %v2204_v7 = vmax.f32 %v2202_v5, 0.0  ;;  %v6419_v5 = vld [vmem:[%s7572_s19 + $0xe8] sm:$0xff] }
 0x917   : > { %6411 = vmatmul.msk.f32.vlgmr.msrb.gmra.mxu3 %vm1370_vm9, %v2204_v7  ;;  %v6416_v7 = vld [vmem:[%s7572_s19 + $0xd0] sm:$0xff] }
 0x918   : > { %6428 = vmatpush.xpose.msk.msrb.mxu0 %vm1056_vm1, %v6416_v7 }
 0x91c   : > { %6429 = vmatpush.xpose.msk.msrb.mxu0 %vm1056_vm1, %v6415_v18  ;;  %v7161_v18 = vld [vmem:[%s9776_s2 + $0x2] ss:$0 sm:$0xff] }
 0x99a   : > { %v2247_v10 = vpop.f32.mrf.mxu3 }
 0x99b   : > { %v2248_v17 = vadd.f32 %v7157_v14, %v2247_v10 }
 0x99d   : > { %v2250_v29 = vadd.f32 %v2248_v17, %v1966_v0  ;;  %v6422_v0 = vld [vmem:[%s7572_s19 + $0x100] sm:$0xff] }
 0x99e   : > { %6436 = vmatpush.xpose.msk.msra.mxu2 %vm1056_vm1, %v6422_v0  ;;  %v6414_v17 = vld [vmem:[%s7572_s19 + $0xc0] sm:$0xff] }
 0x99f   : > { %v2255_v37 = vsel %vm1056_vm1, %v2250_v29, 0.0  ;;  %6430 = vmatpush.xpose.msk.msrb.mxu0 %vm1056_vm1, %v6414_v17 }
 0x9a0   : > { %2256 = vadd.xlane.f32.xlu1 %v2255_v37 }
 0x9a2   : > { %6437 = vmatpush.xpose.msk.msra.mxu2 %vm1056_vm1, %v6421_v1 }
 0x9a6   : > { %6438 = vmatpush.xpose.msk.msra.mxu2 %vm1056_vm1, %v6420_v30 }
 0x9a8   : > { %2090 = vadd.xlane.f32.xlu1 %v2089_v39  ;;  %v8323_v39 = vld [vmem:[%s7577_s24 + $0x2] ss:$0 sm:$0xff] }
 0x9aa   : > { %6439 = vmatpush.xpose.msk.msra.mxu2 %vm1056_vm1, %v6419_v5  ;;  %v7159_v5 = vld [vmem:[%s7612_s25 + $0x2] ss:$0 sm:$0xff] }
 0x9ae   : > { %6440 = vmatpush.xpose.msk.msra.mxu2 %vm1056_vm1, %v6418_v16 }
 0x9b0   : > { %2093 = vadd.xlane.f32.xlu1 %v2092_v13 }
 0xa13   : > { %v2257_v59 = vpop.xlane.xlu1 %2256 }
 0xa14   : > { %v2258_v12 = vmul.f32 %v2257_v59, %v8175_v3 }
 0xa16   : > { %v8281_v22 = vsub.f32 %v2250_v29, %v2258_v12 }
 0xa18   : > { %v2260_v50 = vmul.f32 %v8281_v22, %v8281_v22 }
 0xa1a   : > { %v2261_v33 = vsel %vm1056_vm1, %v2260_v50, 0.0 }
 0xa1b   : > { %2262 = vadd.xlane.f32.xlu1 %v2261_v33  ;;  %v2091_v34 = vpop.xlane.xlu1 %2090 }
 0xa1c   : > { %v2095_v31 = vmul.f32 %v2091_v34, %v8175_v3 }
 0xa1e   : > { %v8287_v35 = vsub.f32 %v2083_v32, %v2095_v31 }
 0xa20   : > { %v2099_v51 = vmul.f32 %v8287_v35, %v8287_v35 }
 0xa22   : > { %v2101_v54 = vsel %vm1056_vm1, %v2099_v51, 0.0  ;;  %v7158_v51 = vld [vmem:[%s7612_s25 + $0x3] ss:$0 sm:$0xff] }
 0xa23   : > { %2102 = vadd.xlane.f32.xlu0 %v2101_v54  ;;  %v2094_v55 = vpop.xlane.xlu1 %2093 }
 0xa24   : > { %v2096_v44 = vmul.f32 %v2094_v55, %v8175_v3 }
 0xa26   : > { %v8293_v56 = vsub.f32 %v2084_v42, %v2096_v44 }
 0xa28   : > { %v2100_v57 = vmul.f32 %v8293_v56, %v8293_v56 }
 0xa2a   : > { %v2104_v58 = vsel %vm1056_vm1, %v2100_v57, 0.0  ;;  %v7160_v57 = vld [vmem:[%s9776_s2 + $0x3] ss:$0 sm:$0xff] }
 0xa2b   : > { %2105 = vadd.xlane.f32.xlu2 %v2104_v58 }
 0xa34   : > { %2344 = vrot.lane.b32.xlu1 %v8323_v39, %s9780_s8 }
 0xa8e   : > { %v2263_v14 = vpop.xlane.xlu1 %2262 }
 0xa8f   : > { %v2264_v10 = vmul.f32 %v2263_v14, %v8175_v3 }
 0xa91   : > { %v2265_v15 = vadd.f32 1e-05, %v2264_v10 }
 0xa93   : > { %7253 = vrsqrt.f32 %v2265_v15  ;;  %vm2272_vm8 = vweird.f32 %v2265_v15 }
 0xa96   : > { %v2103_v29 = vpop.xlane.xlu0 %2102 }
 0xa97   : > { %v2107_v49 = vmul.f32 %v2103_v29, %v8175_v3 }
 0xa99   : > { %v7254_v37 = vpop.eup %7253  ;;  %v2109_v32 = vadd.f32 1e-05, %v2107_v49 }
 0xa9a   : > { %v2267_v41 = vmul.f32 %v7254_v37, %v2265_v15  ;;  %vm2273_vm14 = vweird.f32 %v7254_v37 }
 0xa9b   : > { %7255 = vrsqrt.f32 %v2109_v32  ;;  %vm2274_vm0 = vmor %vm2272_vm8, %vm2273_vm14  ;;  %vm2117_vm15 = vweird.f32 %v2109_v32 }
 0xa9c   : > { %v2268_v42 = vmul.f32 %v7254_v37, %v2267_v41 }
 0xa9e   : > { %v2269_v13 = vmul.f32 0.5, %v2268_v42  ;;  %v2106_v47 = vpop.xlane.xlu2 %2105 }
 0xa9f   : > { %v2108_v59 = vmul.f32 %v2106_v47, %v8175_v3 }
 0xaa0   : > { %v2270_v12 = vsub.f32 1.5, %v2269_v13 }
 0xaa1   : > { %v7256_v50 = vpop.eup %7255  ;;  %v2110_v33 = vadd.f32 1e-05, %v2108_v59 }
 0xaa2   : > { %v2271_v34 = vmul.f32 %v7254_v37, %v2270_v12  ;;  %v2112_v31 = vmul.f32 %v7256_v50, %v2109_v32  ;;  %vm2118_vm12 = vweird.f32 %v7256_v50 }
 0xaa3   : > { %7257 = vrsqrt.f32 %v2110_v33  ;;  %vm2119_vm13 = vmor %vm2117_vm15, %vm2118_vm12  ;;  %vm2127_vm8 = vweird.f32 %v2110_v33 }
 0xaa4   : > { %v2275_v54 = vsel %vm2274_vm0, %v7254_v37, %v2271_v34  ;;  %v2113_v55 = vmul.f32 %v7256_v50, %v2112_v31  ;;  %v6465_v31 = vld [vmem:[%s7572_s19 + $0x130] sm:$0xff] }
 0xaa5   : > { %v2276_v44 = vmul.f32 %v2275_v54, %v8281_v22  ;;  %v6464_v54 = vld [vmem:[%s7572_s19 + $0x128] sm:$0xff] }
 0xaa6   : > { %v2114_v58 = vmul.f32 0.5, %v2113_v55 }
 0xaa7   : > { %v2280_v60 = vmul.f32 %v7158_v51, %v2276_v44  ;;  %v6463_v44 = vld [vmem:[%s7572_s19 + $0x120] sm:$0xff] }
 0xaa8   : > { %v2115_v63 = vsub.f32 1.5, %v2114_v58 }
 0xaa9   : > { %v7258_v0 = vpop.eup %7257  ;;  %v8331_v1 = vadd.f32 %v7160_v57, %v2280_v60 }
 0xaaa   : > { %v2116_v30 = vmul.f32 %v7256_v50, %v2115_v63  ;;  %v2122_v2 = vmul.f32 %v7258_v0, %v2110_v33  ;;  %vm2128_vm14 = vweird.f32 %v7258_v0  ;;  %v6466_v33 = vld [vmem:[%s7572_s19 + $0x138] sm:$0xff] }
 0xaab   : > { %6441 = vmatmul.msk.f32.vlgmr.msra.gmra.mxu2 %vm1056_vm1, %v8331_v1  ;;  %vm2129_vm0 = vmor %vm2127_vm8, %vm2128_vm14 }
 0xaac   : > { %v2120_v7 = vsel %vm2119_vm13, %v7256_v50, %v2116_v30  ;;  %v2123_v16 = vmul.f32 %v7258_v0, %v2122_v2 }
 0xaad   : > { %v2131_v22 = vmul.f32 %v2120_v7, %v8287_v35  ;;  %v2345_v35 = vpop.permute.xlu1 %2344 }
 0xaae   : > { %v2124_v14 = vmul.f32 0.5, %v2123_v16 }
 0xaaf   : > { %v2136_v10 = vmul.f32 %v7159_v5, %v2131_v22 }
 0xab0   : > { %v2125_v15 = vsub.f32 1.5, %v2124_v14 }
 0xab1   : > { %v8338_v17 = vadd.f32 %v7161_v18, %v2136_v10 }
 0xab2   : > { %v2126_v29 = vmul.f32 %v7258_v0, %v2125_v15 }
 0xab3   : > { %6431 = vmatmul.msk.f32.vlgmr.msrb.gmra.mxu0 %vm1056_vm1, %v8338_v17 }
 0xab4   : > { %v2130_v49 = vsel %vm2129_vm0, %v7258_v0, %v2126_v29 }
 0xab5   : > { %v2132_v37 = vmul.f32 %v2130_v49, %v8293_v56 }
 0xab7   : > { %v2137_v32 = vmul.f32 %v7159_v5, %v2132_v37 }
 0xab9   : > { %v8343_v41 = vadd.f32 %v7161_v18, %v2137_v32 }
 0xabb   : > { %6432 = vmatmul.msk.f32.gmra.mxu0 %vm1056_vm1, %v8343_v41 }
 0xb2e   : > { %v2391_v42 = vpop.f32.mrf.mxu2 }
 0xb2f   : > { %v8347_v13 = vadd.f32 %v2391_v42, %v2345_v35 }
 0xb30   : > { %v2338_v12 = vpop.f32.mrf.mxu0 }
 0xb31   : > { %v2397_v47 = vmul.f32 %v7772_v23, %v8347_v13  ;;  %v2396_v56 = vmul.f32 %v7801_v27, %v8347_v13  ;;  %v2395_v59 = vmul.f32 %v7787_v25, %v8347_v13  ;;  %v2394_v50 = vmul.f32 %v7806_v28, %v8347_v13 }
 0xb32   : > { %v2339_v34 = vadd.f32 %v8323_v39, %v2338_v12  ;;  %v2398_v35 = vmul.f32 %v8347_v13, %v7844_v46  ;;  %v2399_v42 = vmul.f32 %v8347_v13, %v7828_v38 }
 0xb33   : > { %6442 = vmatpush.xpose.msk.msra.mxu3 %vm1056_vm1, %v2397_v47 }
 0xb34   : > { %v7056_v47 = vpack.i.bf16 %v2398_v35, %v2399_v42 }
 0xb37   : > { %6443 = vmatpush.xpose.msk.msra.mxu3 %vm1056_vm1, %v2396_v56 }
 0xb38   : > { %v2341_v51 = vpop.f32.mrf.mxu0 }
 0xb39   : > { %v2342_v55 = vadd.f32 %v8323_v39, %v2341_v51 }
 0xb3b   : > { %6444 = vmatpush.xpose.msk.msra.mxu3 %vm1056_vm1, %v2395_v59 }
 0xb3f   : > { %6445 = vmatpush.xpose.msk.msra.mxu3 %vm1056_vm1, %v2394_v50 }
 0xb42   : > { %6446 = vmatmul.msk.f32.vlgmr.msra.gmra.mxu3 %vm1056_vm1, %v2339_v34 }
 0xb43   : > { %6476 = vmatpush.xpose.msk.msrb.mxu3 %vm1056_vm1, %v6466_v33 }
 0xb47   : > { %6477 = vmatpush.xpose.msk.msrb.mxu3 %vm1056_vm1, %v6465_v31 }
 0xb4a   : > { %6447 = vmatmul.msk.f32.gmra.mxu3 %vm1056_vm1, %v2342_v55 }
 0xb4b   : > { %6478 = vmatpush.xpose.msk.msrb.mxu3 %vm1056_vm1, %v6464_v54 }
 0xb4f   : > { %6479 = vmatpush.xpose.msk.msrb.mxu3 %vm1056_vm1, %v6463_v44 }
 0xb52   : > { %6480 = vmatmul.msk.f32.vlgmr.msrb.gmra.mxu3 %vm1056_vm1, %v8331_v1 }
 0xbc5   : > { %v2437_v57 = vpop.f32.mrf.mxu3 }
 0xbc6   : > { %v2438_v58 = vadd.f32 %v2437_v57, %v8120_v45 }
 0xbc8   : > { %v2451_v60 = vsel %vm7776_vm7, %v2438_v58, -1e+30  ;;  %v2443_v63 = vsel %vm1002_vm11, %v2438_v58, -1e+30  ;;  %v2467_v5 = vsel %vm7764_vm5, %v2438_v58, -1e+30 }
 0xbc9   : > { %v2453_v39 = vsel %vm1056_vm1, %v2451_v60, -inf  ;;  %v2445_v0 = vsel %vm1056_vm1, %v2443_v63, -inf  ;;  %v2459_v7 = vsel %vm7793_vm10, %v2438_v58, -1e+30  ;;  %v2469_v18 = vsel %vm1056_vm1, %v2467_v5, -inf }
 0xbca   : > { %2454 = vmax.xlane.f32.xlu2 %v2453_v39  ;;  %2446 = vmax.xlane.f32.xlu0 %v2445_v0  ;;  %v2461_v14 = vsel %vm1056_vm1, %v2459_v7, -inf }
 0xbcd   : > { %v2440_v30 = vpop.f32.mrf.mxu3 }
 0xbce   : > { %v2441_v2 = vadd.f32 %v2440_v30, %v8120_v45 }
 0xbd0   : > { %v2460_v16 = vsel %vm7793_vm10, %v2441_v2, -1e+30  ;;  %v2452_v10 = vsel %vm7776_vm7, %v2441_v2, -1e+30  ;;  %v2444_v15 = vsel %vm1002_vm11, %v2441_v2, -1e+30 }
 0xbd1   : > { %v2464_v22 = vsel %vm1056_vm1, %v2460_v16, -inf  ;;  %v2456_v29 = vsel %vm1056_vm1, %v2452_v10, -inf  ;;  %v2448_v49 = vsel %vm1056_vm1, %v2444_v15, -inf  ;;  %v2468_v37 = vsel %vm7764_vm5, %v2441_v2, -1e+30 }
 0xbd2   : > { %2465 = vmax.xlane.f32.xlu1 %v2464_v22  ;;  %2470 = vmax.xlane.f32.xlu2 %v2469_v18  ;;  %v2472_v32 = vsel %vm1056_vm1, %v2468_v37, -inf }
 0xbd3   : > { %2462 = vmax.xlane.f32.xlu0 %v2461_v14 }
 0xbda   : > { %2457 = vmax.xlane.f32.xlu2 %v2456_v29 }
 0xbdb   : > { %2449 = vmax.xlane.f32.xlu0 %v2448_v49 }
 0xbe3   : > { %2473 = vmax.xlane.f32.xlu0 %v2472_v32 }
 0xbeb   : > { %7057 = vrot.lane.b32.xlu1 %v7056_v47, %s9780_s8 }
 0xc3d   : > { %v2455_v56 = vpop.xlane.xlu2 %2454  ;;  %v2447_v59 = vpop.xlane.xlu0 %2446 }
 0xc3e   : > { %v2479_v12 = vmul.f32 %v7787_v25, %v2455_v56  ;;  %v2475_v50 = vmul.f32 %v7806_v28, %v2447_v59 }
 0xc40   : > { %v2481_v31 = vadd.f32 %v2479_v12, %v2475_v50 }
 0xc45   : > { %v2471_v33 = vpop.xlane.xlu2 %2470  ;;  %v2466_v5 = vpop.xlane.xlu1 %2465 }
 0xc46   : > { %v2463_v34 = vpop.xlane.xlu0 %2462  ;;  %v2487_v54 = vmul.f32 %v7772_v23, %v2471_v33  ;;  %v2484_v16 = vmul.f32 %v7801_v27, %v2466_v5 }
 0xc47   : > { %v2483_v51 = vmul.f32 %v7801_v27, %v2463_v34 }
 0xc49   : > { %v2485_v55 = vadd.f32 %v2483_v51, %v2481_v31 }
 0xc4b   : > { %v2489_v44 = vadd.f32 %v2487_v54, %v2485_v55  ;;  %v2400_v55 = vmul.f32 %v8347_v13, %v7830_v40 }
 0xc4d   : > { %v2491_v57 = vsub.f32 %v2438_v58, %v2489_v44  ;;  %v2458_v60 = vpop.xlane.xlu2 %2457  ;;  %v2401_v44 = vmul.f32 %v8347_v13, %v7825_v36 }
 0xc4e   : > { %v2450_v63 = vpop.xlane.xlu0 %2449  ;;  %v2480_v0 = vmul.f32 %v7787_v25, %v2458_v60 }
 0xc4f   : > { %v2493_v39 = vmul.f32 1.442695, %v2491_v57  ;;  %v2476_v30 = vmul.f32 %v7806_v28, %v2450_v63  ;;  %v7051_v60 = vpack.i.bf16 %v2400_v55, %v2401_v44  ;;  %v8448_v63 = vld [vmem:[%s7577_s24 + $0x3] ss:$0 sm:$0xff] }
 0xc51   : > { %7259 = vpow2.f32 %v2493_v39  ;;  %v2482_v7 = vadd.f32 %v2480_v0, %v2476_v30 }
 0xc53   : > { %v2486_v14 = vadd.f32 %v2484_v16, %v2482_v7 }
 0xc56   : > { %v2474_v22 = vpop.xlane.xlu0 %2473 }
 0xc57   : > { %v8413_v18 = vpop.eup %7259  ;;  %v2488_v10 = vmul.f32 %v7772_v23, %v2474_v22 }
 0xc58   : > { %v2507_v58 = vmul.f32 %v8413_v18, %v7787_v25  ;;  %v2497_v15 = vmul.f32 %v8413_v18, %v7806_v28  ;;  %v2527_v42 = vmul.f32 %v8413_v18, %v7772_v23  ;;  %v2517_v47 = vmul.f32 %v8413_v18, %v7801_v27 }
 0xc59   : > { %v2490_v29 = vadd.f32 %v2488_v10, %v2486_v14 }
 0xc5a   : > { %v2509_v49 = vsel %vm1056_vm1, %v2507_v58, 0.0  ;;  %v2499_v37 = vsel %vm1056_vm1, %v2497_v15, 0.0  ;;  %v2529_v56 = vsel %vm1056_vm1, %v2527_v42, 0.0  ;;  %v2519_v59 = vsel %vm1056_vm1, %v2517_v47, 0.0 }
 0xc5b   : > { %v2492_v32 = vsub.f32 %v2441_v2, %v2490_v29  ;;  %2510 = vadd.xlane.f32.xlu0 %v2509_v49  ;;  %2500 = vadd.xlane.f32.xlu2 %v2499_v37 }
 0xc5d   : > { %v2495_v35 = vmul.f32 1.442695, %v2492_v32 }
 0xc5f   : > { %7261 = vpow2.f32 %v2495_v35 }
 0xc63   : > { %2530 = vadd.xlane.f32.xlu0 %v2529_v56  ;;  %2520 = vadd.xlane.f32.xlu2 %v2519_v59 }
 0xc65   : > { %v8428_v12 = vpop.eup %7261 }
 0xc66   : > { %v2508_v2 = vmul.f32 %v8428_v12, %v7787_v25  ;;  %v2498_v50 = vmul.f32 %v8428_v12, %v7806_v28  ;;  %v2518_v31 = vmul.f32 %v8428_v12, %v7801_v27  ;;  %v2528_v54 = vmul.f32 %v8428_v12, %v7772_v23 }
 0xc68   : > { %v2512_v33 = vsel %vm1056_vm1, %v2508_v2, 0.0  ;;  %v2502_v34 = vsel %vm1056_vm1, %v2498_v50, 0.0  ;;  %v2522_v51 = vsel %vm1056_vm1, %v2518_v31, 0.0  ;;  %v2532_v57 = vsel %vm1056_vm1, %v2528_v54, 0.0  ;;  %v7058_v2 = vpop.permute.xlu1 %7057 }
 0xc69   : > { %v7059_v44 = vunpack.i.l.bf16 %v7058_v2 }
 0xc6b   : > { %2513 = vadd.xlane.f32.xlu0 %v2512_v33  ;;  %2503 = vadd.xlane.f32.xlu2 %v2502_v34 }
 0xc73   : > { %2523 = vadd.xlane.f32.xlu2 %v2522_v51 }
 0xc7b   : > { %2533 = vadd.xlane.f32.xlu2 %v2532_v57 }
 0xc7f   : > { %7052 = vrot.lane.b32.xlu0 %v7051_v60, %s9780_s8  ;;  %v7060_v60 = vunpack.i.h.bf16 %v7058_v2 }
 0xc93   : > { %2761 = vrot.lane.b32.xlu2 %v8448_v63, %s9780_s8 }
 0xcce   : > { %v2501_v39 = vpop.xlane.xlu2 %2500  ;;  %v2511_v0 = vpop.xlane.xlu0 %2510 }
 0xccf   : > { %7263 = vrcp.f32 %v2501_v39 }
 0xcd0   : > { %7265 = vrcp.f32 %v2511_v0 }
 0xcd5   : > { %v7264_v16 = vpop.eup %7263 }
 0xcd6   : > { %v2521_v30 = vpop.xlane.xlu2 %2520  ;;  %v2531_v7 = vpop.xlane.xlu0 %2530  ;;  %v2537_v58 = vmul.f32 %v7264_v16, %v7806_v28 }
 0xcd7   : > { %7267 = vrcp.f32 %v2521_v30  ;;  %v7266_v22 = vpop.eup %7265  ;;  %v6474_v30 = vld [vmem:[%s7572_s19 + $0x178] sm:$0xff] }
 0xcd8   : > { %7269 = vrcp.f32 %v2531_v7  ;;  %v2541_v15 = vmul.f32 %v7266_v22, %v7787_v25  ;;  %v6472_v22 = vld [vmem:[%s7572_s19 + $0x168] sm:$0xff] }
 0xcda   : > { %v2543_v37 = vadd.f32 %v2541_v15, %v2537_v58  ;;  %v6452_v58 = vld [vmem:[%s7582_s30 + $0x50] sm:$0xff]  ;;  %v6470_v15 = vld [vmem:[%s7572_s19 + $0x158] sm:$0xff] }
 0xcdd   : > { %v7268_v10 = vpop.eup %7267 }
 0xcde   : > { %v2504_v5 = vpop.xlane.xlu2 %2503  ;;  %v2514_v14 = vpop.xlane.xlu0 %2513  ;;  %v2545_v29 = vmul.f32 %v7268_v10, %v7801_v27  ;;  %v6471_v10 = vld [vmem:[%s7572_s19 + $0x160] sm:$0xff] }
 0xcdf   : > { %7271 = vrcp.f32 %v2504_v5  ;;  %v7270_v32 = vpop.eup %7269 }
 0xce0   : > { %7273 = vrcp.f32 %v2514_v14  ;;  %v2547_v42 = vadd.f32 %v2545_v29, %v2543_v37  ;;  %v2549_v50 = vmul.f32 %v7270_v32, %v7772_v23  ;;  %v6453_v14 = vld [vmem:[%s7582_s30 + $0x58] sm:$0xff]  ;;  %v6451_v29 = vld [vmem:[%s7582_s30 + $0x48] sm:$0xff]  ;;  %v6467_v32 = vld [vmem:[%s7572_s19 + $0x140] sm:$0xff] }
 0xce1   : > { %6455 = vmatpush.xpose.msk.msra.mxu0 %vm1056_vm1, %v6453_v14  ;;  %v6468_v37 = vld [vmem:[%s7572_s19 + $0x148] sm:$0xff] }
 0xce2   : > { %v2551_v31 = vadd.f32 %v2549_v50, %v2547_v42 }
 0xce4   : > { %v2553_v39 = vmul.f32 %v8413_v18, %v2551_v31 }
 0xce5   : > { %v7272_v35 = vpop.eup %7271  ;;  %6456 = vmatpush.xpose.msk.msra.mxu0 %vm1056_vm1, %v6452_v58 }
 0xce6   : > { %v2524_v13 = vpop.xlane.xlu2 %2523  ;;  %v7274_v56 = vpop.eup %7273  ;;  %v2538_v51 = vmul.f32 %v7272_v35, %v7806_v28 }
 0xce7   : > { %7275 = vrcp.f32 %v2524_v13  ;;  %v2542_v54 = vmul.f32 %v7274_v56, %v7787_v25  ;;  %v6473_v13 = vld [vmem:[%s7572_s19 + $0x170] sm:$0xff] }
 0xce9   : > { %v2544_v0 = vadd.f32 %v2542_v54, %v2538_v51  ;;  %6457 = vmatpush.xpose.msk.msra.mxu0 %vm1056_vm1, %v6451_v29 }
 0xced   : > { %v7276_v33 = vpop.eup %7275 }
 0xcee   : > { %v2534_v49 = vpop.xlane.xlu2 %2533  ;;  %v2546_v57 = vmul.f32 %v7276_v33, %v7801_v27 }
 0xcef   : > { %7277 = vrcp.f32 %v2534_v49  ;;  %v6450_v49 = vld [vmem:[%s7582_s30 + $0x40] sm:$0xff] }
 0xcf0   : > { %v2548_v7 = vadd.f32 %v2546_v57, %v2544_v0  ;;  %6458 = vmatpush.xpose.msk.msra.mxu0 %vm1056_vm1, %v6450_v49 }
 0xcf1   : > { %v7053_v47 = vpop.permute.xlu0 %7052 }
 0xcf2   : > { %v7054_v59 = vunpack.i.l.bf16 %v7053_v47  ;;  %v7055_v34 = vunpack.i.h.bf16 %v7053_v47 }
 0xcf4   : > { %2589 = vmatpush.msrb.mxu1 %v7054_v59 }
 0xcf5   : > { %v7278_v55 = vpop.eup %7277 }
 0xcf6   : > { %2590 = vmatpush.msrb.mxu1 %v7055_v34  ;;  %v2550_v5 = vmul.f32 %v7278_v55, %v7772_v23  ;;  %v2762_v56 = vpop.permute.xlu2 %2761 }
 0xcf8   : > { %2591 = vmatpush.msrb.mxu1 %v7059_v44  ;;  %v2552_v16 = vadd.f32 %v2550_v5, %v2548_v7 }
 0xcfa   : > { %2592 = vmatpush.msrb.mxu1 %v7060_v60  ;;  %v2554_v18 = vmul.f32 %v8428_v12, %v2552_v16  ;;  %v6469_v12 = vld [vmem:[%s7572_s19 + $0x150] sm:$0xff] }
 0xcfb   : > { %6448 = vmatmul.msk.f32.vlgmr.msrb.gmra.mxu1 %vm1056_vm1, %v2553_v39 }
 0xcfc   : > { %6481 = vmatpush.xpose.msk.msra.mxu1 %vm1056_vm1, %v6474_v30 }
 0xd00   : > { %6482 = vmatpush.xpose.msk.msra.mxu1 %vm1056_vm1, %v6473_v13 }
 0xd03   : > { %6449 = vmatmul.msk.f32.gmra.mxu1 %vm1056_vm1, %v2554_v18 }
 0xd04   : > { %6483 = vmatpush.xpose.msk.msra.mxu1 %vm1056_vm1, %v6472_v22 }
 0xd08   : > { %6484 = vmatpush.xpose.msk.msra.mxu1 %vm1056_vm1, %v6471_v10  ;;  %v2758_v10 = vpop.f32.mrf.mxu3 }
 0xd0c   : > { %6485 = vmatpush.xpose.msk.msra.mxu1 %vm1056_vm1, %v6470_v15  ;;  %v2759_v15 = vadd.f32 %v8448_v63, %v2758_v10 }
 0xd10   : > { %6486 = vmatpush.xpose.msk.msra.mxu1 %vm1056_vm1, %v6469_v12 }
 0xd14   : > { %6487 = vmatpush.xpose.msk.msra.mxu1 %vm1056_vm1, %v6468_v37  ;;  %v7164_v37 = vld [vmem:[%s9754_s6 + $0x2] ss:$0 sm:$0xff] }
 0xd18   : > { %6488 = vmatpush.xpose.msk.msra.mxu1 %vm1056_vm1, %v6467_v32 }
 0xd1b   : > { %6489 = vmatmul.msk.f32.vlgmr.msra.gmra.mxu1 %vm1056_vm1, %v8338_v17 }
 0xd23   : > { %6490 = vmatmul.msk.f32.gmra.mxu1 %vm1056_vm1, %v8343_v41 }
 0xd78   : > { %v2594_v35 = vpop.f32.mrf.mxu1 }
 0xd79   : > { %6459 = vmatmul.msk.f32.vlgmr.msra.gmra.mxu0 %vm1056_vm1, %v2594_v35 }
 0xd80   : > { %v2597_v42 = vpop.f32.mrf.mxu1 }
 0xd81   : > { %6460 = vmatmul.msk.f32.gmra.mxu0 %vm1056_vm1, %v2597_v42 }
 0xd98   : > { %v2805_v47 = vpop.f32.mrf.mxu1 }
 0xd99   : > { %v2806_v59 = vadd.f32 %v2805_v47, %v2762_v56 }
 0xd9b   : > { %v2825_v33 = vmul.f32 %v2806_v59, %v7825_v36  ;;  %v8497_v31 = vmul.f32 %v2806_v59, %v7844_v46  ;;  %v8500_v51 = vmul.f32 %v2806_v59, %v7828_v38  ;;  %v8503_v54 = vmul.f32 %v2806_v59, %v7830_v40 }
 0xd9c   : > { %v2817_v7 = vmul.f32 %v7772_v23, %v2806_v59  ;;  %v2815_v16 = vmul.f32 %v7801_v27, %v2806_v59  ;;  %v2813_v22 = vmul.f32 %v7787_v25, %v2806_v59  ;;  %v2811_v58 = vmul.f32 %v7806_v28, %v2806_v59 }
 0xda0   : > { %v2808_v2 = vpop.f32.mrf.mxu1 }
 0xda1   : > { %v2809_v50 = vadd.f32 %v2808_v2, %v2762_v56 }
 0xda3   : > { %v2818_v34 = vmul.f32 %v7772_v23, %v2809_v50  ;;  %v2826_v55 = vmul.f32 %v2809_v50, %v7825_v36  ;;  %v8507_v44 = vmul.f32 %v2809_v50, %v7844_v46  ;;  %v8510_v57 = vmul.f32 %v2809_v50, %v7828_v38 }
 0xda4   : > { %v8513_v60 = vmul.f32 %v2809_v50, %v7830_v40  ;;  %v2816_v13 = vmul.f32 %v7801_v27, %v2809_v50  ;;  %v2814_v18 = vmul.f32 %v7787_v25, %v2809_v50  ;;  %v2812_v14 = vmul.f32 %v7806_v28, %v2809_v50 }
 0xda5   : > { %6491 = vmatpush.xpose.msk.msrb.mxu0 %vm1056_vm1, %v2818_v34  ;;  %v7061_v39 = vpack.i.bf16 %v2825_v33, %v2826_v55  ;;  %v7076_v0 = vpack.i.bf16 %v8497_v31, %v8507_v44  ;;  %v7071_v30 = vpack.i.bf16 %v8500_v51, %v8510_v57 }
 0xda6   : > { %v7066_v5 = vpack.i.bf16 %v8503_v54, %v8513_v60 }
 0xda9   : > { %6492 = vmatpush.xpose.msk.msrb.mxu0 %vm1056_vm1, %v2817_v7 }
 0xdad   : > { %6493 = vmatpush.xpose.msk.msrb.mxu0 %vm1056_vm1, %v2816_v13 }
 0xdb1   : > { %6494 = vmatpush.xpose.msk.msrb.mxu0 %vm1056_vm1, %v2815_v16 }
 0xdb5   : > { %6495 = vmatpush.xpose.msk.msrb.mxu0 %vm1056_vm1, %v2814_v18 }
 0xdb9   : > { %6496 = vmatpush.xpose.msk.msrb.mxu0 %vm1056_vm1, %v2813_v22 }
 0xdbd   : > { %6497 = vmatpush.xpose.msk.msrb.mxu0 %vm1056_vm1, %v2812_v14 }
 0xdc1   : > { %6498 = vmatpush.xpose.msk.msrb.mxu0 %vm1056_vm1, %v2811_v58 }
 0xdc4   : > { %6499 = vmatmul.msk.f32.vlgmr.msrb.gmra.mxu0 %vm1056_vm1, %v2759_v15 }
 0xdf6   : > { %v2645_v29 = vpop.f32.mrf.mxu0 }
 0xdf7   : > { %v2646_v50 = vadd.f32 %v7164_v37, %v2645_v29 }
 0xdf9   : > { %v2651_v34 = vadd.f32 %v2646_v50, %v8338_v17 }
 0xdfb   : > { %v2657_v7 = vsel %vm1056_vm1, %v2651_v34, 0.0 }
 0xdfe   : > { %v2648_v12 = vpop.f32.mrf.mxu0 }
 0xdff   : > { %v2649_v56 = vadd.f32 %v7164_v37, %v2648_v12 }
 0xe01   : > { %v2652_v33 = vadd.f32 %v2649_v56, %v8343_v41 }
 0xe03   : > { %v2660_v55 = vsel %vm1056_vm1, %v2652_v33, 0.0 }
 0xe41   : > { %v2871_v49 = vpop.f32.mrf.mxu0 }
 0xe42   : > { %v2872_v32 = vadd.f32 %v2871_v49, %v7888_v8 }
 0xe44   : > { %v2882_v35 = vsel %vm7890_vm2, %v2872_v32, -1e+30  ;;  %v2878_v42 = vsel %vm7898_vm4, %v2872_v32, -1e+30  ;;  %v2874_v47 = vsel %vm1007_vm6, %v2872_v32, -1e+30 }
 0xe45   : > { %v2883_v63 = vsel %vm1370_vm9, %v2882_v35, -inf  ;;  %v2879_v59 = vsel %vm1370_vm9, %v2878_v42, -inf  ;;  %v2875_v2 = vsel %vm1370_vm9, %v2874_v47, -inf  ;;  %v2886_v13 = vsel %vm7919_vm3, %v2872_v32, -1e+30 }
 0xe46   : > { %2884 = vmax.xlane.f32.xlu2 %v2883_v63  ;;  %2880 = vmax.xlane.f32.xlu1 %v2879_v59  ;;  %v2887_v16 = vsel %vm1370_vm9, %v2886_v13, -inf }
 0xe47   : > { %2876 = vmax.xlane.f32.xlu0 %v2875_v2 }
 0xe4e   : > { %2661 = vadd.xlane.f32.xlu2 %v2660_v55 }
 0xe4f   : > { %2658 = vadd.xlane.f32.xlu0 %v2657_v7 }
 0xe57   : > { %2888 = vmax.xlane.f32.xlu0 %v2887_v16 }
 0xe6b   : > { %7062 = vrot.lane.b32.xlu0 %v7061_v39, %s9780_s8 }
 0xeb9   : > { %v2885_v18 = vpop.xlane.xlu2 %2884  ;;  %v2881_v14 = vpop.xlane.xlu1 %2880 }
 0xeba   : > { %v2877_v22 = vpop.xlane.xlu0 %2876  ;;  %v2892_v17 = vmul.f32 %v7960_v61, %v2881_v14  ;;  %v2894_v39 = vmul.f32 %v7972_v4, %v2885_v18 }
 0xebb   : > { %v2890_v58 = vmul.f32 %v7965_v62, %v2877_v22 }
 0xebd   : > { %v2893_v49 = vadd.f32 %v2892_v17, %v2890_v58 }
 0xebf   : > { %v2895_v56 = vadd.f32 %v2894_v39, %v2893_v49 }
 0xec1   : > { %v2662_v10 = vpop.xlane.xlu2 %2661 }
 0xec2   : > { %v2659_v41 = vpop.xlane.xlu0 %2658  ;;  %v2664_v12 = vmul.f32 %v2662_v10, %v8175_v3 }
 0xec3   : > { %v2663_v15 = vmul.f32 %v2659_v41, %v8175_v3 }
 0xec4   : > { %v8566_v35 = vsub.f32 %v2652_v33, %v2664_v12 }
 0xec5   : > { %v8560_v29 = vsub.f32 %v2651_v34, %v2663_v15 }
 0xec6   : > { %v2668_v2 = vmul.f32 %v8566_v35, %v8566_v35 }
 0xec7   : > { %v2667_v37 = vmul.f32 %v8560_v29, %v8560_v29 }
 0xec8   : > { %v2672_v55 = vsel %vm1056_vm1, %v2668_v2, 0.0 }
 0xec9   : > { %v2669_v42 = vsel %vm1056_vm1, %v2667_v37, 0.0 }
 0xeca   : > { %2670 = vadd.xlane.f32.xlu1 %v2669_v42  ;;  %v2889_v47 = vpop.xlane.xlu0 %2888 }
 0xecb   : > { %v2896_v63 = vmul.f32 %v7977_v6, %v2889_v47 }
 0xecd   : > { %v2897_v59 = vadd.f32 %v2896_v63, %v2895_v56 }
 0xecf   : > { %v2898_v50 = vsub.f32 %v2872_v32, %v2897_v59 }
 0xed1   : > { %v2899_v34 = vmul.f32 1.442695, %v2898_v50 }
 0xed2   : > { %2673 = vadd.xlane.f32.xlu1 %v2672_v55 }
 0xed3   : > { %7279 = vpow2.f32 %v2899_v34 }
 0xed9   : > { %v8573_v7 = vpop.eup %7279 }
 0xeda   : > { %v2901_v33 = vmul.f32 %v8573_v7, %v7965_v62  ;;  %v2906_v13 = vmul.f32 %v8573_v7, %v7960_v61  ;;  %v2911_v16 = vmul.f32 %v8573_v7, %v7972_v4  ;;  %v2916_v17 = vmul.f32 %v8573_v7, %v7977_v6 }
 0xedc   : > { %v2902_v18 = vsel %vm1370_vm9, %v2901_v33, 0.0  ;;  %v2907_v32 = vsel %vm1370_vm9, %v2906_v13, 0.0  ;;  %v2912_v22 = vsel %vm1370_vm9, %v2911_v16, 0.0  ;;  %v2917_v58 = vsel %vm1370_vm9, %v2916_v17, 0.0  ;;  %v6520_v17 = vld [vmem:[%s9753_s12 + $0xb8] sm:$0xff] }
 0xedd   : > { %2903 = vadd.xlane.f32.xlu0 %v2902_v18  ;;  %v7063_v14 = vpop.permute.xlu0 %7062  ;;  %2908 = vadd.xlane.f32.xlu2 %v2907_v32 }
 0xede   : > { %v7064_v41 = vunpack.i.l.bf16 %v7063_v14  ;;  %2913 = vadd.xlane.f32.xlu1 %v2912_v22  ;;  %v7065_v10 = vunpack.i.h.bf16 %v7063_v14 }
 0xee0   : > { %2973 = vmatpush.msrb.mxu2 %v7064_v41 }
 0xee2   : > { %2974 = vmatpush.msrb.mxu2 %v7065_v10 }
 0xee5   : > { %2918 = vadd.xlane.f32.xlu2 %v2917_v58 }
 0xef1   : > { %7077 = vrot.lane.b32.xlu0 %v7076_v0, %s9780_s8 }
 0xef7   : > { %7072 = vrot.lane.b32.xlu1 %v7071_v30, %s9780_s8 }
 0xefd   : > { %7067 = vrot.lane.b32.xlu2 %v7066_v5, %s9780_s8 }
 0xf3d   : > { %v2671_v15 = vpop.xlane.xlu1 %2670 }
 0xf3e   : > { %v2675_v51 = vmul.f32 %v2671_v15, %v8175_v3  ;;  %v6519_v15 = vld [vmem:[%s9753_s12 + $0xb0] sm:$0xff] }
 0xf40   : > { %v2677_v47 = vadd.f32 1e-05, %v2675_v51 }
 0xf42   : > { %vm2685_vm15 = vweird.f32 %v2677_v47 }
 0xf45   : > { %v2674_v49 = vpop.xlane.xlu1 %2673 }
 0xf46   : > { %v2676_v59 = vmul.f32 %v2674_v49, %v8175_v3 }
 0xf48   : > { %v2678_v18 = vadd.f32 1e-05, %v2676_v59 }
 0xf4a   : > { %vm2695_vm8 = vweird.f32 %v2678_v18 }
 0xf50   : > { %v2909_v12 = vpop.xlane.xlu2 %2908  ;;  %v2904_v37 = vpop.xlane.xlu0 %2903 }
 0xf51   : > { %7281 = vrcp.f32 %v2904_v37  ;;  %v2914_v42 = vpop.xlane.xlu1 %2913  ;;  %v6518_v37 = vld [vmem:[%s9753_s12 + $0xa8] sm:$0xff] }
 0xf52   : > { %7283 = vrcp.f32 %v2909_v12 }
 0xf53   : > { %7285 = vrcp.f32 %v2914_v42 }
 0xf57   : > { %v7282_v31 = vpop.eup %7281 }
 0xf58   : > { %v2919_v39 = vpop.xlane.xlu2 %2918  ;;  %v7284_v44 = vpop.eup %7283  ;;  %v2921_v30 = vmul.f32 %v7282_v31, %v7965_v62  ;;  %v6517_v31 = vld [vmem:[%s9753_s12 + $0xa0] sm:$0xff] }
 0xf59   : > { %7287 = vrcp.f32 %v2919_v39  ;;  %v2923_v54 = vmul.f32 %v7284_v44, %v7960_v61  ;;  %v7286_v5 = vpop.eup %7285  ;;  %v6503_v44 = vld [vmem:[%s7582_s30 + $0x70] sm:$0xff] }
 0xf5a   : > { %7289 = vrsqrt.f32 %v2677_v47  ;;  %v2925_v2 = vmul.f32 %v7286_v5, %v7972_v4  ;;  %v6515_v5 = vld [vmem:[%s9753_s12 + $0x90] sm:$0xff] }
 0xf5b   : > { %v2924_v63 = vadd.f32 %v2923_v54, %v2921_v30  ;;  %7291 = vrsqrt.f32 %v2678_v18  ;;  %v6502_v30 = vld [vmem:[%s7582_s30 + $0x68] sm:$0xff] }
 0xf5d   : > { %v2926_v33 = vadd.f32 %v2925_v2, %v2924_v63  ;;  %v7165_v2 = vld [vmem:[%s7612_s25 + $0x4] ss:$0 sm:$0xff] }
 0xf5f   : > { %v7288_v56 = vpop.eup %7287 }
 0xf60   : > { %v7068_v0 = vpop.permute.xlu2 %7067  ;;  %v2927_v50 = vmul.f32 %v7288_v56, %v7977_v6  ;;  %v7290_v14 = vpop.eup %7289  ;;  %v6501_v56 = vld [vmem:[%s7582_s30 + $0x60] sm:$0xff] }
 0xf61   : > { %v7069_v57 = vunpack.i.l.bf16 %v7068_v0  ;;  %v7070_v60 = vunpack.i.h.bf16 %v7068_v0  ;;  %v2680_v58 = vmul.f32 %v7290_v14, %v2677_v47  ;;  %v7292_v49 = vpop.eup %7291  ;;  %vm2686_vm12 = vweird.f32 %v7290_v14 }
 0xf62   : > { %v2928_v32 = vadd.f32 %v2927_v50, %v2926_v33  ;;  %v2690_v42 = vmul.f32 %v7292_v49, %v2678_v18  ;;  %vm2687_vm13 = vmor %vm2685_vm15, %vm2686_vm12  ;;  %vm2696_vm14 = vweird.f32 %v7292_v49  ;;  %v6513_v33 = vld [vmem:[%s9753_s12 + $0x80] sm:$0xff] }
 0xf63   : > { %2975 = vmatpush.msrb.mxu2 %v7069_v57  ;;  %v7078_v13 = vpop.permute.xlu0 %7077  ;;  %v2681_v12 = vmul.f32 %v7290_v14, %v2680_v58  ;;  %v6516_v57 = vld [vmem:[%s9753_s12 + $0x98] sm:$0xff]  ;;  %vm2697_vm0 = vmor %vm2695_vm8, %vm2696_vm14  ;;  %v7167_v58 = vld [vmem:[%s9778_s3 + $0x2] ss:$0 sm:$0xff] }
 0xf64   : > { %v7079_v22 = vunpack.i.l.bf16 %v7078_v13  ;;  %v7080_v41 = vunpack.i.h.bf16 %v7078_v13  ;;  %v2929_v10 = vmul.f32 %v8573_v7, %v2928_v32  ;;  %v6504_v7 = vld [vmem:[%s7582_s30 + $0x78] sm:$0xff]  ;;  %v2691_v51 = vmul.f32 %v7292_v49, %v2690_v42  ;;  %v7166_v13 = vld [vmem:[%s9776_s2 + $0x4] ss:$0 sm:$0xff] }
 0xf65   : > { %2976 = vmatpush.msrb.mxu2 %v7070_v60  ;;  %v2682_v39 = vmul.f32 0.5, %v2681_v12  ;;  %6506 = vmatpush.xpose.msk.msra.mxu3 %vm1056_vm1, %v6504_v7 }
 0xf66   : > { %v2692_v60 = vmul.f32 0.5, %v2691_v51 }
 0xf67   : > { %v2683_v0 = vsub.f32 1.5, %v2682_v39 }
 0xf68   : > { %v2693_v59 = vsub.f32 1.5, %v2692_v60 }
 0xf69   : > { %v7073_v34 = vpop.permute.xlu1 %7072  ;;  %6507 = vmatpush.xpose.msk.msra.mxu3 %vm1056_vm1, %v6503_v44  ;;  %v2684_v54 = vmul.f32 %v7290_v14, %v2683_v0 }
 0xf6a   : > { %v7074_v55 = vunpack.i.l.bf16 %v7073_v34  ;;  %v7075_v16 = vunpack.i.h.bf16 %v7073_v34  ;;  %v6514_v34 = vld [vmem:[%s9753_s12 + $0x88] sm:$0xff]  ;;  %v2694_v47 = vmul.f32 %v7292_v49, %v2693_v59 }
 0xf6b   : > { %v2688_v63 = vsel %vm2687_vm13, %v7290_v14, %v2684_v54  ;;  %v6535_v14 = vld [vmem:[%s9777_s18 + $0x58] sm:$0xff]  ;;  %v7168_v54 = vld [vmem:[%s9754_s6 + $0x3] ss:$0 sm:$0xff] }
 0xf6c   : > { %2977 = vmatpush.msrb.mxu2 %v7074_v55  ;;  %v2699_v50 = vmul.f32 %v2688_v63, %v8560_v29 }
 0xf6d   : > { %6508 = vmatpush.xpose.msk.msra.mxu3 %vm1056_vm1, %v6502_v30 }
 0xf6e   : > { %2978 = vmatpush.msrb.mxu2 %v7075_v16  ;;  %v2704_v55 = vmul.f32 %v7165_v2, %v2699_v50  ;;  %v2698_v16 = vsel %vm2697_vm0, %v7292_v49, %v2694_v47  ;;  %v6586_v50 = vld [vmem:[%s7572_s19 + $0x1d8] sm:$0xff]  ;;  %v6584_v47 = vld [vmem:[%s7572_s19 + $0x1c8] sm:$0xff] }
 0xf6f   : > { %v2700_v29 = vmul.f32 %v2698_v16, %v8566_v35  ;;  %v6532_v35 = vld [vmem:[%s9777_s18 + $0x40] sm:$0xff] }
 0xf70   : > { %2979 = vmatpush.msrb.mxu2 %v7079_v22  ;;  %v2709_v32 = vadd.f32 %v7166_v13, %v2704_v55 }
 0xf71   : > { %6509 = vmatpush.xpose.msk.msra.mxu3 %vm1056_vm1, %v6501_v56  ;;  %v2705_v22 = vmul.f32 %v7165_v2, %v2700_v29 }
 0xf72   : > { %2980 = vmatpush.msrb.mxu2 %v7080_v41  ;;  %v6534_v41 = vld [vmem:[%s9777_s18 + $0x50] sm:$0xff] }
 0xf73   : > { %6500 = vmatmul.msk.f32.vlgmr.msrb.gmra.mxu2 %vm1370_vm9, %v2929_v10  ;;  %v2710_v18 = vadd.f32 %v7166_v13, %v2705_v22  ;;  %v6533_v10 = vld [vmem:[%s9777_s18 + $0x48] sm:$0xff]  ;;  %v6583_v13 = vld [vmem:[%s7572_s19 + $0x1c0] sm:$0xff] }
 0xf74   : > { %6522 = vmatpush.xpose.msk.msra.mxu2 %vm1056_vm1, %v6520_v17 }
 0xf75   : > { %6537 = vmatpush.xpose.msk.msrb.mxu3 %vm1370_vm9, %v6535_v14 }
 0xf78   : > { %6523 = vmatpush.xpose.msk.msra.mxu2 %vm1056_vm1, %v6519_v15 }
 0xf79   : > { %6538 = vmatpush.xpose.msk.msrb.mxu3 %vm1370_vm9, %v6534_v41 }
 0xf7c   : > { %6524 = vmatpush.xpose.msk.msra.mxu2 %vm1056_vm1, %v6518_v37 }
 0xf7d   : > { %6539 = vmatpush.xpose.msk.msrb.mxu3 %vm1370_vm9, %v6533_v10 }
 0xf80   : > { %6525 = vmatpush.xpose.msk.msra.mxu2 %vm1056_vm1, %v6517_v31  ;;  %v7169_v31 = vld [vmem:[%s9779_s21 + $0x2] ss:$0 sm:$0xff] }
 0xf81   : > { %6540 = vmatpush.xpose.msk.msrb.mxu3 %vm1370_vm9, %v6532_v35 }
 0xf84   : > { %6526 = vmatpush.xpose.msk.msra.mxu2 %vm1056_vm1, %v6516_v57 }
 0xf88   : > { %6527 = vmatpush.xpose.msk.msra.mxu2 %vm1056_vm1, %v6515_v5 }
 0xf8c   : > { %6528 = vmatpush.xpose.msk.msra.mxu2 %vm1056_vm1, %v6514_v34  ;;  %v6585_v34 = vld [vmem:[%s7572_s19 + $0x1d0] sm:$0xff] }
 0xf90   : > { %6529 = vmatpush.xpose.msk.msra.mxu2 %vm1056_vm1, %v6513_v33 }
 0xf93   : > { %6530 = vmatmul.msk.f32.vlgmr.msra.gmra.mxu2 %vm1056_vm1, %v2709_v32 }
 0xf9b   : > { %6531 = vmatmul.msk.f32.gmra.mxu2 %vm1056_vm1, %v2710_v18 }
 0xff6   : > { %v2982_v17 = vpop.f32.mrf.mxu2 }
 0xff7   : > { %6510 = vmatmul.msk.f32.vlgmr.msra.gmra.mxu3 %vm1056_vm1, %v2982_v17 }
 0xff8   : > { %6588 = vmatpush.xpose.msk.msra.mxu3 %vm1056_vm1, %v6586_v50 }
 0xffc   : > { %6589 = vmatpush.xpose.msk.msra.mxu3 %vm1056_vm1, %v6585_v34  ;;  %v6545_v34 = vld [vmem:[%s9753_s12 + $0xc0] sm:$0xff] }
0x1000   : > { %6590 = vmatpush.xpose.msk.msra.mxu3 %vm1056_vm1, %v6584_v47 }
0x1004   : > { %6591 = vmatpush.xpose.msk.msra.mxu3 %vm1056_vm1, %v6583_v13  ;;  %v6566_v13 = vld [vmem:[%s9777_s18 + $0x78] sm:$0xff] }
0x1005   : > { %6568 = vmatpush.xpose.msk.msra.mxu0 %vm1370_vm9, %v6566_v13  ;;  %v6564_v13 = vld [vmem:[%s9777_s18 + $0x68] sm:$0xff] }
0x1016   : > { %v3126_v15 = vpop.f32.mrf.mxu2 }
0x1017   : > { %v3127_v12 = vadd.f32 %v7167_v58, %v3126_v15 }
0x1019   : > { %v3132_v49 = vmax.f32 %v3127_v12, 0.0 }
0x101b   : > { %6541 = vmatmul.msk.f32.vlgmr.msrb.gmra.mxu3 %vm1370_vm9, %v3132_v49  ;;  %v6581_v49 = vld [vmem:[%s7572_s19 + $0x1b0] sm:$0xff] }
0x101e   : > { %v3129_v37 = vpop.f32.mrf.mxu2 }
0x101f   : > { %v3130_v39 = vadd.f32 %v7167_v58, %v3129_v37  ;;  %v6580_v37 = vld [vmem:[%s7572_s19 + $0x1a8] sm:$0xff] }
0x1021   : > { %v3133_v42 = vmax.f32 %v3130_v39, 0.0  ;;  %v6579_v39 = vld [vmem:[%s7572_s19 + $0x1a0] sm:$0xff] }
0x1023   : > { %6542 = vmatmul.msk.f32.gmra.mxu3 %vm1370_vm9, %v3133_v42  ;;  %v6552_v42 = vld [vmem:[%s9753_s12 + $0xf8] sm:$0xff] }
0x1024   : > { %6554 = vmatpush.xpose.msk.msrb.mxu1 %vm1056_vm1, %v6552_v42 }
0x107a   : > { %v3027_v7 = vpop.f32.mrf.mxu3 }
0x107b   : > { %v3028_v56 = vadd.f32 %v7168_v54, %v3027_v7  ;;  %v6578_v7 = vld [vmem:[%s7572_s19 + $0x198] sm:$0xff] }
0x107c   : > { %v6548_v54 = vld [vmem:[%s9753_s12 + $0xd8] sm:$0xff] }
0x107d   : > { %v3030_v59 = vadd.f32 %v3028_v56, %v8331_v1  ;;  %v6547_v56 = vld [vmem:[%s9753_s12 + $0xd0] sm:$0xff] }
0x107f   : > { %v3035_v2 = vsel %vm1056_vm1, %v3030_v59, 0.0 }
0x109e   : > { %v3179_v44 = vpop.f32.mrf.mxu3 }
0x109f   : > { %v3180_v0 = vadd.f32 %v7169_v31, %v3179_v44  ;;  %v6577_v44 = vld [vmem:[%s7572_s19 + $0x190] sm:$0xff] }
0x10a1   : > { %v3185_v51 = vadd.f32 %v3180_v0, %v2709_v32  ;;  %v6582_v32 = vld [vmem:[%s7572_s19 + $0x1b8] sm:$0xff]  ;;  %v6550_v0 = vld [vmem:[%s9753_s12 + $0xe8] sm:$0xff] }
0x10a2   : > { %6592 = vmatpush.xpose.msk.msra.mxu3 %vm1056_vm1, %v6582_v32 }
0x10a3   : > { %v3191_v57 = vsel %vm1056_vm1, %v3185_v51, 0.0 }
0x10a4   : > { %3192 = vadd.xlane.f32.xlu0 %v3191_v57  ;;  %v6549_v57 = vld [vmem:[%s9753_s12 + $0xe0] sm:$0xff] }
0x10a6   : > { %v3182_v30 = vpop.f32.mrf.mxu3  ;;  %6593 = vmatpush.xpose.msk.msra.mxu3 %vm1056_vm1, %v6581_v49 }
0x10a7   : > { %v3183_v60 = vadd.f32 %v7169_v31, %v3182_v30  ;;  %v6551_v31 = vld [vmem:[%s9753_s12 + $0xf0] sm:$0xff]  ;;  %v6575_v30 = vld [vmem:[%s7572_s19 + $0x180] sm:$0xff] }
0x10a8   : > { %6555 = vmatpush.xpose.msk.msrb.mxu1 %vm1056_vm1, %v6551_v31 }
0x10a9   : > { %v3186_v5 = vadd.f32 %v3183_v60, %v2710_v18 }
0x10aa   : > { %6594 = vmatpush.xpose.msk.msra.mxu3 %vm1056_vm1, %v6580_v37 }
0x10ab   : > { %v3194_v63 = vsel %vm1056_vm1, %v3186_v5, 0.0 }
0x10ac   : > { %3195 = vadd.xlane.f32.xlu2 %v3194_v63  ;;  %6556 = vmatpush.xpose.msk.msrb.mxu1 %vm1056_vm1, %v6550_v0 }
0x10ae   : > { %6595 = vmatpush.xpose.msk.msra.mxu3 %vm1056_vm1, %v6579_v39  ;;  %v7172_v39 = vld [vmem:[%s9776_s2 + $0x6] ss:$0 sm:$0xff] }
0x10b0   : > { %6557 = vmatpush.xpose.msk.msrb.mxu1 %vm1056_vm1, %v6549_v57 }
0x10b2   : > { %6596 = vmatpush.xpose.msk.msra.mxu3 %vm1056_vm1, %v6578_v7 }
0x10b4   : > { %3036 = vadd.xlane.f32.xlu2 %v3035_v2  ;;  %6558 = vmatpush.xpose.msk.msrb.mxu1 %vm1056_vm1, %v6548_v54 }
0x10b6   : > { %6597 = vmatpush.xpose.msk.msra.mxu3 %vm1056_vm1, %v6577_v44 }
0x10b8   : > { %6559 = vmatpush.xpose.msk.msrb.mxu1 %vm1056_vm1, %v6547_v56 }
0x1117   : > { %v3193_v55 = vpop.xlane.xlu0 %3192 }
0x1118   : > { %v3197_v33 = vmul.f32 %v3193_v55, %v8175_v3 }
0x111a   : > { %v8663_v16 = vsub.f32 %v3185_v51, %v3197_v33  ;;  %v6576_v51 = vld [vmem:[%s7572_s19 + $0x188] sm:$0xff] }
0x111b   : > { %6598 = vmatpush.xpose.msk.msra.mxu3 %vm1056_vm1, %v6576_v51 }
0x111c   : > { %v3201_v1 = vmul.f32 %v8663_v16, %v8663_v16 }
0x111e   : > { %v3203_v29 = vsel %vm1056_vm1, %v3201_v1, 0.0 }
0x111f   : > { %v3196_v22 = vpop.xlane.xlu2 %3195  ;;  %3204 = vadd.xlane.f32.xlu1 %v3203_v29  ;;  %6599 = vmatpush.xpose.msk.msra.mxu3 %vm1056_vm1, %v6575_v30 }
0x1120   : > { %v3198_v18 = vmul.f32 %v3196_v22, %v8175_v3 }
0x1122   : > { %v8672_v14 = vsub.f32 %v3186_v5, %v3198_v18 }
0x1124   : > { %v3202_v41 = vmul.f32 %v8672_v14, %v8672_v14 }
0x1126   : > { %v3206_v10 = vsel %vm1056_vm1, %v3202_v41, 0.0 }
0x1127   : > { %3207 = vadd.xlane.f32.xlu0 %v3206_v10  ;;  %v3037_v17 = vpop.xlane.xlu2 %3036 }
0x1128   : > { %v3038_v35 = vmul.f32 %v3037_v17, %v8175_v3 }
0x112a   : > { %v8678_v58 = vsub.f32 %v3030_v59, %v3038_v35  ;;  %v6546_v59 = vld [vmem:[%s9753_s12 + $0xc8] sm:$0xff] }
0x112b   : > { %6560 = vmatpush.xpose.msk.msrb.mxu1 %vm1056_vm1, %v6546_v59 }
0x112c   : > { %v3040_v15 = vmul.f32 %v8678_v58, %v8678_v58 }
0x112e   : > { %v3041_v12 = vsel %vm1056_vm1, %v3040_v15, 0.0  ;;  %v7170_v15 = vld [vmem:[%s7612_s25 + $0x6] ss:$0 sm:$0xff] }
0x112f   : > { %3042 = vadd.xlane.f32.xlu0 %v3041_v12  ;;  %6561 = vmatpush.xpose.msk.msrb.mxu1 %vm1056_vm1, %v6545_v34  ;;  %v7173_v34 = vld [vmem:[%s9776_s2 + $0x5] ss:$0 sm:$0xff] }
0x1192   : > { %v3205_v60 = vpop.xlane.xlu1 %3204 }
0x1193   : > { %v3209_v5 = vmul.f32 %v3205_v60, %v8175_v3 }
0x1195   : > { %v3211_v63 = vadd.f32 1e-05, %v3209_v5 }
0x1197   : > { %7293 = vrsqrt.f32 %v3211_v63  ;;  %vm3219_vm15 = vweird.f32 %v3211_v63 }
0x119a   : > { %v3208_v2 = vpop.xlane.xlu0 %3207 }
0x119b   : > { %v3210_v50 = vmul.f32 %v3208_v2, %v8175_v3  ;;  %v7171_v2 = vld [vmem:[%s7612_s25 + $0x5] ss:$0 sm:$0xff] }
0x119d   : > { %v7294_v47 = vpop.eup %7293  ;;  %v3212_v55 = vadd.f32 1e-05, %v3210_v50 }
0x119e   : > { %v3214_v33 = vmul.f32 %v7294_v47, %v3211_v63  ;;  %vm3220_vm12 = vweird.f32 %v7294_v47 }
0x119f   : > { %7295 = vrsqrt.f32 %v3212_v55  ;;  %vm3221_vm13 = vmor %vm3219_vm15, %vm3220_vm12  ;;  %vm3229_vm8 = vweird.f32 %v3212_v55 }
0x11a0   : > { %v3215_v1 = vmul.f32 %v7294_v47, %v3214_v33  ;;  %v6565_v33 = vld [vmem:[%s9777_s18 + $0x70] sm:$0xff] }
0x11a1   : > { %6569 = vmatpush.xpose.msk.msra.mxu0 %vm1370_vm9, %v6565_v33 }
0x11a2   : > { %v3216_v32 = vmul.f32 0.5, %v3215_v1  ;;  %v3043_v29 = vpop.xlane.xlu0 %3042  ;;  %v6563_v1 = vld [vmem:[%s9777_s18 + $0x60] sm:$0xff] }
0x11a3   : > { %v3044_v22 = vmul.f32 %v3043_v29, %v8175_v3 }
0x11a4   : > { %v3217_v18 = vsub.f32 1.5, %v3216_v32  ;;  %v7174_v32 = vld [vmem:[%s7577_s24 + $0x4] ss:$0 sm:$0xff] }
0x11a5   : > { %v7296_v41 = vpop.eup %7295  ;;  %v3045_v10 = vadd.f32 1e-05, %v3044_v22  ;;  %6570 = vmatpush.xpose.msk.msra.mxu0 %vm1370_vm9, %v6564_v13 }
0x11a6   : > { %v3218_v17 = vmul.f32 %v7294_v47, %v3217_v18  ;;  %v3224_v35 = vmul.f32 %v7296_v41, %v3212_v55  ;;  %vm3230_vm14 = vweird.f32 %v7296_v41  ;;  %v7175_v18 = vld [vmem:[%s9778_s3 + $0x3] ss:$0 sm:$0xff] }
0x11a7   : > { %7297 = vrsqrt.f32 %v3045_v10  ;;  %vm3231_vm0 = vmor %vm3229_vm8, %vm3230_vm14  ;;  %vm3052_vm15 = vweird.f32 %v3045_v10 }
0x11a8   : > { %v3222_v12 = vsel %vm3221_vm13, %v7294_v47, %v3218_v17  ;;  %v3225_v49 = vmul.f32 %v7296_v41, %v3224_v35 }
0x11a9   : > { %v3233_v37 = vmul.f32 %v3222_v12, %v8663_v16  ;;  %6571 = vmatpush.xpose.msk.msra.mxu0 %vm1370_vm9, %v6563_v1 }
0x11aa   : > { %v3226_v42 = vmul.f32 0.5, %v3225_v49 }
0x11ab   : > { %v3238_v7 = vmul.f32 %v7170_v15, %v3233_v37 }
0x11ac   : > { %v3227_v31 = vsub.f32 1.5, %v3226_v42 }
0x11ad   : > { %v7298_v44 = vpop.eup %7297  ;;  %v8721_v0 = vadd.f32 %v7172_v39, %v3238_v7 }
0x11ae   : > { %v3228_v51 = vmul.f32 %v7296_v41, %v3227_v31  ;;  %v3047_v57 = vmul.f32 %v7298_v44, %v3045_v10  ;;  %vm3053_vm12 = vweird.f32 %v7298_v44 }
0x11af   : > { %6600 = vmatmul.msk.f32.vlgmr.msra.gmra.mxu3 %vm1056_vm1, %v8721_v0  ;;  %vm3054_vm13 = vmor %vm3052_vm15, %vm3053_vm12 }
0x11b0   : > { %v3232_v30 = vsel %vm3231_vm0, %v7296_v41, %v3228_v51  ;;  %v3048_v54 = vmul.f32 %v7298_v44, %v3047_v57 }
0x11b1   : > { %v3234_v16 = vmul.f32 %v3232_v30, %v8672_v14  ;;  %v7176_v30 = vld [vmem:[%s9779_s21 + $0x3] ss:$0 sm:$0xff] }
0x11b2   : > { %v3049_v60 = vmul.f32 0.5, %v3048_v54 }
0x11b3   : > { %v3239_v5 = vmul.f32 %v7170_v15, %v3234_v16 }
0x11b4   : > { %v3050_v56 = vsub.f32 1.5, %v3049_v60 }
0x11b5   : > { %v8726_v63 = vadd.f32 %v7172_v39, %v3239_v5 }
0x11b6   : > { %v3051_v59 = vmul.f32 %v7298_v44, %v3050_v56 }
0x11b7   : > { %6601 = vmatmul.msk.f32.gmra.mxu3 %vm1056_vm1, %v8726_v63 }
0x11b8   : > { %v3055_v50 = vsel %vm3054_vm13, %v7298_v44, %v3051_v59 }
0x11b9   : > { %v3056_v14 = vmul.f32 %v3055_v50, %v8678_v58 }
0x11bb   : > { %v3060_v47 = vmul.f32 %v7171_v2, %v3056_v14 }
0x11bd   : > { %v3064_v55 = vadd.f32 %v7173_v34, %v3060_v47 }
0x11bf   : > { %6562 = vmatmul.msk.f32.vlgmr.msrb.gmra.mxu1 %vm1056_vm1, %v3064_v55 }
0x1232   : > { %v3464_v29 = vpop.f32.mrf.mxu3 }
0x1233   : > { %v8741_v22 = vadd.f32 %v7174_v32, %v3464_v29 }
0x1235   : > { %v3476_v58 = vmul.f32 %v8741_v22, %v7825_v36  ;;  %v3472_v12 = vmul.f32 %v8741_v22, %v7828_v38  ;;  %v3474_v39 = vmul.f32 %v8741_v22, %v7830_v40  ;;  %v3470_v31 = vmul.f32 %v8741_v22, %v7844_v46 }
0x1237   : > { %3506 = vrot.lane.b32.xlu2 %v3476_v58, %s9780_s8 }
0x123a   : > { %v3467_v41 = vpop.f32.mrf.mxu3 }
0x123b   : > { %v8747_v10 = vadd.f32 %v7174_v32, %v3467_v41 }
0x123c   : > { %v3303_v17 = vpop.f32.mrf.mxu1 }
0x123d   : > { %v3304_v35 = vadd.f32 %v7175_v18, %v3303_v17  ;;  %v3477_v15 = vmul.f32 %v8747_v10, %v7825_v36  ;;  %v3475_v49 = vmul.f32 %v8747_v10, %v7830_v40  ;;  %v3473_v42 = vmul.f32 %v8747_v10, %v7828_v38 }
0x123e   : > { %v3471_v7 = vmul.f32 %v8747_v10, %v7844_v46 }
0x123f   : > { %v3306_v37 = vmax.f32 %v3304_v35, 0.0  ;;  %3508 = vrot.lane.b32.xlu1 %v3477_v15, %s9780_s8  ;;  %3498 = vrot.lane.b32.xlu2 %v3472_v12, %s9780_s8 }
0x1240   : > { %3504 = vrot.lane.b32.xlu0 %v3475_v49, %s9780_s8 }
0x1241   : > { %6572 = vmatmul.msk.f32.vlgmr.msra.gmra.mxu0 %vm1370_vm9, %v3306_v37 }
0x1247   : > { %3502 = vrot.lane.b32.xlu1 %v3474_v39, %s9780_s8 }
0x1248   : > { %3500 = vrot.lane.b32.xlu0 %v3473_v42, %s9780_s8 }
0x124f   : > { %3496 = vrot.lane.b32.xlu1 %v3471_v7, %s9780_s8 }
0x1250   : > { %3494 = vrot.lane.b32.xlu0 %v3470_v31, %s9780_s8 }
0x1291   : > { %v3507_v51 = vpop.permute.xlu2 %3506 }
0x1299   : > { %v3499_v2 = vpop.permute.xlu2 %3498 }
0x12b1   : > { %v3509_v44 = vpop.permute.xlu1 %3508 }
0x12b2   : > { %6602 = vmatpush.xpose.msk.msrb.mxu0 %vm1056_vm1, %v3509_v44  ;;  %v3505_v57 = vpop.permute.xlu0 %3504 }
0x12b6   : > { %6603 = vmatpush.xpose.msk.msrb.mxu0 %vm1056_vm1, %v3507_v51 }
0x12b9   : > { %v3503_v54 = vpop.permute.xlu1 %3502 }
0x12ba   : > { %6604 = vmatpush.xpose.msk.msrb.mxu0 %vm1056_vm1, %v3505_v57  ;;  %v3501_v5 = vpop.permute.xlu0 %3500 }
0x12be   : > { %v3349_v16 = vpop.f32.mrf.mxu0  ;;  %6605 = vmatpush.xpose.msk.msrb.mxu0 %vm1056_vm1, %v3503_v54  ;;  %v3483_v54 = vmul.f32 %v7942_v53, %v8747_v10 }
0x12bf   : > { %v3350_v60 = vadd.f32 %v7176_v30, %v3349_v16  ;;  %v3482_v16 = vmul.f32 %v7942_v53, %v8741_v22 }
0x12c1   : > { %v3352_v56 = vadd.f32 %v3350_v60, %v3064_v55  ;;  %v3497_v50 = vpop.permute.xlu1 %3496  ;;  %v7086_v60 = vpack.i.bf16 %v3482_v16, %v3483_v54 }
0x12c2   : > { %6606 = vmatpush.xpose.msk.msrb.mxu0 %vm1056_vm1, %v3501_v5  ;;  %v3495_v14 = vpop.permute.xlu0 %3494 }
0x12c3   : > { %v3357_v59 = vsel %vm1056_vm1, %v3352_v56, 0.0 }
0x12c4   : > { %3358 = vadd.xlane.f32.xlu0 %v3357_v59 }
0x12c6   : > { %6607 = vmatpush.xpose.msk.msrb.mxu0 %vm1056_vm1, %v3499_v2 }
0x12ca   : > { %6608 = vmatpush.xpose.msk.msrb.mxu0 %vm1056_vm1, %v3497_v50 }
0x12ce   : > { %6609 = vmatpush.xpose.msk.msrb.mxu0 %vm1056_vm1, %v3495_v14 }
0x12d1   : > { %6610 = vmatmul.msk.f32.vlgmr.msrb.gmra.mxu0 %vm1056_vm1, %v8741_v22 }
0x12d9   : > { %6611 = vmatmul.msk.f32.gmra.mxu0 %vm1056_vm1, %v8747_v10 }
0x1337   : > { %v3359_v58 = vpop.xlane.xlu0 %3358 }
0x1338   : > { %v3360_v18 = vmul.f32 %v3359_v58, %v8175_v3 }
0x133a   : > { %v8803_v49 = vsub.f32 %v3352_v56, %v3360_v18 }
0x133c   : > { %v3362_v7 = vmul.f32 %v8803_v49, %v8803_v49 }
0x133e   : > { %v3363_v51 = vsel %vm1056_vm1, %v3362_v7, 0.0 }
0x134e   : > { %v3549_v34 = vpop.f32.mrf.mxu0 }
0x134f   : > { %v3550_v47 = vadd.f32 %v3549_v34, %v7888_v8 }
0x1351   : > { %v3571_v55 = vsel %vm7890_vm2, %v3550_v47, -1e+30  ;;  %v3563_v33 = vsel %vm7898_vm4, %v3550_v47, -1e+30  ;;  %v3555_v13 = vsel %vm1007_vm6, %v3550_v47, -1e+30 }
0x1352   : > { %v3573_v1 = vsel %vm1370_vm9, %v3571_v55, -inf  ;;  %v3565_v32 = vsel %vm1370_vm9, %v3563_v33, -inf  ;;  %v3557_v29 = vsel %vm1370_vm9, %v3555_v13, -inf  ;;  %v3579_v35 = vsel %vm7919_vm3, %v3550_v47, -1e+30 }
0x1353   : > { %3574 = vmax.xlane.f32.xlu0 %v3573_v1  ;;  %3566 = vmax.xlane.f32.xlu1 %v3565_v32  ;;  %v3581_v42 = vsel %vm1370_vm9, %v3579_v35, -inf }
0x1354   : > { %3558 = vmax.xlane.f32.xlu2 %v3557_v29 }
0x1356   : > { %v3552_v41 = vpop.f32.mrf.mxu0 }
0x1357   : > { %v3553_v17 = vadd.f32 %v3552_v41, %v7888_v8 }
0x1359   : > { %v3564_v15 = vsel %vm7898_vm4, %v3553_v17, -1e+30  ;;  %v3556_v12 = vsel %vm1007_vm6, %v3553_v17, -1e+30  ;;  %v3580_v31 = vsel %vm7919_vm3, %v3553_v17, -1e+30 }
0x135a   : > { %v3568_v37 = vsel %vm1370_vm9, %v3564_v15, -inf  ;;  %v3560_v39 = vsel %vm1370_vm9, %v3556_v12, -inf  ;;  %v3572_v44 = vsel %vm7890_vm2, %v3553_v17, -1e+30  ;;  %v3584_v57 = vsel %vm1370_vm9, %v3580_v31, -inf }
0x135b   : > { %3569 = vmax.xlane.f32.xlu0 %v3568_v37  ;;  %3561 = vmax.xlane.f32.xlu1 %v3560_v39  ;;  %v3576_v30 = vsel %vm1370_vm9, %v3572_v44, -inf }
0x135c   : > { %3582 = vmax.xlane.f32.xlu2 %v3581_v42 }
0x1363   : > { %3364 = vadd.xlane.f32.xlu0 %v3363_v51  ;;  %3585 = vmax.xlane.f32.xlu1 %v3584_v57 }
0x1364   : > { %3577 = vmax.xlane.f32.xlu2 %v3576_v30 }
0x137c   : > { %7087 = vrot.lane.b32.xlu1 %v7086_v60, %s9775_s5 }
0x13c6   : > { %v3567_v5 = vpop.xlane.xlu1 %3566  ;;  %v3575_v56 = vpop.xlane.xlu0 %3574 }
0x13c7   : > { %v3559_v59 = vpop.xlane.xlu2 %3558  ;;  %v3591_v2 = vmul.f32 %v7960_v61, %v3567_v5  ;;  %v3595_v34 = vmul.f32 %v7972_v4, %v3575_v56 }
0x13c8   : > { %v3587_v50 = vmul.f32 %v7965_v62, %v3559_v59 }
0x13ca   : > { %v3593_v14 = vadd.f32 %v3591_v2, %v3587_v50 }
0x13cc   : > { %v3597_v13 = vadd.f32 %v3595_v34, %v3593_v14 }
0x13ce   : > { %v3562_v55 = vpop.xlane.xlu1 %3561  ;;  %v3570_v32 = vpop.xlane.xlu0 %3569 }
0x13cf   : > { %v3583_v33 = vpop.xlane.xlu2 %3582  ;;  %v3592_v58 = vmul.f32 %v7960_v61, %v3570_v32  ;;  %v3588_v18 = vmul.f32 %v7965_v62, %v3562_v55 }
0x13d0   : > { %v3599_v1 = vmul.f32 %v7977_v6, %v3583_v33 }
0x13d1   : > { %v3594_v37 = vadd.f32 %v3592_v58, %v3588_v18  ;;  %v3480_v58 = vmul.f32 %v8026_v43, %v8741_v22 }
0x13d2   : > { %v3601_v29 = vadd.f32 %v3599_v1, %v3597_v13  ;;  %v3485_v13 = vmul.f32 %v7940_v52, %v8747_v10  ;;  %v3484_v1 = vmul.f32 %v7940_v52, %v8741_v22 }
0x13d4   : > { %v3603_v41 = vsub.f32 %v3550_v47, %v3601_v29  ;;  %v7081_v32 = vpack.i.bf16 %v3484_v1, %v3485_v13  ;;  %v3481_v29 = vmul.f32 %v8026_v43, %v8747_v10 }
0x13d6   : > { %v3605_v35 = vmul.f32 1.442695, %v3603_v41  ;;  %v3586_v15 = vpop.xlane.xlu1 %3585  ;;  %v7091_v18 = vpack.i.bf16 %v3480_v58, %v3481_v29  ;;  %v3479_v41 = vmul.f32 %v8033_v48, %v8747_v10 }
0x13d7   : > { %v3578_v12 = vpop.xlane.xlu2 %3577  ;;  %v3600_v42 = vmul.f32 %v7977_v6, %v3586_v15 }
0x13d8   : > { %7299 = vpow2.f32 %v3605_v35  ;;  %v3596_v39 = vmul.f32 %v7972_v4, %v3578_v12  ;;  %v3478_v35 = vmul.f32 %v8033_v48, %v8741_v22 }
0x13da   : > { %v3598_v7 = vadd.f32 %v3596_v39, %v3594_v37  ;;  %v7096_v15 = vpack.i.bf16 %v3478_v35, %v3479_v41 }
0x13dc   : > { %v3602_v31 = vadd.f32 %v3600_v42, %v3598_v7  ;;  %v3365_v42 = vpop.xlane.xlu0 %3364 }
0x13de   : > { %v8830_v44 = vpop.eup %7299  ;;  %v3604_v51 = vsub.f32 %v3553_v17, %v3602_v31 }
0x13df   : > { %v3629_v57 = vmul.f32 %v8830_v44, %v7972_v4  ;;  %v3619_v47 = vmul.f32 %v8830_v44, %v7960_v61  ;;  %v3609_v30 = vmul.f32 %v8830_v44, %v7965_v62  ;;  %v3639_v17 = vmul.f32 %v8830_v44, %v7977_v6 }
0x13e0   : > { %v3607_v54 = vmul.f32 1.442695, %v3604_v51 }
0x13e1   : > { %v3631_v16 = vsel %vm1370_vm9, %v3629_v57, 0.0  ;;  %v3621_v60 = vsel %vm1370_vm9, %v3619_v47, 0.0  ;;  %v3611_v5 = vsel %vm1370_vm9, %v3609_v30, 0.0  ;;  %v3641_v59 = vsel %vm1370_vm9, %v3639_v17, 0.0 }
0x13e2   : > { %7301 = vpow2.f32 %v3607_v54  ;;  %3632 = vadd.xlane.f32.xlu0 %v3631_v16  ;;  %3622 = vadd.xlane.f32.xlu1 %v3621_v60 }
0x13e3   : > { %3612 = vadd.xlane.f32.xlu2 %v3611_v5 }
0x13e8   : > { %v8843_v56 = vpop.eup %7301 }
0x13e9   : > { %v3610_v2 = vmul.f32 %v8843_v56, %v7965_v62  ;;  %v3640_v14 = vmul.f32 %v8843_v56, %v7977_v6  ;;  %v3620_v34 = vmul.f32 %v8843_v56, %v7960_v61  ;;  %v3630_v12 = vmul.f32 %v8843_v56, %v7972_v4 }
0x13ea   : > { %3642 = vadd.xlane.f32.xlu1 %v3641_v59 }
0x13eb   : > { %v3614_v50 = vsel %vm1370_vm9, %v3610_v2, 0.0  ;;  %v3644_v55 = vsel %vm1370_vm9, %v3640_v14, 0.0  ;;  %v3624_v33 = vsel %vm1370_vm9, %v3620_v34, 0.0  ;;  %v3634_v37 = vsel %vm1370_vm9, %v3630_v12, 0.0 }
0x13ec   : > { %3615 = vadd.xlane.f32.xlu0 %v3614_v50 }
0x13ee   : > { %v7088_v51 = vpop.permute.xlu1 %7087 }
0x13ef   : > { %v7089_v10 = vunpack.i.l.bf16 %v7088_v51  ;;  %v7090_v22 = vunpack.i.h.bf16 %v7088_v51 }
0x13f2   : > { %3645 = vadd.xlane.f32.xlu1 %v3644_v55 }
0x13f4   : > { %3625 = vadd.xlane.f32.xlu0 %v3624_v33 }
0x13fb   : > { %7082 = vrot.lane.b32.xlu2 %v7081_v32, %s9775_s5 }
0x1408   : > { %7092 = vrot.lane.b32.xlu0 %v7091_v18, %s9775_s5 }
0x1410   : > { %7097 = vrot.lane.b32.xlu0 %v7096_v15, %s9775_s5  ;;  %v3366_v15 = vmul.f32 %v3365_v42, %v8175_v3  ;;  %v6635_v42 = vld [vmem:[%s7572_s19 + $0x220] sm:$0xff] }
0x1424   : > { %3635 = vadd.xlane.f32.xlu2 %v3634_v37  ;;  %v6638_v37 = vld [vmem:[%s7572_s19 + $0x238] sm:$0xff] }
0x1455   : > { %v3633_v57 = vpop.xlane.xlu0 %3632  ;;  %v3623_v30 = vpop.xlane.xlu1 %3622 }
0x1456   : > { %v3613_v39 = vpop.xlane.xlu2 %3612  ;;  %7303 = vrcp.f32 %v3623_v30  ;;  %v6617_v30 = vld [vmem:[%s7582_s30 + $0x98] sm:$0xff] }
0x1457   : > { %7305 = vrcp.f32 %v3613_v39  ;;  %v3367_v39 = vadd.f32 1e-05, %v3366_v15  ;;  %6619 = vmatpush.xpose.msk.msra.mxu1 %vm1056_vm1, %v6617_v30  ;;  %v6630_v15 = vld [vmem:[%s7572_s19 + $0x1f8] sm:$0xff] }
0x1458   : > { %7307 = vrcp.f32 %v3633_v57  ;;  %v6634_v57 = vld [vmem:[%s7572_s19 + $0x218] sm:$0xff] }
0x1459   : > { %vm3374_vm8 = vweird.f32 %v3367_v39 }
0x145c   : > { %v7304_v5 = vpop.eup %7303 }
0x145d   : > { %v3643_v16 = vpop.xlane.xlu1 %3642  ;;  %v7306_v17 = vpop.eup %7305  ;;  %v3653_v59 = vmul.f32 %v7304_v5, %v7960_v61  ;;  %v6616_v5 = vld [vmem:[%s7582_s30 + $0x90] sm:$0xff] }
0x145e   : > { %v7083_v7 = vpop.permute.xlu2 %7082  ;;  %7309 = vrcp.f32 %v3643_v16  ;;  %v3649_v2 = vmul.f32 %v7306_v17, %v7965_v62  ;;  %v7308_v50 = vpop.eup %7307  ;;  %6620 = vmatpush.xpose.msk.msra.mxu1 %vm1056_vm1, %v6616_v5 }
0x145f   : > { %v7084_v31 = vunpack.i.l.bf16 %v7083_v7  ;;  %v7085_v47 = vunpack.i.h.bf16 %v7083_v7  ;;  %v3616_v54 = vpop.xlane.xlu0 %3615  ;;  %v3657_v1 = vmul.f32 %v7308_v50, %v7972_v4  ;;  %v6637_v7 = vld [vmem:[%s7572_s19 + $0x230] sm:$0xff]  ;;  %7311 = vrsqrt.f32 %v3367_v39 }
0x1460   : > { %v3655_v33 = vadd.f32 %v3653_v59, %v3649_v2 }
0x1461   : > { %3713 = vmatpush.msrb.mxu2 %v7084_v31  ;;  %v6636_v31 = vld [vmem:[%s7572_s19 + $0x228] sm:$0xff] }
0x1462   : > { %v3659_v29 = vadd.f32 %v3657_v1, %v3655_v33 }
0x1463   : > { %3714 = vmatpush.msrb.mxu2 %v7085_v47 }
0x1464   : > { %v7310_v34 = vpop.eup %7309 }
0x1465   : > { %3715 = vmatpush.msrb.mxu2 %v7089_v10  ;;  %v3661_v32 = vmul.f32 %v7310_v34, %v7977_v6  ;;  %v3646_v51 = vpop.xlane.xlu1 %3645  ;;  %v6615_v34 = vld [vmem:[%s7582_s30 + $0x88] sm:$0xff] }
0x1466   : > { %6621 = vmatpush.xpose.msk.msra.mxu1 %vm1056_vm1, %v6615_v34 }
0x1467   : > { %3716 = vmatpush.msrb.mxu2 %v7090_v22  ;;  %v3626_v60 = vpop.xlane.xlu0 %3625  ;;  %v3663_v58 = vadd.f32 %v3661_v32, %v3659_v29  ;;  %v6631_v29 = vld [vmem:[%s7572_s19 + $0x200] sm:$0xff] }
0x1468   : > { %7313 = vrcp.f32 %v3626_v60  ;;  %v6633_v60 = vld [vmem:[%s7572_s19 + $0x210] sm:$0xff] }
0x1469   : > { %v3665_v12 = vmul.f32 %v8830_v44, %v3663_v58  ;;  %v7312_v44 = vpop.eup %7311  ;;  %7315 = vrcp.f32 %v3616_v54  ;;  %v6614_v58 = vld [vmem:[%s7582_s30 + $0x80] sm:$0xff] }
0x146a   : > { %v3369_v47 = vmul.f32 %v7312_v44, %v3367_v39  ;;  %7317 = vrcp.f32 %v3646_v51  ;;  %6622 = vmatpush.xpose.msk.msra.mxu1 %vm1056_vm1, %v6614_v58  ;;  %vm3375_vm14 = vweird.f32 %v7312_v44 }
0x146b   : > { %vm3376_vm0 = vmor %vm3374_vm8, %vm3375_vm14 }
0x146c   : > { %v3370_v54 = vmul.f32 %v7312_v44, %v3369_v47  ;;  %v7178_v47 = vld [vmem:[%s9776_s2 + $0x7] ss:$0 sm:$0xff] }
0x146e   : > { %v7314_v22 = vpop.eup %7313 }
0x146f   : > { %v7316_v16 = vpop.eup %7315  ;;  %v3654_v17 = vmul.f32 %v7314_v22, %v7960_v61 }
0x1470   : > { %v7318_v59 = vpop.eup %7317  ;;  %v3650_v2 = vmul.f32 %v7316_v16, %v7965_v62 }
0x1471   : > { %v3662_v1 = vmul.f32 %v7318_v59, %v7977_v6 }
0x1472   : > { %v3656_v33 = vadd.f32 %v3654_v17, %v3650_v2 }
0x147a   : > { %v7093_v14 = vpop.permute.xlu0 %7092 }
0x147b   : > { %v7094_v55 = vunpack.i.l.bf16 %v7093_v14  ;;  %v7095_v13 = vunpack.i.h.bf16 %v7093_v14  ;;  %v6632_v14 = vld [vmem:[%s7572_s19 + $0x208] sm:$0xff] }
0x147d   : > { %3717 = vmatpush.msrb.mxu2 %v7094_v55  ;;  %v3371_v55 = vmul.f32 0.5, %v3370_v54 }
0x147f   : > { %3718 = vmatpush.msrb.mxu2 %v7095_v13 }
0x1482   : > { %v7098_v18 = vpop.permute.xlu0 %7097 }
0x1483   : > { %v7099_v41 = vunpack.i.l.bf16 %v7098_v18  ;;  %v7100_v35 = vunpack.i.h.bf16 %v7098_v18  ;;  %v3372_v18 = vsub.f32 1.5, %v3371_v55  ;;  %v7180_v55 = vld [vmem:[%s9754_s6 + $0x4] ss:$0 sm:$0xff] }
0x1485   : > { %3719 = vmatpush.msrb.mxu2 %v7099_v41 }
0x1487   : > { %3720 = vmatpush.msrb.mxu2 %v7100_v35 }
0x1488   : > { %6612 = vmatmul.msk.f32.vlgmr.msrb.gmra.mxu2 %vm1370_vm9, %v3665_v12  ;;  %v3373_v12 = vmul.f32 %v7312_v44, %v3372_v18 }
0x1489   : > { %6640 = vmatpush.xpose.msk.msra.mxu2 %vm1056_vm1, %v6638_v37  ;;  %v6629_v37 = vld [vmem:[%s7572_s19 + $0x1f0] sm:$0xff] }
0x148d   : > { %6641 = vmatpush.xpose.msk.msra.mxu2 %vm1056_vm1, %v6637_v7  ;;  %v3377_v7 = vsel %vm3376_vm0, %v7312_v44, %v3373_v12 }
0x1491   : > { %6642 = vmatpush.xpose.msk.msra.mxu2 %vm1056_vm1, %v6636_v31  ;;  %v7177_v31 = vld [vmem:[%s7612_s25 + $0x7] ss:$0 sm:$0xff] }
0x1495   : > { %6643 = vmatpush.xpose.msk.msra.mxu2 %vm1056_vm1, %v6635_v42  ;;  %v6628_v42 = vld [vmem:[%s7572_s19 + $0x1e8] sm:$0xff] }
0x1497   : > { %v3636_v10 = vpop.xlane.xlu2 %3635 }
0x1498   : > { %7319 = vrcp.f32 %v3636_v10 }
0x1499   : > { %6644 = vmatpush.xpose.msk.msra.mxu2 %vm1056_vm1, %v6634_v57  ;;  %v6627_v57 = vld [vmem:[%s7572_s19 + $0x1e0] sm:$0xff] }
0x149d   : > { %6645 = vmatpush.xpose.msk.msra.mxu2 %vm1056_vm1, %v6633_v60 }
0x149e   : > { %v7320_v50 = vpop.eup %7319 }
0x149f   : > { %v3658_v13 = vmul.f32 %v7320_v50, %v7972_v4 }
0x14a1   : > { %6646 = vmatpush.xpose.msk.msra.mxu2 %vm1056_vm1, %v6632_v14  ;;  %v3660_v32 = vadd.f32 %v3658_v13, %v3656_v33 }
0x14a3   : > { %v3664_v41 = vadd.f32 %v3662_v1, %v3660_v32 }
0x14a5   : > { %6647 = vmatpush.xpose.msk.msra.mxu2 %vm1056_vm1, %v6631_v29  ;;  %v3666_v35 = vmul.f32 %v8843_v56, %v3664_v41  ;;  %v3378_v56 = vmul.f32 %v3377_v7, %v8803_v49  ;;  %v7179_v49 = vld [vmem:[%s7577_s24 + $0x5] ss:$0 sm:$0xff] }
0x14a7   : > { %6613 = vmatmul.msk.f32.gmra.mxu2 %vm1370_vm9, %v3666_v35  ;;  %v3382_v51 = vmul.f32 %v7177_v31, %v3378_v56 }
0x14a9   : > { %6648 = vmatpush.xpose.msk.msra.mxu2 %vm1056_vm1, %v6630_v15  ;;  %v8921_v39 = vadd.f32 %v7178_v47, %v3382_v51 }
0x14ad   : > { %6649 = vmatpush.xpose.msk.msra.mxu2 %vm1056_vm1, %v6629_v37 }
0x14b1   : > { %6650 = vmatpush.xpose.msk.msra.mxu2 %vm1056_vm1, %v6628_v42 }
0x14b5   : > { %6651 = vmatpush.xpose.msk.msra.mxu2 %vm1056_vm1, %v6627_v57 }
0x14b8   : > { %6652 = vmatmul.msk.f32.vlgmr.msra.gmra.mxu2 %vm1056_vm1, %v8921_v39 }
0x150b   : > { %v3722_v44 = vpop.f32.mrf.mxu2 }
0x150c   : > { %6623 = vmatmul.msk.f32.vlgmr.msra.gmra.mxu1 %vm1056_vm1, %v3722_v44 }
0x152a   : > { %v3725_v10 = vpop.f32.mrf.mxu2 }
0x152b   : > { %6624 = vmatmul.msk.f32.gmra.mxu1 %vm1056_vm1, %v3725_v10 }
0x153b   : > { %v3913_v22 = vpop.f32.mrf.mxu2 }
0x153c   : > { %v8928_v30 = vadd.f32 %v7179_v49, %v3913_v22 }
0x153e   : > { %v3919_v16 = vmul.f32 %v8928_v30, %v7825_v36  ;;  %v3918_v60 = vmul.f32 %v8928_v30, %v7830_v40  ;;  %v3917_v5 = vmul.f32 %v8928_v30, %v7828_v38  ;;  %v3916_v54 = vmul.f32 %v8928_v30, %v7844_v46 }
0x153f   : > { %v3922_v42 = vmul.f32 %v7942_v53, %v8928_v30  ;;  %v3923_v51 = vmul.f32 %v7940_v52, %v8928_v30 }
0x1540   : > { %3934 = vrot.lane.b32.xlu0 %v3919_v16, %s9780_s8  ;;  %3932 = vrot.lane.b32.xlu2 %v3918_v60, %s9780_s8 }
0x1541   : > { %v7101_v57 = vpack.i.bf16 %v3922_v42, %v3923_v51  ;;  %v6678_v42 = vld [vmem:[%s9753_s12 + $0x138] sm:$0xff]  ;;  %v6677_v51 = vld [vmem:[%s9753_s12 + $0x130] sm:$0xff] }
0x1548   : > { %3930 = vrot.lane.b32.xlu0 %v3917_v5, %s9780_s8 }
0x1550   : > { %3928 = vrot.lane.b32.xlu0 %v3916_v54, %s9780_s8 }
0x1589   : > { %v3773_v14 = vpop.f32.mrf.mxu1 }
0x158a   : > { %v3774_v58 = vadd.f32 %v7180_v55, %v3773_v14 }
0x158c   : > { %v3779_v15 = vadd.f32 %v3774_v58, %v8721_v0 }
0x158e   : > { %v3785_v7 = vsel %vm1056_vm1, %v3779_v15, 0.0 }
0x159a   : > { %v3933_v59 = vpop.permute.xlu2 %3932 }
0x15a8   : > { %v3776_v34 = vpop.f32.mrf.mxu1 }
0x15a9   : > { %v3777_v37 = vadd.f32 %v7180_v55, %v3776_v34 }
0x15ab   : > { %v3780_v56 = vadd.f32 %v3777_v37, %v8726_v63  ;;  %v3920_v37 = vmul.f32 %v8033_v48, %v8928_v30 }
0x15ad   : > { %v3788_v0 = vsel %vm1056_vm1, %v3780_v56, 0.0 }
0x15b2   : > { %v3935_v17 = vpop.permute.xlu0 %3934 }
0x15b3   : > { %6653 = vmatpush.xpose.msk.msrb.mxu1 %vm1056_vm1, %v3935_v17 }
0x15b7   : > { %6654 = vmatpush.xpose.msk.msrb.mxu1 %vm1056_vm1, %v3933_v59 }
0x15ba   : > { %v3931_v2 = vpop.permute.xlu0 %3930 }
0x15bb   : > { %6655 = vmatpush.xpose.msk.msrb.mxu1 %vm1056_vm1, %v3931_v2 }
0x15c2   : > { %v3929_v50 = vpop.permute.xlu0 %3928 }
0x15c3   : > { %6656 = vmatpush.xpose.msk.msrb.mxu1 %vm1056_vm1, %v3929_v50 }
0x15c6   : > { %6657 = vmatmul.msk.f32.vlgmr.msrb.gmra.mxu1 %vm1056_vm1, %v8928_v30 }
0x15c7   : > { %6680 = vmatpush.xpose.msk.msra.mxu1 %vm1056_vm1, %v6678_v42 }
0x15cb   : > { %6681 = vmatpush.xpose.msk.msra.mxu1 %vm1056_vm1, %v6677_v51 }
0x1643   : > { %v3964_v33 = vpop.f32.mrf.mxu1 }
0x1644   : > { %v3965_v13 = vadd.f32 %v3964_v33, %v8120_v45 }
0x1646   : > { %v3979_v1 = vsel %vm7764_vm5, %v3965_v13, -1e+30  ;;  %v3971_v32 = vsel %vm7776_vm7, %v3965_v13, -1e+30  ;;  %v3967_v29 = vsel %vm1002_vm11, %v3965_v13, -1e+30 }
0x1647   : > { %v3980_v18 = vsel %vm1056_vm1, %v3979_v1, -inf  ;;  %v3972_v41 = vsel %vm1056_vm1, %v3971_v32, -inf  ;;  %v3968_v35 = vsel %vm1056_vm1, %v3967_v29, -inf  ;;  %v3975_v12 = vsel %vm7793_vm10, %v3965_v13, -1e+30 }
0x1648   : > { %3981 = vmax.xlane.f32.xlu2 %v3980_v18  ;;  %3973 = vmax.xlane.f32.xlu0 %v3972_v41  ;;  %v3976_v31 = vsel %vm1056_vm1, %v3975_v12, -inf }
0x1649   : > { %3969 = vmax.xlane.f32.xlu1 %v3968_v35 }
0x1650   : > { %3786 = vadd.xlane.f32.xlu2 %v3785_v7  ;;  %v3921_v7 = vmul.f32 %v8026_v43, %v8928_v30  ;;  %v6674_v30 = vld [vmem:[%s9753_s12 + $0x118] sm:$0xff] }
0x1651   : > { %3977 = vmax.xlane.f32.xlu1 %v3976_v31 }
0x1652   : > { %v7106_v31 = vpack.i.bf16 %v3920_v37, %v3921_v7 }
0x1658   : > { %3789 = vadd.xlane.f32.xlu2 %v3788_v0 }
0x165c   : > { %7102 = vrot.lane.b32.xlu0 %v7101_v57, %s9775_s5  ;;  %v6676_v57 = vld [vmem:[%s9753_s12 + $0x128] sm:$0xff] }
0x165d   : > { %6682 = vmatpush.xpose.msk.msra.mxu1 %vm1056_vm1, %v6676_v57 }
0x16bb   : > { %v3982_v47 = vpop.xlane.xlu2 %3981  ;;  %v3974_v10 = vpop.xlane.xlu0 %3973 }
0x16bc   : > { %v3970_v44 = vpop.xlane.xlu1 %3969  ;;  %v3985_v49 = vmul.f32 %v7787_v25, %v3974_v10  ;;  %v3989_v54 = vmul.f32 %v7772_v23, %v3982_v47  ;;  %v6675_v47 = vld [vmem:[%s9753_s12 + $0x120] sm:$0xff]  ;;  %v6673_v10 = vld [vmem:[%s9753_s12 + $0x110] sm:$0xff] }
0x16bd   : > { %v3983_v22 = vmul.f32 %v7806_v28, %v3970_v44  ;;  %6683 = vmatpush.xpose.msk.msra.mxu1 %vm1056_vm1, %v6675_v47 }
0x16bf   : > { %v3986_v60 = vadd.f32 %v3985_v49, %v3983_v22  ;;  %v6672_v22 = vld [vmem:[%s9753_s12 + $0x108] sm:$0xff] }
0x16c1   : > { %6684 = vmatpush.xpose.msk.msra.mxu1 %vm1056_vm1, %v6674_v30 }
0x16c3   : > { %v3787_v63 = vpop.xlane.xlu2 %3786 }
0x16c4   : > { %v3791_v16 = vmul.f32 %v3787_v63, %v8175_v3  ;;  %v3978_v53 = vpop.xlane.xlu1 %3977  ;;  %v6671_v63 = vld [vmem:[%s9753_s12 + $0x100] sm:$0xff] }
0x16c5   : > { %v3987_v52 = vmul.f32 %v7801_v27, %v3978_v53  ;;  %6685 = vmatpush.xpose.msk.msra.mxu1 %vm1056_vm1, %v6673_v10  ;;  %v6692_v10 = vld [vmem:[%s9777_s18 + $0x90] sm:$0xff] }
0x16c6   : > { %v8975_v5 = vsub.f32 %v3779_v15, %v3791_v16 }
0x16c7   : > { %v3988_v17 = vadd.f32 %v3987_v52, %v3986_v60 }
0x16c8   : > { %v3795_v59 = vmul.f32 %v8975_v5, %v8975_v5 }
0x16c9   : > { %v3990_v2 = vadd.f32 %v3989_v54, %v3988_v17  ;;  %6686 = vmatpush.xpose.msk.msra.mxu1 %vm1056_vm1, %v6672_v22 }
0x16ca   : > { %v3797_v50 = vsel %vm1056_vm1, %v3795_v59, 0.0 }
0x16cb   : > { %v3991_v14 = vsub.f32 %v3965_v13, %v3990_v2  ;;  %3798 = vadd.xlane.f32.xlu2 %v3797_v50  ;;  %v3790_v0 = vpop.xlane.xlu2 %3789 }
0x16cc   : > { %v3792_v48 = vmul.f32 %v3790_v0, %v8175_v3 }
0x16cd   : > { %v3992_v34 = vmul.f32 1.442695, %v3991_v14  ;;  %6687 = vmatpush.xpose.msk.msra.mxu1 %vm1056_vm1, %v6671_v63  ;;  %v7181_v14 = vld [vmem:[%s7612_s25 + $0x8] ss:$0 sm:$0xff] }
0x16ce   : > { %v7103_v55 = vpop.permute.xlu0 %7102  ;;  %v9009_v43 = vsub.f32 %v3780_v56, %v3792_v48 }
0x16cf   : > { %7321 = vpow2.f32 %v3992_v34  ;;  %v7104_v33 = vunpack.i.l.bf16 %v7103_v55  ;;  %v7105_v1 = vunpack.i.h.bf16 %v7103_v55 }
0x16d0   : > { %v3796_v44 = vmul.f32 %v9009_v43, %v9009_v43 }
0x16d1   : > { %4054 = vmatpush.msra.mxu0 %v7104_v33  ;;  %v7182_v33 = vld [vmem:[%s9776_s2 + $0x8] ss:$0 sm:$0xff] }
0x16d2   : > { %v3800_v49 = vsel %vm1056_vm1, %v3796_v44, 0.0  ;;  %v6693_v44 = vld [vmem:[%s9777_s18 + $0x98] sm:$0xff] }
0x16d3   : > { %4055 = vmatpush.msra.mxu0 %v7105_v1 }
0x16d5   : > { %v8981_v32 = vpop.eup %7321 }
0x16d6   : > { %v3994_v29 = vmul.f32 %v8981_v32, %v7806_v28  ;;  %v3999_v13 = vmul.f32 %v8981_v32, %v7787_v25  ;;  %v4004_v41 = vmul.f32 %v8981_v32, %v7801_v27  ;;  %v4009_v15 = vmul.f32 %v8981_v32, %v7772_v23 }
0x16d8   : > { %v3995_v58 = vsel %vm1056_vm1, %v3994_v29, 0.0  ;;  %v4000_v18 = vsel %vm1056_vm1, %v3999_v13, 0.0  ;;  %v4005_v35 = vsel %vm1056_vm1, %v4004_v41, 0.0  ;;  %v4010_v12 = vsel %vm1056_vm1, %v4009_v15, 0.0 }
0x16d9   : > { %3996 = vadd.xlane.f32.xlu1 %v3995_v58 }
0x16e1   : > { %4001 = vadd.xlane.f32.xlu1 %v4000_v18 }
0x16e9   : > { %4006 = vadd.xlane.f32.xlu1 %v4005_v35 }
0x16f1   : > { %4011 = vadd.xlane.f32.xlu1 %v4010_v12 }
0x170a   : > { %7107 = vrot.lane.b32.xlu1 %v7106_v31, %s9775_s5  ;;  %s9781_s5 = sld [smem:[#allocation21_spill]] }
0x1734   : > { %3801 = vadd.xlane.f32.xlu1 %v3800_v49 }
0x173e   : > { %v3799_v56 = vpop.xlane.xlu2 %3798 }
0x173f   : > { %v3803_v16 = vmul.f32 %v3799_v56, %v8175_v3  ;;  %v6691_v56 = vld [vmem:[%s9777_s18 + $0x88] sm:$0xff] }
0x1741   : > { %v3805_v53 = vadd.f32 1e-05, %v3803_v16 }
0x1743   : > { %7323 = vrsqrt.f32 %v3805_v53  ;;  %vm3813_vm15 = vweird.f32 %v3805_v53 }
0x1749   : > { %v7324_v60 = vpop.eup %7323 }
0x174a   : > { %v3808_v52 = vmul.f32 %v7324_v60, %v3805_v53  ;;  %vm3814_vm12 = vweird.f32 %v7324_v60 }
0x174b   : > { %vm3815_vm13 = vmor %vm3813_vm15, %vm3814_vm12 }
0x174c   : > { %v3809_v54 = vmul.f32 %v7324_v60, %v3808_v52  ;;  %v3997_v59 = vpop.xlane.xlu1 %3996 }
0x174e   : > { %v3810_v17 = vmul.f32 0.5, %v3809_v54  ;;  %v6690_v54 = vld [vmem:[%s9777_s18 + $0x80] sm:$0xff] }
0x1750   : > { %v3811_v2 = vsub.f32 1.5, %v3810_v17 }
0x1752   : > { %v3812_v50 = vmul.f32 %v7324_v60, %v3811_v2  ;;  %v6662_v2 = vld [vmem:[%s7582_s30 + $0xb8] sm:$0xff] }
0x1753   : > { %6664 = vmatpush.xpose.msk.msrb.mxu3 %vm1056_vm1, %v6662_v2 }
0x1754   : > { %v3816_v34 = vsel %vm3815_vm13, %v7324_v60, %v3812_v50  ;;  %v4002_v29 = vpop.xlane.xlu1 %4001 }
0x1755   : > { %v3827_v55 = vmul.f32 %v3816_v34, %v8975_v5  ;;  %7325 = vrcp.f32 %v4002_v29  ;;  %v6661_v34 = vld [vmem:[%s7582_s30 + $0xb0] sm:$0xff]  ;;  %v6660_v29 = vld [vmem:[%s7582_s30 + $0xa8] sm:$0xff] }
0x1756   : > { %7327 = vrcp.f32 %v3997_v59 }
0x1757   : > { %v3832_v1 = vmul.f32 %v7181_v14, %v3827_v55  ;;  %6665 = vmatpush.xpose.msk.msrb.mxu3 %vm1056_vm1, %v6661_v34 }
0x1759   : > { %v9026_v58 = vadd.f32 %v7182_v33, %v3832_v1 }
0x175b   : > { %6688 = vmatmul.msk.f32.vlgmr.msra.gmra.mxu1 %vm1056_vm1, %v9026_v58  ;;  %v7326_v41 = vpop.eup %7325  ;;  %6666 = vmatpush.xpose.msk.msrb.mxu3 %vm1056_vm1, %v6660_v29  ;;  %v7186_v29 = vld [vmem:[%s7612_s25 + $0x9] ss:$0 sm:$0xff] }
0x175c   : > { %v4007_v13 = vpop.xlane.xlu1 %4006  ;;  %v7328_v35 = vpop.eup %7327  ;;  %v4016_v5 = vmul.f32 %v7326_v41, %v7787_v25 }
0x175d   : > { %7329 = vrcp.f32 %v4007_v13  ;;  %v4014_v37 = vmul.f32 %v7328_v35, %v7806_v28  ;;  %v6659_v13 = vld [vmem:[%s7582_s30 + $0xa0] sm:$0xff] }
0x175f   : > { %v4017_v31 = vadd.f32 %v4016_v5, %v4014_v37  ;;  %6667 = vmatpush.xpose.msk.msrb.mxu3 %vm1056_vm1, %v6659_v13 }
0x1763   : > { %v7330_v15 = vpop.eup %7329 }
0x1764   : > { %v4012_v18 = vpop.xlane.xlu1 %4011  ;;  %v4018_v7 = vmul.f32 %v7330_v15, %v7801_v27 }
0x1765   : > { %7331 = vrcp.f32 %v4012_v18  ;;  %v7183_v18 = vld [vmem:[%s9778_s3 + $0x4] ss:$0 sm:$0xff] }
0x1766   : > { %v4019_v51 = vadd.f32 %v4018_v7, %v4017_v31 }
0x176b   : > { %v7332_v12 = vpop.eup %7331 }
0x176c   : > { %v4020_v42 = vmul.f32 %v7332_v12, %v7772_v23  ;;  %v7185_v12 = vld [vmem:[%s9754_s6 + $0x5] ss:$0 sm:$0xff] }
0x176e   : > { %v4021_v0 = vadd.f32 %v4020_v42, %v4019_v51  ;;  %v6710_v51 = vld [vmem:[%s9753_s12 + $0x178] sm:$0xff] }
0x176f   : > { %6712 = vmatpush.xpose.msk.msra.mxu3 %vm1056_vm1, %v6710_v51  ;;  %v7184_v51 = vld [vmem:[%s9779_s21 + $0x4] ss:$0 sm:$0xff] }
0x1770   : > { %v4022_v30 = vmul.f32 %v8981_v32, %v4021_v0 }
0x177c   : > { %v7108_v57 = vpop.permute.xlu1 %7107 }
0x177d   : > { %v7109_v48 = vunpack.i.l.bf16 %v7108_v57  ;;  %v7110_v47 = vunpack.i.h.bf16 %v7108_v57 }
0x177f   : > { %4056 = vmatpush.msra.mxu0 %v7109_v48 }
0x1781   : > { %4057 = vmatpush.msra.mxu0 %v7110_v47 }
0x1782   : > { %6658 = vmatmul.msk.f32.vlgmr.msra.gmra.mxu0 %vm1056_vm1, %v4022_v30 }
0x1783   : > { %6695 = vmatpush.xpose.msk.msrb.mxu0 %vm1370_vm9, %v6693_v44  ;;  %v6708_v44 = vld [vmem:[%s9753_s12 + $0x168] sm:$0xff] }
0x1787   : > { %6696 = vmatpush.xpose.msk.msrb.mxu0 %vm1370_vm9, %v6692_v10  ;;  %v6707_v10 = vld [vmem:[%s9753_s12 + $0x160] sm:$0xff] }
0x178b   : > { %6697 = vmatpush.xpose.msk.msrb.mxu0 %vm1370_vm9, %v6691_v56  ;;  %v6703_v56 = vld [vmem:[%s9753_s12 + $0x140] sm:$0xff] }
0x178f   : > { %6698 = vmatpush.xpose.msk.msrb.mxu0 %vm1370_vm9, %v6690_v54  ;;  %v6722_v54 = vld [vmem:[%s9777_s18 + $0xa8] sm:$0xff] }
0x17a7   : > { %v3802_v49 = vpop.xlane.xlu1 %3801 }
0x17a8   : > { %v3804_v22 = vmul.f32 %v3802_v49, %v8175_v3  ;;  %v6706_v49 = vld [vmem:[%s9753_s12 + $0x158] sm:$0xff] }
0x17aa   : > { %v3806_v63 = vadd.f32 1e-05, %v3804_v22  ;;  %v6705_v22 = vld [vmem:[%s9753_s12 + $0x150] sm:$0xff] }
0x17ac   : > { %7333 = vrsqrt.f32 %v3806_v63  ;;  %vm3823_vm8 = vweird.f32 %v3806_v63 }
0x17b2   : > { %v7334_v32 = vpop.eup %7333 }
0x17b3   : > { %v3818_v16 = vmul.f32 %v7334_v32, %v3806_v63  ;;  %vm3824_vm14 = vweird.f32 %v7334_v32  ;;  %v6704_v63 = vld [vmem:[%s9753_s12 + $0x148] sm:$0xff] }
0x17b4   : > { %vm3825_vm0 = vmor %vm3823_vm8, %vm3824_vm14 }
0x17b5   : > { %v3819_v53 = vmul.f32 %v7334_v32, %v3818_v16  ;;  %v6723_v16 = vld [vmem:[%s9777_s18 + $0xb0] sm:$0xff] }
0x17b7   : > { %v3820_v60 = vmul.f32 0.5, %v3819_v53 }
0x17b9   : > { %v3821_v52 = vsub.f32 1.5, %v3820_v60 }
0x17bb   : > { %v3822_v17 = vmul.f32 %v7334_v32, %v3821_v52 }
0x17bd   : > { %v3826_v59 = vsel %vm3825_vm0, %v7334_v32, %v3822_v17  ;;  %v6724_v32 = vld [vmem:[%s9777_s18 + $0xb8] sm:$0xff] }
0x17be   : > { %v3828_v50 = vmul.f32 %v3826_v59, %v9009_v43  ;;  %6726 = vmatpush.xpose.msk.msra.mxu0 %vm1370_vm9, %v6724_v32 }
0x17c0   : > { %v3833_v55 = vmul.f32 %v7181_v14, %v3828_v50 }
0x17c2   : > { %v9049_v1 = vadd.f32 %v7182_v33, %v3833_v55  ;;  %6727 = vmatpush.xpose.msk.msra.mxu0 %vm1370_vm9, %v6723_v16 }
0x17c4   : > { %6689 = vmatmul.msk.f32.gmra.mxu1 %vm1056_vm1, %v9049_v1 }
0x17c6   : > { %6728 = vmatpush.xpose.msk.msra.mxu0 %vm1370_vm9, %v6722_v54 }
0x17d8   : > { %v4203_v43 = vpop.f32.mrf.mxu1 }
0x17d9   : > { %v4204_v41 = vadd.f32 %v7183_v18, %v4203_v43  ;;  %v7187_v43 = vld [vmem:[%s9776_s2 + $0x9] ss:$0 sm:$0xff] }
0x17db   : > { %v4209_v35 = vmax.f32 %v4204_v41, 0.0 }
0x17dd   : > { %6699 = vmatmul.msk.f32.vlgmr.msrb.gmra.mxu0 %vm1370_vm9, %v4209_v35 }
0x17ff   : > { %v4059_v14 = vpop.f32.mrf.mxu0 }
0x1800   : > { %6668 = vmatmul.msk.f32.vlgmr.msrb.gmra.mxu3 %vm1056_vm1, %v4059_v14  ;;  %v6721_v14 = vld [vmem:[%s9777_s18 + $0xa0] sm:$0xff] }
0x1801   : > { %6729 = vmatpush.xpose.msk.msra.mxu0 %vm1370_vm9, %v6721_v14  ;;  %v6735_v14 = vld [vmem:[%s7572_s19 + $0x250] sm:$0xff] }
0x1841   : > { %v4206_v33 = vpop.f32.mrf.mxu1 }
0x1842   : > { %v4207_v15 = vadd.f32 %v7183_v18, %v4206_v33  ;;  %v7188_v33 = vld [vmem:[%s9778_s3 + $0x5] ss:$0 sm:$0xff] }
0x1844   : > { %v4210_v5 = vmax.f32 %v4207_v15, 0.0 }
0x1846   : > { %6700 = vmatmul.msk.f32.gmra.mxu0 %vm1370_vm9, %v4210_v5 }
0x1883   : > { %v4104_v37 = vpop.f32.mrf.mxu3 }
0x1884   : > { %v4105_v7 = vadd.f32 %v7185_v12, %v4104_v37  ;;  %v4256_v37 = vpop.f32.mrf.mxu0 }
0x1886   : > { %v4107_v31 = vadd.f32 %v4105_v7, %v8921_v39  ;;  %v6709_v39 = vld [vmem:[%s9753_s12 + $0x170] sm:$0xff] }
0x1887   : > { %6713 = vmatpush.xpose.msk.msra.mxu3 %vm1056_vm1, %v6709_v39 }
0x1888   : > { %v4112_v42 = vsel %vm1056_vm1, %v4107_v31, 0.0 }
0x1889   : > { %4113 = vadd.xlane.f32.xlu0 %v4112_v42 }
0x188b   : > { %6714 = vmatpush.xpose.msk.msra.mxu3 %vm1056_vm1, %v6708_v44 }
0x188f   : > { %6715 = vmatpush.xpose.msk.msra.mxu3 %vm1056_vm1, %v6707_v10 }
0x1893   : > { %6716 = vmatpush.xpose.msk.msra.mxu3 %vm1056_vm1, %v6706_v49 }
0x1897   : > { %6717 = vmatpush.xpose.msk.msra.mxu3 %vm1056_vm1, %v6705_v22  ;;  %v6744_v22 = vld [vmem:[%s7572_s19 + $0x298] sm:$0xff] }
0x1898   : > { %6752 = vmatpush.xpose.msk.msrb.mxu1 %vm1056_vm1, %v6744_v22 }
0x189b   : > { %6718 = vmatpush.xpose.msk.msra.mxu3 %vm1056_vm1, %v6704_v63 }
0x189f   : > { %6719 = vmatpush.xpose.msk.msra.mxu3 %vm1056_vm1, %v6703_v56 }
0x18c3   : > { %v4259_v7 = vpop.f32.mrf.mxu0 }
0x18c4   : > { %v4260_v39 = vadd.f32 %v7184_v51, %v4259_v7 }
0x18c6   : > { %v4263_v10 = vadd.f32 %v4260_v39, %v9049_v1 }
0x18c8   : > { %v4271_v49 = vsel %vm1056_vm1, %v4263_v10, 0.0 }
0x18fc   : > { %v4114_v0 = vpop.xlane.xlu0 %4113 }
0x18fd   : > { %v4115_v57 = vmul.f32 %v4114_v0, %v8175_v3 }
0x18ff   : > { %v4116_v48 = vsub.f32 %v4107_v31, %v4115_v57  ;;  %v7189_v31 = vld [vmem:[%s9779_s21 + $0x5] ss:$0 sm:$0xff] }
0x1901   : > { %v4117_v47 = vmul.f32 %v4116_v48, %v4116_v48 }
0x1903   : > { %v4118_v30 = vsel %vm1056_vm1, %v4117_v47, 0.0 }
0x1904   : > { %4119 = vadd.xlane.f32.xlu2 %v4118_v30 }
0x1977   : > { %v4120_v53 = vpop.xlane.xlu2 %4119 }
0x1978   : > { %v4121_v60 = vmul.f32 %v4120_v53, %v8175_v3 }
0x197a   : > { %v4122_v52 = vadd.f32 1e-05, %v4121_v60 }
0x197c   : > { %7335 = vrsqrt.f32 %v4122_v52  ;;  %vm4129_vm15 = vweird.f32 %v4122_v52 }
0x1982   : > { %v7336_v17 = vpop.eup %7335 }
0x1983   : > { %v4124_v59 = vmul.f32 %v7336_v17, %v4122_v52  ;;  %vm4130_vm12 = vweird.f32 %v7336_v17 }
0x1984   : > { %vm4131_vm13 = vmor %vm4129_vm15, %vm4130_vm12 }
0x1985   : > { %v4125_v2 = vmul.f32 %v7336_v17, %v4124_v59 }
0x1987   : > { %v4126_v50 = vmul.f32 0.5, %v4125_v2 }
0x1989   : > { %v4127_v34 = vsub.f32 1.5, %v4126_v50 }
0x198b   : > { %v4128_v55 = vmul.f32 %v7336_v17, %v4127_v34 }
0x198d   : > { %v4132_v13 = vsel %vm4131_vm13, %v7336_v17, %v4128_v55  ;;  %v6743_v55 = vld [vmem:[%s7572_s19 + $0x290] sm:$0xff] }
0x198e   : > { %v4133_v18 = vmul.f32 %v4132_v13, %v4116_v48  ;;  %v4257_v48 = vadd.f32 %v7184_v51, %v4256_v37  ;;  %6753 = vmatpush.xpose.msk.msrb.mxu1 %vm1056_vm1, %v6743_v55  ;;  %v6741_v13 = vld [vmem:[%s7572_s19 + $0x280] sm:$0xff] }
0x198f   : > { %v6733_v37 = vld [vmem:[%s7572_s19 + $0x240] sm:$0xff] }
0x1990   : > { %v4137_v41 = vmul.f32 %v7186_v29, %v4133_v18  ;;  %v4262_v30 = vadd.f32 %v4257_v48, %v9026_v58  ;;  %v6742_v29 = vld [vmem:[%s7572_s19 + $0x288] sm:$0xff]  ;;  %v6740_v18 = vld [vmem:[%s7572_s19 + $0x278] sm:$0xff] }
0x1992   : > { %v4141_v35 = vadd.f32 %v7187_v43, %v4137_v41  ;;  %v4268_v44 = vsel %vm1056_vm1, %v4262_v30, 0.0  ;;  %6754 = vmatpush.xpose.msk.msrb.mxu1 %vm1056_vm1, %v6742_v29  ;;  %v6739_v43 = vld [vmem:[%s7572_s19 + $0x270] sm:$0xff]  ;;  %v6736_v41 = vld [vmem:[%s7572_s19 + $0x258] sm:$0xff] }
0x1993   : > { %6746 = vmatpush.xpose.msk.msrb.mxu2 %vm1056_vm1, %v6736_v41  ;;  %v7193_v41 = vld [vmem:[%s9776_s2 + $0xa] ss:$0 sm:$0xff] }
0x1994   : > { %6720 = vmatmul.msk.f32.vlgmr.msra.gmra.mxu3 %vm1056_vm1, %v4141_v35 }
0x1996   : > { %6755 = vmatpush.xpose.msk.msrb.mxu1 %vm1056_vm1, %v6741_v13  ;;  %v7191_v13 = vld [vmem:[%s7612_s25 + $0xa] ss:$0 sm:$0xff] }
0x1997   : > { %6747 = vmatpush.xpose.msk.msrb.mxu2 %vm1056_vm1, %v6735_v14 }
0x199a   : > { %6756 = vmatpush.xpose.msk.msrb.mxu1 %vm1056_vm1, %v6740_v18 }
0x199e   : > { %6757 = vmatpush.xpose.msk.msrb.mxu1 %vm1056_vm1, %v6739_v43 }
0x1a17   : > { %v4380_v15 = vpop.f32.mrf.mxu3 }
0x1a18   : > { %v4381_v5 = vadd.f32 %v7188_v33, %v4380_v15  ;;  %v6737_v33 = vld [vmem:[%s7572_s19 + $0x260] sm:$0xff]  ;;  %v6734_v15 = vld [vmem:[%s7572_s19 + $0x248] sm:$0xff] }
0x1a19   : > { %6748 = vmatpush.xpose.msk.msrb.mxu2 %vm1056_vm1, %v6734_v15 }
0x1a1a   : > { %v4383_v12 = vmax.f32 %v4381_v5, 0.0 }
0x1a1c   : > { %6730 = vmatmul.msk.f32.vlgmr.msra.gmra.mxu0 %vm1370_vm9, %v4383_v12 }
0x1a1d   : > { %6749 = vmatpush.xpose.msk.msrb.mxu2 %vm1056_vm1, %v6733_v37 }
0x1a99   : > { %v4426_v42 = vpop.f32.mrf.mxu0 }
0x1a9a   : > { %v4427_v0 = vadd.f32 %v7189_v31, %v4426_v42  ;;  %v9148_v31 = vld [vmem:[%s7577_s24 + $0x6] ss:$0 sm:$0xff] }
0x1a9c   : > { %v4429_v57 = vadd.f32 %v4427_v0, %v4141_v35  ;;  %v6738_v35 = vld [vmem:[%s7572_s19 + $0x268] sm:$0xff] }
0x1a9d   : > { %6758 = vmatpush.xpose.msk.msrb.mxu1 %vm1056_vm1, %v6738_v35 }
0x1a9e   : > { %v4434_v47 = vsel %vm1056_vm1, %v4429_v57, 0.0 }
0x1a9f   : > { %4435 = vadd.xlane.f32.xlu2 %v4434_v47 }
0x1aa1   : > { %6759 = vmatpush.xpose.msk.msrb.mxu1 %vm1056_vm1, %v6737_v33 }
0x1aa7   : > { %4269 = vadd.xlane.f32.xlu2 %v4268_v44 }
0x1aaf   : > { %4272 = vadd.xlane.f32.xlu2 %v4271_v49 }
0x1b12   : > { %v4436_v63 = vpop.xlane.xlu2 %4435 }
0x1b13   : > { %v4437_v56 = vmul.f32 %v4436_v63, %v8175_v3 }
0x1b15   : > { %v9107_v32 = vsub.f32 %v4429_v57, %v4437_v56 }
0x1b17   : > { %v4439_v58 = vmul.f32 %v9107_v32, %v9107_v32 }
0x1b19   : > { %v4440_v16 = vsel %vm1056_vm1, %v4439_v58, 0.0  ;;  %v7190_v58 = vld [vmem:[%s7612_s25 + $0xb] ss:$0 sm:$0xff] }
0x1b1a   : > { %4441 = vadd.xlane.f32.xlu2 %v4440_v16  ;;  %v4270_v1 = vpop.xlane.xlu2 %4269 }
0x1b1b   : > { %v4274_v53 = vmul.f32 %v4270_v1, %v8175_v3 }
0x1b1d   : > { %v9113_v60 = vsub.f32 %v4262_v30, %v4274_v53 }
0x1b1f   : > { %v4278_v52 = vmul.f32 %v9113_v60, %v9113_v60 }
0x1b21   : > { %v4280_v54 = vsel %vm1056_vm1, %v4278_v52, 0.0  ;;  %v7192_v52 = vld [vmem:[%s9776_s2 + $0xb] ss:$0 sm:$0xff] }
0x1b22   : > { %4281 = vadd.xlane.f32.xlu0 %v4280_v54  ;;  %v4273_v17 = vpop.xlane.xlu2 %4272 }
0x1b23   : > { %v4275_v59 = vmul.f32 %v4273_v17, %v8175_v3 }
0x1b25   : > { %v9119_v2 = vsub.f32 %v4263_v10, %v4275_v59 }
0x1b27   : > { %v4279_v50 = vmul.f32 %v9119_v2, %v9119_v2 }
0x1b29   : > { %v4283_v34 = vsel %vm1056_vm1, %v4279_v50, 0.0 }
0x1b2a   : > { %4284 = vadd.xlane.f32.xlu2 %v4283_v34 }
0x1b36   : > { %4523 = vrot.lane.b32.xlu0 %v9148_v31, %s9780_s8 }
0x1b8d   : > { %v4442_v5 = vpop.xlane.xlu2 %4441 }
0x1b8e   : > { %v4443_v12 = vmul.f32 %v4442_v5, %v8175_v3 }
0x1b90   : > { %v4444_v7 = vadd.f32 1e-05, %v4443_v12 }
0x1b92   : > { %7337 = vrsqrt.f32 %v4444_v7  ;;  %vm4451_vm8 = vweird.f32 %v4444_v7 }
0x1b95   : > { %v4282_v42 = vpop.xlane.xlu0 %4281 }
0x1b96   : > { %v4286_v51 = vmul.f32 %v4282_v42, %v8175_v3 }
0x1b98   : > { %v7338_v0 = vpop.eup %7337  ;;  %v4288_v57 = vadd.f32 1e-05, %v4286_v51 }
0x1b99   : > { %v4446_v48 = vmul.f32 %v7338_v0, %v4444_v7  ;;  %vm4452_vm14 = vweird.f32 %v7338_v0 }
0x1b9a   : > { %7339 = vrsqrt.f32 %v4288_v57  ;;  %vm4453_vm0 = vmor %vm4451_vm8, %vm4452_vm14  ;;  %vm4296_vm15 = vweird.f32 %v4288_v57 }
0x1b9b   : > { %v4447_v47 = vmul.f32 %v7338_v0, %v4446_v48 }
0x1b9d   : > { %v4448_v30 = vmul.f32 0.5, %v4447_v47  ;;  %v4285_v39 = vpop.xlane.xlu2 %4284 }
0x1b9e   : > { %v4287_v44 = vmul.f32 %v4285_v39, %v8175_v3  ;;  %v6793_v39 = vld [vmem:[%s7572_s19 + $0x2f8] sm:$0xff] }
0x1b9f   : > { %v4449_v10 = vsub.f32 1.5, %v4448_v30 }
0x1ba0   : > { %v7340_v49 = vpop.eup %7339  ;;  %v4289_v22 = vadd.f32 1e-05, %v4287_v44 }
0x1ba1   : > { %v4450_v63 = vmul.f32 %v7338_v0, %v4449_v10  ;;  %v4291_v56 = vmul.f32 %v7340_v49, %v4288_v57  ;;  %vm4297_vm12 = vweird.f32 %v7340_v49  ;;  %v6792_v10 = vld [vmem:[%s7572_s19 + $0x2f0] sm:$0xff] }
0x1ba2   : > { %7341 = vrsqrt.f32 %v4289_v22  ;;  %vm4298_vm13 = vmor %vm4296_vm15, %vm4297_vm12  ;;  %vm4306_vm8 = vweird.f32 %v4289_v22 }
0x1ba3   : > { %v4454_v16 = vsel %vm4453_vm0, %v7338_v0, %v4450_v63  ;;  %v4292_v1 = vmul.f32 %v7340_v49, %v4291_v56  ;;  %v6790_v56 = vld [vmem:[%s7572_s19 + $0x2e0] sm:$0xff] }
0x1ba4   : > { %v4455_v53 = vmul.f32 %v4454_v16, %v9107_v32  ;;  %v6788_v16 = vld [vmem:[%s7572_s19 + $0x2d0] sm:$0xff] }
0x1ba5   : > { %v4293_v54 = vmul.f32 0.5, %v4292_v1  ;;  %v6787_v1 = vld [vmem:[%s7572_s19 + $0x2c8] sm:$0xff] }
0x1ba6   : > { %v4459_v17 = vmul.f32 %v7190_v58, %v4455_v53  ;;  %v6789_v58 = vld [vmem:[%s7572_s19 + $0x2d8] sm:$0xff]  ;;  %v6786_v53 = vld [vmem:[%s7572_s19 + $0x2c0] sm:$0xff] }
0x1ba7   : > { %v4294_v59 = vsub.f32 1.5, %v4293_v54 }
0x1ba8   : > { %v7342_v50 = vpop.eup %7341  ;;  %v9157_v34 = vadd.f32 %v7192_v52, %v4459_v17 }
0x1ba9   : > { %v4295_v55 = vmul.f32 %v7340_v49, %v4294_v59  ;;  %v4301_v29 = vmul.f32 %v7342_v50, %v4289_v22  ;;  %vm4307_vm14 = vweird.f32 %v7342_v50  ;;  %v6791_v22 = vld [vmem:[%s7572_s19 + $0x2e8] sm:$0xff] }
0x1baa   : > { %6760 = vmatmul.msk.f32.vlgmr.msrb.gmra.mxu1 %vm1056_vm1, %v9157_v34  ;;  %vm4308_vm0 = vmor %vm4306_vm8, %vm4307_vm14 }
0x1bab   : > { %v4299_v18 = vsel %vm4298_vm13, %v7340_v49, %v4295_v55  ;;  %v4302_v43 = vmul.f32 %v7342_v50, %v4301_v29 }
0x1bac   : > { %v4310_v32 = vmul.f32 %v4299_v18, %v9113_v60  ;;  %v4524_v60 = vpop.permute.xlu0 %4523 }
0x1bad   : > { %v4303_v35 = vmul.f32 0.5, %v4302_v43 }
0x1bae   : > { %v4315_v14 = vmul.f32 %v7191_v13, %v4310_v32 }
0x1baf   : > { %v4304_v33 = vsub.f32 1.5, %v4303_v35 }
0x1bb0   : > { %v9164_v15 = vadd.f32 %v7193_v41, %v4315_v14 }
0x1bb1   : > { %v4305_v5 = vmul.f32 %v7342_v50, %v4304_v33 }
0x1bb2   : > { %6750 = vmatmul.msk.f32.vlgmr.msrb.gmra.mxu2 %vm1056_vm1, %v9164_v15 }
0x1bb3   : > { %v4309_v12 = vsel %vm4308_vm0, %v7342_v50, %v4305_v5 }
0x1bb4   : > { %v4311_v37 = vmul.f32 %v4309_v12, %v9119_v2 }
0x1bb6   : > { %v4316_v7 = vmul.f32 %v7191_v13, %v4311_v37 }
0x1bb8   : > { %v9169_v42 = vadd.f32 %v7193_v41, %v4316_v7 }
0x1bba   : > { %6751 = vmatmul.msk.f32.gmra.mxu2 %vm1056_vm1, %v9169_v42 }
0x1c27   : > { %v4570_v51 = vpop.f32.mrf.mxu1 }
0x1c28   : > { %v9173_v0 = vadd.f32 %v4570_v51, %v4524_v60 }
0x1c2a   : > { %v4576_v57 = vmul.f32 %v7772_v23, %v9173_v0  ;;  %v4575_v2 = vmul.f32 %v7801_v27, %v9173_v0  ;;  %v4574_v48 = vmul.f32 %v7787_v25, %v9173_v0  ;;  %v4573_v30 = vmul.f32 %v7806_v28, %v9173_v0 }
0x1c2c   : > { %6761 = vmatpush.xpose.msk.msrb.mxu0 %vm1056_vm1, %v4576_v57 }
0x1c30   : > { %6762 = vmatpush.xpose.msk.msrb.mxu0 %vm1056_vm1, %v4575_v2 }
0x1c34   : > { %6763 = vmatpush.xpose.msk.msrb.mxu0 %vm1056_vm1, %v4574_v48 }
0x1c35   : > { %v4517_v47 = vpop.f32.mrf.mxu2 }
0x1c36   : > { %v4518_v44 = vadd.f32 %v9148_v31, %v4517_v47 }
0x1c38   : > { %6764 = vmatpush.xpose.msk.msrb.mxu0 %vm1056_vm1, %v4573_v30 }
0x1c3b   : > { %6765 = vmatmul.msk.f32.vlgmr.msrb.gmra.mxu0 %vm1056_vm1, %v4518_v44 }
0x1c3c   : > { %6800 = vmatpush.xpose.msk.msra.mxu0 %vm1056_vm1, %v6793_v39 }
0x1c3d   : > { %v4520_v49 = vpop.f32.mrf.mxu2 }
0x1c3e   : > { %v4521_v63 = vadd.f32 %v9148_v31, %v4520_v49 }
0x1c40   : > { %6801 = vmatpush.xpose.msk.msra.mxu0 %vm1056_vm1, %v6792_v10 }
0x1c43   : > { %6766 = vmatmul.msk.f32.gmra.mxu0 %vm1056_vm1, %v4521_v63 }
0x1c44   : > { %6802 = vmatpush.xpose.msk.msra.mxu0 %vm1056_vm1, %v6791_v22 }
0x1c48   : > { %6803 = vmatpush.xpose.msk.msra.mxu0 %vm1056_vm1, %v6790_v56 }
0x1c4c   : > { %6804 = vmatpush.xpose.msk.msra.mxu0 %vm1056_vm1, %v6789_v58 }
0x1c50   : > { %6805 = vmatpush.xpose.msk.msra.mxu0 %vm1056_vm1, %v6788_v16 }
0x1c54   : > { %6806 = vmatpush.xpose.msk.msra.mxu0 %vm1056_vm1, %v6787_v1 }
0x1c58   : > { %6807 = vmatpush.xpose.msk.msra.mxu0 %vm1056_vm1, %v6786_v53 }
0x1c5b   : > { %6808 = vmatmul.msk.f32.vlgmr.msra.gmra.mxu0 %vm1056_vm1, %v9164_v15 }
0x1c63   : > { %6809 = vmatmul.msk.f32.gmra.mxu0 %vm1056_vm1, %v9169_v42 }
0x1cb8   : > { %v4616_v31 = vpop.f32.mrf.mxu0 }
0x1cb9   : > { %v4617_v52 = vadd.f32 %v4616_v31, %v8120_v45 }
0x1cbb   : > { %v4630_v54 = vsel %vm7776_vm7, %v4617_v52, -1e+30  ;;  %v4622_v17 = vsel %vm1002_vm11, %v4617_v52, -1e+30  ;;  %v4646_v13 = vsel %vm7764_vm5, %v4617_v52, -1e+30 }
0x1cbc   : > { %v4632_v59 = vsel %vm1056_vm1, %v4630_v54, -inf  ;;  %v4624_v50 = vsel %vm1056_vm1, %v4622_v17, -inf  ;;  %v4638_v18 = vsel %vm7793_vm10, %v4617_v52, -1e+30  ;;  %v4648_v32 = vsel %vm1056_vm1, %v4646_v13, -inf }
0x1cbd   : > { %4633 = vmax.xlane.f32.xlu2 %v4632_v59  ;;  %4625 = vmax.xlane.f32.xlu1 %v4624_v50  ;;  %v4640_v41 = vsel %vm1056_vm1, %v4638_v18, -inf }
0x1cc0   : > { %v4619_v55 = vpop.f32.mrf.mxu0 }
0x1cc1   : > { %v4620_v29 = vadd.f32 %v4619_v55, %v8120_v45 }
0x1cc3   : > { %v4631_v43 = vsel %vm7776_vm7, %v4620_v29, -1e+30  ;;  %v4639_v45 = vsel %vm7793_vm10, %v4620_v29, -1e+30  ;;  %v4623_v14 = vsel %vm1002_vm11, %v4620_v29, -1e+30 }
0x1cc4   : > { %v4635_v35 = vsel %vm1056_vm1, %v4631_v43, -inf  ;;  %v4643_v33 = vsel %vm1056_vm1, %v4639_v45, -inf  ;;  %v4627_v24 = vsel %vm1056_vm1, %v4623_v14, -inf  ;;  %v4647_v5 = vsel %vm7764_vm5, %v4620_v29, -1e+30 }
0x1cc5   : > { %4649 = vmax.xlane.f32.xlu2 %v4648_v32  ;;  %4641 = vmax.xlane.f32.xlu1 %v4640_v41  ;;  %v4651_v12 = vsel %vm1056_vm1, %v4647_v5, -inf }
0x1cc6   : > { %4636 = vmax.xlane.f32.xlu0 %v4635_v35 }
0x1ccd   : > { %4644 = vmax.xlane.f32.xlu2 %v4643_v33  ;;  %4628 = vmax.xlane.f32.xlu1 %v4627_v24 }
0x1cd5   : > { %4652 = vmax.xlane.f32.xlu1 %v4651_v12 }
0x1d30   : > { %v4626_v37 = vpop.xlane.xlu1 %4625  ;;  %v4634_v7 = vpop.xlane.xlu2 %4633 }
0x1d31   : > { %v4654_v26 = vmul.f32 %v7806_v28, %v4626_v37  ;;  %v4658_v60 = vmul.f32 %v7787_v25, %v4634_v7 }
0x1d33   : > { %v4660_v2 = vadd.f32 %v4658_v60, %v4654_v26  ;;  %v9274_v26 = vld [vmem:[%s7577_s24 + $0x7] ss:$0 sm:$0xff]  ;;  %v4579_v60 = vmul.f32 %v9173_v0, %v7830_v40 }
0x1d38   : > { %v4642_v51 = vpop.xlane.xlu1 %4641  ;;  %v4650_v57 = vpop.xlane.xlu2 %4649 }
0x1d39   : > { %v4662_v48 = vmul.f32 %v7801_v27, %v4642_v51  ;;  %v4666_v30 = vmul.f32 %v7772_v23, %v4650_v57  ;;  %v4637_v44 = vpop.xlane.xlu0 %4636  ;;  %v4580_v51 = vmul.f32 %v9173_v0, %v7825_v36 }
0x1d3a   : > { %v4659_v63 = vmul.f32 %v7787_v25, %v4637_v44 }
0x1d3b   : > { %v4664_v47 = vadd.f32 %v4662_v48, %v4660_v2  ;;  %v7111_v57 = vpack.i.bf16 %v4579_v60, %v4580_v51  ;;  %v4577_v2 = vmul.f32 %v9173_v0, %v7844_v46  ;;  %v4578_v48 = vmul.f32 %v9173_v0, %v7828_v38 }
0x1d3d   : > { %v4668_v39 = vadd.f32 %v4666_v30, %v4664_v47  ;;  %v7116_v47 = vpack.i.bf16 %v4577_v2, %v4578_v48  ;;  %v6772_v30 = vld [vmem:[%s7582_s30 + $0xd8] sm:$0xff] }
0x1d3e   : > { %6774 = vmatpush.xpose.msk.msra.mxu2 %vm1056_vm1, %v6772_v30 }
0x1d3f   : > { %v4670_v21 = vsub.f32 %v4617_v52, %v4668_v39  ;;  %v6771_v39 = vld [vmem:[%s7582_s30 + $0xd0] sm:$0xff] }
0x1d40   : > { %v4629_v10 = vpop.xlane.xlu1 %4628  ;;  %v4645_v56 = vpop.xlane.xlu2 %4644 }
0x1d41   : > { %v4672_v49 = vmul.f32 1.442695, %v4670_v21  ;;  %v4655_v22 = vmul.f32 %v7806_v28, %v4629_v10  ;;  %v4663_v16 = vmul.f32 %v7801_v27, %v4645_v56  ;;  %v6770_v21 = vld [vmem:[%s7582_s30 + $0xc8] sm:$0xff]  ;;  %v6769_v10 = vld [vmem:[%s7582_s30 + $0xc0] sm:$0xff]  ;;  %v4984_v56 = vpop.f32.mrf.mxu0 }
0x1d42   : > { %6775 = vmatpush.xpose.msk.msra.mxu2 %vm1056_vm1, %v6771_v39 }
0x1d43   : > { %7343 = vpow2.f32 %v4672_v49  ;;  %v4661_v58 = vadd.f32 %v4659_v63, %v4655_v22 }
0x1d45   : > { %v4665_v31 = vadd.f32 %v4663_v16, %v4661_v58 }
0x1d46   : > { %6776 = vmatpush.xpose.msk.msra.mxu2 %vm1056_vm1, %v6770_v21 }
0x1d48   : > { %v4653_v1 = vpop.xlane.xlu1 %4652 }
0x1d49   : > { %v9244_v53 = vpop.eup %7343  ;;  %v4667_v54 = vmul.f32 %v7772_v23, %v4653_v1 }
0x1d4a   : > { %v4686_v52 = vmul.f32 %v9244_v53, %v7787_v25  ;;  %v4676_v17 = vmul.f32 %v9244_v53, %v7806_v28  ;;  %v4706_v43 = vmul.f32 %v9244_v53, %v7772_v23  ;;  %v4696_v32 = vmul.f32 %v9244_v53, %v7801_v27  ;;  %6777 = vmatpush.xpose.msk.msra.mxu2 %vm1056_vm1, %v6769_v10 }
0x1d4b   : > { %v4669_v59 = vadd.f32 %v4667_v54, %v4665_v31 }
0x1d4c   : > { %v4688_v50 = vsel %vm1056_vm1, %v4686_v52, 0.0  ;;  %v4678_v55 = vsel %vm1056_vm1, %v4676_v17, 0.0  ;;  %v4708_v41 = vsel %vm1056_vm1, %v4706_v43, 0.0  ;;  %v4698_v35 = vsel %vm1056_vm1, %v4696_v32, 0.0  ;;  %v4987_v17 = vpop.f32.mrf.mxu0 }
0x1d4d   : > { %v4671_v13 = vsub.f32 %v4620_v29, %v4669_v59  ;;  %4689 = vadd.xlane.f32.xlu1 %v4688_v50  ;;  %4679 = vadd.xlane.f32.xlu2 %v4678_v55 }
0x1d4f   : > { %v4674_v18 = vmul.f32 1.442695, %v4671_v13 }
0x1d51   : > { %7345 = vpow2.f32 %v4674_v18 }
0x1d55   : > { %4709 = vadd.xlane.f32.xlu1 %v4708_v41  ;;  %4699 = vadd.xlane.f32.xlu2 %v4698_v35 }
0x1d57   : > { %v9259_v45 = vpop.eup %7345 }
0x1d58   : > { %v4707_v29 = vmul.f32 %v9259_v45, %v7772_v23  ;;  %v4687_v14 = vmul.f32 %v9259_v45, %v7787_v25  ;;  %v4677_v33 = vmul.f32 %v9259_v45, %v7806_v28  ;;  %v4697_v37 = vmul.f32 %v9259_v45, %v7801_v27 }
0x1d5a   : > { %v4711_v24 = vsel %vm1056_vm1, %v4707_v29, 0.0  ;;  %v4691_v5 = vsel %vm1056_vm1, %v4687_v14, 0.0  ;;  %v4681_v12 = vsel %vm1056_vm1, %v4677_v33, 0.0  ;;  %v4701_v7 = vsel %vm1056_vm1, %v4697_v37, 0.0 }
0x1d5b   : > { %4712 = vadd.xlane.f32.xlu0 %v4711_v24 }
0x1d5d   : > { %4692 = vadd.xlane.f32.xlu1 %v4691_v5  ;;  %4682 = vadd.xlane.f32.xlu2 %v4681_v12 }
0x1d65   : > { %4702 = vadd.xlane.f32.xlu2 %v4701_v7 }
0x1d6f   : > { %4940 = vrot.lane.b32.xlu0 %v9274_v26, %s9780_s8 }
0x1d76   : > { %7112 = vrot.lane.b32.xlu1 %v7111_v57, %s9780_s8 }
0x1d7d   : > { %7117 = vrot.lane.b32.xlu2 %v7116_v47, %s9780_s8 }
0x1dc0   : > { %v4680_v44 = vpop.xlane.xlu2 %4679  ;;  %v4690_v49 = vpop.xlane.xlu1 %4689 }
0x1dc1   : > { %7347 = vrcp.f32 %v4690_v49 }
0x1dc2   : > { %7349 = vrcp.f32 %v4680_v44 }
0x1dc7   : > { %v7348_v16 = vpop.eup %7347 }
0x1dc8   : > { %v4700_v22 = vpop.xlane.xlu2 %4699  ;;  %v4710_v63 = vpop.xlane.xlu1 %4709  ;;  %v4720_v59 = vmul.f32 %v7348_v16, %v7787_v25 }
0x1dc9   : > { %7351 = vrcp.f32 %v4700_v22  ;;  %v7350_v31 = vpop.eup %7349 }
0x1dca   : > { %7353 = vrcp.f32 %v4710_v63  ;;  %v4716_v50 = vmul.f32 %v7350_v31, %v7806_v28 }
0x1dcc   : > { %v4722_v35 = vadd.f32 %v4720_v59, %v4716_v50 }
0x1dce   : > { %v4713_v58 = vpop.xlane.xlu0 %4712 }
0x1dcf   : > { %v7352_v54 = vpop.eup %7351 }
0x1dd0   : > { %v4683_v0 = vpop.xlane.xlu2 %4682  ;;  %v4693_v1 = vpop.xlane.xlu1 %4692  ;;  %v4724_v43 = vmul.f32 %v7352_v54, %v7801_v27 }
0x1dd1   : > { %7355 = vrcp.f32 %v4693_v1  ;;  %v7354_v41 = vpop.eup %7353 }
0x1dd2   : > { %7357 = vrcp.f32 %v4683_v0  ;;  %v4726_v12 = vadd.f32 %v4724_v43, %v4722_v35  ;;  %v4728_v39 = vmul.f32 %v7354_v41, %v7772_v23  ;;  %v6783_v43 = vld [vmem:[%s7572_s19 + $0x2a8] sm:$0xff]  ;;  %v6782_v41 = vld [vmem:[%s7572_s19 + $0x2a0] sm:$0xff] }
0x1dd4   : > { %v4730_v22 = vadd.f32 %v4728_v39, %v4726_v12 }
0x1dd6   : > { %v4732_v31 = vmul.f32 %v9244_v53, %v4730_v22  ;;  %v6784_v53 = vld [vmem:[%s7572_s19 + $0x2b0] sm:$0xff] }
0x1dd7   : > { %v7356_v29 = vpop.eup %7355 }
0x1dd8   : > { %v4703_v52 = vpop.xlane.xlu2 %4702  ;;  %v7358_v5 = vpop.eup %7357  ;;  %v4721_v21 = vmul.f32 %v7356_v29, %v7787_v25 }
0x1dd9   : > { %7359 = vrcp.f32 %v4703_v52  ;;  %v4717_v44 = vmul.f32 %v7358_v5, %v7806_v28  ;;  %v6785_v52 = vld [vmem:[%s7572_s19 + $0x2b8] sm:$0xff] }
0x1dda   : > { %7361 = vrcp.f32 %v4713_v58 }
0x1ddb   : > { %v4723_v58 = vadd.f32 %v4721_v21, %v4717_v44 }
0x1ddf   : > { %v7360_v48 = vpop.eup %7359 }
0x1de0   : > { %v7118_v10 = vpop.permute.xlu2 %7117  ;;  %v4725_v63 = vmul.f32 %v7360_v48, %v7801_v27  ;;  %v7362_v16 = vpop.eup %7361 }
0x1de1   : > { %v4941_v55 = vpop.permute.xlu0 %4940  ;;  %v7120_v1 = vunpack.i.h.bf16 %v7118_v10  ;;  %v4729_v59 = vmul.f32 %v7362_v16, %v7772_v23 }
0x1de2   : > { %v9298_v13 = vadd.f32 %v4984_v56, %v4941_v55  ;;  %v9300_v18 = vadd.f32 %v4987_v17, %v4941_v55  ;;  %v7119_v56 = vunpack.i.l.bf16 %v7118_v10  ;;  %v4727_v17 = vadd.f32 %v4725_v63, %v4723_v58 }
0x1de4   : > { %v4997_v32 = vmul.f32 %v7772_v23, %v9300_v18  ;;  %v9308_v14 = vmul.f32 %v9298_v13, %v7830_v40  ;;  %v9312_v33 = vmul.f32 %v9300_v18, %v7830_v40  ;;  %v9316_v24 = vmul.f32 %v9298_v13, %v7844_v46 }
0x1de5   : > { %v9320_v37 = vmul.f32 %v9300_v18, %v7844_v46  ;;  %v9324_v7 = vmul.f32 %v9298_v13, %v7825_v36  ;;  %v9328_v60 = vmul.f32 %v9300_v18, %v7825_v36  ;;  %v4996_v51 = vmul.f32 %v7772_v23, %v9298_v13 }
0x1de6   : > { %6810 = vmatpush.xpose.msk.msrb.mxu2 %vm1056_vm1, %v4997_v32  ;;  %v7126_v57 = vpack.i.bf16 %v9308_v14, %v9312_v33  ;;  %v9336_v2 = vmul.f32 %v9298_v13, %v7828_v38  ;;  %v9340_v46 = vmul.f32 %v9300_v18, %v7828_v38  ;;  %v4995_v0 = vmul.f32 %v7801_v27, %v9300_v18 }
0x1de7   : > { %v7136_v36 = vpack.i.bf16 %v9316_v24, %v9320_v37  ;;  %v7121_v30 = vpack.i.bf16 %v9324_v7, %v9328_v60  ;;  %v4994_v54 = vmul.f32 %v7801_v27, %v9298_v13  ;;  %v4993_v50 = vmul.f32 %v7787_v25, %v9300_v18 }
0x1de8   : > { %v7113_v40 = vpop.permute.xlu1 %7112  ;;  %v7131_v38 = vpack.i.bf16 %v9336_v2, %v9340_v46  ;;  %v4731_v55 = vadd.f32 %v4729_v59, %v4727_v17  ;;  %v4992_v23 = vmul.f32 %v7787_v25, %v9298_v13  ;;  %v4991_v32 = vmul.f32 %v7806_v28, %v9300_v18 }
0x1de9   : > { %v7114_v47 = vunpack.i.l.bf16 %v7113_v40  ;;  %v7115_v49 = vunpack.i.h.bf16 %v7113_v40 }
0x1dea   : > { %6811 = vmatpush.xpose.msk.msrb.mxu2 %vm1056_vm1, %v4996_v51  ;;  %v4733_v27 = vmul.f32 %v9259_v45, %v4731_v55  ;;  %v4990_v45 = vmul.f32 %v7806_v28, %v9298_v13 }
0x1deb   : > { %4768 = vmatpush.msrb.mxu3 %v7114_v47 }
0x1ded   : > { %4769 = vmatpush.msrb.mxu3 %v7115_v49 }
0x1dee   : > { %6812 = vmatpush.xpose.msk.msrb.mxu2 %vm1056_vm1, %v4995_v0 }
0x1def   : > { %4770 = vmatpush.msrb.mxu3 %v7119_v56 }
0x1df1   : > { %4771 = vmatpush.msrb.mxu3 %v7120_v1 }
0x1df2   : > { %6767 = vmatmul.msk.f32.vlgmr.msrb.gmra.mxu3 %vm1056_vm1, %v4732_v31  ;;  %6813 = vmatpush.xpose.msk.msrb.mxu2 %vm1056_vm1, %v4994_v54 }
0x1df3   : > { %6795 = vmatpush.xpose.msk.msra.mxu3 %vm1056_vm1, %v6785_v52 }
0x1df6   : > { %6814 = vmatpush.xpose.msk.msrb.mxu2 %vm1056_vm1, %v4993_v50  ;;  %v7196_v50 = vld [vmem:[%s9754_s6 + $0x6] ss:$0 sm:$0xff] }
0x1df7   : > { %6796 = vmatpush.xpose.msk.msra.mxu3 %vm1056_vm1, %v6784_v53 }
0x1dfa   : > { %6768 = vmatmul.msk.f32.gmra.mxu3 %vm1056_vm1, %v4733_v27  ;;  %6815 = vmatpush.xpose.msk.msrb.mxu2 %vm1056_vm1, %v4992_v23 }
0x1dfb   : > { %6797 = vmatpush.xpose.msk.msra.mxu3 %vm1056_vm1, %v6783_v43 }
0x1dfe   : > { %6816 = vmatpush.xpose.msk.msrb.mxu2 %vm1056_vm1, %v4991_v32 }
0x1dff   : > { %6798 = vmatpush.xpose.msk.msra.mxu3 %vm1056_vm1, %v6782_v41 }
0x1e02   : > { %6799 = vmatmul.msk.f32.vlgmr.msra.gmra.mxu3 %vm1056_vm1, %v9157_v34  ;;  %6817 = vmatpush.xpose.msk.msrb.mxu2 %vm1056_vm1, %v4990_v45 }
0x1e75   : > { %v4773_v25 = vpop.f32.mrf.mxu3 }
0x1e76   : > { %6778 = vmatmul.msk.f32.vlgmr.msra.gmra.mxu2 %vm1056_vm1, %v4773_v25 }
0x1e7d   : > { %v4776_v35 = vpop.f32.mrf.mxu3 }
0x1e7e   : > { %6779 = vmatmul.msk.f32.gmra.mxu2 %vm1056_vm1, %v4776_v35 }
0x1e85   : > { %v4937_v18 = vpop.f32.mrf.mxu3 }
0x1e86   : > { %v4938_v29 = vadd.f32 %v9274_v26, %v4937_v18 }
0x1e88   : > { %6818 = vmatmul.msk.f32.vlgmr.msrb.gmra.mxu2 %vm1056_vm1, %v4938_v29 }
0x1ef9   : > { %v4824_v5 = vpop.f32.mrf.mxu2 }
0x1efa   : > { %v4825_v55 = vadd.f32 %v7196_v50, %v4824_v5 }
0x1efc   : > { %v4830_v23 = vadd.f32 %v4825_v55, %v9164_v15 }
0x1efe   : > { %v4836_v37 = vsel %vm1056_vm1, %v4830_v23, 0.0 }
0x1f01   : > { %v4827_v12 = vpop.f32.mrf.mxu2 }
0x1f02   : > { %v4828_v53 = vadd.f32 %v7196_v50, %v4827_v12 }
0x1f04   : > { %v4831_v27 = vadd.f32 %v4828_v53, %v9169_v42 }
0x1f06   : > { %v4839_v24 = vsel %vm1056_vm1, %v4831_v27, 0.0 }
0x1f0b   : > { %v5050_v40 = vpop.f32.mrf.mxu2 }
0x1f0c   : > { %v5051_v28 = vadd.f32 %v5050_v40, %v7888_v8 }
0x1f0e   : > { %v5061_v13 = vsel %vm7890_vm2, %v5051_v28, -1e+30  ;;  %v5057_v51 = vsel %vm7898_vm4, %v5051_v28, -1e+30  ;;  %v5053_v48 = vsel %vm1007_vm6, %v5051_v28, -1e+30 }
0x1f0f   : > { %v5062_v47 = vsel %vm1370_vm9, %v5061_v13, -inf  ;;  %v5058_v26 = vsel %vm1370_vm9, %v5057_v51, -inf  ;;  %v5054_v39 = vsel %vm1370_vm9, %v5053_v48, -inf  ;;  %v5065_v8 = vsel %vm7919_vm3, %v5051_v28, -1e+30 }
0x1f10   : > { %5063 = vmax.xlane.f32.xlu0 %v5062_v47  ;;  %5059 = vmax.xlane.f32.xlu2 %v5058_v26  ;;  %v5066_v9 = vsel %vm1370_vm9, %v5065_v8, -inf  ;;  %v6820_v8 = vld [vmem:[%s7582_s30 + $0xe0] sm:$0xff] }
0x1f11   : > { %5055 = vmax.xlane.f32.xlu1 %v5054_v39  ;;  %v6821_v39 = vld [vmem:[%s7582_s30 + $0xe8] sm:$0xff] }
0x1f19   : > { %5067 = vmax.xlane.f32.xlu1 %v5066_v9 }
0x1f24   : > { %7127 = vrot.lane.b32.xlu0 %v7126_v57, %s9780_s8 }
0x1f83   : > { %v5060_v20 = vpop.xlane.xlu2 %5059  ;;  %v5064_v10 = vpop.xlane.xlu0 %5063 }
0x1f84   : > { %v5056_v11 = vpop.xlane.xlu1 %5055  ;;  %v5071_v21 = vmul.f32 %v7960_v61, %v5060_v20  ;;  %v5073_v22 = vmul.f32 %v7972_v4, %v5064_v10 }
0x1f85   : > { %v5069_v44 = vmul.f32 %v7965_v62, %v5056_v11 }
0x1f87   : > { %v5072_v49 = vadd.f32 %v5071_v21, %v5069_v44 }
0x1f89   : > { %v5074_v63 = vadd.f32 %v5073_v22, %v5072_v49 }
0x1f8c   : > { %v5068_v19 = vpop.xlane.xlu1 %5067 }
0x1f8d   : > { %v5075_v0 = vmul.f32 %v7977_v6, %v5068_v19 }
0x1f8f   : > { %v5076_v56 = vadd.f32 %v5075_v0, %v5074_v63  ;;  %v6839_v0 = vld [vmem:[%s9753_s12 + $0x1b8] sm:$0xff] }
0x1f91   : > { %v5077_v58 = vsub.f32 %v5051_v28, %v5076_v56  ;;  %v6838_v56 = vld [vmem:[%s9753_s12 + $0x1b0] sm:$0xff] }
0x1f93   : > { %v5078_v16 = vmul.f32 1.442695, %v5077_v58  ;;  %v6837_v58 = vld [vmem:[%s9753_s12 + $0x1a8] sm:$0xff] }
0x1f95   : > { %7363 = vpow2.f32 %v5078_v16 }
0x1f96   : > { %v7128_v43 = vpop.permute.xlu0 %7127 }
0x1f97   : > { %v7129_v46 = vunpack.i.l.bf16 %v7128_v43 }
0x1f9b   : > { %v9411_v14 = vpop.eup %7363 }
0x1f9c   : > { %v5090_v33 = vmul.f32 %v9411_v14, %v7972_v4  ;;  %v5085_v57 = vmul.f32 %v9411_v14, %v7960_v61  ;;  %v5080_v1 = vmul.f32 %v9411_v14, %v7965_v62  ;;  %v5095_v17 = vmul.f32 %v9411_v14, %v7977_v6 }
0x1f9e   : > { %v5091_v31 = vsel %vm1370_vm9, %v5090_v33, 0.0  ;;  %v5086_v54 = vsel %vm1370_vm9, %v5085_v57, 0.0  ;;  %v5081_v52 = vsel %vm1370_vm9, %v5080_v1, 0.0  ;;  %v5096_v59 = vsel %vm1370_vm9, %v5095_v17, 0.0  ;;  %v6835_v33 = vld [vmem:[%s9753_s12 + $0x198] sm:$0xff]  ;;  %v6834_v57 = vld [vmem:[%s9753_s12 + $0x190] sm:$0xff] }
0x1f9f   : > { %5092 = vadd.xlane.f32.xlu0 %v5091_v31  ;;  %5087 = vadd.xlane.f32.xlu1 %v5086_v54  ;;  %v6833_v1 = vld [vmem:[%s9753_s12 + $0x188] sm:$0xff]  ;;  %v6832_v31 = vld [vmem:[%s9753_s12 + $0x180] sm:$0xff] }
0x1fa0   : > { %5082 = vadd.xlane.f32.xlu2 %v5081_v52 }
0x1fa7   : > { %5097 = vadd.xlane.f32.xlu1 %v5096_v59 }
0x1fb3   : > { %7137 = vrot.lane.b32.xlu0 %v7136_v36, %s9780_s8 }
0x1fb8   : > { %7122 = vrot.lane.b32.xlu2 %v7121_v30, %s9780_s8 }
0x1fc0   : > { %7132 = vrot.lane.b32.xlu1 %v7131_v38, %s9780_s8  ;;  %v7130_v38 = vunpack.i.h.bf16 %v7128_v43 }
0x1fdd   : > { %4840 = vadd.xlane.f32.xlu0 %v4839_v24 }
0x1fe1   : > { %4837 = vadd.xlane.f32.xlu2 %v4836_v37 }
0x2012   : > { %v5088_v36 = vpop.xlane.xlu1 %5087  ;;  %v5093_v15 = vpop.xlane.xlu0 %5092 }
0x2013   : > { %v5083_v7 = vpop.xlane.xlu2 %5082  ;;  %7365 = vrcp.f32 %v5088_v36 }
0x2014   : > { %7367 = vrcp.f32 %v5083_v7 }
0x2015   : > { %7369 = vrcp.f32 %v5093_v15  ;;  %v7197_v15 = vld [vmem:[%s7612_s25 + $0xc] ss:$0 sm:$0xff] }
0x2019   : > { %v7366_v32 = vpop.eup %7365 }
0x201a   : > { %v5098_v42 = vpop.xlane.xlu1 %5097  ;;  %v7368_v41 = vpop.eup %7367  ;;  %v5102_v45 = vmul.f32 %v7366_v32, %v7960_v61 }
0x201b   : > { %v7123_v60 = vpop.permute.xlu2 %7122  ;;  %7371 = vrcp.f32 %v5098_v42  ;;  %v5100_v25 = vmul.f32 %v7368_v41, %v7965_v62  ;;  %v7370_v35 = vpop.eup %7369 }
0x201c   : > { %v7124_v30 = vunpack.i.l.bf16 %v7123_v60  ;;  %v7125_v2 = vunpack.i.h.bf16 %v7123_v60  ;;  %v5104_v5 = vmul.f32 %v7370_v35, %v7972_v4  ;;  %v6823_v4 = vld [vmem:[%s7582_s30 + $0xf8] sm:$0xff] }
0x201d   : > { %v5103_v29 = vadd.f32 %v5102_v45, %v5100_v25  ;;  %6825 = vmatpush.xpose.msk.msrb.mxu3 %vm1056_vm1, %v6823_v4  ;;  %v7198_v45 = vld [vmem:[%s9776_s2 + $0xc] ss:$0 sm:$0xff] }
0x201e   : > { %5152 = vmatpush.msra.mxu1 %v7124_v30 }
0x201f   : > { %v5105_v13 = vadd.f32 %v5104_v5, %v5103_v29  ;;  %v6854_v5 = vld [vmem:[%s9777_s18 + $0xd8] sm:$0xff] }
0x2020   : > { %5153 = vmatpush.msra.mxu1 %v7125_v2 }
0x2021   : > { %v7372_v18 = vpop.eup %7371 }
0x2022   : > { %5154 = vmatpush.msra.mxu1 %v7129_v46  ;;  %v5106_v12 = vmul.f32 %v7372_v18, %v7977_v6  ;;  %v6822_v6 = vld [vmem:[%s7582_s30 + $0xf0] sm:$0xff] }
0x2023   : > { %6826 = vmatpush.xpose.msk.msrb.mxu3 %vm1056_vm1, %v6822_v6 }
0x2024   : > { %5155 = vmatpush.msra.mxu1 %v7130_v38  ;;  %v5107_v61 = vadd.f32 %v5106_v12, %v5105_v13  ;;  %v6853_v12 = vld [vmem:[%s9777_s18 + $0xd0] sm:$0xff] }
0x2025   : > { %v7138_v51 = vpop.permute.xlu0 %7137 }
0x2026   : > { %v7139_v47 = vunpack.i.l.bf16 %v7138_v51  ;;  %v7140_v62 = vunpack.i.h.bf16 %v7138_v51  ;;  %v5108_v26 = vmul.f32 %v9411_v14, %v5107_v61  ;;  %v6836_v14 = vld [vmem:[%s9753_s12 + $0x1a0] sm:$0xff] }
0x2027   : > { %6827 = vmatpush.xpose.msk.msrb.mxu3 %vm1056_vm1, %v6821_v39 }
0x202b   : > { %6828 = vmatpush.xpose.msk.msrb.mxu3 %vm1056_vm1, %v6820_v8 }
0x202f   : > { %6856 = vmatpush.xpose.msk.msra.mxu3 %vm1370_vm9, %v6854_v5 }
0x2032   : > { %v7133_v40 = vpop.permute.xlu1 %7132 }
0x2033   : > { %v7134_v28 = vunpack.i.l.bf16 %v7133_v40  ;;  %v7135_v48 = vunpack.i.h.bf16 %v7133_v40  ;;  %6857 = vmatpush.xpose.msk.msra.mxu3 %vm1370_vm9, %v6853_v12  ;;  %v6852_v40 = vld [vmem:[%s9777_s18 + $0xc8] sm:$0xff] }
0x2035   : > { %5156 = vmatpush.msra.mxu1 %v7134_v28  ;;  %v7199_v28 = vld [vmem:[%s9754_s6 + $0x7] ss:$0 sm:$0xff]  ;;  %s9783_s6 = sld [smem:[#allocation20_spill]] }
0x2037   : > { %5157 = vmatpush.msra.mxu1 %v7135_v48  ;;  %6858 = vmatpush.xpose.msk.msra.mxu3 %vm1370_vm9, %v6852_v40 }
0x2039   : > { %5158 = vmatpush.msra.mxu1 %v7139_v47  ;;  %v6851_v47 = vld [vmem:[%s9777_s18 + $0xc0] sm:$0xff] }
0x203b   : > { %5159 = vmatpush.msra.mxu1 %v7140_v62  ;;  %6859 = vmatpush.xpose.msk.msra.mxu3 %vm1370_vm9, %v6851_v47  ;;  %v7200_v62 = vld [vmem:[%s9778_s3 + $0x6] ss:$0 sm:$0xff] }
0x203c   : > { %6819 = vmatmul.msk.f32.vlgmr.msra.gmra.mxu1 %vm1370_vm9, %v5108_v26 }
0x203d   : > { %6841 = vmatpush.xpose.msk.msrb.mxu1 %vm1056_vm1, %v6839_v0 }
0x2041   : > { %6842 = vmatpush.xpose.msk.msrb.mxu1 %vm1056_vm1, %v6838_v56 }
0x2045   : > { %6843 = vmatpush.xpose.msk.msrb.mxu1 %vm1056_vm1, %v6837_v58 }
0x2049   : > { %6844 = vmatpush.xpose.msk.msrb.mxu1 %vm1056_vm1, %v6836_v14 }
0x204d   : > { %6845 = vmatpush.xpose.msk.msrb.mxu1 %vm1056_vm1, %v6835_v33  ;;  %v6870_v33 = vld [vmem:[%s9753_s12 + $0x1f0] sm:$0xff] }
0x2050   : > { %v4841_v9 = vpop.xlane.xlu0 %4840 }
0x2051   : > { %v4843_v20 = vmul.f32 %v4841_v9, %v8175_v3  ;;  %6846 = vmatpush.xpose.msk.msrb.mxu1 %vm1056_vm1, %v6834_v57  ;;  %v6869_v57 = vld [vmem:[%s9753_s12 + $0x1e8] sm:$0xff] }
0x2053   : > { %v4845_v11 = vsub.f32 %v4831_v27, %v4843_v20 }
0x2054   : > { %v4838_v21 = vpop.xlane.xlu2 %4837 }
0x2055   : > { %v4842_v44 = vmul.f32 %v4838_v21, %v8175_v3  ;;  %v4847_v10 = vmul.f32 %v4845_v11, %v4845_v11  ;;  %6847 = vmatpush.xpose.msk.msrb.mxu1 %vm1056_vm1, %v6833_v1  ;;  %v6868_v1 = vld [vmem:[%s9753_s12 + $0x1e0] sm:$0xff] }
0x2057   : > { %v4844_v49 = vsub.f32 %v4830_v23, %v4842_v44  ;;  %v4851_v22 = vsel %vm1056_vm1, %v4847_v10, 0.0  ;;  %v6871_v10 = vld [vmem:[%s9753_s12 + $0x1f8] sm:$0xff] }
0x2058   : > { %4852 = vadd.xlane.f32.xlu2 %v4851_v22  ;;  %6873 = vmatpush.xpose.msk.msrb.mxu0 %vm1056_vm1, %v6871_v10 }
0x2059   : > { %v4846_v19 = vmul.f32 %v4844_v49, %v4844_v49  ;;  %6848 = vmatpush.xpose.msk.msrb.mxu1 %vm1056_vm1, %v6832_v31  ;;  %v6867_v31 = vld [vmem:[%s9753_s12 + $0x1d8] sm:$0xff] }
0x205b   : > { %v4848_v63 = vsel %vm1056_vm1, %v4846_v19, 0.0 }
0x205c   : > { %4849 = vadd.xlane.f32.xlu1 %v4848_v63  ;;  %6874 = vmatpush.xpose.msk.msrb.mxu0 %vm1056_vm1, %v6870_v33 }
0x2060   : > { %6875 = vmatpush.xpose.msk.msrb.mxu0 %vm1056_vm1, %v6869_v57 }
0x2064   : > { %6876 = vmatpush.xpose.msk.msrb.mxu0 %vm1056_vm1, %v6868_v1 }
0x2068   : > { %6877 = vmatpush.xpose.msk.msrb.mxu0 %vm1056_vm1, %v6867_v31 }
0x20b9   : > { %v5161_v16 = vpop.f32.mrf.mxu1 }
0x20ba   : > { %6829 = vmatmul.msk.f32.vlgmr.msrb.gmra.mxu3 %vm1056_vm1, %v5161_v16 }
0x20cb   : > { %v4853_v54 = vpop.xlane.xlu2 %4852 }
0x20cc   : > { %v4855_v52 = vmul.f32 %v4853_v54, %v8175_v3  ;;  %v6866_v54 = vld [vmem:[%s9753_s12 + $0x1d0] sm:$0xff] }
0x20cd   : > { %6878 = vmatpush.xpose.msk.msrb.mxu0 %vm1056_vm1, %v6866_v54 }
0x20ce   : > { %v4857_v17 = vadd.f32 1e-05, %v4855_v52  ;;  %v6865_v52 = vld [vmem:[%s9753_s12 + $0x1c8] sm:$0xff] }
0x20cf   : > { %v4850_v59 = vpop.xlane.xlu1 %4849 }
0x20d0   : > { %7373 = vrsqrt.f32 %v4857_v17  ;;  %v4854_v50 = vmul.f32 %v4850_v59, %v8175_v3  ;;  %vm4874_vm11 = vweird.f32 %v4857_v17 }
0x20d1   : > { %6879 = vmatpush.xpose.msk.msrb.mxu0 %vm1056_vm1, %v6865_v52 }
0x20d2   : > { %v4856_v53 = vadd.f32 1e-05, %v4854_v50 }
0x20d4   : > { %7375 = vrsqrt.f32 %v4856_v53  ;;  %vm4864_vm7 = vweird.f32 %v4856_v53 }
0x20d6   : > { %v7374_v55 = vpop.eup %7373 }
0x20d7   : > { %v4869_v27 = vmul.f32 %v7374_v55, %v4857_v17  ;;  %vm4875_vm6 = vweird.f32 %v7374_v55  ;;  %v6864_v17 = vld [vmem:[%s9753_s12 + $0x1c0] sm:$0xff]  ;;  %s6081_s12 = scalar_lea.sflag [#allocation4], %s9792_s9 }
0x20d8   : > { %vm4876_vm2 = vmor %vm4874_vm11, %vm4875_vm6  ;;  %6880 = vmatpush.xpose.msk.msrb.mxu0 %vm1056_vm1, %v6864_v17 }
0x20d9   : > { %v4870_v23 = vmul.f32 %v7374_v55, %v4869_v27 }
0x20da   : > { %v7376_v24 = vpop.eup %7375 }
0x20db   : > { %v4871_v37 = vmul.f32 0.5, %v4870_v23  ;;  %v4859_v7 = vmul.f32 %v7376_v24, %v4856_v53  ;;  %vm4865_vm5 = vweird.f32 %v7376_v24 }
0x20dc   : > { %vm4866_vm10 = vmor %vm4864_vm7, %vm4865_vm5 }
0x20dd   : > { %v4860_v60 = vmul.f32 %v7376_v24, %v4859_v7  ;;  %v4872_v36 = vsub.f32 1.5, %v4871_v37 }
0x20df   : > { %v4861_v30 = vmul.f32 0.5, %v4860_v60  ;;  %v4873_v2 = vmul.f32 %v7374_v55, %v4872_v36  ;;  %v7202_v60 = vld [vmem:[%s7612_s25 + $0xd] ss:$0 sm:$0xff] }
0x20e1   : > { %v4862_v43 = vsub.f32 1.5, %v4861_v30  ;;  %v4877_v32 = vsel %vm4876_vm2, %v7374_v55, %v4873_v2 }
0x20e2   : > { %v4879_v35 = vmul.f32 %v4877_v32, %v4845_v11 }
0x20e3   : > { %v4863_v46 = vmul.f32 %v7376_v24, %v4862_v43  ;;  %v7203_v43 = vld [vmem:[%s9776_s2 + $0xd] ss:$0 sm:$0xff] }
0x20e4   : > { %v4884_v18 = vmul.f32 %v7197_v15, %v4879_v35 }
0x20e5   : > { %v4867_v38 = vsel %vm4866_vm10, %v7376_v24, %v4863_v46 }
0x20e6   : > { %v4878_v42 = vmul.f32 %v4867_v38, %v4844_v49  ;;  %v4889_v29 = vadd.f32 %v7198_v45, %v4884_v18  ;;  %v7201_v49 = vld [vmem:[%s9779_s21 + $0x6] ss:$0 sm:$0xff]  ;;  %v6885_v38 = vld [vmem:[%s9777_s18 + $0xf8] sm:$0xff] }
0x20e7   : > { %6887 = vmatpush.xpose.msk.msra.mxu2 %vm1370_vm9, %v6885_v38  ;;  %v5653_v38 = vld [vmem:[%s9781_s5 + $0x38] sm:$0xff] }
0x20e8   : > { %v4883_v41 = vmul.f32 %v7197_v15, %v4878_v42  ;;  %v6884_v15 = vld [vmem:[%s9777_s18 + $0xf0] sm:$0xff]  ;;  %v6883_v42 = vld [vmem:[%s9777_s18 + $0xe8] sm:$0xff]  ;;  %6894 = vmatpush.xpose.msk.msrb.mxu3 %vm1056_vm1, %v5653_v38 }
0x20ea   : > { %v4888_v25 = vadd.f32 %v7198_v45, %v4883_v41 }
0x20eb   : > { %6888 = vmatpush.xpose.msk.msra.mxu2 %vm1370_vm9, %v6884_v15 }
0x20ec   : > { %6849 = vmatmul.msk.f32.vlgmr.msrb.gmra.mxu1 %vm1056_vm1, %v4888_v25 }
0x20ef   : > { %6889 = vmatpush.xpose.msk.msra.mxu2 %vm1370_vm9, %v6883_v42 }
0x20f4   : > { %6850 = vmatmul.msk.f32.gmra.mxu1 %vm1056_vm1, %v4889_v29 }
0x213d   : > { %v5206_v13 = vpop.f32.mrf.mxu3 }
0x213e   : > { %v5207_v51 = vadd.f32 %v7199_v28, %v5206_v13  ;;  %v6882_v28 = vld [vmem:[%s9777_s18 + $0xe0] sm:$0xff] }
0x213f   : > { %6890 = vmatpush.xpose.msk.msra.mxu2 %vm1370_vm9, %v6882_v28  ;;  %v7204_v13 = vld [vmem:[%s9778_s3 + $0x7] ss:$0 sm:$0xff]  ;;  %s9782_s3 = sld [smem:[#allocation19_spill]] }
0x2140   : > { %v5209_v48 = vadd.f32 %v5207_v51, %v9157_v34 }
0x2142   : > { %v5214_v61 = vsel %vm1056_vm1, %v5209_v48, 0.0 }
0x2143   : > { %5215 = vadd.xlane.f32.xlu2 %v5214_v61 }
0x2169   : > { %v5305_v26 = vpop.f32.mrf.mxu1 }
0x216a   : > { %v5306_v4 = vadd.f32 %v7200_v62, %v5305_v26 }
0x216c   : > { %v5311_v6 = vmax.f32 %v5306_v4, 0.0 }
0x216e   : > { %6860 = vmatmul.msk.f32.vlgmr.msra.gmra.mxu3 %vm1370_vm9, %v5311_v6 }
0x2171   : > { %v5308_v39 = vpop.f32.mrf.mxu1 }
0x2172   : > { %v5309_v8 = vadd.f32 %v7200_v62, %v5308_v39 }
0x2174   : > { %v5312_v9 = vmax.f32 %v5309_v8, 0.0 }
0x2176   : > { %6861 = vmatmul.msk.f32.gmra.mxu3 %vm1370_vm9, %v5312_v9 }
0x21b6   : > { %v5216_v34 = vpop.xlane.xlu2 %5215 }
0x21b7   : > { %v5217_v20 = vmul.f32 %v5216_v34, %v8175_v3 }
0x21b9   : > { %v5218_v11 = vsub.f32 %v5209_v48, %v5217_v20 }
0x21bb   : > { %v5219_v21 = vmul.f32 %v5218_v11, %v5218_v11 }
0x21bd   : > { %v5220_v44 = vsel %vm1056_vm1, %v5219_v21, 0.0 }
0x21be   : > { %5221 = vadd.xlane.f32.xlu0 %v5220_v44 }
0x21f1   : > { %v5358_v22 = vpop.f32.mrf.mxu3 }
0x21f2   : > { %v5359_v19 = vadd.f32 %v7201_v49, %v5358_v22 }
0x21f4   : > { %v5364_v63 = vadd.f32 %v5359_v19, %v4888_v25 }
0x21f6   : > { %v5370_v0 = vsel %vm1056_vm1, %v5364_v63, 0.0 }
0x21f7   : > { %5371 = vadd.xlane.f32.xlu1 %v5370_v0  ;;  %v7206_v0 = vld [vmem:[%s9776_s2 + $0xe] ss:$0 sm:$0xff] }
0x21f9   : > { %v5361_v56 = vpop.f32.mrf.mxu3 }
0x21fa   : > { %v5362_v58 = vadd.f32 %v7201_v49, %v5361_v56  ;;  %v7205_v49 = vld [vmem:[%s7612_s25 + $0xe] ss:$0 sm:$0xff] }
0x21fc   : > { %v5365_v16 = vadd.f32 %v5362_v58, %v4889_v29 }
0x21fe   : > { %v5373_v14 = vsel %vm1056_vm1, %v5365_v16, 0.0 }
0x21ff   : > { %5374 = vadd.xlane.f32.xlu2 %v5373_v14 }
0x2231   : > { %v5222_v59 = vpop.xlane.xlu0 %5221 }
0x2232   : > { %v5223_v50 = vmul.f32 %v5222_v59, %v8175_v3  ;;  %v7207_v59 = vld [vmem:[%s9779_s21 + $0x7] ss:$0 sm:$0xff] }
0x2234   : > { %v5224_v53 = vadd.f32 1e-05, %v5223_v50 }
0x2236   : > { %7377 = vrsqrt.f32 %v5224_v53  ;;  %vm5231_vm3 = vweird.f32 %v5224_v53 }
0x223c   : > { %v7378_v55 = vpop.eup %7377 }
0x223d   : > { %v5226_v27 = vmul.f32 %v7378_v55, %v5224_v53  ;;  %vm5232_vm4 = vweird.f32 %v7378_v55 }
0x223e   : > { %vm5233_vm12 = vmor %vm5231_vm3, %vm5232_vm4 }
0x223f   : > { %v5227_v23 = vmul.f32 %v7378_v55, %v5226_v27 }
0x2241   : > { %v5228_v24 = vmul.f32 0.5, %v5227_v23 }
0x2243   : > { %v5229_v37 = vsub.f32 1.5, %v5228_v24 }
0x2245   : > { %v5230_v7 = vmul.f32 %v7378_v55, %v5229_v37 }
0x2247   : > { %v5234_v36 = vsel %vm5233_vm12, %v7378_v55, %v5230_v7 }
0x2248   : > { %v5235_v30 = vmul.f32 %v5234_v36, %v5218_v11 }
0x224a   : > { %v5239_v2 = vmul.f32 %v7202_v60, %v5235_v30 }
0x224c   : > { %v9521_v46 = vadd.f32 %v7203_v43, %v5239_v2 }
0x224e   : > { %6881 = vmatmul.msk.f32.vlgmr.msrb.gmra.mxu0 %vm1056_vm1, %v9521_v46 }
0x226a   : > { %v5372_v32 = vpop.xlane.xlu1 %5371 }
0x226b   : > { %v5376_v41 = vmul.f32 %v5372_v32, %v8175_v3 }
0x226d   : > { %v5378_v45 = vsub.f32 %v5364_v63, %v5376_v41 }
0x226f   : > { %v5380_v25 = vmul.f32 %v5378_v45, %v5378_v45 }
0x2271   : > { %v5382_v35 = vsel %vm1056_vm1, %v5380_v25, 0.0  ;;  %v5652_v25 = vld [vmem:[%s9781_s5 + $0x30] sm:$0xff] }
0x2272   : > { %5383 = vadd.xlane.f32.xlu0 %v5382_v35  ;;  %v5375_v18 = vpop.xlane.xlu2 %5374  ;;  %6895 = vmatpush.xpose.msk.msrb.mxu3 %vm1056_vm1, %v5652_v25  ;;  %v5651_v35 = vld [vmem:[%s9781_s5 + $0x28] sm:$0xff] }
0x2273   : > { %v5377_v29 = vmul.f32 %v5375_v18, %v8175_v3  ;;  %v5650_v18 = vld [vmem:[%s9781_s5 + $0x20] sm:$0xff] }
0x2275   : > { %v5379_v5 = vsub.f32 %v5365_v16, %v5377_v29  ;;  %v5649_v29 = vld [vmem:[%s9781_s5 + $0x18] sm:$0xff] }
0x2276   : > { %6896 = vmatpush.xpose.msk.msrb.mxu3 %vm1056_vm1, %v5651_v35 }
0x2277   : > { %v5381_v12 = vmul.f32 %v5379_v5, %v5379_v5 }
0x2279   : > { %v5385_v40 = vsel %vm1056_vm1, %v5381_v12, 0.0  ;;  %v5647_v12 = vld [vmem:[%s9781_s5 + $0x8] sm:$0xff] }
0x227a   : > { %5386 = vadd.xlane.f32.xlu1 %v5385_v40  ;;  %6897 = vmatpush.xpose.msk.msrb.mxu3 %vm1056_vm1, %v5650_v18  ;;  %v5646_v40 = vld [vmem:[%s9781_s5] sm:$0xff] }
0x227e   : > { %6898 = vmatpush.xpose.msk.msrb.mxu3 %vm1056_vm1, %v5649_v29 }
0x22cb   : > { %v5482_v51 = vpop.f32.mrf.mxu0 }
0x22cc   : > { %v5483_v48 = vadd.f32 %v7204_v13, %v5482_v51 }
0x22ce   : > { %v5485_v61 = vmax.f32 %v5483_v48, 0.0 }
0x22d0   : > { %6891 = vmatmul.msk.f32.vlgmr.msra.gmra.mxu2 %vm1370_vm9, %v5485_v61 }
0x22e5   : > { %v5384_v47 = vpop.xlane.xlu0 %5383 }
0x22e6   : > { %v5388_v62 = vmul.f32 %v5384_v47, %v8175_v3 }
0x22e8   : > { %v5390_v26 = vadd.f32 1e-05, %v5388_v62 }
0x22ea   : > { %7379 = vrsqrt.f32 %v5390_v26  ;;  %vm5398_vm9 = vweird.f32 %v5390_v26 }
0x22ed   : > { %v5387_v4 = vpop.xlane.xlu1 %5386 }
0x22ee   : > { %v5389_v6 = vmul.f32 %v5387_v4, %v8175_v3 }
0x22f0   : > { %v7380_v39 = vpop.eup %7379  ;;  %v5391_v8 = vadd.f32 1e-05, %v5389_v6 }
0x22f1   : > { %v5393_v9 = vmul.f32 %v7380_v39, %v5390_v26  ;;  %vm5399_vm15 = vweird.f32 %v7380_v39 }
0x22f2   : > { %7381 = vrsqrt.f32 %v5391_v8  ;;  %vm5400_vm13 = vmor %vm5398_vm9, %vm5399_vm15  ;;  %vm5408_vm8 = vweird.f32 %v5391_v8 }
0x22f3   : > { %v5394_v34 = vmul.f32 %v7380_v39, %v5393_v9 }
0x22f5   : > { %v5395_v20 = vmul.f32 0.5, %v5394_v34 }
0x22f7   : > { %v5396_v11 = vsub.f32 1.5, %v5395_v20  ;;  %v9577_v20 = vld [vmem:[%s9782_s3] ss:$0 sm:$0xff]  ;;  %s9785_s3 = sld [smem:[#allocation23_spill]] }
0x22f8   : > { %v7382_v21 = vpop.eup %7381 }
0x22f9   : > { %v5397_v44 = vmul.f32 %v7380_v39, %v5396_v11  ;;  %v5403_v10 = vmul.f32 %v7382_v21, %v5391_v8  ;;  %vm5409_vm14 = vweird.f32 %v7382_v21 }
0x22fa   : > { %vm5410_vm0 = vmor %vm5408_vm8, %vm5409_vm14  ;;  %vm5820_vm8 = vcmask 7168  }
0x22fb   : > { %v5404_v22 = vmul.f32 %v7382_v21, %v5403_v10  ;;  %v5401_v19 = vsel %vm5400_vm13, %v7380_v39, %v5397_v44  ;;  %v9580_v10 = vld [vmem:[%s9783_s6] ss:$0 sm:$0xff]  ;;  %s9784_s6 = sld [smem:[#allocation22_spill]] }
0x22fc   : > { %v5412_v63 = vmul.f32 %v5401_v19, %v5378_v45 }
0x22fd   : > { %v5405_v56 = vmul.f32 0.5, %v5404_v22 }
0x22fe   : > { %v5417_v58 = vmul.f32 %v7205_v49, %v5412_v63 }
0x22ff   : > { %v5406_v16 = vsub.f32 1.5, %v5405_v56 }
0x2300   : > { %v5422_v14 = vadd.f32 %v7206_v0, %v5417_v58 }
0x2301   : > { %v5407_v33 = vmul.f32 %v7382_v21, %v5406_v16 }
0x2302   : > { %v5568_v57 = vsel %vm1056_vm1, %v5422_v14, 0.0 }
0x2303   : > { %5569 = vadd.xlane.f32.xlu2 %v5568_v57  ;;  %v5411_v1 = vsel %vm5410_vm0, %v7382_v21, %v5407_v33 }
0x2304   : > { %v5413_v31 = vmul.f32 %v5411_v1, %v5379_v5  ;;  %v5648_v5 = vld [vmem:[%s9781_s5 + $0x10] sm:$0xff] }
0x2305   : > { %6899 = vmatpush.xpose.msk.msrb.mxu3 %vm1056_vm1, %v5648_v5 }
0x2306   : > { %v5418_v54 = vmul.f32 %v7205_v49, %v5413_v31 }
0x2308   : > { %v5423_v52 = vadd.f32 %v7206_v0, %v5418_v54 }
0x2309   : > { %6900 = vmatpush.xpose.msk.msrb.mxu3 %vm1056_vm1, %v5647_v12  ;;  %v5720_v12 = vld [vmem:[%s9785_s3 + $0x38] sm:$0xff] }
0x230a   : > { %v5571_v17 = vsel %vm1056_vm1, %v5423_v52, 0.0  ;;  %6904 = vmatpush.xpose.msk.msrb.mxu2 %vm1056_vm1, %v5720_v12 }
0x230b   : > { %5572 = vadd.xlane.f32.xlu0 %v5571_v17 }
0x230d   : > { %6901 = vmatpush.xpose.msk.msrb.mxu3 %vm1056_vm1, %v5646_v40 }
0x2353   : > { %v5528_v50 = vpop.f32.mrf.mxu2 }
0x2354   : > { %v5529_v53 = vadd.f32 %v7207_v59, %v5528_v50 }
0x2356   : > { %v5531_v55 = vadd.f32 %v5529_v53, %v9521_v46  ;;  %v7210_v53 = vld [vmem:[%s7612_s25 + $0xf] ss:$0 sm:$0xff] }
0x2358   : > { %v5536_v27 = vsel %vm1056_vm1, %v5531_v55, 0.0 }
0x2359   : > { %5537 = vadd.xlane.f32.xlu1 %v5536_v27 }
0x2376   : > { %v5570_v23 = vpop.xlane.xlu2 %5569 }
0x2377   : > { %v5574_v24 = vmul.f32 %v5570_v23, %v8175_v3  ;;  %v7211_v23 = vld [vmem:[%s9776_s2 + $0xf] ss:$0 sm:$0xff]  ;;  %s9787_s2 = sshll.u32 %s7721_s28, 4 }
0x2379   : > { %v5576_v37 = vsub.f32 %v5422_v14, %v5574_v24 }
0x237b   : > { %v5578_v7 = vmul.f32 %v5576_v37, %v5576_v37 }
0x237d   : > { %v5580_v60 = vsel %vm1056_vm1, %v5578_v7, 0.0 }
0x237e   : > { %v5573_v36 = vpop.xlane.xlu0 %5572  ;;  %5581 = vadd.xlane.f32.xlu2 %v5580_v60  ;;  %v7212_v60 = vld [vmem:[%s9784_s6] ss:$0 sm:$0xff]  ;;  %s9786_s6 = sld [smem:[#allocation9_spill]] }
0x237f   : > { %v5575_v30 = vmul.f32 %v5573_v36, %v8175_v3 }
0x2381   : > { %v5577_v43 = vsub.f32 %v5423_v52, %v5575_v30 }
0x2383   : > { %v5579_v2 = vmul.f32 %v5577_v43, %v5577_v43 }
0x2384   : > { %s986_s5 = scalar_lea.vmem %s9786_s6, %s9787_s2  ;;  %s9788_s2 = sld [smem:[#allocation24_spill]] }
0x2385   : > { %v5583_v46 = vsel %vm1056_vm1, %v5579_v2, 0.0 }
0x2386   : > { %5584 = vadd.xlane.f32.xlu0 %v5583_v46 }
0x23cc   : > { %v5538_v15 = vpop.xlane.xlu1 %5537 }
0x23cd   : > { %v5539_v42 = vmul.f32 %v5538_v15, %v8175_v3 }
0x23cf   : > { %v9555_v32 = vsub.f32 %v5531_v55, %v5539_v42 }
0x23d1   : > { %v5541_v41 = vmul.f32 %v9555_v32, %v9555_v32 }
0x23d3   : > { %v5542_v45 = vsel %vm1056_vm1, %v5541_v41, 0.0 }
0x23d4   : > { %5543 = vadd.xlane.f32.xlu1 %v5542_v45 }
0x23f1   : > { %v5582_v28 = vpop.xlane.xlu2 %5581 }
0x23f2   : > { %v5586_v13 = vmul.f32 %v5582_v28, %v8175_v3 }
0x23f4   : > { %v5588_v51 = vadd.f32 1e-05, %v5586_v13 }
0x23f6   : > { %7383 = vrsqrt.f32 %v5588_v51  ;;  %vm5596_vm6 = vweird.f32 %v5588_v51 }
0x23f9   : > { %v5585_v48 = vpop.xlane.xlu0 %5584 }
0x23fa   : > { %v5587_v61 = vmul.f32 %v5585_v48, %v8175_v3 }
0x23fc   : > { %v7384_v47 = vpop.eup %7383  ;;  %v5589_v62 = vadd.f32 1e-05, %v5587_v61 }
0x23fd   : > { %v5591_v26 = vmul.f32 %v7384_v47, %v5588_v51  ;;  %vm5597_vm5 = vweird.f32 %v7384_v47 }
0x23fe   : > { %7385 = vrsqrt.f32 %v5589_v62  ;;  %vm5598_vm7 = vmor %vm5596_vm6, %vm5597_vm5  ;;  %vm5606_vm11 = vweird.f32 %v5589_v62 }
0x23ff   : > { %v5592_v4 = vmul.f32 %v7384_v47, %v5591_v26 }
0x2401   : > { %v5593_v6 = vmul.f32 0.5, %v5592_v4 }
0x2403   : > { %v5594_v39 = vsub.f32 1.5, %v5593_v6 }
0x2404   : > { %v7386_v8 = vpop.eup %7385 }
0x2405   : > { %v5595_v9 = vmul.f32 %v7384_v47, %v5594_v39  ;;  %v5601_v34 = vmul.f32 %v7386_v8, %v5589_v62  ;;  %vm5607_vm10 = vweird.f32 %v7386_v8 }
0x2406   : > { %vm5608_vm2 = vmor %vm5606_vm11, %vm5607_vm10 }
0x2407   : > { %v5599_v11 = vsel %vm5598_vm7, %v7384_v47, %v5595_v9  ;;  %v5602_v21 = vmul.f32 %v7386_v8, %v5601_v34 }
0x2408   : > { %v5610_v44 = vmul.f32 %v5599_v11, %v5576_v37 }
0x2409   : > { %v5603_v49 = vmul.f32 0.5, %v5602_v21 }
0x240a   : > { %v5615_v22 = vmul.f32 %v9577_v20, %v5610_v44 }
0x240b   : > { %v5604_v19 = vsub.f32 1.5, %v5603_v49 }
0x240c   : > { %v5620_v63 = vadd.f32 %v9580_v10, %v5615_v22 }
0x240d   : > { %v5605_v0 = vmul.f32 %v7386_v8, %v5604_v19 }
0x240e   : > { %6902 = vmatmul.msk.f32.vlgmr.msrb.gmra.mxu3 %vm1056_vm1, %v5620_v63 }
0x240f   : > { %v5609_v56 = vsel %vm5608_vm2, %v7386_v8, %v5605_v0 }
0x2410   : > { %v5611_v58 = vmul.f32 %v5609_v56, %v5577_v43 }
0x2412   : > { %v5616_v16 = vmul.f32 %v9577_v20, %v5611_v58 }
0x2414   : > { %v5621_v14 = vadd.f32 %v9580_v10, %v5616_v16 }
0x2416   : > { %6903 = vmatmul.msk.f32.gmra.mxu3 %vm1056_vm1, %v5621_v14 }
0x2447   : > { %v5544_v33 = vpop.xlane.xlu1 %5543 }
0x2448   : > { %v5545_v57 = vmul.f32 %v5544_v33, %v8175_v3 }
0x244a   : > { %v5546_v1 = vadd.f32 1e-05, %v5545_v57  ;;  %v5719_v57 = vld [vmem:[%s9785_s3 + $0x30] sm:$0xff] }
0x244b   : > { %6905 = vmatpush.xpose.msk.msrb.mxu2 %vm1056_vm1, %v5719_v57 }
0x244c   : > { %7387 = vrsqrt.f32 %v5546_v1  ;;  %vm5553_vm3 = vweird.f32 %v5546_v1 }
0x2452   : > { %v7388_v31 = vpop.eup %7387 }
0x2453   : > { %v5548_v54 = vmul.f32 %v7388_v31, %v5546_v1  ;;  %vm5554_vm4 = vweird.f32 %v7388_v31 }
0x2454   : > { %vm5555_vm12 = vmor %vm5553_vm3, %vm5554_vm4 }
0x2455   : > { %v5549_v52 = vmul.f32 %v7388_v31, %v5548_v54 }
0x2457   : > { %v5550_v17 = vmul.f32 0.5, %v5549_v52 }
0x2459   : > { %v5551_v59 = vsub.f32 1.5, %v5550_v17  ;;  %v5718_v17 = vld [vmem:[%s9785_s3 + $0x28] sm:$0xff] }
0x245a   : > { %6906 = vmatpush.xpose.msk.msrb.mxu2 %vm1056_vm1, %v5718_v17 }
0x245b   : > { %v5552_v50 = vmul.f32 %v7388_v31, %v5551_v59  ;;  %v5717_v59 = vld [vmem:[%s9785_s3 + $0x20] sm:$0xff] }
0x245d   : > { %v5556_v55 = vsel %vm5555_vm12, %v7388_v31, %v5552_v50  ;;  %v996_v50 = vld [vmem:[%s986_s5] sm:$0xff] }
0x245e   : > { %v5557_v27 = vmul.f32 %v5556_v55, %v9555_v32  ;;  %6907 = vmatpush.xpose.msk.msrb.mxu2 %vm1056_vm1, %v5717_v59 }
0x2460   : > { %v5561_v24 = vmul.f32 %v7210_v53, %v5557_v27  ;;  %v997_v53 = vld [vmem:[%s986_s5 + $0x8] sm:$0xff]  ;;  %s9789_s5 = sld [smem:[#allocation10_spill]] }
0x2462   : > { %v5565_v37 = vadd.f32 %v7211_v23, %v5561_v24  ;;  %v5716_v23 = vld [vmem:[%s9785_s3 + $0x18] sm:$0xff] }
0x2463   : > { %6908 = vmatpush.xpose.msk.msrb.mxu2 %vm1056_vm1, %v5716_v23  ;;  %v7213_v23 = vld [vmem:[%s9788_s2] ss:$0 sm:$0xff]  ;;  %s9731_s2 = sand.u32 1, %s7465_s10  }
0x2464   : > { %v5622_v7 = vsel %vm1056_vm1, %v5565_v37, 0.0 }
0x2465   : > { %5623 = vadd.xlane.f32.xlu2 %v5622_v7 }
0x2491   : > { %v5705_v36 = vpop.f32.mrf.mxu3 }
0x2492   : > { %v5706_v30 = vadd.f32 %v7212_v60, %v5705_v36  ;;  %v5715_v36 = vld [vmem:[%s9785_s3 + $0x10] sm:$0xff] }
0x2493   : > { %6909 = vmatpush.xpose.msk.msrb.mxu2 %vm1056_vm1, %v5715_v36 }
0x2494   : > { %v9594_v43 = vmax.f32 %v5706_v30, 0.0 }
0x2496   : > { %v5773_v2 = vmul.f32 %v9594_v43, %v9594_v43 }
0x2498   : > { %v5775_v46 = vsel %vm1056_vm1, %v5773_v2, 0.0 }
0x2499   : > { %v5708_v38 = vpop.f32.mrf.mxu3  ;;  %5776 = vadd.xlane.f32.xlu1 %v5775_v46  ;;  %v7513_v46 = vmov 0  }
0x249a   : > { %v5709_v15 = vadd.f32 %v7212_v60, %v5708_v38  ;;  %7142 = vset.pattern.permute.xlu1 %v7513_v46  ;;  %7141 = vset.pattern.permute.xlu0 %v7513_v46 }
0x249b   : > { %7143 = vset.pattern.permute.xlu2 %v7513_v46 }
0x249c   : > { %v9599_v42 = vmax.f32 %v5709_v15, 0.0  ;;  %v5714_v15 = vld [vmem:[%s9785_s3 + $0x8] sm:$0xff] }
0x249d   : > { %6910 = vmatpush.xpose.msk.msrb.mxu2 %vm1056_vm1, %v5714_v15 }
0x249e   : > { %v5774_v32 = vmul.f32 %v9599_v42, %v9599_v42 }
0x24a0   : > { %v5778_v41 = vsel %vm1056_vm1, %v5774_v32, 0.0 }
0x24a1   : > { %5779 = vadd.xlane.f32.xlu2 %v5778_v41  ;;  %v5713_v41 = vld [vmem:[%s9785_s3] sm:$0xff] }
0x24a2   : > { %6911 = vmatpush.xpose.msk.msrb.mxu2 %vm1056_vm1, %v5713_v41 }
0x24d8   : > { %v5624_v45 = vpop.xlane.xlu2 %5623 }
0x24d9   : > { %v5625_v25 = vmul.f32 %v5624_v45, %v8175_v3 }
0x24db   : > { %v9605_v35 = vsub.f32 %v5565_v37, %v5625_v25 }
0x24dd   : > { %v5627_v18 = vmul.f32 %v9605_v35, %v9605_v35 }
0x24df   : > { %v5628_v29 = vsel %vm1056_vm1, %v5627_v18, 0.0 }
0x24e0   : > { %5629 = vadd.xlane.f32.xlu0 %v5628_v29 }
0x250c   : > { %v5777_v5 = vpop.xlane.xlu1 %5776 }
0x250d   : > { %7389 = vrsqrt.f32 %v5777_v5  ;;  %vm5788_vm15 = vcmp.eq.f32.partialorder %v5777_v5, inf  ;;  %v5791_v21 = vand.u32 2147483648, %v5777_v5  ;;  %vm5790_vm13 = vcmp.eq.f32.partialorder %v5777_v5, 0.0 }
0x2513   : > { %v7390_v40 = vpop.eup %7389 }
0x2514   : > { %v5782_v28 = vmul.f32 %v7390_v40, %v5777_v5  ;;  %v5780_v13 = vpop.xlane.xlu2 %5779 }
0x2515   : > { %7391 = vrsqrt.f32 %v5780_v13  ;;  %vm5800_vm9 = vcmp.eq.f32.partialorder %v5780_v13, inf  ;;  %v5803_v44 = vand.u32 2147483648, %v5780_v13  ;;  %vm5802_vm14 = vcmp.eq.f32.partialorder %v5780_v13, 0.0 }
0x2516   : > { %v5783_v51 = vmul.f32 %v7390_v40, %v5782_v28 }
0x2518   : > { %v5784_v48 = vmul.f32 0.5, %v5783_v51 }
0x251a   : > { %v5785_v61 = vsub.f32 1.5, %v5784_v48 }
0x251b   : > { %v7392_v47 = vpop.eup %7391 }
0x251c   : > { %v5794_v62 = vmul.f32 %v7392_v47, %v5780_v13  ;;  %v5786_v26 = vmul.f32 %v7390_v40, %v5785_v61 }
0x251e   : > { %v5795_v4 = vmul.f32 %v7392_v47, %v5794_v62  ;;  %v5787_v39 = vmul.f32 %v5786_v26, %v5777_v5 }
0x2520   : > { %v5796_v6 = vmul.f32 0.5, %v5795_v4  ;;  %v5789_v34 = vsel %vm5788_vm15, %v5777_v5, %v5787_v39 }
0x2521   : > { %v5792_v22 = vsel %vm5790_vm13, %v5791_v21, %v5789_v34 }
0x2522   : > { %v5797_v8 = vsub.f32 1.5, %v5796_v6 }
0x2524   : > { %v5798_v9 = vmul.f32 %v7392_v47, %v5797_v8 }
0x2526   : > { %v5799_v11 = vmul.f32 %v5798_v9, %v5780_v13 }
0x2528   : > { %v5801_v49 = vsel %vm5800_vm9, %v5780_v13, %v5799_v11 }
0x2529   : > { %v5804_v19 = vsel %vm5802_vm14, %v5803_v44, %v5801_v49 }
0x252a   : > { %v5805_v63 = vmax.f32 %v5792_v22, %v5804_v19 }
0x252c   : > { %v5806_v0 = vrot.slane %v5805_v63, 4 }
0x252e   : > { %v5807_v56 = vmax.f32 %v5805_v63, %v5806_v0  ;;  %v5939_v0 = vld [vmem:[%s7652_s27 + $0x18] sm:$0xff] }
0x252f   : > { %6913 = vmatpush.xpose.msk.msra.mxu1 %vm1056_vm1, %v5939_v0  ;;  %6918 = vmatpush.xpose.msk.msra.mxu0 %vm1056_vm1, %v5939_v0 }
0x2530   : > { %v5808_v58 = vrot.slane %v5807_v56, 2 }
0x2532   : > { %v5809_v16 = vmax.f32 %v5807_v56, %v5808_v58  ;;  %v5938_v56 = vld [vmem:[%s7652_s27 + $0x10] sm:$0xff] }
0x2533   : > { %6914 = vmatpush.xpose.msk.msra.mxu1 %vm1056_vm1, %v5938_v56  ;;  %6919 = vmatpush.xpose.msk.msra.mxu0 %vm1056_vm1, %v5938_v56 }
0x2534   : > { %v5810_v14 = vrot.slane %v5809_v16, 1 }
0x2536   : > { %v5811_v33 = vmax.f32 %v5809_v16, %v5810_v14 }
0x2538   : > { %v5812_v1 = vsub.f32 %v5792_v22, %v5811_v33  ;;  %v5813_v31 = vsub.f32 %v5804_v19, %v5811_v33 }
0x253a   : > { %v5814_v54 = vmul.f32 1.442695, %v5812_v1  ;;  %v5816_v52 = vmul.f32 1.442695, %v5813_v31 }
0x253c   : > { %7393 = vpow2.f32 %v5814_v54 }
0x253d   : > { %7395 = vpow2.f32 %v5816_v52 }
0x2542   : > { %v7394_v55 = vpop.eup %7393 }
0x2543   : > { %v7396_v27 = vpop.eup %7395  ;;  %v5818_v24 = vmul.f32 %v7394_v55, %v996_v50 }
0x2544   : > { %v5819_v37 = vmul.f32 %v7396_v27, %v997_v53 }
0x2545   : > { %v5821_v7 = vsel %vm5820_vm8, %v5818_v24, 0.0 }
0x2546   : > { %v5822_v60 = vsel %vm5820_vm8, %v5819_v37, 0.0 }
0x2547   : > { %v5823_v30 = vadd.f32 %v5822_v60, %v5821_v7 }
0x2549   : > { %v5824_v2 = vrot.slane %v5823_v30, 4 }
0x254b   : > { %v5825_v38 = vadd.f32 %v5824_v2, %v5823_v30 }
0x254d   : > { %v5826_v32 = vrot.slane %v5825_v38, 2 }
0x254f   : > { %v5827_v45 = vadd.f32 %v5826_v32, %v5825_v38 }
0x2551   : > { %v5828_v25 = vrot.slane %v5827_v45, 1 }
0x2553   : > { %v5630_v18 = vpop.xlane.xlu0 %5629  ;;  %v5829_v29 = vadd.f32 %v5828_v25, %v5827_v45 }
0x2554   : > { %v5631_v5 = vmul.f32 %v5630_v18, %v8175_v3 }
0x2555   : > { %v5830_v12 = vadd.f32 1e-06, %v5829_v29 }
0x2556   : > { %v5632_v40 = vadd.f32 1e-05, %v5631_v5 }
0x2557   : > { %7397 = vrcp.f32 %v5830_v12  ;;  %v5842_v62 = vand.u32 2147483648, %v5830_v12  ;;  %v5840_v4 = vand.u32 2147483647, %v5830_v12  ;;  %vm5836_vm5 = vweird.f32 %v5830_v12 }
0x2558   : > { %7399 = vrsqrt.f32 %v5632_v40  ;;  %vm5639_vm11 = vweird.f32 %v5632_v40 }
0x2559   : > { %v5843_v3 = vor.u32 1.1754944e-38, %v5842_v62  ;;  %vm5841_vm10 = vcmp.eq.f32.partialorder %v5840_v4, 8.507059e+37 }
0x255d   : > { %v7398_v28 = vpop.eup %7397 }
0x255e   : > { %v7400_v13 = vpop.eup %7399  ;;  %v5832_v51 = vmul.f32 %v7398_v28, %v5830_v12  ;;  %vm5837_vm0 = vweird.f32 %v7398_v28 }
0x255f   : > { %v5634_v48 = vmul.f32 %v7400_v13, %v5632_v40  ;;  %vm5640_vm6 = vweird.f32 %v7400_v13  ;;  %vm5838_vm7 = vmor %vm5836_vm5, %vm5837_vm0 }
0x2560   : > { %v5833_v61 = vsub.f32 1.0, %v5832_v51  ;;  %vm5641_vm2 = vmor %vm5639_vm11, %vm5640_vm6  ;;  %vm5976_vm6 = vcmask 253952  }
0x2561   : > { %v5635_v47 = vmul.f32 %v7400_v13, %v5634_v48 }
0x2562   : > { %v5834_v26 = vmul.f32 %v7398_v28, %v5833_v61 }
0x2563   : > { %v5636_v6 = vmul.f32 0.5, %v5635_v47 }
0x2564   : > { %v5835_v39 = vadd.f32 %v7398_v28, %v5834_v26 }
0x2565   : > { %v5637_v8 = vsub.f32 1.5, %v5636_v6 }
0x2566   : > { %v5839_v9 = vsel %vm5838_vm7, %v7398_v28, %v5835_v39 }
0x2567   : > { %v5638_v34 = vmul.f32 %v7400_v13, %v5637_v8  ;;  %v5844_v11 = vsel %vm5841_vm10, %v5843_v3, %v5839_v9 }
0x2568   : > { %v5846_v21 = vmul.f32 %v5844_v11, %v5819_v37  ;;  %v5845_v44 = vmul.f32 %v5844_v11, %v5818_v24 }
0x2569   : > { %v5642_v49 = vsel %vm5641_vm2, %v7400_v13, %v5638_v34 }
0x256a   : > { %v5643_v22 = vmul.f32 %v5642_v49, %v9605_v35  ;;  %5903 = vperm.xlu1 %7142, %v5846_v21   ;;  %5898 = vperm.xlu0 %7141, %v5845_v44   ;;  %v5937_v35 = vld [vmem:[%s7652_s27 + $0x8] sm:$0xff] }
0x256b   : > { %6915 = vmatpush.xpose.msk.msra.mxu1 %vm1056_vm1, %v5937_v35  ;;  %6920 = vmatpush.xpose.msk.msra.mxu0 %vm1056_vm1, %v5937_v35 }
0x256c   : > { %v5644_v19 = vmul.f32 %v9577_v20, %v5643_v22  ;;  %v5936_v20 = vld [vmem:[%s7652_s27] sm:$0xff] }
0x256e   : > { %v5645_v63 = vadd.f32 %v9580_v10, %v5644_v19 }
0x256f   : > { %6916 = vmatpush.xpose.msk.msra.mxu1 %vm1056_vm1, %v5936_v20  ;;  %6921 = vmatpush.xpose.msk.msra.mxu0 %vm1056_vm1, %v5936_v20 }
0x2570   : > { %6912 = vmatmul.msk.f32.vlgmr.msrb.gmra.mxu2 %vm1056_vm1, %v5645_v63 }
0x2572   : > { %6017 = vrot.lane.b32.xlu1 %v9594_v43, %s9780_s8 }
0x25dc   : > { %v5904_v10 = vpop.permute.xlu1 %5903  ;;  %v5899_v58 = vpop.permute.xlu0 %5898 }
0x25dd   : > { %v5907_v16 = vmul.f32 %v5904_v10, %v9599_v42  ;;  %v5906_v14 = vmul.f32 %v5899_v58, %v9594_v43 }
0x25df   : > { %v5909_v33 = vsel %vm1056_vm1, %v5907_v16, 0.0  ;;  %v5908_v57 = vsel %vm1056_vm1, %v5906_v14, 0.0 }
0x25e0   : > { %v5910_v1 = vadd.f32 %v5909_v33, %v5908_v57 }
0x25e2   : > { %v5911_v31 = vrot.slane %v5910_v1, 4 }
0x25e4   : > { %v5912_v54 = vadd.f32 %v5911_v31, %v5910_v1  ;;  %v6018_v2 = vpop.permute.xlu1 %6017 }
0x25e6   : > { %v5913_v52 = vrot.slane %v5912_v54, 2 }
0x25e8   : > { %v5914_v17 = vadd.f32 %v5913_v52, %v5912_v54 }
0x25ea   : > { %v5915_v59 = vrot.slane %v5914_v17, 1 }
0x25ec   : > { %v5916_v50 = vadd.f32 %v5915_v59, %v5914_v17 }
0x25ee   : > { %v5933_v53 = vmax.f32 %v5916_v50, 0.0  ;;  %v5934_v55 = vsub.f32 0.0, %v5916_v50 }
0x25f0   : > { %6917 = vmatmul.msk.f32.vlgmr.msra.gmra.mxu1 %vm1056_vm1, %v5933_v53  ;;  %v5935_v27 = vmax.f32 %v5934_v55, 0.0 }
0x25f2   : > { %6922 = vmatmul.msk.f32.vlgmr.msra.gmra.mxu0 %vm1056_vm1, %v5935_v27 }
0x25f3   : > { %v5769_v43 = vpop.f32.mrf.mxu2 }
0x25f4   : > { %v5770_v24 = vadd.f32 %v7213_v23, %v5769_v43 }
0x25f6   : > { %v9657_v37 = vmax.f32 %v5770_v24, 0.0  ;;  %v7214_v24 = vld [vmem:[%s7838_s23] ss:$0 sm:$0xff]  ;;  %s6928_s23 = sshll.u32 %s7688_s0, 3  ;;  %s7431_s0 = scalar_lea.hbm %s7665_s4, 16 }
0x25f8   : > { %6013 = vrot.lane.b32.xlu1 %v9657_v37, %s9780_s8  ;;  %v5847_v7 = vmul.f32 %v9657_v37, %v9657_v37 }
0x25fa   : > { %v5848_v60 = vsel %vm1056_vm1, %v5847_v7, 0.0 }
0x25fb   : > { %5849 = vadd.xlane.f32.xlu2 %v5848_v60 }
0x2613   : > { %6019 = vrot.lane.b32.xlu2 %v9599_v42, %s9780_s8  ;;  %s9790_s8 = sshll.u32 %s7721_s28, 3 }
0x2614   : > { %s990_s6 = scalar_lea.vmem %s9789_s5, %s9790_s8  ;;  %s6264_s5 = sshll.u32 %s9731_s2, 3 }
0x2615   : > { %v998_v62 = vld [vmem:[%s990_s6] sm:$0xff]  ;;  %s966_s8 = scalar_lea.vmem [#allocation3], %s6264_s5  ;;  %s6094_s6 = scalar_lea.hbm %s7665_s4, %s6928_s23 }
0x2616   : > { %s6096_s2 = sshll.u32 %s966_s8, 4  ;;  %s6098_s3 = sshll.u32 %s6094_s6, 4  ;;  %s6097_s2 = int_to_ptr.vmem [resolvable:$true] %s6096_s2  ;;  %s6099_s3 = int_to_ptr.hbm [resolvable:$true] %s6098_s3 }
0x2617   : > { %s7425_s5 = sshra.s32 %s6099_s3, 4  ;;  %s7426_s5 = int_to_ptr.hbm [resolvable:$true] %s7425_s5 }
0x2618   : > { %s7427_s13 = scalar_lea.hbm %s7426_s5, 8  ;;  %p7432_p0 = scmp.lt.s32.totalorder %s7426_s5, %s7665_s4 }
0x2619   : > { %p7428_p11 = scmp.ne.s32.totalorder %s7426_s5, %s7427_s13  ;;  %p7433_p1 = scmp.lt.s32.totalorder %s7431_s0, %s7427_s13 }
0x261b   : > { %p7429_p12 = pnand %p7428_p11, %p7705_p5  ;;  %p7434_p2 = por %p7433_p1, %p7432_p0 }
0x261d   : > { %p7430_p13 = pneg %p7429_p12 }
0x261f   : > { %p7435_p3 = pnand %p7434_p2, %p7430_p13 }
0x266a   : > { %v6014_v45 = vpop.permute.xlu1 %6013 }
0x266d   : > { %v5972_v16 = vpop.f32.mrf.mxu1 }
0x266e   : > { %v5850_v36 = vpop.xlane.xlu2 %5849 }
0x266f   : > { %7401 = vrsqrt.f32 %v5850_v36  ;;  %vm5858_vm4 = vcmp.eq.f32.partialorder %v5850_v36, inf  ;;  %v5861_v18 = vand.u32 2147483648, %v5850_v36  ;;  %vm5860_vm3 = vcmp.eq.f32.partialorder %v5850_v36, 0.0 }
0x2675   : > { %v7402_v30 = vpop.eup %7401 }
0x2676   : > { %v5852_v46 = vmul.f32 %v7402_v30, %v5850_v36  ;;  %v6020_v38 = vpop.permute.xlu2 %6019 }
0x2677   : > { %6923 = vmatpush.xpose.msk.msrb.mxu1 %vm1056_vm1, %v6020_v38 }
0x2678   : > { %v5853_v15 = vmul.f32 %v7402_v30, %v5852_v46 }
0x267a   : > { %v5854_v32 = vmul.f32 0.5, %v5853_v15 }
0x267b   : > { %6924 = vmatpush.xpose.msk.msrb.mxu1 %vm1056_vm1, %v6018_v2 }
0x267c   : > { %v5855_v41 = vsub.f32 1.5, %v5854_v32 }
0x267e   : > { %v5856_v25 = vmul.f32 %v7402_v30, %v5855_v41  ;;  %6925 = vmatmul.msk.f32.vlgmr.msrb.gmra.mxu1 %vm1056_vm1, %v6014_v45 }
0x2680   : > { %v5857_v42 = vmul.f32 %v5856_v25, %v5850_v36 }
0x2682   : > { %v5859_v29 = vsel %vm5858_vm4, %v5850_v36, %v5857_v42 }
0x2683   : > { %v5862_v5 = vsel %vm5860_vm3, %v5861_v18, %v5859_v29 }
0x2684   : > { %v5863_v12 = vrot.slane %v5862_v5, 4 }
0x2686   : > { %v5864_v40 = vmax.f32 %v5862_v5, %v5863_v12 }
0x2688   : > { %v5865_v28 = vrot.slane %v5864_v40, 2 }
0x268a   : > { %v5866_v13 = vmax.f32 %v5864_v40, %v5865_v28 }
0x268c   : > { %v5867_v51 = vrot.slane %v5866_v13, 1 }
0x268e   : > { %v5868_v48 = vmax.f32 %v5866_v13, %v5867_v51 }
0x2690   : > { %v5869_v61 = vsub.f32 %v5862_v5, %v5868_v48 }
0x2692   : > { %v5870_v47 = vmul.f32 1.442695, %v5869_v61 }
0x2694   : > { %7403 = vpow2.f32 %v5870_v47 }
0x269a   : > { %v7404_v26 = vpop.eup %7403 }
0x269b   : > { %v5872_v4 = vmul.f32 %v7404_v26, %v998_v62 }
0x269d   : > { %v5873_v6 = vsel %vm5820_vm8, %v5872_v4, 0.0 }
0x269e   : > { %v5874_v39 = vrot.slane %v5873_v6, 4 }
0x26a0   : > { %v5875_v8 = vadd.f32 %v5874_v39, %v5873_v6 }
0x26a2   : > { %v5876_v3 = vrot.slane %v5875_v8, 2 }
0x26a4   : > { %v5877_v9 = vadd.f32 %v5876_v3, %v5875_v8 }
0x26a6   : > { %v5878_v34 = vrot.slane %v5877_v9, 1 }
0x26a8   : > { %v5879_v11 = vadd.f32 %v5878_v34, %v5877_v9 }
0x26aa   : > { %v5880_v21 = vadd.f32 1e-06, %v5879_v11 }
0x26ac   : > { %7405 = vrcp.f32 %v5880_v21  ;;  %v5892_v19 = vand.u32 2147483648, %v5880_v21  ;;  %v5890_v0 = vand.u32 2147483647, %v5880_v21  ;;  %vm5886_vm15 = vweird.f32 %v5880_v21 }
0x26ae   : > { %v5893_v35 = vor.u32 1.1754944e-38, %v5892_v19  ;;  %vm5891_vm13 = vcmp.eq.f32.partialorder %v5890_v0, 8.507059e+37 }
0x26b2   : > { %v7406_v44 = vpop.eup %7405 }
0x26b3   : > { %v5882_v49 = vmul.f32 %v7406_v44, %v5880_v21  ;;  %vm5887_vm12 = vweird.f32 %v7406_v44 }
0x26b4   : > { %vm5888_vm9 = vmor %vm5886_vm15, %vm5887_vm12 }
0x26b5   : > { %v5883_v22 = vsub.f32 1.0, %v5882_v49 }
0x26b7   : > { %v5884_v63 = vmul.f32 %v7406_v44, %v5883_v22 }
0x26b9   : > { %v5885_v56 = vadd.f32 %v7406_v44, %v5884_v63 }
0x26bb   : > { %v5889_v20 = vsel %vm5888_vm9, %v7406_v44, %v5885_v56 }
0x26bc   : > { %v5894_v10 = vsel %vm5891_vm13, %v5893_v35, %v5889_v20 }
0x26bd   : > { %v5895_v58 = vmul.f32 %v5894_v10, %v5872_v4 }
0x26bf   : > { %5919 = vperm.xlu2 %7143, %v5895_v58  }
0x26c7   : > { %6068 = vperm.xlu2 %7143, %v998_v62  }
0x26fb   : > { %v6044_v14 = vpop.f32.mrf.mxu1 }
0x26fc   : > { %v6926_v33 = vmul.f32 -1.442695, %v6044_v14 }
0x26fe   : > { %7407 = vpow2.f32 %v6926_v33 }
0x2704   : > { %v7408_v57 = vpop.eup %7407 }
0x2705   : > { %v6050_v1 = vadd.f32 1.0, %v7408_v57 }
0x2707   : > { %7409 = vrcp.f32 %v6050_v1  ;;  %v6062_v23 = vand.u32 2147483648, %v6050_v1  ;;  %vm6056_vm8 = vweird.f32 %v6050_v1  ;;  %v6060_v43 = vand.u32 2147483647, %v6050_v1 }
0x2709   : > { %v6063_v30 = vor.u32 1.1754944e-38, %v6062_v23  ;;  %vm6061_vm5 = vcmp.eq.f32.partialorder %v6060_v43, 8.507059e+37 }
0x270d   : > { %v7410_v31 = vpop.eup %7409 }
0x270e   : > { %v6052_v54 = vmul.f32 %v7410_v31, %v6050_v1  ;;  %vm6057_vm14 = vweird.f32 %v7410_v31 }
0x270f   : > { %vm6058_vm0 = vmor %vm6056_vm8, %vm6057_vm14 }
0x2710   : > { %v6053_v52 = vsub.f32 1.0, %v6052_v54 }
0x2712   : > { %v6054_v17 = vmul.f32 %v7410_v31, %v6053_v52 }
0x2714   : > { %v6055_v55 = vadd.f32 %v7410_v31, %v6054_v17 }
0x2716   : > { %v6059_v60 = vsel %vm6058_vm0, %v7410_v31, %v6055_v55 }
0x2717   : > { %v6064_v38 = vsel %vm6061_vm5, %v6063_v30, %v6059_v60 }
0x2719   : > { %v5920_v59 = vpop.permute.xlu2 %5919 }
0x271a   : > { %v5922_v50 = vmul.f32 %v5920_v59, %v9657_v37 }
0x271c   : > { %v5923_v53 = vsel %vm1056_vm1, %v5922_v50, 0.0  ;;  %vm9791_vm1 = vcmask 130048  }
0x271d   : > { %v5924_v27 = vrot.slane %v5923_v53, 4 }
0x271f   : > { %v5925_v7 = vadd.f32 %v5924_v27, %v5923_v53 }
0x2721   : > { %v5926_v36 = vrot.slane %v5925_v7, 2  ;;  %v6069_v37 = vpop.permute.xlu2 %6068 }
0x2722   : > { %v6074_v2 = vmul.f32 %v7214_v24, %v6069_v37 }
0x2723   : > { %v5927_v46 = vadd.f32 %v5926_v36, %v5925_v7 }
0x2724   : > { %v6075_v15 = vmul.f32 %v6074_v2, %v6064_v38 }
0x2725   : > { %v5928_v32 = vrot.slane %v5927_v46, 1 }
0x2726   : > { %6076 = vst.msk [vmem:[%s966_s8] sm:$0xff] %vm9791_vm1, %v6075_v15 }
0x2727   : > { %v5929_v41 = vadd.f32 %v5928_v32, %v5927_v46 }
0x2729   : > { %v5930_v45 = vmax.f32 %v5929_v41, 0.0  ;;  %v5931_v25 = vsub.f32 0.0, %v5929_v41 }
0x272b   : > { %v5975_v42 = vmul.f32 %v5972_v16, %v5930_v45  ;;  %v5932_v18 = vmax.f32 %v5931_v25, 0.0 }
0x272c   : > { %7438 = shalt.err (!%p7435_p3)
}
0x272d   : > { %6933 = dma.vmem_to_hbm [thread:$0]  (%p7705_p5), %s6097_s2, 128, %s6099_s3, %s6081_s12   ;;  %v6000_v29 = vpop.f32.mrf.mxu0  ;;  %v5977_v5 = vsel %vm5976_vm6, %v5975_v42, 0.0  ;;  %v6008_v13 = vld [vmem:[#allocation2] sm:$0x1]  ;;  %vm6010_vm7 = vcmask 0  }
0x272e   : > { %v6003_v12 = vmul.f32 %v6000_v29, %v5932_v18  ;;  %5978 = vadd.xlane.f32.xlu0 %v5977_v5  ;;  %s993_s9 = scalar_lea.vmem %s7660_s20, %s7721_s28 }
0x2730   : > { %v6004_v40 = vsel %vm5976_vm6, %v6003_v12, 0.0 }
0x2731   : > { %6005 = vadd.xlane.f32.xlu1 %v6004_v40 }
0x27a1   : > { %v5979_v28 = vpop.xlane.xlu0 %5978 }
0x27a4   : > { %v6006_v51 = vpop.xlane.xlu1 %6005 }
0x27a5   : > { %v6007_v48 = vadd.f32 %v6006_v51, %v5979_v28 }
0x27a7   : > { %v6009_v61 = vadd.f32 %v6008_v13, %v6007_v48 }
0x27a9   : > { %6011 = vst.msk [vmem:[%s993_s9] sm:$0x1] %vm6010_vm7, %v6009_v61 }
0x27aa PF: > { %p6939_p4 = scmp.ge.s32.totalorder %s7473_s15, 2  ;;  %s6116_s13 = sand.u32 1, %s7461_s7  }
0x27ab   : > { %s6117_s12 = scalar_lea.sflag [#allocation4], %s6116_s13 }
0x27ac   : > { %p6936_p5 = pnand %p6939_p4, %p7709_p6 }
0x27ae   : > { %p6937_p7 = pneg %p6936_p5 }
0x27b0   : > { %7456 = dma.done.wait (%p6937_p7), %s6117_s12, 128  }
0x27b1   : > { %7458 = vsyncadd (%p6937_p7), %s6117_s12, 4294967168  ;;  %p72_p8 = scmp.ge.s32.totalorder %s7692_s16, 4   ;;  %s9793_s7 = smov %s7465_s10 }
0x27b2   : > { %s9794_s10 = smov %s7469_s11  ;;  %s9795_s11 = smov %s7703_s22 }
0x27b3   : > { %s9796_s15 = smov %s7692_s16  ;;  %74 = sbr.rel (!%p72_p8) target bundleno = 62 (0x3e), region = 309 }
0x27b8   :  { %6123 = vsyncpa [#allocation4], 1 }
0x27b9   :  { %6125 = vsyncpa [#allocation4 + $0x1], 1 }

</bundles_post_ra>
